<compile_context>
chip_gen: v7x
topology: tpu7x:2x2x1
jax: 0.10.0
libtpu: 0.0.40
codegen_flags: <defaults>
</compile_context>

<pallas_src>
import functools
import math

import jax
import jax.numpy as jnp
from jax import lax
from jax.experimental import pallas as pl
from jax.experimental.pallas import tpu as pltpu

F32 = jnp.float32
BF16 = jnp.bfloat16
VMEM = pl.BlockSpec(memory_space=pltpu.MemorySpace.VMEM)


def _round_up(x, m):
    return ((x + m - 1) // m) * m


def _vmem_limit_bytes():
    cap = 128 * 1024 * 1024
    try:
        info = pltpu.get_tpu_info()
        cap = int(getattr(info, "vmem_capacity_bytes", cap))
    except Exception:
        pass
    # ~3/4 of physical VMEM, capped at 100 MiB: 96 MiB on v5e/v6e, 48 MiB on v7x.
    return int(min(cap * 3 // 4, 100 * 1024 * 1024))


_VMEM_LIMIT = _vmem_limit_bytes()


# ----------------------------------------------------------------------------
# generic fused pallas_call: data arrays + a params pytree, whole-array VMEM
# ----------------------------------------------------------------------------
def _fused_call(body, out_shapes, data, params, flops=0, transcendentals=0):
    flat_p, treedef = jax.tree_util.tree_flatten(params)
    n_data, n_p, n_out = len(data), len(flat_p), len(out_shapes)

    def kernel(*refs):
        data_refs = refs[:n_data]
        p_refs = jax.tree_util.tree_unflatten(treedef, refs[n_data:n_data + n_p])
        out_refs = refs[n_data + n_p:]
        p = jax.tree_util.tree_map(lambda r: r[...], p_refs)   # weights -> values
        body(data_refs, p, out_refs)

    outs = tuple(jax.ShapeDtypeStruct(s, F32) for s in out_shapes)
    bytes_accessed = sum(int(a.size) * a.dtype.itemsize for a in list(data) + flat_p)
    bytes_accessed += sum(4 * math.prod(s) for s in out_shapes)

    fn = pl.pallas_call(
        kernel,
        out_shape=outs,
        in_specs=[VMEM] * (n_data + n_p),
        out_specs=tuple([VMEM] * n_out),
        compiler_params=pltpu.CompilerParams(vmem_limit_bytes=_VMEM_LIMIT),
        cost_estimate=pl.CostEstimate(flops=int(flops),
                                      transcendentals=int(transcendentals),
                                      bytes_accessed=int(bytes_accessed)),
    )
    return fn(*data, *flat_p)


# ----------------------------------------------------------------------------
# in-kernel math helpers (operate on values, not refs)
# ----------------------------------------------------------------------------
def _layernorm(s, gamma, beta, eps=1e-5):
    mu = jnp.mean(s, axis=-1, keepdims=True)
    var = jnp.mean(jnp.square(s - mu), axis=-1, keepdims=True)
    return (s - mu) * lax.rsqrt(var + eps) * gamma + beta


def _vec_layernorm(v3):
    # gvp.LayerNorm on vector channels; v3: (3, rows, C)
    vn2 = jnp.maximum(jnp.sum(v3 * v3, axis=0), 1e-8)        # clamp == _norm_no_nan
    inv = lax.rsqrt(jnp.mean(vn2, axis=-1, keepdims=True))
    return v3 * inv[None]                                     # broadcast, no concat


def _dot2(a, b):
    # scalar-path matmul; K == 1 goes to the VPU as a broadcast multiply
    if a.shape[-1] == 1:
        return a * b.reshape(1, -1)
    return jnp.dot(a, b, preferred_element_type=F32)


def _vdot(v3, w):
    # channel-mixing matmul on a (3, rows, Ci) vector array -> (3, rows, Co);
    # single 2-D MXU matmul via leading-dim reshape (rows % 8 == 0).
    if v3.shape[-1] == 1:                                      # K=1 outer product
        return v3 * w.reshape(1, 1, -1)
    r = v3.shape[1]
    out = jnp.dot(v3.reshape(3 * r, v3.shape[-1]), w, preferred_element_type=F32)
    return out.reshape(3, r, w.shape[-1])


def _gvp(s, v3, p, relu):
    """GVP (vector_gate=True, vector_act=None). s:(r,si), v3:(3,r,vi)."""
    vh = _vdot(v3, p["wh"])                                    # (3, r, h)
    vn = jnp.sqrt(jnp.maximum(jnp.sum(vh * vh, axis=0), 1e-8))  # (r, h)
    s_lin = _dot2(s, p["ws_s"]) + _dot2(vn, p["ws_n"]) + p["bs"]
    s_act = jnp.maximum(s_lin, 0.0) if relu else s_lin
    gate = jax.nn.sigmoid(_dot2(s_act, p["wsv"]) + p["bg"])    # (r, vo)
    v_out = _vdot(vh, p["wv"]) * gate[None]
    return s_act, v_out


# ----------------------------------------------------------------------------
# Kernel A: node embedding + edge featurization (radial, cosine, W_e) fused
# ----------------------------------------------------------------------------
def embed_edge_body(data_refs, p, out_refs, *, e, r_max, poly_p, se, se1p):
    atoms_ref, pos_ref, g_ref = data_refs
    hs_ref, es_ref, ev_ref = out_refs

    # ---- W_v: LayerNorm(s_dim) + GVP((s,0)->(s,v))  (== Linear, zero vectors)
    s = _layernorm(atoms_ref[...], p["Wv_ln"]["gamma"], p["Wv_ln"]["beta"])
    hs_ref[...] = jnp.dot(s, p["Wv_w"], preferred_element_type=F32) + p["Wv_b"]

    # ---- edge geometry: both endpoints in ONE gather matmul (exact, f32)
    pos = pos_ref[...]
    g = g_ref[...].astype(F32)                                 # bf16 0/1 -> exact f32
    pg = jnp.dot(g, pos, preferred_element_type=F32)           # (2E, 3) [src; dst]
    p_src, p_dst = pg[:e], pg[e:]
    vec = p_src - p_dst
    x = jnp.sqrt(jnp.sum(vec * vec, axis=-1, keepdims=True))   # (E, 1)
    # exact guarded 1/x; x == 0 edges -> 0 (matches torch.nan_to_num)
    inv_x = jnp.where(x > 0.0, 1.0 / jnp.maximum(x, 1e-30), 0.0)

    # CosineSimilarity(dim=1)(pos[src], pos[dst])
    dotp = jnp.sum(p_src * p_dst, axis=-1, keepdims=True)
    n1 = jnp.sqrt(jnp.sum(p_src * p_src, axis=-1, keepdims=True))
    n2 = jnp.sqrt(jnp.sum(p_dst * p_dst, axis=-1, keepdims=True))
    cosine = dotp / jnp.maximum(n1 * n2, 1e-8)                  # (E, 1)

    # ---- RadialEmbeddingBlock: Bessel basis * polynomial cutoff
    bw = p["bessel_w"]                                          # (1, nb)
    prefactor = (2.0 / r_max) ** 0.5
    bessel = prefactor * jnp.sin(x * bw) * inv_x                # (E, nb)
    u = x / r_max
    pp = float(poly_p)
    env = (1.0
           - ((pp + 1.0) * (pp + 2.0) / 2.0) * u ** poly_p
           + pp * (pp + 2.0) * u ** (poly_p + 1)
           - (pp * (pp + 1.0) / 2.0) * u ** (poly_p + 2))
    env = env * (x < r_max).astype(F32)
    rbf = bessel * env                                          # (E, nb)

    # ---- unit edge vectors as (3, E, 1)
    unit = vec * inv_x
    ev3 = jnp.stack([unit[:, 0:1], unit[:, 1:2], unit[:, 2:3]], axis=0)

    # ---- W_e: LayerNorm((rbf, unit)) + GVP((nb, 1) -> (se, 1))
    rbf_n = _layernorm(rbf, p["We_ln"]["gamma"], p["We_ln"]["beta"])
    ev_n = _vec_layernorm(ev3)
    e_s, e_v = _gvp(rbf_n, ev_n, p["We"], relu=False)

    # single lane-dense store: [e_s | cosine | zero pad to se1p]
    pieces = [e_s, cosine]
    if se1p > se + 1:
        pieces.append(jnp.zeros((e, se1p - se - 1), F32))
    es_ref[...] = jnp.concatenate(pieces, axis=-1)
    ev_ref[...] = e_v


# ----------------------------------------------------------------------------
# Kernel B: one fused conv layer (gather + 3-GVP msg + scatter + LN + FF + LN)
# ----------------------------------------------------------------------------
def conv_layer_body(data_refs, p, out_refs, *, e, sd, vd):
    s_ref, v_ref, es_ref, ev_ref, g_ref = data_refs
    s_out_ref, v_out_ref = out_refs

    s = s_ref[...]                       # (N, sd)       f32
    v = v_ref[...]                       # (3, N, vd)    f32
    e_s = es_ref[...]                    # (E, se1p)     f32
    e_v = ev_ref[...]                    # (3, E, ve)    f32
    g = g_ref[...]                       # (2E, N)       bf16  [src; dst]

    # ---- fused endpoint gather: ONE bf16 MXU matmul for both endpoints,
    #      scalars and all 3 vector coordinates at once.
    node_slab = jnp.concatenate([s, v[0], v[1], v[2]], axis=-1).astype(BF16)
    feats = jnp.dot(g, node_slab, preferred_element_type=F32)  # (2E, sd+3vd)
    f_j, f_i = feats[:e], feats[e:]

    # ---- msg0: GVP on ([s_j|e_s|s_i], [v_j|e_v|v_i]); scalar weights are
    #      row-stacked so the K=2sd+se1p path is one matmul.
    m0 = p["msg0"]
    s_in = jnp.concatenate([f_j[:, :sd], e_s, f_i[:, :sd]], axis=-1)
    v_in = jnp.stack(
        [jnp.concatenate([f_j[:, sd + c * vd: sd + (c + 1) * vd],
                          e_v[c],
                          f_i[:, sd + c * vd: sd + (c + 1) * vd]], axis=-1)
         for c in range(3)], axis=0)                            # (3, E, 2vd+ve)
    vh = _vdot(v_in, m0["wh"])                                  # (3, E, h)
    vn = jnp.sqrt(jnp.maximum(jnp.sum(vh * vh, axis=0), 1e-8))
    s_lin = _dot2(s_in, m0["ws"]) + _dot2(vn, m0["ws_n"]) + m0["bs"]
    ms = jnp.maximum(s_lin, 0.0)                                # scalar act (relu)
    gate = jax.nn.sigmoid(_dot2(ms, m0["wsv"]) + m0["bg"])
    mv = _vdot(vh, m0["wv"]) * gate[None]

    ms, mv = _gvp(ms, mv, p["msg1"], relu=True)
    ms, mv = _gvp(ms, mv, p["msg2"], relu=False)

    # ---- scatter-add at destination nodes: transposed contraction on the
    #      dst half of the adjacency (no materialized transpose operand).
    msg_slab = jnp.concatenate([ms, mv[0], mv[1], mv[2]], axis=-1).astype(BF16)
    agg = lax.dot_general(g[e:], msg_slab,
                          dimension_numbers=(((0,), (0,)), ((), ())),
                          preferred_element_type=F32)           # (N, sd+3vd)
    agg_s = agg[:, :sd]
    agg_v = jnp.stack([agg[:, sd + c * vd: sd + (c + 1) * vd] for c in range(3)],
                      axis=0)                                   # (3, N, vd)

    # residual + LayerNorm
    s1 = _layernorm(s + agg_s, p["norm0"]["gamma"], p["norm0"]["beta"])
    v1 = _vec_layernorm(v + agg_v)

    # feed-forward (2 GVPs) + residual + LayerNorm
    fs, fv = _gvp(s1, v1, p["ff0"], relu=True)
    fs, fv = _gvp(fs, fv, p["ff1"], relu=False)
    s_out_ref[...] = _layernorm(s1 + fs, p["norm1"]["gamma"], p["norm1"]["beta"])
    v_out_ref[...] = _vec_layernorm(v1 + fv)


# ----------------------------------------------------------------------------
# Kernel C: prediction head (row-tiled "parallel" grid)
# ----------------------------------------------------------------------------
def pred_kernel(s_ref, w1_ref, b1_ref, w2_ref, b2_ref, out_ref):
    h = jnp.maximum(
        jnp.dot(s_ref[...], w1_ref[...], preferred_element_type=F32) + b1_ref[...], 0.0)
    y = jnp.dot(h, w2_ref[...], preferred_element_type=F32) + b2_ref[...]
    y = y - jnp.max(y, axis=-1, keepdims=True)
    ey = jnp.exp(y)
    out_ref[...] = ey / jnp.sum(ey, axis=-1, keepdims=True)     # exact softmax


def pred_head(s, w1, b1, w2, b2, out_dim, block_rows=2048):
    n, sd = s.shape
    bn = min(n, block_rows)
    grid = (pl.cdiv(n, bn),)
    return pl.pallas_call(
        pred_kernel,
        out_shape=jax.ShapeDtypeStruct((n, out_dim), F32),
        grid=grid,
        in_specs=[pl.BlockSpec((bn, sd), lambda i: (i, 0)),
                  pl.BlockSpec((sd, sd), lambda i: (0, 0)),
                  pl.BlockSpec((1, sd), lambda i: (0, 0)),
                  pl.BlockSpec((sd, out_dim), lambda i: (0, 0)),
                  pl.BlockSpec((1, out_dim), lambda i: (0, 0))],
        out_specs=pl.BlockSpec((bn, out_dim), lambda i: (i, 0)),
        compiler_params=pltpu.CompilerParams(
            dimension_semantics=("parallel",),
            vmem_limit_bytes=_VMEM_LIMIT),
    )(s, w1, b1, w2, b2)


# ----------------------------------------------------------------------------
# Parameter initialization (deterministic, synthetic)
# ----------------------------------------------------------------------------
def _dense(key, shape, scale=0.1):
    return scale * jax.random.normal(key, shape, F32)


def ln_params(dim):
    return {"gamma": jnp.ones((1, dim), F32), "beta": jnp.zeros((1, dim), F32)}


def gvp_params(key, si, vi, so, vo):
    h = max(vi, vo)
    k = jax.random.split(key, 5)
    return {"wh": _dense(k[0], (vi, h)),
            "ws_s": _dense(k[1], (si, so)),
            "ws_n": _dense(k[2], (h, so)),
            "bs": jnp.zeros((1, so), F32),
            "wv": _dense(k[3], (h, vo)),
            "wsv": _dense(k[4], (so, vo)),
            "bg": jnp.zeros((1, vo), F32)}


def msg0_params(key, sd, se1, se1p, vd, ve):
    # GVP((2*sd + se1, 2*vd + ve) -> (sd, vd)); scalar weights row-stacked,
    # edge rows zero-padded to the lane-padded edge-feature width se1p.
    vi = 2 * vd + ve
    h = max(vi, vd)
    k = jax.random.split(key, 7)
    ws_sj = _dense(k[0], (sd, sd))
    ws_e = _dense(k[1], (se1, sd))
    ws_si = _dense(k[2], (sd, sd))
    if se1p > se1:
        ws_e = jnp.concatenate([ws_e, jnp.zeros((se1p - se1, sd), F32)], axis=0)
    return {"wh": _dense(k[3], (vi, h)),
            "ws": jnp.concatenate([ws_sj, ws_e, ws_si], axis=0),   # (2sd+se1p, sd)
            "ws_n": _dense(k[4], (h, sd)),
            "bs": jnp.zeros((1, sd), F32),
            "wv": _dense(k[5], (h, vd)),
            "wsv": _dense(k[6], (sd, vd)),
            "bg": jnp.zeros((1, vd), F32)}


def init_params(key, cfg):
    sd, vd = cfg["s_dim"], cfg["v_dim"]
    se, ve = cfg["s_dim_edge"], cfg["v_dim_edge"]
    nb = cfg["num_bessel"]
    se1p = _round_up(se + 1, 8)
    keys = jax.random.split(key, 4 + cfg["num_layers"])
    params = {
        "W_v_ln": ln_params(sd),
        "W_v_w": _dense(keys[0], (sd, sd)),
        "W_v_b": jnp.zeros((1, sd), F32),
        # BesselBasis init: pi * k / r_max, k = 1..num_bessel
        "bessel_w": (jnp.pi / cfg["r_max"]) * jnp.arange(1, nb + 1, dtype=F32).reshape(1, nb),
        "W_e_ln": ln_params(nb),
        "W_e": gvp_params(keys[1], nb, 1, se, ve),
        "pred_w1": _dense(keys[2], (sd, sd)),
        "pred_b1": jnp.zeros((1, sd), F32),
        "pred_w2": _dense(keys[3], (sd, cfg["out_dim"])),
        "pred_b2": jnp.zeros((1, cfg["out_dim"]), F32),
        "layers": [],
    }
    for l in range(cfg["num_layers"]):
        lk = jax.random.split(keys[4 + l], 5)
        params["layers"].append({
            "msg0": msg0_params(lk[0], sd, se + 1, se1p, vd, ve),
            "msg1": gvp_params(lk[1], sd, vd, sd, vd),
            "msg2": gvp_params(lk[2], sd, vd, sd, vd),
            "norm0": ln_params(sd),
            "ff0": gvp_params(lk[3], sd, vd, 4 * sd, 2 * vd),
            "ff1": gvp_params(lk[4], 4 * sd, 2 * vd, sd, vd),
            "norm1": ln_params(sd),
        })
    return params


# ----------------------------------------------------------------------------
# cost estimates (advisory, for XLA scheduling around the custom calls)
# ----------------------------------------------------------------------------
def _gvp_flops(rows, si, vi, so, vo):
    h = max(vi, vo)
    return 2 * rows * (3 * vi * h + (si + h) * so + so * vo + 3 * h * vo)


def _embed_cost(n, e, sd, nb, se, ve):
    flops = 2 * (2 * e) * n * 3 + 2 * n * sd * sd + _gvp_flops(e, nb, 1, se, ve)
    trans = e * (nb + 8)
    return flops, trans


def _conv_cost(n, e, sd, vd, se1p, ve):
    d = sd + 3 * vd
    flops = 2 * (2 * e) * n * d + 2 * e * n * d                 # gather + scatter
    flops += _gvp_flops(e, 2 * sd + se1p, 2 * vd + ve, sd, vd)
    flops += 2 * _gvp_flops(e, sd, vd, sd, vd)
    flops += _gvp_flops(n, sd, vd, 4 * sd, 2 * vd)
    flops += _gvp_flops(n, 4 * sd, 2 * vd, sd, vd)
    trans = 4 * (e * (sd + vd) + n * (4 * sd + 2 * vd))
    return flops, trans


# ----------------------------------------------------------------------------
# Forward pass: 2 + num_layers pallas_calls
# ----------------------------------------------------------------------------
def forward(params, cfg, atoms, pos, edge_index):
    n = atoms.shape[0]
    src, dst = edge_index[0], edge_index[1]
    e = src.shape[0]
    sd, vd = cfg["s_dim"], cfg["v_dim"]
    se, ve = cfg["s_dim_edge"], cfg["v_dim_edge"]
    se1p = _round_up(se + 1, 8)
    assert n % 8 == 0 and e % 8 == 0, "demo assumes 8-aligned node/edge counts"

    # single (2E, N) bf16 one-hot gather operator [src; dst], shared by all layers
    g_both = jnp.concatenate([jax.nn.one_hot(src, n, dtype=BF16),
                              jax.nn.one_hot(dst, n, dtype=BF16)], axis=0)

    # Kernel A: node embed + radial + cosine + W_e, all fused
    fl, tr = _embed_cost(n, e, sd, cfg["num_bessel"], se, ve)
    embed_body = functools.partial(
        embed_edge_body, e=e, r_max=cfg["r_max"],
        poly_p=cfg["num_polynomial_cutoff"], se=se, se1p=se1p)
    h_s, e_s, e_v = _fused_call(
        embed_body,
        [(n, sd), (e, se1p), (3, e, ve)],
        [atoms, pos, g_both],
        {"Wv_ln": params["W_v_ln"], "Wv_w": params["W_v_w"], "Wv_b": params["W_v_b"],
         "bessel_w": params["bessel_w"], "We_ln": params["W_e_ln"],
         "We": params["W_e"]},
        flops=fl, transcendentals=tr)

    # GVP with 0 input vector channels outputs zero vectors
    h_v = jnp.zeros((3, n, vd), F32)

    # Kernel B: one fused call per conv layer
    fl, tr = _conv_cost(n, e, sd, vd, se1p, ve)
    layer_body = functools.partial(conv_layer_body, e=e, sd=sd, vd=vd)
    for lp in params["layers"]:
        h_s, h_v = _fused_call(
            layer_body,
            [(n, sd), (3, n, vd)],
            [h_s, h_v, e_s, e_v, g_both],
            lp, flops=fl, transcendentals=tr)

    # out = _merge(s, v)[:, :s_dim] == s ; Kernel C: prediction head
    return pred_head(h_s, params["pred_w1"], params["pred_b1"],
                     params["pred_w2"], params["pred_b2"], cfg["out_dim"])


# ----------------------------------------------------------------------------
if __name__ == "__main__":
    cfg = dict(r_max=10.0, num_bessel=8, num_polynomial_cutoff=5, num_layers=2,
               in_dim=1, out_dim=4, s_dim=32, v_dim=4, s_dim_edge=16, v_dim_edge=1)

    key = jax.random.PRNGKey(0)
    kp, ka, kpos = jax.random.split(key, 3)
    params = init_params(kp, cfg)

    N = 16
    atoms = jax.random.normal(ka, (N, cfg["s_dim"]), F32)     # per-node scalar feats
    pos = 3.0 * jax.random.normal(kpos, (N, 3), F32)          # 3-D coordinates
    idx = jnp.arange(N)
    src = jnp.concatenate([idx, idx])
    dst = jnp.concatenate([(idx + 1) % N, (idx + 5) % N])
    edge_index = jnp.stack([src, dst])                        # (2, 32)

    fwd = jax.jit(lambda p, a, x, ei: forward(p, cfg, a, x, ei))
    out = fwd(params, atoms, pos, edge_index)
    jax.block_until_ready(out)
    assert out.shape == (N, cfg["out_dim"])
    assert bool(jnp.all(jnp.isfinite(out)))
    # softmax rows must sum to ~1
    assert bool(jnp.all(jnp.abs(jnp.sum(out, axis=-1) - 1.0) < 1e-4))
    print("KERNEL_OK")
</pallas_src>

<mosaic_0001>
module attributes {stable_mosaic.version = 11 : i64} {
  func.func @kernel(%arg0: memref<16x32xf32, #tpu.memory_space<vmem>>, %arg1: memref<16x3xf32, #tpu.memory_space<vmem>>, %arg2: memref<64x16xbf16, #tpu.memory_space<vmem>>, %arg3: memref<1x1xf32, #tpu.memory_space<vmem>>, %arg4: memref<1x16xf32, #tpu.memory_space<vmem>>, %arg5: memref<1x1xf32, #tpu.memory_space<vmem>>, %arg6: memref<1x16xf32, #tpu.memory_space<vmem>>, %arg7: memref<8x16xf32, #tpu.memory_space<vmem>>, %arg8: memref<16x1xf32, #tpu.memory_space<vmem>>, %arg9: memref<1x1xf32, #tpu.memory_space<vmem>>, %arg10: memref<1x8xf32, #tpu.memory_space<vmem>>, %arg11: memref<1x8xf32, #tpu.memory_space<vmem>>, %arg12: memref<1x32xf32, #tpu.memory_space<vmem>>, %arg13: memref<1x32xf32, #tpu.memory_space<vmem>>, %arg14: memref<1x32xf32, #tpu.memory_space<vmem>>, %arg15: memref<32x32xf32, #tpu.memory_space<vmem>>, %arg16: memref<1x8xf32, #tpu.memory_space<vmem>>, %arg17: memref<16x32xf32, #tpu.memory_space<vmem>>, %arg18: memref<32x24xf32, #tpu.memory_space<vmem>>, %arg19: memref<3x32x1xf32, #tpu.memory_space<vmem>>) attributes {dimension_semantics = [], scalar_prefetch = 0 : i64, scratch_operands = 0 : i64, tpu.core_type = #tpu.core_type<tc>} {
    %c0 = arith.constant 0 : index
    %c0_0 = arith.constant 0 : index
    %0 = vector.load %arg3[%c0, %c0_0] : memref<1x1xf32, #tpu.memory_space<vmem>>, vector<1x1xf32>
    %c0_1 = arith.constant 0 : index
    %c0_2 = arith.constant 0 : index
    %1 = vector.load %arg4[%c0_1, %c0_2] : memref<1x16xf32, #tpu.memory_space<vmem>>, vector<1x16xf32>
    %c0_3 = arith.constant 0 : index
    %c0_4 = arith.constant 0 : index
    %2 = vector.load %arg5[%c0_3, %c0_4] : memref<1x1xf32, #tpu.memory_space<vmem>>, vector<1x1xf32>
    %c0_5 = arith.constant 0 : index
    %c0_6 = arith.constant 0 : index
    %3 = vector.load %arg6[%c0_5, %c0_6] : memref<1x16xf32, #tpu.memory_space<vmem>>, vector<1x16xf32>
    %c0_7 = arith.constant 0 : index
    %c0_8 = arith.constant 0 : index
    %4 = vector.load %arg7[%c0_7, %c0_8] : memref<8x16xf32, #tpu.memory_space<vmem>>, vector<8x16xf32>
    %c0_9 = arith.constant 0 : index
    %c0_10 = arith.constant 0 : index
    %5 = vector.load %arg8[%c0_9, %c0_10] : memref<16x1xf32, #tpu.memory_space<vmem>>, vector<16x1xf32>
    %c0_11 = arith.constant 0 : index
    %c0_12 = arith.constant 0 : index
    %6 = vector.load %arg9[%c0_11, %c0_12] : memref<1x1xf32, #tpu.memory_space<vmem>>, vector<1x1xf32>
    %c0_13 = arith.constant 0 : index
    %c0_14 = arith.constant 0 : index
    %7 = vector.load %arg10[%c0_13, %c0_14] : memref<1x8xf32, #tpu.memory_space<vmem>>, vector<1x8xf32>
    %c0_15 = arith.constant 0 : index
    %c0_16 = arith.constant 0 : index
    %8 = vector.load %arg11[%c0_15, %c0_16] : memref<1x8xf32, #tpu.memory_space<vmem>>, vector<1x8xf32>
    %c0_17 = arith.constant 0 : index
    %c0_18 = arith.constant 0 : index
    %9 = vector.load %arg12[%c0_17, %c0_18] : memref<1x32xf32, #tpu.memory_space<vmem>>, vector<1x32xf32>
    %c0_19 = arith.constant 0 : index
    %c0_20 = arith.constant 0 : index
    %10 = vector.load %arg13[%c0_19, %c0_20] : memref<1x32xf32, #tpu.memory_space<vmem>>, vector<1x32xf32>
    %c0_21 = arith.constant 0 : index
    %c0_22 = arith.constant 0 : index
    %11 = vector.load %arg14[%c0_21, %c0_22] : memref<1x32xf32, #tpu.memory_space<vmem>>, vector<1x32xf32>
    %c0_23 = arith.constant 0 : index
    %c0_24 = arith.constant 0 : index
    %12 = vector.load %arg15[%c0_23, %c0_24] : memref<32x32xf32, #tpu.memory_space<vmem>>, vector<32x32xf32>
    %c0_25 = arith.constant 0 : index
    %c0_26 = arith.constant 0 : index
    %13 = vector.load %arg16[%c0_25, %c0_26] : memref<1x8xf32, #tpu.memory_space<vmem>>, vector<1x8xf32>
    %c0_27 = arith.constant 0 : index
    %c0_28 = arith.constant 0 : index
    %14 = vector.load %arg0[%c0_27, %c0_28] : memref<16x32xf32, #tpu.memory_space<vmem>>, vector<16x32xf32>
    %cst = arith.constant dense<0.000000e+00> : vector<16xf32>
    %15 = vector.multi_reduction <add>, %14, %cst [1] : vector<16x32xf32> to vector<16xf32>
    %16 = vector.shape_cast %15 : vector<16xf32> to vector<16x1xf32>
    %cst_29 = arith.constant 3.200000e+01 : f32
    %17 = vector.broadcast %cst_29 : f32 to vector<16x1xf32>
    %18 = arith.divf %16, %17 : vector<16x1xf32>
    %19 = vector.broadcast %18 : vector<16x1xf32> to vector<16x32xf32>
    %20 = arith.subf %14, %19 : vector<16x32xf32>
    %21 = arith.mulf %20, %20 : vector<16x32xf32>
    %cst_30 = arith.constant dense<0.000000e+00> : vector<16xf32>
    %22 = vector.multi_reduction <add>, %21, %cst_30 [1] : vector<16x32xf32> to vector<16xf32>
    %23 = vector.shape_cast %22 : vector<16xf32> to vector<16x1xf32>
    %cst_31 = arith.constant 3.200000e+01 : f32
    %24 = vector.broadcast %cst_31 : f32 to vector<16x1xf32>
    %25 = arith.divf %23, %24 : vector<16x1xf32>
    %26 = vector.broadcast %18 : vector<16x1xf32> to vector<16x32xf32>
    %27 = arith.subf %14, %26 : vector<16x32xf32>
    %cst_32 = arith.constant 9.99999974E-6 : f32
    %28 = vector.broadcast %cst_32 : f32 to vector<16x1xf32>
    %29 = arith.addf %25, %28 : vector<16x1xf32>
    %30 = math.rsqrt %29 : vector<16x1xf32>
    %31 = vector.broadcast %30 : vector<16x1xf32> to vector<16x32xf32>
    %32 = arith.mulf %27, %31 : vector<16x32xf32>
    %33 = vector.broadcast %11 : vector<1x32xf32> to vector<16x32xf32>
    %34 = arith.mulf %32, %33 : vector<16x32xf32>
    %35 = vector.broadcast %10 : vector<1x32xf32> to vector<16x32xf32>
    %36 = arith.addf %34, %35 : vector<16x32xf32>
    %cst_33 = arith.constant dense<0.000000e+00> : vector<16x32xf32>
    %37 = tpu.matmul %36, %12, %cst_33 {dimension_numbers = #tpu.dot_dimension_numbers<[1], [0], [0], [1], [0, 0, 1, 1], [], []>} : vector<16x32xf32>, vector<32x32xf32>, vector<16x32xf32> -> vector<16x32xf32>
    %38 = vector.broadcast %9 : vector<1x32xf32> to vector<16x32xf32>
    %39 = arith.addf %37, %38 : vector<16x32xf32>
    %c0_34 = arith.constant 0 : index
    %c0_35 = arith.constant 0 : index
    %40 = vector.load %arg17[%c0_34, %c0_35] : memref<16x32xf32, #tpu.memory_space<vmem>>, vector<16x32xf32>
    tpu.vector_store %arg17[%c0_34, %c0_35], %39 {strides = array<i32>} : memref<16x32xf32, #tpu.memory_space<vmem>>, vector<16x32xf32>,
    %c0_36 = arith.constant 0 : index
    %c0_37 = arith.constant 0 : index
    %41 = vector.load %arg1[%c0_36, %c0_37] : memref<16x3xf32, #tpu.memory_space<vmem>>, vector<16x3xf32>
    %c0_38 = arith.constant 0 : index
    %c0_39 = arith.constant 0 : index
    %42 = vector.load %arg2[%c0_38, %c0_39] : memref<64x16xbf16, #tpu.memory_space<vmem>>, vector<64x16xbf16>
    %43 = arith.extf %42 : vector<64x16xbf16> to vector<64x16xf32>
    %cst_40 = arith.constant dense<0.000000e+00> : vector<64x3xf32>
    %44 = tpu.matmul %43, %41, %cst_40 {dimension_numbers = #tpu.dot_dimension_numbers<[1], [0], [0], [1], [0, 0, 1, 1], [], []>} : vector<64x16xf32>, vector<16x3xf32>, vector<64x3xf32> -> vector<64x3xf32>
    %45 = vector.extract_strided_slice %44 {offsets = [0, 0], sizes = [32, 3], strides = [1, 1]} : vector<64x3xf32> to vector<32x3xf32>
    %46 = vector.extract_strided_slice %44 {offsets = [32, 0], sizes = [32, 3], strides = [1, 1]} : vector<64x3xf32> to vector<32x3xf32>
    %47 = arith.subf %45, %46 : vector<32x3xf32>
    %48 = arith.mulf %47, %47 : vector<32x3xf32>
    %cst_41 = arith.constant dense<0.000000e+00> : vector<32xf32>
    %49 = vector.multi_reduction <add>, %48, %cst_41 [1] : vector<32x3xf32> to vector<32xf32>
    %50 = vector.shape_cast %49 : vector<32xf32> to vector<32x1xf32>
    %51 = math.sqrt %50 : vector<32x1xf32>
    %cst_42 = arith.constant 0.000000e+00 : f32
    %52 = vector.broadcast %cst_42 : f32 to vector<32x1xf32>
    %53 = arith.cmpf ogt, %51, %52 : vector<32x1xf32>
    %cst_43 = arith.constant 1.000000e-30 : f32
    %54 = vector.broadcast %cst_43 : f32 to vector<32x1xf32>
    %55 = arith.maximumf %51, %54 : vector<32x1xf32>
    %cst_44 = arith.constant 1.000000e+00 : f32
    %56 = vector.broadcast %cst_44 : f32 to vector<32x1xf32>
    %57 = arith.divf %56, %55 : vector<32x1xf32>
    %cst_45 = arith.constant 0.000000e+00 : f32
    %58 = vector.broadcast %cst_45 : f32 to vector<32x1xf32>
    %59 = arith.select %53, %57, %58 : vector<32x1xi1>, vector<32x1xf32>
    %60 = arith.mulf %45, %46 : vector<32x3xf32>
    %cst_46 = arith.constant dense<0.000000e+00> : vector<32xf32>
    %61 = vector.multi_reduction <add>, %60, %cst_46 [1] : vector<32x3xf32> to vector<32xf32>
    %62 = vector.shape_cast %61 : vector<32xf32> to vector<32x1xf32>
    %63 = arith.mulf %45, %45 : vector<32x3xf32>
    %cst_47 = arith.constant dense<0.000000e+00> : vector<32xf32>
    %64 = vector.multi_reduction <add>, %63, %cst_47 [1] : vector<32x3xf32> to vector<32xf32>
    %65 = vector.shape_cast %64 : vector<32xf32> to vector<32x1xf32>
    %66 = math.sqrt %65 : vector<32x1xf32>
    %67 = arith.mulf %46, %46 : vector<32x3xf32>
    %cst_48 = arith.constant dense<0.000000e+00> : vector<32xf32>
    %68 = vector.multi_reduction <add>, %67, %cst_48 [1] : vector<32x3xf32> to vector<32xf32>
    %69 = vector.shape_cast %68 : vector<32xf32> to vector<32x1xf32>
    %70 = math.sqrt %69 : vector<32x1xf32>
    %71 = arith.mulf %66, %70 : vector<32x1xf32>
    %cst_49 = arith.constant 9.99999993E-9 : f32
    %72 = vector.broadcast %cst_49 : f32 to vector<32x1xf32>
    %73 = arith.maximumf %71, %72 : vector<32x1xf32>
    %74 = arith.divf %62, %73 : vector<32x1xf32>
    %75 = vector.broadcast %51 : vector<32x1xf32> to vector<32x8xf32>
    %76 = vector.broadcast %13 : vector<1x8xf32> to vector<32x8xf32>
    %77 = arith.mulf %75, %76 : vector<32x8xf32>
    %78 = math.sin %77 : vector<32x8xf32>
    %cst_50 = arith.constant 0.44721359 : f32
    %79 = vector.broadcast %cst_50 : f32 to vector<32x8xf32>
    %80 = arith.mulf %79, %78 : vector<32x8xf32>
    %81 = vector.broadcast %59 : vector<32x1xf32> to vector<32x8xf32>
    %82 = arith.mulf %80, %81 : vector<32x8xf32>
    %cst_51 = arith.constant 1.000000e+01 : f32
    %83 = vector.broadcast %cst_51 : f32 to vector<32x1xf32>
    %84 = arith.divf %51, %83 : vector<32x1xf32>
    %85 = arith.mulf %84, %84 : vector<32x1xf32>
    %86 = arith.mulf %85, %85 : vector<32x1xf32>
    %87 = arith.mulf %84, %86 : vector<32x1xf32>
    %cst_52 = arith.constant 2.100000e+01 : f32
    %88 = vector.broadcast %cst_52 : f32 to vector<32x1xf32>
    %89 = arith.mulf %88, %87 : vector<32x1xf32>
    %cst_53 = arith.constant 1.000000e+00 : f32
    %90 = vector.broadcast %cst_53 : f32 to vector<32x1xf32>
    %91 = arith.subf %90, %89 : vector<32x1xf32>
    %92 = arith.mulf %84, %84 : vector<32x1xf32>
    %93 = arith.mulf %92, %92 : vector<32x1xf32>
    %94 = arith.mulf %92, %93 : vector<32x1xf32>
    %cst_54 = arith.constant 3.500000e+01 : f32
    %95 = vector.broadcast %cst_54 : f32 to vector<32x1xf32>
    %96 = arith.mulf %95, %94 : vector<32x1xf32>
    %97 = arith.addf %91, %96 : vector<32x1xf32>
    %98 = arith.mulf %84, %84 : vector<32x1xf32>
    %99 = arith.mulf %84, %98 : vector<32x1xf32>
    %100 = arith.mulf %98, %98 : vector<32x1xf32>
    %101 = arith.mulf %99, %100 : vector<32x1xf32>
    %cst_55 = arith.constant 1.500000e+01 : f32
    %102 = vector.broadcast %cst_55 : f32 to vector<32x1xf32>
    %103 = arith.mulf %102, %101 : vector<32x1xf32>
    %104 = arith.subf %97, %103 : vector<32x1xf32>
    %cst_56 = arith.constant 1.000000e+01 : f32
    %105 = vector.broadcast %cst_56 : f32 to vector<32x1xf32>
    %106 = arith.cmpf olt, %51, %105 : vector<32x1xf32>
    %107 = arith.extui %106 : vector<32x1xi1> to vector<32x1xi32>
    %108 = arith.sitofp %107 : vector<32x1xi32> to vector<32x1xf32>
    %109 = arith.mulf %104, %108 : vector<32x1xf32>
    %110 = vector.broadcast %109 : vector<32x1xf32> to vector<32x8xf32>
    %111 = arith.mulf %82, %110 : vector<32x8xf32>
    %112 = vector.broadcast %59 : vector<32x1xf32> to vector<32x3xf32>
    %113 = arith.mulf %47, %112 : vector<32x3xf32>
    %114 = vector.extract_strided_slice %113 {offsets = [0, 0], sizes = [32, 1], strides = [1, 1]} : vector<32x3xf32> to vector<32x1xf32>
    %115 = vector.extract_strided_slice %113 {offsets = [0, 1], sizes = [32, 1], strides = [1, 1]} : vector<32x3xf32> to vector<32x1xf32>
    %116 = vector.extract_strided_slice %113 {offsets = [0, 2], sizes = [32, 1], strides = [1, 1]} : vector<32x3xf32> to vector<32x1xf32>
    %117 = vector.shape_cast %114 : vector<32x1xf32> to vector<1x32x1xf32>
    %118 = vector.shape_cast %115 : vector<32x1xf32> to vector<1x32x1xf32>
    %119 = vector.shape_cast %116 : vector<32x1xf32> to vector<1x32x1xf32>
    %120 = tpu.concatenate %117, %118, %119 in 0 : vector<1x32x1xf32>, vector<1x32x1xf32>, vector<1x32x1xf32> -> vector<3x32x1xf32>
    %cst_57 = arith.constant dense<0.000000e+00> : vector<32xf32>
    %121 = vector.multi_reduction <add>, %111, %cst_57 [1] : vector<32x8xf32> to vector<32xf32>
    %122 = vector.shape_cast %121 : vector<32xf32> to vector<32x1xf32>
    %cst_58 = arith.constant 8.000000e+00 : f32
    %123 = vector.broadcast %cst_58 : f32 to vector<32x1xf32>
    %124 = arith.divf %122, %123 : vector<32x1xf32>
    %125 = vector.broadcast %124 : vector<32x1xf32> to vector<32x8xf32>
    %126 = arith.subf %111, %125 : vector<32x8xf32>
    %127 = arith.mulf %126, %126 : vector<32x8xf32>
    %cst_59 = arith.constant dense<0.000000e+00> : vector<32xf32>
    %128 = vector.multi_reduction <add>, %127, %cst_59 [1] : vector<32x8xf32> to vector<32xf32>
    %129 = vector.shape_cast %128 : vector<32xf32> to vector<32x1xf32>
    %cst_60 = arith.constant 8.000000e+00 : f32
    %130 = vector.broadcast %cst_60 : f32 to vector<32x1xf32>
    %131 = arith.divf %129, %130 : vector<32x1xf32>
    %132 = vector.broadcast %124 : vector<32x1xf32> to vector<32x8xf32>
    %133 = arith.subf %111, %132 : vector<32x8xf32>
    %cst_61 = arith.constant 9.99999974E-6 : f32
    %134 = vector.broadcast %cst_61 : f32 to vector<32x1xf32>
    %135 = arith.addf %131, %134 : vector<32x1xf32>
    %136 = math.rsqrt %135 : vector<32x1xf32>
    %137 = vector.broadcast %136 : vector<32x1xf32> to vector<32x8xf32>
    %138 = arith.mulf %133, %137 : vector<32x8xf32>
    %139 = vector.broadcast %8 : vector<1x8xf32> to vector<32x8xf32>
    %140 = arith.mulf %138, %139 : vector<32x8xf32>
    %141 = vector.broadcast %7 : vector<1x8xf32> to vector<32x8xf32>
    %142 = arith.addf %140, %141 : vector<32x8xf32>
    %143 = arith.mulf %120, %120 : vector<3x32x1xf32>
    %cst_62 = arith.constant dense<0.000000e+00> : vector<32x1xf32>
    %144 = vector.multi_reduction <add>, %143, %cst_62 [0] : vector<3x32x1xf32> to vector<32x1xf32>
    %cst_63 = arith.constant 9.99999993E-9 : f32
    %145 = vector.broadcast %cst_63 : f32 to vector<32x1xf32>
    %146 = arith.maximumf %144, %145 : vector<32x1xf32>
    %cst_64 = arith.constant dense<0.000000e+00> : vector<32xf32>
    %147 = vector.multi_reduction <add>, %146, %cst_64 [1] : vector<32x1xf32> to vector<32xf32>
    %148 = vector.shape_cast %147 : vector<32xf32> to vector<32x1xf32>
    %cst_65 = arith.constant 1.000000e+00 : f32
    %149 = vector.broadcast %cst_65 : f32 to vector<32x1xf32>
    %150 = arith.divf %148, %149 : vector<32x1xf32>
    %151 = math.rsqrt %150 : vector<32x1xf32>
    %152 = vector.shape_cast %151 : vector<32x1xf32> to vector<1x32x1xf32>
    %153 = vector.broadcast %152 : vector<1x32x1xf32> to vector<3x32x1xf32>
    %154 = arith.mulf %120, %153 : vector<3x32x1xf32>
    %155 = vector.shape_cast %2 : vector<1x1xf32> to vector<1x1x1xf32>
    %156 = vector.broadcast %155 : vector<1x1x1xf32> to vector<3x32x1xf32>
    %157 = arith.mulf %154, %156 : vector<3x32x1xf32>
    %158 = arith.mulf %157, %157 : vector<3x32x1xf32>
    %cst_66 = arith.constant dense<0.000000e+00> : vector<32x1xf32>
    %159 = vector.multi_reduction <add>, %158, %cst_66 [0] : vector<3x32x1xf32> to vector<32x1xf32>
    %cst_67 = arith.constant 9.99999993E-9 : f32
    %160 = vector.broadcast %cst_67 : f32 to vector<32x1xf32>
    %161 = arith.maximumf %159, %160 : vector<32x1xf32>
    %162 = math.sqrt %161 : vector<32x1xf32>
    %cst_68 = arith.constant dense<0.000000e+00> : vector<32x16xf32>
    %163 = tpu.matmul %142, %4, %cst_68 {dimension_numbers = #tpu.dot_dimension_numbers<[1], [0], [0], [1], [0, 0, 1, 1], [], []>} : vector<32x8xf32>, vector<8x16xf32>, vector<32x16xf32> -> vector<32x16xf32>
    %164 = vector.broadcast %162 : vector<32x1xf32> to vector<32x16xf32>
    %165 = vector.broadcast %3 : vector<1x16xf32> to vector<32x16xf32>
    %166 = arith.mulf %164, %165 : vector<32x16xf32>
    %167 = arith.addf %163, %166 : vector<32x16xf32>
    %168 = vector.broadcast %1 : vector<1x16xf32> to vector<32x16xf32>
    %169 = arith.addf %167, %168 : vector<32x16xf32>
    %cst_69 = arith.constant dense<0.000000e+00> : vector<32x1xf32>
    %170 = tpu.matmul %169, %5, %cst_69 {dimension_numbers = #tpu.dot_dimension_numbers<[1], [0], [0], [1], [0, 0, 1, 1], [], []>} : vector<32x16xf32>, vector<16x1xf32>, vector<32x1xf32> -> vector<32x1xf32>
    %171 = vector.broadcast %0 : vector<1x1xf32> to vector<32x1xf32>
    %172 = arith.addf %170, %171 : vector<32x1xf32>
    %173 = arith.negf %172 : vector<32x1xf32>
    %174 = math.exp %173 : vector<32x1xf32>
    %cst_70 = arith.constant 1.000000e+00 : f32
    %175 = vector.broadcast %cst_70 : f32 to vector<32x1xf32>
    %176 = arith.addf %175, %174 : vector<32x1xf32>
    %177 = arith.divf %175, %176 : vector<32x1xf32>
    %178 = vector.shape_cast %6 : vector<1x1xf32> to vector<1x1x1xf32>
    %179 = vector.broadcast %178 : vector<1x1x1xf32> to vector<3x32x1xf32>
    %180 = arith.mulf %157, %179 : vector<3x32x1xf32>
    %181 = vector.shape_cast %177 : vector<32x1xf32> to vector<1x32x1xf32>
    %182 = vector.broadcast %181 : vector<1x32x1xf32> to vector<3x32x1xf32>
    %183 = arith.mulf %180, %182 : vector<3x32x1xf32>
    %cst_71 = arith.constant 0.000000e+00 : f32
    %184 = vector.broadcast %cst_71 : f32 to vector<32x7xf32>
    %185 = tpu.concatenate %169, %74, %184 in 1 : vector<32x16xf32>, vector<32x1xf32>, vector<32x7xf32> -> vector<32x24xf32>
    %c0_72 = arith.constant 0 : index
    %c0_73 = arith.constant 0 : index
    %186 = vector.load %arg18[%c0_72, %c0_73] : memref<32x24xf32, #tpu.memory_space<vmem>>, vector<32x24xf32>
    tpu.vector_store %arg18[%c0_72, %c0_73], %185 {strides = array<i32>} : memref<32x24xf32, #tpu.memory_space<vmem>>, vector<32x24xf32>,
    %c0_74 = arith.constant 0 : index
    %c0_75 = arith.constant 0 : index
    %c0_76 = arith.constant 0 : index
    %187 = vector.load %arg19[%c0_74, %c0_75, %c0_76] : memref<3x32x1xf32, #tpu.memory_space<vmem>>, vector<3x32x1xf32>
    tpu.vector_store %arg19[%c0_74, %c0_75, %c0_76], %183 {strides = array<i32>} : memref<3x32x1xf32, #tpu.memory_space<vmem>>, vector<3x32x1xf32>,
    return
  }
}

module attributes {stable_mosaic.version = 11 : i64} {
  func.func @kernel(%arg0: memref<16x32xf32, #tpu.memory_space<vmem>>, %arg1: memref<3x16x4xf32, #tpu.memory_space<vmem>>, %arg2: memref<32x24xf32, #tpu.memory_space<vmem>>, %arg3: memref<3x32x1xf32, #tpu.memory_space<vmem>>, %arg4: memref<64x16xbf16, #tpu.memory_space<vmem>>, %arg5: memref<1x8xf32, #tpu.memory_space<vmem>>, %arg6: memref<1x128xf32, #tpu.memory_space<vmem>>, %arg7: memref<4x8xf32, #tpu.memory_space<vmem>>, %arg8: memref<8x128xf32, #tpu.memory_space<vmem>>, %arg9: memref<32x128xf32, #tpu.memory_space<vmem>>, %arg10: memref<128x8xf32, #tpu.memory_space<vmem>>, %arg11: memref<8x8xf32, #tpu.memory_space<vmem>>, %arg12: memref<1x4xf32, #tpu.memory_space<vmem>>, %arg13: memref<1x32xf32, #tpu.memory_space<vmem>>, %arg14: memref<8x8xf32, #tpu.memory_space<vmem>>, %arg15: memref<8x32xf32, #tpu.memory_space<vmem>>, %arg16: memref<128x32xf32, #tpu.memory_space<vmem>>, %arg17: memref<32x4xf32, #tpu.memory_space<vmem>>, %arg18: memref<8x4xf32, #tpu.memory_space<vmem>>, %arg19: memref<1x4xf32, #tpu.memory_space<vmem>>, %arg20: memref<1x32xf32, #tpu.memory_space<vmem>>, %arg21: memref<9x9xf32, #tpu.memory_space<vmem>>, %arg22: memref<88x32xf32, #tpu.memory_space<vmem>>, %arg23: memref<9x32xf32, #tpu.memory_space<vmem>>, %arg24: memref<32x4xf32, #tpu.memory_space<vmem>>, %arg25: memref<9x4xf32, #tpu.memory_space<vmem>>, %arg26: memref<1x4xf32, #tpu.memory_space<vmem>>, %arg27: memref<1x32xf32, #tpu.memory_space<vmem>>, %arg28: memref<4x4xf32, #tpu.memory_space<vmem>>, %arg29: memref<4x32xf32, #tpu.memory_space<vmem>>, %arg30: memref<32x32xf32, #tpu.memory_space<vmem>>, %arg31: memref<32x4xf32, #tpu.memory_space<vmem>>, %arg32: memref<4x4xf32, #tpu.memory_space<vmem>>, %arg33: memref<1x4xf32, #tpu.memory_space<vmem>>, %arg34: memref<1x32xf32, #tpu.memory_space<vmem>>, %arg35: memref<4x4xf32, #tpu.memory_space<vmem>>, %arg36: memref<4x32xf32, #tpu.memory_space<vmem>>, %arg37: memref<32x32xf32, #tpu.memory_space<vmem>>, %arg38: memref<32x4xf32, #tpu.memory_space<vmem>>, %arg39: memref<4x4xf32, #tpu.memory_space<vmem>>, %arg40: memref<1x32xf32, #tpu.memory_space<vmem>>, %arg41: memref<1x32xf32, #tpu.memory_space<vmem>>, %arg42: memref<1x32xf32, #tpu.memory_space<vmem>>, %arg43: memref<1x32xf32, #tpu.memory_space<vmem>>, %arg44: memref<16x32xf32, #tpu.memory_space<vmem>>, %arg45: memref<3x16x4xf32, #tpu.memory_space<vmem>>) attributes {dimension_semantics = [], scalar_prefetch = 0 : i64, scratch_operands = 0 : i64, tpu.core_type = #tpu.core_type<tc>} {
    %c0 = arith.constant 0 : index
    %c0_0 = arith.constant 0 : index
    %0 = vector.load %arg5[%c0, %c0_0] : memref<1x8xf32, #tpu.memory_space<vmem>>, vector<1x8xf32>
    %c0_1 = arith.constant 0 : index
    %c0_2 = arith.constant 0 : index
    %1 = vector.load %arg6[%c0_1, %c0_2] : memref<1x128xf32, #tpu.memory_space<vmem>>, vector<1x128xf32>
    %c0_3 = arith.constant 0 : index
    %c0_4 = arith.constant 0 : index
    %2 = vector.load %arg7[%c0_3, %c0_4] : memref<4x8xf32, #tpu.memory_space<vmem>>, vector<4x8xf32>
    %c0_5 = arith.constant 0 : index
    %c0_6 = arith.constant 0 : index
    %3 = vector.load %arg8[%c0_5, %c0_6] : memref<8x128xf32, #tpu.memory_space<vmem>>, vector<8x128xf32>
    %c0_7 = arith.constant 0 : index
    %c0_8 = arith.constant 0 : index
    %4 = vector.load %arg9[%c0_7, %c0_8] : memref<32x128xf32, #tpu.memory_space<vmem>>, vector<32x128xf32>
    %c0_9 = arith.constant 0 : index
    %c0_10 = arith.constant 0 : index
    %5 = vector.load %arg10[%c0_9, %c0_10] : memref<128x8xf32, #tpu.memory_space<vmem>>, vector<128x8xf32>
    %c0_11 = arith.constant 0 : index
    %c0_12 = arith.constant 0 : index
    %6 = vector.load %arg11[%c0_11, %c0_12] : memref<8x8xf32, #tpu.memory_space<vmem>>, vector<8x8xf32>
    %c0_13 = arith.constant 0 : index
    %c0_14 = arith.constant 0 : index
    %7 = vector.load %arg12[%c0_13, %c0_14] : memref<1x4xf32, #tpu.memory_space<vmem>>, vector<1x4xf32>
    %c0_15 = arith.constant 0 : index
    %c0_16 = arith.constant 0 : index
    %8 = vector.load %arg13[%c0_15, %c0_16] : memref<1x32xf32, #tpu.memory_space<vmem>>, vector<1x32xf32>
    %c0_17 = arith.constant 0 : index
    %c0_18 = arith.constant 0 : index
    %9 = vector.load %arg14[%c0_17, %c0_18] : memref<8x8xf32, #tpu.memory_space<vmem>>, vector<8x8xf32>
    %c0_19 = arith.constant 0 : index
    %c0_20 = arith.constant 0 : index
    %10 = vector.load %arg15[%c0_19, %c0_20] : memref<8x32xf32, #tpu.memory_space<vmem>>, vector<8x32xf32>
    %c0_21 = arith.constant 0 : index
    %c0_22 = arith.constant 0 : index
    %11 = vector.load %arg16[%c0_21, %c0_22] : memref<128x32xf32, #tpu.memory_space<vmem>>, vector<128x32xf32>
    %c0_23 = arith.constant 0 : index
    %c0_24 = arith.constant 0 : index
    %12 = vector.load %arg17[%c0_23, %c0_24] : memref<32x4xf32, #tpu.memory_space<vmem>>, vector<32x4xf32>
    %c0_25 = arith.constant 0 : index
    %c0_26 = arith.constant 0 : index
    %13 = vector.load %arg18[%c0_25, %c0_26] : memref<8x4xf32, #tpu.memory_space<vmem>>, vector<8x4xf32>
    %c0_27 = arith.constant 0 : index
    %c0_28 = arith.constant 0 : index
    %14 = vector.load %arg19[%c0_27, %c0_28] : memref<1x4xf32, #tpu.memory_space<vmem>>, vector<1x4xf32>
    %c0_29 = arith.constant 0 : index
    %c0_30 = arith.constant 0 : index
    %15 = vector.load %arg20[%c0_29, %c0_30] : memref<1x32xf32, #tpu.memory_space<vmem>>, vector<1x32xf32>
    %c0_31 = arith.constant 0 : index
    %c0_32 = arith.constant 0 : index
    %16 = vector.load %arg21[%c0_31, %c0_32] : memref<9x9xf32, #tpu.memory_space<vmem>>, vector<9x9xf32>
    %c0_33 = arith.constant 0 : index
    %c0_34 = arith.constant 0 : index
    %17 = vector.load %arg22[%c0_33, %c0_34] : memref<88x32xf32, #tpu.memory_space<vmem>>, vector<88x32xf32>
    %c0_35 = arith.constant 0 : index
    %c0_36 = arith.constant 0 : index
    %18 = vector.load %arg23[%c0_35, %c0_36] : memref<9x32xf32, #tpu.memory_space<vmem>>, vector<9x32xf32>
    %c0_37 = arith.constant 0 : index
    %c0_38 = arith.constant 0 : index
    %19 = vector.load %arg24[%c0_37, %c0_38] : memref<32x4xf32, #tpu.memory_space<vmem>>, vector<32x4xf32>
    %c0_39 = arith.constant 0 : index
    %c0_40 = arith.constant 0 : index
    %20 = vector.load %arg25[%c0_39, %c0_40] : memref<9x4xf32, #tpu.memory_space<vmem>>, vector<9x4xf32>
    %c0_41 = arith.constant 0 : index
    %c0_42 = arith.constant 0 : index
    %21 = vector.load %arg26[%c0_41, %c0_42] : memref<1x4xf32, #tpu.memory_space<vmem>>, vector<1x4xf32>
    %c0_43 = arith.constant 0 : index
    %c0_44 = arith.constant 0 : index
    %22 = vector.load %arg27[%c0_43, %c0_44] : memref<1x32xf32, #tpu.memory_space<vmem>>, vector<1x32xf32>
    %c0_45 = arith.constant 0 : index
    %c0_46 = arith.constant 0 : index
    %23 = vector.load %arg28[%c0_45, %c0_46] : memref<4x4xf32, #tpu.memory_space<vmem>>, vector<4x4xf32>
    %c0_47 = arith.constant 0 : index
    %c0_48 = arith.constant 0 : index
    %24 = vector.load %arg29[%c0_47, %c0_48] : memref<4x32xf32, #tpu.memory_space<vmem>>, vector<4x32xf32>
    %c0_49 = arith.constant 0 : index
    %c0_50 = arith.constant 0 : index
    %25 = vector.load %arg30[%c0_49, %c0_50] : memref<32x32xf32, #tpu.memory_space<vmem>>, vector<32x32xf32>
    %c0_51 = arith.constant 0 : index
    %c0_52 = arith.constant 0 : index
    %26 = vector.load %arg31[%c0_51, %c0_52] : memref<32x4xf32, #tpu.memory_space<vmem>>, vector<32x4xf32>
    %c0_53 = arith.constant 0 : index
    %c0_54 = arith.constant 0 : index
    %27 = vector.load %arg32[%c0_53, %c0_54] : memref<4x4xf32, #tpu.memory_space<vmem>>, vector<4x4xf32>
    %c0_55 = arith.constant 0 : index
    %c0_56 = arith.constant 0 : index
    %28 = vector.load %arg33[%c0_55, %c0_56] : memref<1x4xf32, #tpu.memory_space<vmem>>, vector<1x4xf32>
    %c0_57 = arith.constant 0 : index
    %c0_58 = arith.constant 0 : index
    %29 = vector.load %arg34[%c0_57, %c0_58] : memref<1x32xf32, #tpu.memory_space<vmem>>, vector<1x32xf32>
    %c0_59 = arith.constant 0 : index
    %c0_60 = arith.constant 0 : index
    %30 = vector.load %arg35[%c0_59, %c0_60] : memref<4x4xf32, #tpu.memory_space<vmem>>, vector<4x4xf32>
    %c0_61 = arith.constant 0 : index
    %c0_62 = arith.constant 0 : index
    %31 = vector.load %arg36[%c0_61, %c0_62] : memref<4x32xf32, #tpu.memory_space<vmem>>, vector<4x32xf32>
    %c0_63 = arith.constant 0 : index
    %c0_64 = arith.constant 0 : index
    %32 = vector.load %arg37[%c0_63, %c0_64] : memref<32x32xf32, #tpu.memory_space<vmem>>, vector<32x32xf32>
    %c0_65 = arith.constant 0 : index
    %c0_66 = arith.constant 0 : index
    %33 = vector.load %arg38[%c0_65, %c0_66] : memref<32x4xf32, #tpu.memory_space<vmem>>, vector<32x4xf32>
    %c0_67 = arith.constant 0 : index
    %c0_68 = arith.constant 0 : index
    %34 = vector.load %arg39[%c0_67, %c0_68] : memref<4x4xf32, #tpu.memory_space<vmem>>, vector<4x4xf32>
    %c0_69 = arith.constant 0 : index
    %c0_70 = arith.constant 0 : index
    %35 = vector.load %arg40[%c0_69, %c0_70] : memref<1x32xf32, #tpu.memory_space<vmem>>, vector<1x32xf32>
    %c0_71 = arith.constant 0 : index
    %c0_72 = arith.constant 0 : index
    %36 = vector.load %arg41[%c0_71, %c0_72] : memref<1x32xf32, #tpu.memory_space<vmem>>, vector<1x32xf32>
    %c0_73 = arith.constant 0 : index
    %c0_74 = arith.constant 0 : index
    %37 = vector.load %arg42[%c0_73, %c0_74] : memref<1x32xf32, #tpu.memory_space<vmem>>, vector<1x32xf32>
    %c0_75 = arith.constant 0 : index
    %c0_76 = arith.constant 0 : index
    %38 = vector.load %arg43[%c0_75, %c0_76] : memref<1x32xf32, #tpu.memory_space<vmem>>, vector<1x32xf32>
    %c0_77 = arith.constant 0 : index
    %c0_78 = arith.constant 0 : index
    %39 = vector.load %arg0[%c0_77, %c0_78] : memref<16x32xf32, #tpu.memory_space<vmem>>, vector<16x32xf32>
    %c0_79 = arith.constant 0 : index
    %c0_80 = arith.constant 0 : index
    %c0_81 = arith.constant 0 : index
    %40 = vector.load %arg1[%c0_79, %c0_80, %c0_81] : memref<3x16x4xf32, #tpu.memory_space<vmem>>, vector<3x16x4xf32>
    %c0_82 = arith.constant 0 : index
    %c0_83 = arith.constant 0 : index
    %41 = vector.load %arg2[%c0_82, %c0_83] : memref<32x24xf32, #tpu.memory_space<vmem>>, vector<32x24xf32>
    %c0_84 = arith.constant 0 : index
    %c0_85 = arith.constant 0 : index
    %c0_86 = arith.constant 0 : index
    %42 = vector.load %arg3[%c0_84, %c0_85, %c0_86] : memref<3x32x1xf32, #tpu.memory_space<vmem>>, vector<3x32x1xf32>
    %c0_87 = arith.constant 0 : index
    %c0_88 = arith.constant 0 : index
    %43 = vector.load %arg4[%c0_87, %c0_88] : memref<64x16xbf16, #tpu.memory_space<vmem>>, vector<64x16xbf16>
    %44 = vector.extract_strided_slice %40 {offsets = [0, 0, 0], sizes = [1, 16, 4], strides = [1, 1, 1]} : vector<3x16x4xf32> to vector<1x16x4xf32>
    %45 = vector.shape_cast %44 : vector<1x16x4xf32> to vector<16x4xf32>
    %46 = vector.extract_strided_slice %40 {offsets = [1, 0, 0], sizes = [1, 16, 4], strides = [1, 1, 1]} : vector<3x16x4xf32> to vector<1x16x4xf32>
    %47 = vector.shape_cast %46 : vector<1x16x4xf32> to vector<16x4xf32>
    %48 = vector.extract_strided_slice %40 {offsets = [2, 0, 0], sizes = [1, 16, 4], strides = [1, 1, 1]} : vector<3x16x4xf32> to vector<1x16x4xf32>
    %49 = vector.shape_cast %48 : vector<1x16x4xf32> to vector<16x4xf32>
    %50 = tpu.concatenate %39, %45, %47, %49 in 1 : vector<16x32xf32>, vector<16x4xf32>, vector<16x4xf32>, vector<16x4xf32> -> vector<16x44xf32>
    %51 = arith.truncf %50 : vector<16x44xf32> to vector<16x44xbf16>
    %cst = arith.constant dense<0.000000e+00> : vector<64x44xf32>
    %52 = tpu.matmul %43, %51, %cst {dimension_numbers = #tpu.dot_dimension_numbers<[1], [0], [0], [1], [0, 0, 1, 1], [], []>} : vector<64x16xbf16>, vector<16x44xbf16>, vector<64x44xf32> -> vector<64x44xf32>
    %53 = vector.extract_strided_slice %52 {offsets = [0, 0], sizes = [32, 44], strides = [1, 1]} : vector<64x44xf32> to vector<32x44xf32>
    %54 = vector.extract_strided_slice %52 {offsets = [32, 0], sizes = [32, 44], strides = [1, 1]} : vector<64x44xf32> to vector<32x44xf32>
    %55 = vector.extract_strided_slice %53 {offsets = [0, 0], sizes = [32, 32], strides = [1, 1]} : vector<32x44xf32> to vector<32x32xf32>
    %56 = vector.extract_strided_slice %54 {offsets = [0, 0], sizes = [32, 32], strides = [1, 1]} : vector<32x44xf32> to vector<32x32xf32>
    %57 = tpu.concatenate %55, %41, %56 in 1 : vector<32x32xf32>, vector<32x24xf32>, vector<32x32xf32> -> vector<32x88xf32>
    %58 = vector.extract_strided_slice %53 {offsets = [0, 32], sizes = [32, 4], strides = [1, 1]} : vector<32x44xf32> to vector<32x4xf32>
    %59 = vector.extract_strided_slice %42 {offsets = [0, 0, 0], sizes = [1, 32, 1], strides = [1, 1, 1]} : vector<3x32x1xf32> to vector<1x32x1xf32>
    %60 = vector.shape_cast %59 : vector<1x32x1xf32> to vector<32x1xf32>
    %61 = vector.extract_strided_slice %54 {offsets = [0, 32], sizes = [32, 4], strides = [1, 1]} : vector<32x44xf32> to vector<32x4xf32>
    %62 = tpu.concatenate %58, %60, %61 in 1 : vector<32x4xf32>, vector<32x1xf32>, vector<32x4xf32> -> vector<32x9xf32>
    %63 = vector.extract_strided_slice %53 {offsets = [0, 36], sizes = [32, 4], strides = [1, 1]} : vector<32x44xf32> to vector<32x4xf32>
    %64 = vector.extract_strided_slice %42 {offsets = [1, 0, 0], sizes = [1, 32, 1], strides = [1, 1, 1]} : vector<3x32x1xf32> to vector<1x32x1xf32>
    %65 = vector.shape_cast %64 : vector<1x32x1xf32> to vector<32x1xf32>
    %66 = vector.extract_strided_slice %54 {offsets = [0, 36], sizes = [32, 4], strides = [1, 1]} : vector<32x44xf32> to vector<32x4xf32>
    %67 = tpu.concatenate %63, %65, %66 in 1 : vector<32x4xf32>, vector<32x1xf32>, vector<32x4xf32> -> vector<32x9xf32>
    %68 = vector.extract_strided_slice %53 {offsets = [0, 40], sizes = [32, 4], strides = [1, 1]} : vector<32x44xf32> to vector<32x4xf32>
    %69 = vector.extract_strided_slice %42 {offsets = [2, 0, 0], sizes = [1, 32, 1], strides = [1, 1, 1]} : vector<3x32x1xf32> to vector<1x32x1xf32>
    %70 = vector.shape_cast %69 : vector<1x32x1xf32> to vector<32x1xf32>
    %71 = vector.extract_strided_slice %54 {offsets = [0, 40], sizes = [32, 4], strides = [1, 1]} : vector<32x44xf32> to vector<32x4xf32>
    %72 = tpu.concatenate %68, %70, %71 in 1 : vector<32x4xf32>, vector<32x1xf32>, vector<32x4xf32> -> vector<32x9xf32>
    %73 = vector.shape_cast %62 : vector<32x9xf32> to vector<1x32x9xf32>
    %74 = vector.shape_cast %67 : vector<32x9xf32> to vector<1x32x9xf32>
    %75 = vector.shape_cast %72 : vector<32x9xf32> to vector<1x32x9xf32>
    %76 = tpu.concatenate %73, %74, %75 in 0 : vector<1x32x9xf32>, vector<1x32x9xf32>, vector<1x32x9xf32> -> vector<3x32x9xf32>
    %77 = vector.shape_cast %76 : vector<3x32x9xf32> to vector<96x9xf32>
    %cst_89 = arith.constant dense<0.000000e+00> : vector<96x9xf32>
    %78 = tpu.matmul %77, %16, %cst_89 {dimension_numbers = #tpu.dot_dimension_numbers<[1], [0], [0], [1], [0, 0, 1, 1], [], []>} : vector<96x9xf32>, vector<9x9xf32>, vector<96x9xf32> -> vector<96x9xf32>
    %79 = vector.shape_cast %78 : vector<96x9xf32> to vector<3x32x9xf32>
    %80 = arith.mulf %79, %79 : vector<3x32x9xf32>
    %cst_90 = arith.constant dense<0.000000e+00> : vector<32x9xf32>
    %81 = vector.multi_reduction <add>, %80, %cst_90 [0] : vector<3x32x9xf32> to vector<32x9xf32>
    %cst_91 = arith.constant 9.99999993E-9 : f32
    %82 = vector.broadcast %cst_91 : f32 to vector<32x9xf32>
    %83 = arith.maximumf %81, %82 : vector<32x9xf32>
    %84 = math.sqrt %83 : vector<32x9xf32>
    %cst_92 = arith.constant dense<0.000000e+00> : vector<32x32xf32>
    %85 = tpu.matmul %57, %17, %cst_92 {dimension_numbers = #tpu.dot_dimension_numbers<[1], [0], [0], [1], [0, 0, 1, 1], [], []>} : vector<32x88xf32>, vector<88x32xf32>, vector<32x32xf32> -> vector<32x32xf32>
    %cst_93 = arith.constant dense<0.000000e+00> : vector<32x32xf32>
    %86 = tpu.matmul %84, %18, %cst_93 {dimension_numbers = #tpu.dot_dimension_numbers<[1], [0], [0], [1], [0, 0, 1, 1], [], []>} : vector<32x9xf32>, vector<9x32xf32>, vector<32x32xf32> -> vector<32x32xf32>
    %87 = arith.addf %85, %86 : vector<32x32xf32>
    %88 = vector.broadcast %15 : vector<1x32xf32> to vector<32x32xf32>
    %89 = arith.addf %87, %88 : vector<32x32xf32>
    %cst_94 = arith.constant 0.000000e+00 : f32
    %90 = vector.broadcast %cst_94 : f32 to vector<32x32xf32>
    %91 = arith.maximumf %89, %90 : vector<32x32xf32>
    %cst_95 = arith.constant dense<0.000000e+00> : vector<32x4xf32>
    %92 = tpu.matmul %91, %19, %cst_95 {dimension_numbers = #tpu.dot_dimension_numbers<[1], [0], [0], [1], [0, 0, 1, 1], [], []>} : vector<32x32xf32>, vector<32x4xf32>, vector<32x4xf32> -> vector<32x4xf32>
    %93 = vector.broadcast %14 : vector<1x4xf32> to vector<32x4xf32>
    %94 = arith.addf %92, %93 : vector<32x4xf32>
    %95 = arith.negf %94 : vector<32x4xf32>
    %96 = math.exp %95 : vector<32x4xf32>
    %cst_96 = arith.constant 1.000000e+00 : f32
    %97 = vector.broadcast %cst_96 : f32 to vector<32x4xf32>
    %98 = arith.addf %97, %96 : vector<32x4xf32>
    %99 = arith.divf %97, %98 : vector<32x4xf32>
    %100 = vector.shape_cast %79 : vector<3x32x9xf32> to vector<96x9xf32>
    %cst_97 = arith.constant dense<0.000000e+00> : vector<96x4xf32>
    %101 = tpu.matmul %100, %20, %cst_97 {dimension_numbers = #tpu.dot_dimension_numbers<[1], [0], [0], [1], [0, 0, 1, 1], [], []>} : vector<96x9xf32>, vector<9x4xf32>, vector<96x4xf32> -> vector<96x4xf32>
    %102 = vector.shape_cast %101 : vector<96x4xf32> to vector<3x32x4xf32>
    %103 = vector.shape_cast %99 : vector<32x4xf32> to vector<1x32x4xf32>
    %104 = vector.broadcast %103 : vector<1x32x4xf32> to vector<3x32x4xf32>
    %105 = arith.mulf %102, %104 : vector<3x32x4xf32>
    %106 = vector.shape_cast %105 : vector<3x32x4xf32> to vector<96x4xf32>
    %cst_98 = arith.constant dense<0.000000e+00> : vector<96x4xf32>
    %107 = tpu.matmul %106, %23, %cst_98 {dimension_numbers = #tpu.dot_dimension_numbers<[1], [0], [0], [1], [0, 0, 1, 1], [], []>} : vector<96x4xf32>, vector<4x4xf32>, vector<96x4xf32> -> vector<96x4xf32>
    %108 = vector.shape_cast %107 : vector<96x4xf32> to vector<3x32x4xf32>
    %109 = arith.mulf %108, %108 : vector<3x32x4xf32>
    %cst_99 = arith.constant dense<0.000000e+00> : vector<32x4xf32>
    %110 = vector.multi_reduction <add>, %109, %cst_99 [0] : vector<3x32x4xf32> to vector<32x4xf32>
    %cst_100 = arith.constant 9.99999993E-9 : f32
    %111 = vector.broadcast %cst_100 : f32 to vector<32x4xf32>
    %112 = arith.maximumf %110, %111 : vector<32x4xf32>
    %113 = math.sqrt %112 : vector<32x4xf32>
    %cst_101 = arith.constant dense<0.000000e+00> : vector<32x32xf32>
    %114 = tpu.matmul %91, %25, %cst_101 {dimension_numbers = #tpu.dot_dimension_numbers<[1], [0], [0], [1], [0, 0, 1, 1], [], []>} : vector<32x32xf32>, vector<32x32xf32>, vector<32x32xf32> -> vector<32x32xf32>
    %cst_102 = arith.constant dense<0.000000e+00> : vector<32x32xf32>
    %115 = tpu.matmul %113, %24, %cst_102 {dimension_numbers = #tpu.dot_dimension_numbers<[1], [0], [0], [1], [0, 0, 1, 1], [], []>} : vector<32x4xf32>, vector<4x32xf32>, vector<32x32xf32> -> vector<32x32xf32>
    %116 = arith.addf %114, %115 : vector<32x32xf32>
    %117 = vector.broadcast %22 : vector<1x32xf32> to vector<32x32xf32>
    %118 = arith.addf %116, %117 : vector<32x32xf32>
    %cst_103 = arith.constant 0.000000e+00 : f32
    %119 = vector.broadcast %cst_103 : f32 to vector<32x32xf32>
    %120 = arith.maximumf %118, %119 : vector<32x32xf32>
    %cst_104 = arith.constant dense<0.000000e+00> : vector<32x4xf32>
    %121 = tpu.matmul %120, %26, %cst_104 {dimension_numbers = #tpu.dot_dimension_numbers<[1], [0], [0], [1], [0, 0, 1, 1], [], []>} : vector<32x32xf32>, vector<32x4xf32>, vector<32x4xf32> -> vector<32x4xf32>
    %122 = vector.broadcast %21 : vector<1x4xf32> to vector<32x4xf32>
    %123 = arith.addf %121, %122 : vector<32x4xf32>
    %124 = arith.negf %123 : vector<32x4xf32>
    %125 = math.exp %124 : vector<32x4xf32>
    %cst_105 = arith.constant 1.000000e+00 : f32
    %126 = vector.broadcast %cst_105 : f32 to vector<32x4xf32>
    %127 = arith.addf %126, %125 : vector<32x4xf32>
    %128 = arith.divf %126, %127 : vector<32x4xf32>
    %129 = vector.shape_cast %108 : vector<3x32x4xf32> to vector<96x4xf32>
    %cst_106 = arith.constant dense<0.000000e+00> : vector<96x4xf32>
    %130 = tpu.matmul %129, %27, %cst_106 {dimension_numbers = #tpu.dot_dimension_numbers<[1], [0], [0], [1], [0, 0, 1, 1], [], []>} : vector<96x4xf32>, vector<4x4xf32>, vector<96x4xf32> -> vector<96x4xf32>
    %131 = vector.shape_cast %130 : vector<96x4xf32> to vector<3x32x4xf32>
    %132 = vector.shape_cast %128 : vector<32x4xf32> to vector<1x32x4xf32>
    %133 = vector.broadcast %132 : vector<1x32x4xf32> to vector<3x32x4xf32>
    %134 = arith.mulf %131, %133 : vector<3x32x4xf32>
    %135 = vector.shape_cast %134 : vector<3x32x4xf32> to vector<96x4xf32>
    %cst_107 = arith.constant dense<0.000000e+00> : vector<96x4xf32>
    %136 = tpu.matmul %135, %30, %cst_107 {dimension_numbers = #tpu.dot_dimension_numbers<[1], [0], [0], [1], [0, 0, 1, 1], [], []>} : vector<96x4xf32>, vector<4x4xf32>, vector<96x4xf32> -> vector<96x4xf32>
    %137 = vector.shape_cast %136 : vector<96x4xf32> to vector<3x32x4xf32>
    %138 = arith.mulf %137, %137 : vector<3x32x4xf32>
    %cst_108 = arith.constant dense<0.000000e+00> : vector<32x4xf32>
    %139 = vector.multi_reduction <add>, %138, %cst_108 [0] : vector<3x32x4xf32> to vector<32x4xf32>
    %cst_109 = arith.constant 9.99999993E-9 : f32
    %140 = vector.broadcast %cst_109 : f32 to vector<32x4xf32>
    %141 = arith.maximumf %139, %140 : vector<32x4xf32>
    %142 = math.sqrt %141 : vector<32x4xf32>
    %cst_110 = arith.constant dense<0.000000e+00> : vector<32x32xf32>
    %143 = tpu.matmul %120, %32, %cst_110 {dimension_numbers = #tpu.dot_dimension_numbers<[1], [0], [0], [1], [0, 0, 1, 1], [], []>} : vector<32x32xf32>, vector<32x32xf32>, vector<32x32xf32> -> vector<32x32xf32>
    %cst_111 = arith.constant dense<0.000000e+00> : vector<32x32xf32>
    %144 = tpu.matmul %142, %31, %cst_111 {dimension_numbers = #tpu.dot_dimension_numbers<[1], [0], [0], [1], [0, 0, 1, 1], [], []>} : vector<32x4xf32>, vector<4x32xf32>, vector<32x32xf32> -> vector<32x32xf32>
    %145 = arith.addf %143, %144 : vector<32x32xf32>
    %146 = vector.broadcast %29 : vector<1x32xf32> to vector<32x32xf32>
    %147 = arith.addf %145, %146 : vector<32x32xf32>
    %cst_112 = arith.constant dense<0.000000e+00> : vector<32x4xf32>
    %148 = tpu.matmul %147, %33, %cst_112 {dimension_numbers = #tpu.dot_dimension_numbers<[1], [0], [0], [1], [0, 0, 1, 1], [], []>} : vector<32x32xf32>, vector<32x4xf32>, vector<32x4xf32> -> vector<32x4xf32>
    %149 = vector.broadcast %28 : vector<1x4xf32> to vector<32x4xf32>
    %150 = arith.addf %148, %149 : vector<32x4xf32>
    %151 = arith.negf %150 : vector<32x4xf32>
    %152 = math.exp %151 : vector<32x4xf32>
    %cst_113 = arith.constant 1.000000e+00 : f32
    %153 = vector.broadcast %cst_113 : f32 to vector<32x4xf32>
    %154 = arith.addf %153, %152 : vector<32x4xf32>
    %155 = arith.divf %153, %154 : vector<32x4xf32>
    %156 = vector.shape_cast %137 : vector<3x32x4xf32> to vector<96x4xf32>
    %cst_114 = arith.constant dense<0.000000e+00> : vector<96x4xf32>
    %157 = tpu.matmul %156, %34, %cst_114 {dimension_numbers = #tpu.dot_dimension_numbers<[1], [0], [0], [1], [0, 0, 1, 1], [], []>} : vector<96x4xf32>, vector<4x4xf32>, vector<96x4xf32> -> vector<96x4xf32>
    %158 = vector.shape_cast %157 : vector<96x4xf32> to vector<3x32x4xf32>
    %159 = vector.shape_cast %155 : vector<32x4xf32> to vector<1x32x4xf32>
    %160 = vector.broadcast %159 : vector<1x32x4xf32> to vector<3x32x4xf32>
    %161 = arith.mulf %158, %160 : vector<3x32x4xf32>
    %162 = vector.extract_strided_slice %161 {offsets = [0, 0, 0], sizes = [1, 32, 4], strides = [1, 1, 1]} : vector<3x32x4xf32> to vector<1x32x4xf32>
    %163 = vector.shape_cast %162 : vector<1x32x4xf32> to vector<32x4xf32>
    %164 = vector.extract_strided_slice %161 {offsets = [1, 0, 0], sizes = [1, 32, 4], strides = [1, 1, 1]} : vector<3x32x4xf32> to vector<1x32x4xf32>
    %165 = vector.shape_cast %164 : vector<1x32x4xf32> to vector<32x4xf32>
    %166 = vector.extract_strided_slice %161 {offsets = [2, 0, 0], sizes = [1, 32, 4], strides = [1, 1, 1]} : vector<3x32x4xf32> to vector<1x32x4xf32>
    %167 = vector.shape_cast %166 : vector<1x32x4xf32> to vector<32x4xf32>
    %168 = tpu.concatenate %147, %163, %165, %167 in 1 : vector<32x32xf32>, vector<32x4xf32>, vector<32x4xf32>, vector<32x4xf32> -> vector<32x44xf32>
    %169 = arith.truncf %168 : vector<32x44xf32> to vector<32x44xbf16>
    %170 = vector.extract_strided_slice %43 {offsets = [32, 0], sizes = [32, 16], strides = [1, 1]} : vector<64x16xbf16> to vector<32x16xbf16>
    %cst_115 = arith.constant dense<0.000000e+00> : vector<16x44xf32>
    %171 = tpu.matmul %170, %169, %cst_115 {dimension_numbers = #tpu.dot_dimension_numbers<[0], [0], [1], [1], [0, 1, 1, 1], [], []>} : vector<32x16xbf16>, vector<32x44xbf16>, vector<16x44xf32> -> vector<16x44xf32>
    %172 = vector.extract_strided_slice %171 {offsets = [0, 0], sizes = [16, 32], strides = [1, 1]} : vector<16x44xf32> to vector<16x32xf32>
    %173 = vector.extract_strided_slice %171 {offsets = [0, 32], sizes = [16, 4], strides = [1, 1]} : vector<16x44xf32> to vector<16x4xf32>
    %174 = vector.extract_strided_slice %171 {offsets = [0, 36], sizes = [16, 4], strides = [1, 1]} : vector<16x44xf32> to vector<16x4xf32>
    %175 = vector.extract_strided_slice %171 {offsets = [0, 40], sizes = [16, 4], strides = [1, 1]} : vector<16x44xf32> to vector<16x4xf32>
    %176 = vector.shape_cast %173 : vector<16x4xf32> to vector<1x16x4xf32>
    %177 = vector.shape_cast %174 : vector<16x4xf32> to vector<1x16x4xf32>
    %178 = vector.shape_cast %175 : vector<16x4xf32> to vector<1x16x4xf32>
    %179 = tpu.concatenate %176, %177, %178 in 0 : vector<1x16x4xf32>, vector<1x16x4xf32>, vector<1x16x4xf32> -> vector<3x16x4xf32>
    %180 = arith.addf %39, %172 : vector<16x32xf32>
    %cst_116 = arith.constant dense<0.000000e+00> : vector<16xf32>
    %181 = vector.multi_reduction <add>, %180, %cst_116 [1] : vector<16x32xf32> to vector<16xf32>
    %182 = vector.shape_cast %181 : vector<16xf32> to vector<16x1xf32>
    %cst_117 = arith.constant 3.200000e+01 : f32
    %183 = vector.broadcast %cst_117 : f32 to vector<16x1xf32>
    %184 = arith.divf %182, %183 : vector<16x1xf32>
    %185 = vector.broadcast %184 : vector<16x1xf32> to vector<16x32xf32>
    %186 = arith.subf %180, %185 : vector<16x32xf32>
    %187 = arith.mulf %186, %186 : vector<16x32xf32>
    %cst_118 = arith.constant dense<0.000000e+00> : vector<16xf32>
    %188 = vector.multi_reduction <add>, %187, %cst_118 [1] : vector<16x32xf32> to vector<16xf32>
    %189 = vector.shape_cast %188 : vector<16xf32> to vector<16x1xf32>
    %cst_119 = arith.constant 3.200000e+01 : f32
    %190 = vector.broadcast %cst_119 : f32 to vector<16x1xf32>
    %191 = arith.divf %189, %190 : vector<16x1xf32>
    %192 = vector.broadcast %184 : vector<16x1xf32> to vector<16x32xf32>
    %193 = arith.subf %180, %192 : vector<16x32xf32>
    %cst_120 = arith.constant 9.99999974E-6 : f32
    %194 = vector.broadcast %cst_120 : f32 to vector<16x1xf32>
    %195 = arith.addf %191, %194 : vector<16x1xf32>
    %196 = math.rsqrt %195 : vector<16x1xf32>
    %197 = vector.broadcast %196 : vector<16x1xf32> to vector<16x32xf32>
    %198 = arith.mulf %193, %197 : vector<16x32xf32>
    %199 = vector.broadcast %36 : vector<1x32xf32> to vector<16x32xf32>
    %200 = arith.mulf %198, %199 : vector<16x32xf32>
    %201 = vector.broadcast %35 : vector<1x32xf32> to vector<16x32xf32>
    %202 = arith.addf %200, %201 : vector<16x32xf32>
    %203 = arith.addf %40, %179 : vector<3x16x4xf32>
    %204 = arith.mulf %203, %203 : vector<3x16x4xf32>
    %cst_121 = arith.constant dense<0.000000e+00> : vector<16x4xf32>
    %205 = vector.multi_reduction <add>, %204, %cst_121 [0] : vector<3x16x4xf32> to vector<16x4xf32>
    %cst_122 = arith.constant 9.99999993E-9 : f32
    %206 = vector.broadcast %cst_122 : f32 to vector<16x4xf32>
    %207 = arith.maximumf %205, %206 : vector<16x4xf32>
    %cst_123 = arith.constant dense<0.000000e+00> : vector<16xf32>
    %208 = vector.multi_reduction <add>, %207, %cst_123 [1] : vector<16x4xf32> to vector<16xf32>
    %209 = vector.shape_cast %208 : vector<16xf32> to vector<16x1xf32>
    %cst_124 = arith.constant 4.000000e+00 : f32
    %210 = vector.broadcast %cst_124 : f32 to vector<16x1xf32>
    %211 = arith.divf %209, %210 : vector<16x1xf32>
    %212 = math.rsqrt %211 : vector<16x1xf32>
    %213 = vector.shape_cast %212 : vector<16x1xf32> to vector<1x16x1xf32>
    %214 = vector.broadcast %213 : vector<1x16x1xf32> to vector<3x16x4xf32>
    %215 = arith.mulf %203, %214 : vector<3x16x4xf32>
    %216 = vector.shape_cast %215 : vector<3x16x4xf32> to vector<48x4xf32>
    %cst_125 = arith.constant dense<0.000000e+00> : vector<48x8xf32>
    %217 = tpu.matmul %216, %2, %cst_125 {dimension_numbers = #tpu.dot_dimension_numbers<[1], [0], [0], [1], [0, 0, 1, 1], [], []>} : vector<48x4xf32>, vector<4x8xf32>, vector<48x8xf32> -> vector<48x8xf32>
    %218 = vector.shape_cast %217 : vector<48x8xf32> to vector<3x16x8xf32>
    %219 = arith.mulf %218, %218 : vector<3x16x8xf32>
    %cst_126 = arith.constant dense<0.000000e+00> : vector<16x8xf32>
    %220 = vector.multi_reduction <add>, %219, %cst_126 [0] : vector<3x16x8xf32> to vector<16x8xf32>
    %cst_127 = arith.constant 9.99999993E-9 : f32
    %221 = vector.broadcast %cst_127 : f32 to vector<16x8xf32>
    %222 = arith.maximumf %220, %221 : vector<16x8xf32>
    %223 = math.sqrt %222 : vector<16x8xf32>
    %cst_128 = arith.constant dense<0.000000e+00> : vector<16x128xf32>
    %224 = tpu.matmul %202, %4, %cst_128 {dimension_numbers = #tpu.dot_dimension_numbers<[1], [0], [0], [1], [0, 0, 1, 1], [], []>} : vector<16x32xf32>, vector<32x128xf32>, vector<16x128xf32> -> vector<16x128xf32>
    %cst_129 = arith.constant dense<0.000000e+00> : vector<16x128xf32>
    %225 = tpu.matmul %223, %3, %cst_129 {dimension_numbers = #tpu.dot_dimension_numbers<[1], [0], [0], [1], [0, 0, 1, 1], [], []>} : vector<16x8xf32>, vector<8x128xf32>, vector<16x128xf32> -> vector<16x128xf32>
    %226 = arith.addf %224, %225 : vector<16x128xf32>
    %227 = vector.broadcast %1 : vector<1x128xf32> to vector<16x128xf32>
    %228 = arith.addf %226, %227 : vector<16x128xf32>
    %cst_130 = arith.constant 0.000000e+00 : f32
    %229 = vector.broadcast %cst_130 : f32 to vector<16x128xf32>
    %230 = arith.maximumf %228, %229 : vector<16x128xf32>
    %cst_131 = arith.constant dense<0.000000e+00> : vector<16x8xf32>
    %231 = tpu.matmul %230, %5, %cst_131 {dimension_numbers = #tpu.dot_dimension_numbers<[1], [0], [0], [1], [0, 0, 1, 1], [], []>} : vector<16x128xf32>, vector<128x8xf32>, vector<16x8xf32> -> vector<16x8xf32>
    %232 = vector.broadcast %0 : vector<1x8xf32> to vector<16x8xf32>
    %233 = arith.addf %231, %232 : vector<16x8xf32>
    %234 = arith.negf %233 : vector<16x8xf32>
    %235 = math.exp %234 : vector<16x8xf32>
    %cst_132 = arith.constant 1.000000e+00 : f32
    %236 = vector.broadcast %cst_132 : f32 to vector<16x8xf32>
    %237 = arith.addf %236, %235 : vector<16x8xf32>
    %238 = arith.divf %236, %237 : vector<16x8xf32>
    %239 = vector.shape_cast %218 : vector<3x16x8xf32> to vector<48x8xf32>
    %cst_133 = arith.constant dense<0.000000e+00> : vector<48x8xf32>
    %240 = tpu.matmul %239, %6, %cst_133 {dimension_numbers = #tpu.dot_dimension_numbers<[1], [0], [0], [1], [0, 0, 1, 1], [], []>} : vector<48x8xf32>, vector<8x8xf32>, vector<48x8xf32> -> vector<48x8xf32>
    %241 = vector.shape_cast %240 : vector<48x8xf32> to vector<3x16x8xf32>
    %242 = vector.shape_cast %238 : vector<16x8xf32> to vector<1x16x8xf32>
    %243 = vector.broadcast %242 : vector<1x16x8xf32> to vector<3x16x8xf32>
    %244 = arith.mulf %241, %243 : vector<3x16x8xf32>
    %245 = vector.shape_cast %244 : vector<3x16x8xf32> to vector<48x8xf32>
    %cst_134 = arith.constant dense<0.000000e+00> : vector<48x8xf32>
    %246 = tpu.matmul %245, %9, %cst_134 {dimension_numbers = #tpu.dot_dimension_numbers<[1], [0], [0], [1], [0, 0, 1, 1], [], []>} : vector<48x8xf32>, vector<8x8xf32>, vector<48x8xf32> -> vector<48x8xf32>
    %247 = vector.shape_cast %246 : vector<48x8xf32> to vector<3x16x8xf32>
    %248 = arith.mulf %247, %247 : vector<3x16x8xf32>
    %cst_135 = arith.constant dense<0.000000e+00> : vector<16x8xf32>
    %249 = vector.multi_reduction <add>, %248, %cst_135 [0] : vector<3x16x8xf32> to vector<16x8xf32>
    %cst_136 = arith.constant 9.99999993E-9 : f32
    %250 = vector.broadcast %cst_136 : f32 to vector<16x8xf32>
    %251 = arith.maximumf %249, %250 : vector<16x8xf32>
    %252 = math.sqrt %251 : vector<16x8xf32>
    %cst_137 = arith.constant dense<0.000000e+00> : vector<16x32xf32>
    %253 = tpu.matmul %230, %11, %cst_137 {dimension_numbers = #tpu.dot_dimension_numbers<[1], [0], [0], [1], [0, 0, 1, 1], [], []>} : vector<16x128xf32>, vector<128x32xf32>, vector<16x32xf32> -> vector<16x32xf32>
    %cst_138 = arith.constant dense<0.000000e+00> : vector<16x32xf32>
    %254 = tpu.matmul %252, %10, %cst_138 {dimension_numbers = #tpu.dot_dimension_numbers<[1], [0], [0], [1], [0, 0, 1, 1], [], []>} : vector<16x8xf32>, vector<8x32xf32>, vector<16x32xf32> -> vector<16x32xf32>
    %255 = arith.addf %253, %254 : vector<16x32xf32>
    %256 = vector.broadcast %8 : vector<1x32xf32> to vector<16x32xf32>
    %257 = arith.addf %255, %256 : vector<16x32xf32>
    %cst_139 = arith.constant dense<0.000000e+00> : vector<16x4xf32>
    %258 = tpu.matmul %257, %12, %cst_139 {dimension_numbers = #tpu.dot_dimension_numbers<[1], [0], [0], [1], [0, 0, 1, 1], [], []>} : vector<16x32xf32>, vector<32x4xf32>, vector<16x4xf32> -> vector<16x4xf32>
    %259 = vector.broadcast %7 : vector<1x4xf32> to vector<16x4xf32>
    %260 = arith.addf %258, %259 : vector<16x4xf32>
    %261 = arith.negf %260 : vector<16x4xf32>
    %262 = math.exp %261 : vector<16x4xf32>
    %cst_140 = arith.constant 1.000000e+00 : f32
    %263 = vector.broadcast %cst_140 : f32 to vector<16x4xf32>
    %264 = arith.addf %263, %262 : vector<16x4xf32>
    %265 = arith.divf %263, %264 : vector<16x4xf32>
    %266 = vector.shape_cast %247 : vector<3x16x8xf32> to vector<48x8xf32>
    %cst_141 = arith.constant dense<0.000000e+00> : vector<48x4xf32>
    %267 = tpu.matmul %266, %13, %cst_141 {dimension_numbers = #tpu.dot_dimension_numbers<[1], [0], [0], [1], [0, 0, 1, 1], [], []>} : vector<48x8xf32>, vector<8x4xf32>, vector<48x4xf32> -> vector<48x4xf32>
    %268 = vector.shape_cast %267 : vector<48x4xf32> to vector<3x16x4xf32>
    %269 = vector.shape_cast %265 : vector<16x4xf32> to vector<1x16x4xf32>
    %270 = vector.broadcast %269 : vector<1x16x4xf32> to vector<3x16x4xf32>
    %271 = arith.mulf %268, %270 : vector<3x16x4xf32>
    %272 = arith.addf %202, %257 : vector<16x32xf32>
    %cst_142 = arith.constant dense<0.000000e+00> : vector<16xf32>
    %273 = vector.multi_reduction <add>, %272, %cst_142 [1] : vector<16x32xf32> to vector<16xf32>
    %274 = vector.shape_cast %273 : vector<16xf32> to vector<16x1xf32>
    %cst_143 = arith.constant 3.200000e+01 : f32
    %275 = vector.broadcast %cst_143 : f32 to vector<16x1xf32>
    %276 = arith.divf %274, %275 : vector<16x1xf32>
    %277 = vector.broadcast %276 : vector<16x1xf32> to vector<16x32xf32>
    %278 = arith.subf %272, %277 : vector<16x32xf32>
    %279 = arith.mulf %278, %278 : vector<16x32xf32>
    %cst_144 = arith.constant dense<0.000000e+00> : vector<16xf32>
    %280 = vector.multi_reduction <add>, %279, %cst_144 [1] : vector<16x32xf32> to vector<16xf32>
    %281 = vector.shape_cast %280 : vector<16xf32> to vector<16x1xf32>
    %cst_145 = arith.constant 3.200000e+01 : f32
    %282 = vector.broadcast %cst_145 : f32 to vector<16x1xf32>
    %283 = arith.divf %281, %282 : vector<16x1xf32>
    %284 = vector.broadcast %276 : vector<16x1xf32> to vector<16x32xf32>
    %285 = arith.subf %272, %284 : vector<16x32xf32>
    %cst_146 = arith.constant 9.99999974E-6 : f32
    %286 = vector.broadcast %cst_146 : f32 to vector<16x1xf32>
    %287 = arith.addf %283, %286 : vector<16x1xf32>
    %288 = math.rsqrt %287 : vector<16x1xf32>
    %289 = vector.broadcast %288 : vector<16x1xf32> to vector<16x32xf32>
    %290 = arith.mulf %285, %289 : vector<16x32xf32>
    %291 = vector.broadcast %38 : vector<1x32xf32> to vector<16x32xf32>
    %292 = arith.mulf %290, %291 : vector<16x32xf32>
    %293 = vector.broadcast %37 : vector<1x32xf32> to vector<16x32xf32>
    %294 = arith.addf %292, %293 : vector<16x32xf32>
    %c0_147 = arith.constant 0 : index
    %c0_148 = arith.constant 0 : index
    %295 = vector.load %arg44[%c0_147, %c0_148] : memref<16x32xf32, #tpu.memory_space<vmem>>, vector<16x32xf32>
    tpu.vector_store %arg44[%c0_147, %c0_148], %294 {strides = array<i32>} : memref<16x32xf32, #tpu.memory_space<vmem>>, vector<16x32xf32>,
    %296 = arith.addf %215, %271 : vector<3x16x4xf32>
    %297 = arith.mulf %296, %296 : vector<3x16x4xf32>
    %cst_149 = arith.constant dense<0.000000e+00> : vector<16x4xf32>
    %298 = vector.multi_reduction <add>, %297, %cst_149 [0] : vector<3x16x4xf32> to vector<16x4xf32>
    %cst_150 = arith.constant 9.99999993E-9 : f32
    %299 = vector.broadcast %cst_150 : f32 to vector<16x4xf32>
    %300 = arith.maximumf %298, %299 : vector<16x4xf32>
    %cst_151 = arith.constant dense<0.000000e+00> : vector<16xf32>
    %301 = vector.multi_reduction <add>, %300, %cst_151 [1] : vector<16x4xf32> to vector<16xf32>
    %302 = vector.shape_cast %301 : vector<16xf32> to vector<16x1xf32>
    %cst_152 = arith.constant 4.000000e+00 : f32
    %303 = vector.broadcast %cst_152 : f32 to vector<16x1xf32>
    %304 = arith.divf %302, %303 : vector<16x1xf32>
    %305 = math.rsqrt %304 : vector<16x1xf32>
    %306 = vector.shape_cast %305 : vector<16x1xf32> to vector<1x16x1xf32>
    %307 = vector.broadcast %306 : vector<1x16x1xf32> to vector<3x16x4xf32>
    %308 = arith.mulf %296, %307 : vector<3x16x4xf32>
    %c0_153 = arith.constant 0 : index
    %c0_154 = arith.constant 0 : index
    %c0_155 = arith.constant 0 : index
    %309 = vector.load %arg45[%c0_153, %c0_154, %c0_155] : memref<3x16x4xf32, #tpu.memory_space<vmem>>, vector<3x16x4xf32>
    tpu.vector_store %arg45[%c0_153, %c0_154, %c0_155], %308 {strides = array<i32>} : memref<3x16x4xf32, #tpu.memory_space<vmem>>, vector<3x16x4xf32>,
    return
  }
}

module attributes {stable_mosaic.version = 11 : i64} {
  func.func @pred_kernel(%arg0: i32, %arg1: memref<16x32xf32, #tpu.memory_space<vmem>>, %arg2: memref<32x32xf32, #tpu.memory_space<vmem>>, %arg3: memref<1x32xf32, #tpu.memory_space<vmem>>, %arg4: memref<32x4xf32, #tpu.memory_space<vmem>>, %arg5: memref<1x4xf32, #tpu.memory_space<vmem>>, %arg6: memref<16x4xf32, #tpu.memory_space<vmem>>) attributes {dimension_semantics = [#tpu.dimension_semantics<parallel>], iteration_bounds = array<i64: 1>, scalar_prefetch = 0 : i64, scratch_operands = 0 : i64, tpu.core_type = #tpu.core_type<tc>, window_params = [{transform_indices = @transform_0, window_bounds = array<i64: 16, 32>}, {pipeline_mode = #tpu.pipeline_mode<synchronous>, transform_indices = @transform_1, window_bounds = array<i64: 32, 32>}, {pipeline_mode = #tpu.pipeline_mode<synchronous>, transform_indices = @transform_2, window_bounds = array<i64: 1, 32>}, {pipeline_mode = #tpu.pipeline_mode<synchronous>, transform_indices = @transform_3, window_bounds = array<i64: 32, 4>}, {pipeline_mode = #tpu.pipeline_mode<synchronous>, transform_indices = @transform_4, window_bounds = array<i64: 1, 4>}, {transform_indices = @transform_5, window_bounds = array<i64: 16, 4>}]} {
    %c0 = arith.constant 0 : index
    %c0_0 = arith.constant 0 : index
    %0 = vector.load %arg1[%c0, %c0_0] : memref<16x32xf32, #tpu.memory_space<vmem>>, vector<16x32xf32>
    %c0_1 = arith.constant 0 : index
    %c0_2 = arith.constant 0 : index
    %1 = vector.load %arg2[%c0_1, %c0_2] : memref<32x32xf32, #tpu.memory_space<vmem>>, vector<32x32xf32>
    %cst = arith.constant dense<0.000000e+00> : vector<16x32xf32>
    %2 = tpu.matmul %0, %1, %cst {dimension_numbers = #tpu.dot_dimension_numbers<[1], [0], [0], [1], [0, 0, 1, 1], [], []>} : vector<16x32xf32>, vector<32x32xf32>, vector<16x32xf32> -> vector<16x32xf32>
    %c0_3 = arith.constant 0 : index
    %c0_4 = arith.constant 0 : index
    %3 = vector.load %arg3[%c0_3, %c0_4] : memref<1x32xf32, #tpu.memory_space<vmem>>, vector<1x32xf32>
    %4 = vector.broadcast %3 : vector<1x32xf32> to vector<16x32xf32>
    %5 = arith.addf %2, %4 : vector<16x32xf32>
    %cst_5 = arith.constant 0.000000e+00 : f32
    %6 = vector.broadcast %cst_5 : f32 to vector<16x32xf32>
    %7 = arith.maximumf %5, %6 : vector<16x32xf32>
    %c0_6 = arith.constant 0 : index
    %c0_7 = arith.constant 0 : index
    %8 = vector.load %arg4[%c0_6, %c0_7] : memref<32x4xf32, #tpu.memory_space<vmem>>, vector<32x4xf32>
    %cst_8 = arith.constant dense<0.000000e+00> : vector<16x4xf32>
    %9 = tpu.matmul %7, %8, %cst_8 {dimension_numbers = #tpu.dot_dimension_numbers<[1], [0], [0], [1], [0, 0, 1, 1], [], []>} : vector<16x32xf32>, vector<32x4xf32>, vector<16x4xf32> -> vector<16x4xf32>
    %c0_9 = arith.constant 0 : index
    %c0_10 = arith.constant 0 : index
    %10 = vector.load %arg5[%c0_9, %c0_10] : memref<1x4xf32, #tpu.memory_space<vmem>>, vector<1x4xf32>
    %11 = vector.broadcast %10 : vector<1x4xf32> to vector<16x4xf32>
    %12 = arith.addf %9, %11 : vector<16x4xf32>
    %cst_11 = arith.constant dense<0xFF800000> : vector<16xf32>
    %13 = vector.multi_reduction <maximumf>, %12, %cst_11 [1] : vector<16x4xf32> to vector<16xf32>
    %14 = vector.shape_cast %13 : vector<16xf32> to vector<16x1xf32>
    %15 = vector.broadcast %14 : vector<16x1xf32> to vector<16x4xf32>
    %16 = arith.subf %12, %15 : vector<16x4xf32>
    %17 = math.exp %16 : vector<16x4xf32>
    %cst_12 = arith.constant dense<0.000000e+00> : vector<16xf32>
    %18 = vector.multi_reduction <add>, %17, %cst_12 [1] : vector<16x4xf32> to vector<16xf32>
    %19 = vector.shape_cast %18 : vector<16xf32> to vector<16x1xf32>
    %20 = vector.broadcast %19 : vector<16x1xf32> to vector<16x4xf32>
    %21 = arith.divf %17, %20 : vector<16x4xf32>
    %c0_13 = arith.constant 0 : index
    %c0_14 = arith.constant 0 : index
    %22 = vector.load %arg6[%c0_13, %c0_14] : memref<16x4xf32, #tpu.memory_space<vmem>>, vector<16x4xf32>
    tpu.vector_store %arg6[%c0_13, %c0_14], %21 {strides = array<i32>} : memref<16x4xf32, #tpu.memory_space<vmem>>, vector<16x4xf32>,
    return
  }
  func.func @transform_0(%arg0: i32) -> (i32, i32) {
    %c0_i32 = arith.constant 0 : i32
    %c0_i32_0 = arith.constant 0 : i32
    return %arg0, %c0_i32 : i32, i32
  }
  func.func @transform_1(%arg0: i32) -> (i32, i32) {
    %c0_i32 = arith.constant 0 : i32
    %c0_i32_0 = arith.constant 0 : i32
    %c0_i32_1 = arith.constant 0 : i32
    return %c0_i32, %c0_i32_0 : i32, i32
  }
  func.func @transform_2(%arg0: i32) -> (i32, i32) {
    %c0_i32 = arith.constant 0 : i32
    %c0_i32_0 = arith.constant 0 : i32
    %c0_i32_1 = arith.constant 0 : i32
    return %c0_i32, %c0_i32_0 : i32, i32
  }
  func.func @transform_3(%arg0: i32) -> (i32, i32) {
    %c0_i32 = arith.constant 0 : i32
    %c0_i32_0 = arith.constant 0 : i32
    %c0_i32_1 = arith.constant 0 : i32
    return %c0_i32, %c0_i32_0 : i32, i32
  }
  func.func @transform_4(%arg0: i32) -> (i32, i32) {
    %c0_i32 = arith.constant 0 : i32
    %c0_i32_0 = arith.constant 0 : i32
    %c0_i32_1 = arith.constant 0 : i32
    return %c0_i32, %c0_i32_0 : i32, i32
  }
  func.func @transform_5(%arg0: i32) -> (i32, i32) {
    %c0_i32 = arith.constant 0 : i32
    %c0_i32_0 = arith.constant 0 : i32
    return %arg0, %c0_i32 : i32, i32
  }
}

</mosaic_0001>

<bundles_post_ra>
// kernel: _lambda_.7
= control target key start
LH: loop header
LB: loop body
LE: loop exit
PB: predicated region body
PF: predicated region fallthrough
CT: control target
= control target key end

     0   :  { %10 = vsyncpa [#allocation3], 0  ;;  %s669_s0 = inlined_call_operand.hbm [shape: f32[16,32], index: 0, kind: input, shape index: {}]   ;;  %s670_s1 = inlined_call_operand.hbm [shape: f32[32,32], index: 1, kind: input, shape index: {}]   ;;  %s671_s2 = inlined_call_operand.hbm [shape: f32[1,32], index: 2, kind: input, shape index: {}]   ;;  %s672_s3 = inlined_call_operand.hbm [shape: f32[32,4], index: 3, kind: input, shape index: {}]   ;;  %s673_s4 = inlined_call_operand.hbm [shape: f32[1,4], index: 4, kind: input, shape index: {}]   ;;  %s674_s5 = inlined_call_operand.hbm [shape: f32[16,4], index: 5, kind: output, shape index: {}]  }
   0x1   :  { %11 = vsyncpa [#allocation6], 0 }
   0x2   :  { %12 = vsyncpa [#allocation9], 0 }
   0x3   :  { %13 = vsyncpa [#allocation4], 0  ;;  %s530_s18 = smov [#allocation5]   ;;  %s531_s20 = smov [#allocation8]  }
   0x4   :  { %s31_s19 = sshll.u32 %s530_s18, 4  ;;  %s53_s21 = sshll.u32 %s531_s20, 4  ;;  %s32_s19 = int_to_ptr.vmem [resolvable:$true] %s31_s19  ;;  %s568_s21 = int_to_ptr.vmem [resolvable:$true] %s53_s21 }
   0x5   :  { %s390_s24 = scalar_lea.hbm %s670_s1, 512 }
   0x6   :  { %p391_p0 = scmp.ne.s32.totalorder %s670_s1, %s390_s24  ;;  %p394_p1 = scmp.lt.u32.totalorder %s390_s24, %s670_s1 }
   0x8   :  { %p396_p2 = pnand %p394_p1, %p391_p0 }
   0xa   :  { %399 = shalt.err (!%p396_p2)
}
   0xb   :  { %s400_s29 = scalar_lea.vmem %s32_s19, 512  ;;  %p405_p4 = scmp.lt.s32.totalorder %s32_s19, %s32_s19 }
   0xc   :  { %p401_p3 = scmp.ne.s32.totalorder %s32_s19, %s400_s29  ;;  %p406_p5 = scmp.lt.s32.totalorder %s400_s29, %s400_s29 }
   0xe   :  { %p407_p6 = por %p406_p5, %p405_p4 }
  0x10   :  { %p408_p7 = pnand %p407_p6, %p401_p3 }
  0x12   :  { %411 = shalt.err (!%p408_p7)
}
  0x13   :  { %s532_s30 = smov 128   ;;  %s533_s6 = smov 8  }
  0x14   :  { %37 = dma.hbm_to_vmem [thread:$0]  %s670_s1, 512, %s32_s19, [#allocation6], %s532_s30, %s532_s30, %s533_s6  }
  0x15   :  { %s412_s11 = scalar_lea.hbm %s672_s3, 512 }
  0x16   :  { %p413_p8 = scmp.ne.s32.totalorder %s672_s3, %s412_s11  ;;  %p416_p9 = scmp.lt.u32.totalorder %s412_s11, %s672_s3 }
  0x18   :  { %p418_p10 = pnand %p416_p9, %p413_p8 }
  0x1a   :  { %421 = shalt.err (!%p418_p10)
}
  0x1b   :  { %s422_s16 = scalar_lea.vmem %s568_s21, 512  ;;  %p427_p12 = scmp.lt.s32.totalorder %s568_s21, %s568_s21 }
  0x1c   :  { %p423_p11 = scmp.ne.s32.totalorder %s568_s21, %s422_s16  ;;  %p428_p13 = scmp.lt.s32.totalorder %s422_s16, %s422_s16 }
  0x1e   :  { %p429_p0 = por %p428_p13, %p427_p12 }
  0x20   :  { %p430_p1 = pnand %p429_p0, %p423_p11 }
  0x22   :  { %433 = shalt.err (!%p430_p1)
}
  0x23   :  { %59 = dma.hbm_to_vmem [thread:$0]  %s672_s3, 512, %s568_s21, [#allocation9], %s532_s30, %s532_s30, %s533_s6  }
  0x24   :  { %s534_s18 = smov [#allocation2]   ;;  %s535_s20 = smov [#allocation7]  }
  0x25   :  { %s19_s19 = sshll.u32 %s534_s18, 4  ;;  %s44_s22 = sshll.u32 %s535_s20, 4  ;;  %s20_s19 = int_to_ptr.vmem [resolvable:$true] %s19_s19  ;;  %s45_s22 = int_to_ptr.vmem [resolvable:$true] %s44_s22 }
  0x26   :  { %s434_s25 = scalar_lea.hbm %s669_s0, 256 }
  0x27   :  { %p435_p2 = scmp.ne.s32.totalorder %s669_s0, %s434_s25  ;;  %p438_p3 = scmp.lt.u32.totalorder %s434_s25, %s669_s0 }
  0x29   :  { %p440_p4 = pnand %p438_p3, %p435_p2 }
  0x2b   :  { %443 = shalt.err (!%p440_p4)
}
  0x2c   :  { %s444_s3 = scalar_lea.vmem %s20_s19, 256  ;;  %p449_p6 = scmp.lt.s32.totalorder %s20_s19, %s20_s19 }
  0x2d   :  { %p445_p5 = scmp.ne.s32.totalorder %s20_s19, %s444_s3  ;;  %p450_p7 = scmp.lt.s32.totalorder %s444_s3, %s444_s3 }
  0x2f   :  { %p451_p8 = por %p450_p7, %p449_p6 }
  0x31   :  { %p452_p9 = pnand %p451_p8, %p445_p5 }
  0x33   :  { %455 = shalt.err (!%p452_p9)
}
  0x34   :  { %25 = dma.hbm_to_vmem [thread:$0]  %s669_s0, 256, %s20_s19, [#allocation3], %s532_s30, %s532_s30, %s533_s6  }
  0x35   :  { %s456_s10 = scalar_lea.hbm %s671_s2, 16 }
  0x36   :  { %p457_p10 = scmp.ne.s32.totalorder %s671_s2, %s456_s10  ;;  %p460_p11 = scmp.lt.u32.totalorder %s456_s10, %s671_s2 }
  0x38   :  { %p462_p12 = pnand %p460_p11, %p457_p10 }
  0x3a   :  { %465 = shalt.err (!%p462_p12)
}
  0x3b   :  { %s466_s15 = scalar_lea.vmem %s45_s22, 16  ;;  %s470_s16 = scalar_lea.vmem %s45_s22, 32 }
  0x3c   :  { %p467_p13 = scmp.ne.s32.totalorder %s45_s22, %s466_s15  ;;  %p471_p0 = scmp.lt.s32.totalorder %s45_s22, %s45_s22 }
  0x3d   :  { %p472_p1 = scmp.lt.s32.totalorder %s470_s16, %s466_s15 }
  0x3f   :  { %p473_p2 = por %p472_p1, %p471_p0 }
  0x41   :  { %p474_p3 = pnand %p473_p2, %p467_p13 }
  0x43   :  { %477 = shalt.err (!%p474_p3)
}
  0x44   :  { %47 = dma.hbm_to_vmem [thread:$0]  %s671_s2, 16, %s45_s22, [#allocation6]  }
  0x45   :  { %s536_s17 = smov [#allocation10]   ;;  %s478_s23 = scalar_lea.hbm %s673_s4, 16 }
  0x46   :  { %s66_s18 = sshll.u32 %s536_s17, 4  ;;  %p479_p4 = scmp.ne.s32.totalorder %s673_s4, %s478_s23  ;;  %s67_s18 = int_to_ptr.vmem [resolvable:$true] %s66_s18 }
  0x47   :  { %p482_p5 = scmp.lt.u32.totalorder %s478_s23, %s673_s4 }
  0x49   :  { %p484_p6 = pnand %p482_p5, %p479_p4 }
  0x4b   :  { %487 = shalt.err (!%p484_p6)
}
  0x4c   :  { %s488_s28 = scalar_lea.vmem %s67_s18, 16  ;;  %s492_s2 = scalar_lea.vmem %s67_s18, 32 }
  0x4d   :  { %p489_p7 = scmp.ne.s32.totalorder %s67_s18, %s488_s28  ;;  %p493_p8 = scmp.lt.s32.totalorder %s67_s18, %s67_s18 }
  0x4e   :  { %p494_p9 = scmp.lt.s32.totalorder %s492_s2, %s488_s28 }
  0x50   :  { %p495_p10 = por %p494_p9, %p493_p8 }
  0x52   :  { %p496_p11 = pnand %p495_p10, %p489_p7 }
  0x54   :  { %499 = shalt.err (!%p496_p11)
}
  0x55   :  { %69 = dma.hbm_to_vmem [thread:$0]  %s673_s4, 16, %s67_s18, [#allocation9]  }
  0x56   :  { %522 = dma.done.wait [#allocation3], 256  }
  0x57   :  { %523 = vsyncadd [#allocation3], 4294967040 }
  0x58   :  { %524 = dma.done.wait [#allocation6], 528  }
  0x59   :  { %525 = vsyncadd [#allocation6], 4294966768 }
  0x5a   :  { %526 = dma.done.wait [#allocation9], 528  }
  0x5b   :  { %527 = vsyncadd [#allocation9], 4294966768  ;;  %vm98_vm0 = vcmask 261120   ;;  %v87_v0 = vld [vmem:[#allocation5] sm:$0xff]  ;;  %v88_v1 = vld [vmem:[#allocation5 + $0x8] sm:$0xff]  ;;  %vm274_vm1 = vcmask 31744  }
  0x5c   :  { %v89_v2 = vld [vmem:[#allocation5 + $0x10] sm:$0xff]  ;;  %v358_v3 = vpack.c.bf16 %v88_v1, %v87_v0  ;;  %v90_v4 = vld [vmem:[#allocation5 + $0x18] sm:$0xff]  ;;  %v182_v7 = vld [vmem:[#allocation8] sm:$0xff]  ;;  %s537_s4 = smov [#allocation11]  }
  0x5d   :  { %v85_v5 = vld [vmem:[#allocation2] sm:$0xff]  ;;  %v362_v6 = vpack.c.bf16 %v90_v4, %v89_v2  ;;  %v86_v10 = vld [vmem:[#allocation2 + $0x8] sm:$0xff]  ;;  %v318_v14 = vld [vmem:[#allocation7] ss:$0 sm:$0xff]  ;;  %s304_s3 = sshll.u32 %s537_s4, 4  ;;  %s305_s3 = int_to_ptr.vmem [resolvable:$true] %s304_s3 }
  0x5e   :  { %344 = vmatprep.mubr.msk.f32.mxu0 %vm98_vm0, %v85_v5  ;;  %v183_v8 = vld [vmem:[#allocation8 + $0x8] sm:$0xff]  ;;  %359 = vmatprep.subr.bf16.mxu0 %v358_v3  ;;  %v184_v11 = vld [vmem:[#allocation8 + $0x10] sm:$0xff]  ;;  %v185_v12 = vld [vmem:[#allocation8 + $0x18] sm:$0xff]  ;;  %s500_s21 = scalar_lea.vmem %s305_s3, 256  ;;  %p505_p13 = scmp.lt.s32.totalorder %s305_s3, %s305_s3 }
  0x5f   :  { %v366_v9 = vpack.c.bf16 %v183_v8, %v182_v7  ;;  %361 = vmatpush3.bf16.msra.mxu0 %v358_v3  ;;  %v370_v13 = vpack.c.bf16 %v185_v12, %v184_v11  ;;  %v321_v21 = vld [vmem:[#allocation10] ss:$0 sm:$0xff]  ;;  %p501_p12 = scmp.ne.s32.totalorder %s305_s3, %s500_s21  ;;  %p506_p0 = scmp.lt.s32.totalorder %s500_s21, %s500_s21 }
  0x60   :  { %363 = vmatprep.subr.bf16.mxu0 %v362_v6 }
  0x61   :  { %367 = vmatprep.subr.bf16.mxu1 %v366_v9  ;;  %p507_p1 = por %p506_p0, %p505_p13 }
  0x62   :  { %369 = vmatpush3.bf16.msra.mxu1 %v366_v9 }
  0x63   :  { %365 = vmatpush3.bf16.msra.mxu0 %v362_v6  ;;  %371 = vmatprep.subr.bf16.mxu1 %v370_v13  ;;  %p508_p2 = pnand %p507_p1, %p501_p12 }
  0x66   :  { %345 = vmatmul.mubr.msk.f32.vlgmr.msra.gmra.mrb[0].mxu0 %vm98_vm0, %v86_v10  ;;  %373 = vmatpush3.bf16.msra.mxu1 %v370_v13 }
 0x139   :  { %v346_v15 = vpop.f32.mrb[0].mxu0 }
 0x13a   :  { %v177_v16 = vadd.f32 %v346_v15, %v318_v14  ;;  %v171_v17 = vpop.f32.mrb[1].mxu0 }
 0x13b   :  { %v172_v18 = vadd.f32 %v318_v14, %v171_v17 }
 0x13c   :  { %v181_v20 = vmax.f32 %v177_v16, 0.0 }
 0x13d   :  { %v180_v19 = vmax.f32 %v172_v18, 0.0 }
 0x13f   :  { %355 = vmatprep.mubr.msk.f32.mxu1 %vm98_vm0, %v180_v19 }
 0x140   :  { %356 = vmatmul.mubr.msk.f32.vlgmr.msra.gmra.mrb[0].mxu1 %vm98_vm0, %v181_v20 }
 0x213   :  { %v357_v22 = vpop.f32.mrb[0].mxu1 }
 0x214   :  { %v265_v23 = vpop.f32.mrb[1].mxu1  ;;  %v271_v25 = vadd.f32 %v357_v22, %v321_v21 }
 0x215   :  { %v266_v24 = vadd.f32 %v321_v21, %v265_v23 }
 0x216   :  { %v278_v27 = vsel %vm274_vm1, %v271_v25, -inf }
 0x217   :  { %v275_v26 = vsel %vm274_vm1, %v266_v24, -inf }
 0x218   :  { %276 = vmax.xlane.f32.xlu0 %v275_v26 }
 0x21c   :  { %279 = vmax.xlane.f32.xlu0 %v278_v27 }
 0x2a5   :  { %v277_v28 = vpop.xlane.xlu0 %276 }
 0x2a6   :  { %v281_v29 = vsub.f32 %v266_v24, %v277_v28 }
 0x2a8   :  { %v283_v30 = vmul.f32 1.442695, %v281_v29 }
 0x2a9   :  { %v280_v31 = vpop.xlane.xlu0 %279 }
 0x2aa   :  { %382 = vpow2.f32 %v283_v30  ;;  %v282_v32 = vsub.f32 %v271_v25, %v280_v31 }
 0x2ac   :  { %v285_v33 = vmul.f32 1.442695, %v282_v32 }
 0x2ae   :  { %384 = vpow2.f32 %v285_v33 }
 0x2b4   :  { %v383_v34 = vpop.eup %382 }
 0x2b5   :  { %v287_v35 = vsel %vm274_vm1, %v383_v34, 0.0 }
 0x2b6   :  { %288 = vadd.xlane.f32.xlu1 %v287_v35 }
 0x2b8   :  { %v385_v36 = vpop.eup %384 }
 0x2b9   :  { %v290_v37 = vsel %vm274_vm1, %v385_v36, 0.0 }
 0x2ba   :  { %291 = vadd.xlane.f32.xlu1 %v290_v37 }
 0x343   :  { %v289_v38 = vpop.xlane.xlu1 %288 }
 0x344   :  { %386 = vrcp.f32 %v289_v38 }
 0x347   :  { %v292_v39 = vpop.xlane.xlu1 %291 }
 0x348   :  { %388 = vrcp.f32 %v292_v39 }
 0x34e   :  { %v387_v40 = vpop.eup %386 }
 0x34f   :  { %v294_v41 = vmul.f32 %v387_v40, %v383_v34 }
 0x351   :  { %297 = vst.msk [vmem:[#allocation11] sm:$0xff] %vm274_vm1, %v294_v41 }
 0x352   :  { %v389_v42 = vpop.eup %388 }
 0x353   :  { %v296_v43 = vmul.f32 %v389_v42, %v385_v36 }
 0x355   :  { %298 = vst.msk [vmem:[#allocation11 + $0x8] sm:$0xff] %vm274_vm1, %v296_v43 }
 0x356   :  { %511 = shalt.err (!%p508_p2)
}
 0x357   :  { %s512_s9 = scalar_lea.hbm %s674_s5, 256 }
 0x358   :  { %p513_p3 = scmp.ne.s32.totalorder %s674_s5, %s512_s9  ;;  %p516_p4 = scmp.lt.u32.totalorder %s512_s9, %s674_s5 }
 0x35a   :  { %p518_p5 = pnand %p516_p4, %p513_p3 }
 0x35c   :  { %521 = shalt.err (!%p518_p5)
}
 0x35d   :  { %310 = dma.vmem_to_hbm [thread:$0]  %s305_s3, 256, %s674_s5, [#allocation4], %s532_s30, %s532_s30, %s533_s6  }
 0x35e   :  { %528 = dma.done.wait [#allocation4], 256  }
 0x35f   :  { %529 = vsyncadd [#allocation4], 4294967040 }
 0x360   :  { %314 = vsyncpa [#allocation3], 1 }
 0x361   :  { %315 = vsyncpa [#allocation6], 1 }
 0x362   :  { %316 = vsyncpa [#allocation9], 1 }
 0x363   :  { %317 = vsyncpa [#allocation4], 1 }

// kernel: _lambda_.4
= control target key start
LH: loop header
LB: loop body
LE: loop exit
PB: predicated region body
PF: predicated region fallthrough
CT: control target
= control target key end

     0   :  { %s3699_s0 = inlined_call_operand.hbm [shape: f32[16,32], index: 0, kind: input, shape index: {}]   ;;  %s3700_s1 = inlined_call_operand.hbm [shape: f32[16,3], index: 1, kind: input, shape index: {}]   ;;  %s3701_s2 = inlined_call_operand.hbm [shape: bf16[64,16], index: 2, kind: input, shape index: {}]   ;;  %s3702_s3 = inlined_call_operand.<no memory space> [shape: f32[1,1], index: 3, kind: input, shape index: {}]   ;;  %s3703_s4 = inlined_call_operand.hbm [shape: f32[1,16], index: 4, kind: input, shape index: {}]   ;;  %s3704_s6 = inlined_call_operand.hbm [shape: f32[1,16], index: 6, kind: input, shape index: {}]   ;;  %s3705_s7 = inlined_call_operand.hbm [shape: f32[8,16], index: 7, kind: input, shape index: {}]   ;;  %s3706_s8 = inlined_call_operand.hbm [shape: f32[16,1], index: 8, kind: input, shape index: {}]   ;;  %s3707_s10 = inlined_call_operand.hbm [shape: f32[1,8], index: 10, kind: input, shape index: {}]   ;;  %s3708_s11 = inlined_call_operand.hbm [shape: f32[1,8], index: 11, kind: input, shape index: {}]   ;;  %s3709_s12 = inlined_call_operand.hbm [shape: f32[1,32], index: 12, kind: input, shape index: {}]   ;;  %s3710_s13 = inlined_call_operand.hbm [shape: f32[1,32], index: 13, kind: input, shape index: {}]   ;;  %s3711_s14 = inlined_call_operand.hbm [shape: f32[1,32], index: 14, kind: input, shape index: {}]   ;;  %s3712_s15 = inlined_call_operand.hbm [shape: f32[32,32], index: 15, kind: input, shape index: {}]   ;;  %s3713_s16 = inlined_call_operand.hbm [shape: f32[1,8], index: 16, kind: input, shape index: {}]   ;;  %s3714_s17 = inlined_call_operand.hbm [shape: f32[16,32], index: 17, kind: output, shape index: {0}]   ;;  %s3715_s18 = inlined_call_operand.hbm [shape: f32[32,24], index: 18, kind: output, shape index: {1}]   ;;  %s3716_s19 = inlined_call_operand.hbm [shape: f32[3,32,1], index: 19, kind: output, shape index: {2}]   ;;  %s3717_s5 = inlined_call_operand.<no memory space> [shape: f32[1,1], index: 5, kind: input, shape index: {}]   ;;  %s3718_s9 = inlined_call_operand.<no memory space> [shape: f32[1,1], index: 9, kind: input, shape index: {}]  }
   0x1   :  { %3736 = sst [smem:[#allocation48_spill]] %s3699_s0  ;;  %v27_v1 = vstv %s3717_s5  ;;  %v29_v2 = vstv %s3718_s9 }
   0x2   :  { %3737 = sst [smem:[#allocation49_spill]] %s3700_s1  ;;  %28 = vst [vmem:[#allocation3] sm:$0x1] %v27_v1  ;;  %30 = vst [vmem:[#allocation4] sm:$0x1] %v29_v2 }
   0x3   :  { %3738 = sst [smem:[#allocation50_spill]] %s3701_s2 }
   0x4   :  { %3739 = sst [smem:[#allocation51_spill]] %s3702_s3 }
   0x5   :  { %s3740_s20 = sld [smem:[#allocation51_spill]] }
   0xb   :  { %v25_v0 = vstv %s3740_s20 }
   0xc   :  { %26 = vst [vmem:[#allocation2] sm:$0x1] %v25_v0 }
   0xd   :  { %31 = vsyncpa [#allocation6], 0 }
   0xe   :  { %32 = vsyncpa [#allocation9], 0 }
   0xf   :  { %33 = vsyncpa [#allocation12], 0 }
  0x10   :  { %34 = vsyncpa [#allocation15], 0 }
  0x11   :  { %35 = vsyncpa [#allocation18], 0 }
  0x12   :  { %36 = vsyncpa [#allocation21], 0 }
  0x13   :  { %37 = vsyncpa [#allocation24], 0 }
  0x14   :  { %38 = vsyncpa [#allocation27], 0 }
  0x15   :  { %39 = vsyncpa [#allocation7], 0 }
  0x16   :  { %40 = vsyncpa [#allocation30], 0  ;;  %s2562_s23 = smov [#allocation8]   ;;  %s2563_s5 = smov [#allocation11]  }
  0x17   :  { %s58_s24 = sshll.u32 %s2562_s23, 4  ;;  %s85_s25 = sshll.u32 %s2563_s5, 4  ;;  %s59_s24 = int_to_ptr.vmem [resolvable:$true] %s58_s24  ;;  %s2702_s25 = int_to_ptr.vmem [resolvable:$true] %s85_s25 }
  0x18   :  { %s3741_s26 = sld [smem:[#allocation49_spill]] }
  0x1e   :  { %s2168_s27 = scalar_lea.hbm %s3741_s26, 256 }
  0x1f   :  { %p2169_p0 = scmp.ne.s32.totalorder %s3741_s26, %s2168_s27  ;;  %p2172_p1 = scmp.lt.u32.totalorder %s2168_s27, %s3741_s26 }
  0x21   :  { %p2174_p2 = pnand %p2172_p1, %p2169_p0 }
  0x23   :  { %2177 = shalt.err (!%p2174_p2)
}
  0x24   :  { %s2178_s20 = scalar_lea.vmem %s59_s24, 256  ;;  %p2183_p4 = scmp.lt.s32.totalorder %s59_s24, %s59_s24 }
  0x25   :  { %p2179_p3 = scmp.ne.s32.totalorder %s59_s24, %s2178_s20  ;;  %p2184_p5 = scmp.lt.s32.totalorder %s2178_s20, %s2178_s20 }
  0x27   :  { %p2185_p6 = por %p2184_p5, %p2183_p4 }
  0x29   :  { %p2186_p7 = pnand %p2185_p6, %p2179_p3 }
  0x2b   :  { %2189 = shalt.err (!%p2186_p7)
}
  0x2c   :  { %s2564_s21 = smov 128   ;;  %s2565_s1 = smov 8  }
  0x2d   :  { %64 = dma.hbm_to_vmem [thread:$0]  %s3741_s26, 256, %s59_s24, [#allocation9], %s2564_s21, %s2564_s21, %s2565_s1  }
  0x2e   :  { %s2190_s9 = scalar_lea.hbm %s3703_s4, 16 }
  0x2f   :  { %p2191_p8 = scmp.ne.s32.totalorder %s3703_s4, %s2190_s9  ;;  %p2194_p9 = scmp.lt.u32.totalorder %s2190_s9, %s3703_s4 }
  0x31   :  { %p2196_p10 = pnand %p2194_p9, %p2191_p8 }
  0x33   :  { %2199 = shalt.err (!%p2196_p10)
}
  0x34   :  { %s2200_s0 = scalar_lea.vmem %s2702_s25, 16  ;;  %s2204_s24 = scalar_lea.vmem %s2702_s25, 32 }
  0x35   :  { %p2201_p11 = scmp.ne.s32.totalorder %s2702_s25, %s2200_s0  ;;  %p2205_p12 = scmp.lt.s32.totalorder %s2702_s25, %s2702_s25 }
  0x36   :  { %p2206_p13 = scmp.lt.s32.totalorder %s2204_s24, %s2200_s0 }
  0x38   :  { %p2207_p0 = por %p2206_p13, %p2205_p12 }
  0x3a   :  { %p2208_p1 = pnand %p2207_p0, %p2201_p11 }
  0x3c   :  { %2211 = shalt.err (!%p2208_p1)
}
  0x3d   :  { %88 = dma.hbm_to_vmem [thread:$0]  %s3703_s4, 16, %s2702_s25, [#allocation12]  }
  0x3e   :  { %s2566_s20 = smov [#allocation14]   ;;  %s2567_s2 = smov [#allocation17]  }
  0x3f   :  { %s107_s22 = sshll.u32 %s2566_s20, 4  ;;  %s131_s23 = sshll.u32 %s2567_s2, 4  ;;  %s108_s22 = int_to_ptr.vmem [resolvable:$true] %s107_s22  ;;  %s132_s23 = int_to_ptr.vmem [resolvable:$true] %s131_s23 }
  0x40   :  { %s2212_s3 = scalar_lea.hbm %s3705_s7, 128 }
  0x41   :  { %p2213_p2 = scmp.ne.s32.totalorder %s3705_s7, %s2212_s3  ;;  %p2216_p3 = scmp.lt.u32.totalorder %s2212_s3, %s3705_s7 }
  0x43   :  { %p2218_p4 = pnand %p2216_p3, %p2213_p2 }
  0x45   :  { %2221 = shalt.err (!%p2218_p4)
}
  0x46   :  { %s2222_s4 = scalar_lea.vmem %s108_s22, 128  ;;  %p2227_p6 = scmp.lt.s32.totalorder %s108_s22, %s108_s22 }
  0x47   :  { %p2223_p5 = scmp.ne.s32.totalorder %s108_s22, %s2222_s4  ;;  %p2228_p7 = scmp.lt.s32.totalorder %s2222_s4, %s2222_s4 }
  0x49   :  { %p2229_p8 = por %p2228_p7, %p2227_p6 }
  0x4b   :  { %p2230_p9 = pnand %p2229_p8, %p2223_p5 }
  0x4d   :  { %2233 = shalt.err (!%p2230_p9)
}
  0x4e   :  { %110 = dma.hbm_to_vmem [thread:$0]  %s3705_s7, 128, %s108_s22, [#allocation15]  }
  0x4f   :  { %s2234_s20 = scalar_lea.hbm %s3707_s10, 16 }
  0x50   :  { %p2235_p10 = scmp.ne.s32.totalorder %s3707_s10, %s2234_s20  ;;  %p2238_p11 = scmp.lt.u32.totalorder %s2234_s20, %s3707_s10 }
  0x52   :  { %p2240_p12 = pnand %p2238_p11, %p2235_p10 }
  0x54   :  { %2243 = shalt.err (!%p2240_p12)
}
  0x55   :  { %s2244_s27 = scalar_lea.vmem %s132_s23, 16  ;;  %s2248_s28 = scalar_lea.vmem %s132_s23, 32 }
  0x56   :  { %p2245_p13 = scmp.ne.s32.totalorder %s132_s23, %s2244_s27  ;;  %p2249_p0 = scmp.lt.s32.totalorder %s132_s23, %s132_s23 }
  0x57   :  { %p2250_p1 = scmp.lt.s32.totalorder %s2248_s28, %s2244_s27 }
  0x59   :  { %p2251_p2 = por %p2250_p1, %p2249_p0 }
  0x5b   :  { %p2252_p3 = pnand %p2251_p2, %p2245_p13 }
  0x5d   :  { %2255 = shalt.err (!%p2252_p3)
}
  0x5e   :  { %134 = dma.hbm_to_vmem [thread:$0]  %s3707_s10, 16, %s132_s23, [#allocation18]  }
  0x5f   :  { %s2568_s29 = smov [#allocation20]   ;;  %s2569_s4 = smov [#allocation23]  }
  0x60   :  { %s151_s0 = sshll.u32 %s2568_s29, 4  ;;  %s171_s25 = sshll.u32 %s2569_s4, 4  ;;  %s152_s0 = int_to_ptr.vmem [resolvable:$true] %s151_s0  ;;  %s172_s25 = int_to_ptr.vmem [resolvable:$true] %s171_s25 }
  0x61   :  { %s2256_s30 = scalar_lea.hbm %s3709_s12, 16 }
  0x62   :  { %p2257_p4 = scmp.ne.s32.totalorder %s3709_s12, %s2256_s30  ;;  %p2260_p5 = scmp.lt.u32.totalorder %s2256_s30, %s3709_s12 }
  0x64   :  { %p2262_p6 = pnand %p2260_p5, %p2257_p4 }
  0x66   :  { %2265 = shalt.err (!%p2262_p6)
}
  0x67   :  { %s2266_s10 = scalar_lea.vmem %s152_s0, 16  ;;  %s2270_s23 = scalar_lea.vmem %s152_s0, 32 }
  0x68   :  { %p2267_p7 = scmp.ne.s32.totalorder %s152_s0, %s2266_s10  ;;  %p2271_p8 = scmp.lt.s32.totalorder %s152_s0, %s152_s0 }
  0x69   :  { %p2272_p9 = scmp.lt.s32.totalorder %s2270_s23, %s2266_s10 }
  0x6b   :  { %p2273_p10 = por %p2272_p9, %p2271_p8 }
  0x6d   :  { %p2274_p11 = pnand %p2273_p10, %p2267_p7 }
  0x6f   :  { %2277 = shalt.err (!%p2274_p11)
}
  0x70   :  { %154 = dma.hbm_to_vmem [thread:$0]  %s3709_s12, 16, %s152_s0, [#allocation21]  }
  0x71   :  { %s2278_s22 = scalar_lea.hbm %s3711_s14, 16 }
  0x72   :  { %p2279_p12 = scmp.ne.s32.totalorder %s3711_s14, %s2278_s22  ;;  %p2282_p13 = scmp.lt.u32.totalorder %s2278_s22, %s3711_s14 }
  0x74   :  { %p2284_p0 = pnand %p2282_p13, %p2279_p12 }
  0x76   :  { %2287 = shalt.err (!%p2284_p0)
}
  0x77   :  { %s2288_s30 = scalar_lea.vmem %s172_s25, 16  ;;  %s2292_s20 = scalar_lea.vmem %s172_s25, 32 }
  0x78   :  { %p2289_p1 = scmp.ne.s32.totalorder %s172_s25, %s2288_s30  ;;  %p2293_p2 = scmp.lt.s32.totalorder %s172_s25, %s172_s25 }
  0x79   :  { %p2294_p3 = scmp.lt.s32.totalorder %s2292_s20, %s2288_s30 }
  0x7b   :  { %p2295_p4 = por %p2294_p3, %p2293_p2 }
  0x7d   :  { %p2296_p5 = pnand %p2295_p4, %p2289_p1 }
  0x7f   :  { %2299 = shalt.err (!%p2296_p5)
}
  0x80   :  { %174 = dma.hbm_to_vmem [thread:$0]  %s3711_s14, 16, %s172_s25, [#allocation24]  }
  0x81   :  { %s2570_s2 = smov [#allocation5]   ;;  %s2571_s9 = smov [#allocation10]  }
  0x82   :  { %s46_s5 = sshll.u32 %s2570_s2, 4  ;;  %s70_s10 = sshll.u32 %s2571_s9, 4  ;;  %s47_s5 = int_to_ptr.vmem [resolvable:$true] %s46_s5  ;;  %s2785_s10 = int_to_ptr.vmem [resolvable:$true] %s70_s10 }
  0x83   :  { %s3742_s27 = sld [smem:[#allocation48_spill]] }
  0x89   :  { %s2300_s28 = scalar_lea.hbm %s3742_s27, 256 }
  0x8a   :  { %p2301_p6 = scmp.ne.s32.totalorder %s3742_s27, %s2300_s28  ;;  %p2304_p7 = scmp.lt.u32.totalorder %s2300_s28, %s3742_s27 }
  0x8c   :  { %p2306_p8 = pnand %p2304_p7, %p2301_p6 }
  0x8e   :  { %2309 = shalt.err (!%p2306_p8)
}
  0x8f   :  { %s2310_s14 = scalar_lea.vmem %s47_s5, 256  ;;  %p2315_p10 = scmp.lt.s32.totalorder %s47_s5, %s47_s5 }
  0x90   :  { %p2311_p9 = scmp.ne.s32.totalorder %s47_s5, %s2310_s14  ;;  %p2316_p11 = scmp.lt.s32.totalorder %s2310_s14, %s2310_s14 }
  0x92   :  { %p2317_p12 = por %p2316_p11, %p2315_p10 }
  0x94   :  { %p2318_p13 = pnand %p2317_p12, %p2311_p9 }
  0x96   :  { %2321 = shalt.err (!%p2318_p13)
}
  0x97   :  { %52 = dma.hbm_to_vmem [thread:$0]  %s3742_s27, 256, %s47_s5, [#allocation6], %s2564_s21, %s2564_s21, %s2565_s1  }
  0x98   :  { %s3743_s20 = sld [smem:[#allocation50_spill]] }
  0x9e   :  { %s2322_s12 = scalar_lea.hbm %s3743_s20, 512 }
  0x9f   :  { %p2323_p0 = scmp.ne.s32.totalorder %s3743_s20, %s2322_s12  ;;  %p2326_p1 = scmp.lt.u32.totalorder %s2322_s12, %s3743_s20 }
  0xa1   :  { %p2328_p2 = pnand %p2326_p1, %p2323_p0 }
  0xa3   :  { %2331 = shalt.err (!%p2328_p2)
}
  0xa4   :  { %s2332_s3 = scalar_lea.vmem %s2785_s10, 512  ;;  %p2337_p4 = scmp.lt.s32.totalorder %s2785_s10, %s2785_s10 }
  0xa5   :  { %p2333_p3 = scmp.ne.s32.totalorder %s2785_s10, %s2332_s3  ;;  %p2338_p5 = scmp.lt.s32.totalorder %s2332_s3, %s2332_s3 }
  0xa7   :  { %p2339_p6 = por %p2338_p5, %p2337_p4 }
  0xa9   :  { %p2340_p7 = pnand %p2339_p6, %p2333_p3 }
  0xab   :  { %2343 = shalt.err (!%p2340_p7)
}
  0xac   :  { %s2572_s5 = smov 64   ;;  %s2573_s27 = smov 4  }
  0xad   :  { %76 = dma.hbm_to_vmem [thread:$0]  %s3743_s20, 512, %s2785_s10, [#allocation9], %s2572_s5, %s2572_s5, %s2573_s27  }
  0xae   :  { %s2574_s22 = smov [#allocation13]   ;;  %s2575_s4 = smov [#allocation16]  }
  0xaf   :  { %s97_s29 = sshll.u32 %s2574_s22, 4  ;;  %s116_s14 = sshll.u32 %s2575_s4, 4  ;;  %s98_s29 = int_to_ptr.vmem [resolvable:$true] %s97_s29  ;;  %s2819_s14 = int_to_ptr.vmem [resolvable:$true] %s116_s14 }
  0xb0   :  { %s2344_s26 = scalar_lea.hbm %s3704_s6, 16 }
  0xb1   :  { %p2345_p8 = scmp.ne.s32.totalorder %s3704_s6, %s2344_s26  ;;  %p2348_p9 = scmp.lt.u32.totalorder %s2344_s26, %s3704_s6 }
  0xb3   :  { %p2350_p10 = pnand %p2348_p9, %p2345_p8 }
  0xb5   :  { %2353 = shalt.err (!%p2350_p10)
}
  0xb6   :  { %s2354_s10 = scalar_lea.vmem %s98_s29, 16  ;;  %s2358_s20 = scalar_lea.vmem %s98_s29, 32 }
  0xb7   :  { %p2355_p11 = scmp.ne.s32.totalorder %s98_s29, %s2354_s10  ;;  %p2359_p12 = scmp.lt.s32.totalorder %s98_s29, %s98_s29 }
  0xb8   :  { %p2360_p13 = scmp.lt.s32.totalorder %s2358_s20, %s2354_s10 }
  0xba   :  { %p2361_p0 = por %p2360_p13, %p2359_p12 }
  0xbc   :  { %p2362_p1 = pnand %p2361_p0, %p2355_p11 }
  0xbe   :  { %2365 = shalt.err (!%p2362_p1)
}
  0xbf   :  { %100 = dma.hbm_to_vmem [thread:$0]  %s3704_s6, 16, %s98_s29, [#allocation12]  }
  0xc0   :  { %s2366_s27 = scalar_lea.hbm %s3706_s8, 256 }
  0xc1   :  { %p2367_p2 = scmp.ne.s32.totalorder %s3706_s8, %s2366_s27  ;;  %p2370_p3 = scmp.lt.u32.totalorder %s2366_s27, %s3706_s8 }
  0xc3   :  { %p2372_p4 = pnand %p2370_p3, %p2367_p2 }
  0xc5   :  { %2375 = shalt.err (!%p2372_p4)
}
  0xc6   :  { %s2376_s25 = scalar_lea.vmem %s2819_s14, 256  ;;  %p2381_p6 = scmp.lt.s32.totalorder %s2819_s14, %s2819_s14 }
  0xc7   :  { %p2377_p5 = scmp.ne.s32.totalorder %s2819_s14, %s2376_s25  ;;  %p2382_p7 = scmp.lt.s32.totalorder %s2376_s25, %s2376_s25 }
  0xc9   :  { %p2383_p8 = por %p2382_p7, %p2381_p6 }
  0xcb   :  { %p2384_p9 = pnand %p2383_p8, %p2377_p5 }
  0xcd   :  { %2387 = shalt.err (!%p2384_p9)
}
  0xce   :  { %122 = dma.hbm_to_vmem [thread:$0]  %s3706_s8, 256, %s2819_s14, [#allocation15], %s2564_s21, %s2564_s21, %s2565_s1  }
  0xcf   :  { %s2576_s24 = smov [#allocation19]   ;;  %s2577_s30 = smov [#allocation22]  }
  0xd0   :  { %s141_s26 = sshll.u32 %s2576_s24, 4  ;;  %s161_s12 = sshll.u32 %s2577_s30, 4  ;;  %s142_s26 = int_to_ptr.vmem [resolvable:$true] %s141_s26  ;;  %s162_s12 = int_to_ptr.vmem [resolvable:$true] %s161_s12 }
  0xd1   :  { %s2388_s10 = scalar_lea.hbm %s3708_s11, 16 }
  0xd2   :  { %p2389_p10 = scmp.ne.s32.totalorder %s3708_s11, %s2388_s10  ;;  %p2392_p11 = scmp.lt.u32.totalorder %s2388_s10, %s3708_s11 }
  0xd4   :  { %p2394_p12 = pnand %p2392_p11, %p2389_p10 }
  0xd6   :  { %2397 = shalt.err (!%p2394_p12)
}
  0xd7   :  { %s2398_s8 = scalar_lea.vmem %s142_s26, 16  ;;  %s2402_s14 = scalar_lea.vmem %s142_s26, 32 }
  0xd8   :  { %p2399_p13 = scmp.ne.s32.totalorder %s142_s26, %s2398_s8  ;;  %p2403_p0 = scmp.lt.s32.totalorder %s142_s26, %s142_s26 }
  0xd9   :  { %p2404_p1 = scmp.lt.s32.totalorder %s2402_s14, %s2398_s8 }
  0xdb   :  { %p2405_p2 = por %p2404_p1, %p2403_p0 }
  0xdd   :  { %p2406_p3 = pnand %p2405_p2, %p2399_p13 }
  0xdf   :  { %2409 = shalt.err (!%p2406_p3)
}
  0xe0   :  { %144 = dma.hbm_to_vmem [thread:$0]  %s3708_s11, 16, %s142_s26, [#allocation18]  }
  0xe1   :  { %s2410_s22 = scalar_lea.hbm %s3710_s13, 16 }
  0xe2   :  { %p2411_p4 = scmp.ne.s32.totalorder %s3710_s13, %s2410_s22  ;;  %p2414_p5 = scmp.lt.u32.totalorder %s2410_s22, %s3710_s13 }
  0xe4   :  { %p2416_p6 = pnand %p2414_p5, %p2411_p4 }
  0xe6   :  { %2419 = shalt.err (!%p2416_p6)
}
  0xe7   :  { %s2420_s24 = scalar_lea.vmem %s162_s12, 16  ;;  %s2424_s30 = scalar_lea.vmem %s162_s12, 32 }
  0xe8   :  { %p2421_p7 = scmp.ne.s32.totalorder %s162_s12, %s2420_s24  ;;  %p2425_p8 = scmp.lt.s32.totalorder %s162_s12, %s162_s12 }
  0xe9   :  { %p2426_p9 = scmp.lt.s32.totalorder %s2424_s30, %s2420_s24 }
  0xeb   :  { %p2427_p10 = por %p2426_p9, %p2425_p8 }
  0xed   :  { %p2428_p11 = pnand %p2427_p10, %p2421_p7 }
  0xef   :  { %2431 = shalt.err (!%p2428_p11)
}
  0xf0   :  { %164 = dma.hbm_to_vmem [thread:$0]  %s3710_s13, 16, %s162_s12, [#allocation21]  }
  0xf1   :  { %s2578_s0 = smov [#allocation25]   ;;  %s2579_s10 = smov [#allocation26]  }
  0xf2   :  { %s180_s2 = sshll.u32 %s2578_s0, 4  ;;  %s193_s20 = sshll.u32 %s2579_s10, 4  ;;  %s181_s2 = int_to_ptr.vmem [resolvable:$true] %s180_s2  ;;  %s194_s20 = int_to_ptr.vmem [resolvable:$true] %s193_s20 }
  0xf3   :  { %s2432_s3 = scalar_lea.hbm %s3712_s15, 512 }
  0xf4   :  { %p2433_p12 = scmp.ne.s32.totalorder %s3712_s15, %s2432_s3  ;;  %p2436_p13 = scmp.lt.u32.totalorder %s2432_s3, %s3712_s15 }
  0xf6   :  { %p2438_p0 = pnand %p2436_p13, %p2433_p12 }
  0xf8   :  { %2441 = shalt.err (!%p2438_p0)
}
  0xf9   :  { %s2442_s13 = scalar_lea.vmem %s181_s2, 512  ;;  %p2447_p2 = scmp.lt.s32.totalorder %s181_s2, %s181_s2 }
  0xfa   :  { %p2443_p1 = scmp.ne.s32.totalorder %s181_s2, %s2442_s13  ;;  %p2448_p3 = scmp.lt.s32.totalorder %s2442_s13, %s2442_s13 }
  0xfc   :  { %p2449_p4 = por %p2448_p3, %p2447_p2 }
  0xfe   :  { %p2450_p5 = pnand %p2449_p4, %p2443_p1 }
 0x100   :  { %2453 = shalt.err (!%p2450_p5)
}
 0x101   :  { %186 = dma.hbm_to_vmem [thread:$0]  %s3712_s15, 512, %s181_s2, [#allocation24], %s2564_s21, %s2564_s21, %s2565_s1  }
 0x102   :  { %s2454_s4 = scalar_lea.hbm %s3713_s16, 16 }
 0x103   :  { %p2455_p6 = scmp.ne.s32.totalorder %s3713_s16, %s2454_s4  ;;  %p2458_p7 = scmp.lt.u32.totalorder %s2454_s4, %s3713_s16 }
 0x105   :  { %p2460_p8 = pnand %p2458_p7, %p2455_p6 }
 0x107   :  { %2463 = shalt.err (!%p2460_p8)
}
 0x108   :  { %s2464_s30 = scalar_lea.vmem %s194_s20, 16  ;;  %s2468_s11 = scalar_lea.vmem %s194_s20, 32 }
 0x109   :  { %p2465_p9 = scmp.ne.s32.totalorder %s194_s20, %s2464_s30  ;;  %p2469_p10 = scmp.lt.s32.totalorder %s194_s20, %s194_s20 }
 0x10a   :  { %p2470_p11 = scmp.lt.s32.totalorder %s2468_s11, %s2464_s30 }
 0x10c   :  { %p2471_p12 = por %p2470_p11, %p2469_p10 }
 0x10e   :  { %p2472_p13 = pnand %p2471_p12, %p2465_p9 }
 0x110   :  { %2475 = shalt.err (!%p2472_p13)
}
 0x111   :  { %196 = dma.hbm_to_vmem [thread:$0]  %s3713_s16, 16, %s194_s20, [#allocation27]  }
 0x112   :  { %2542 = dma.done.wait [#allocation6], 256  }
 0x113   :  { %2543 = vsyncadd [#allocation6], 4294967040 }
 0x114   :  { %2544 = dma.done.wait [#allocation9], 768  }
 0x115   :  { %2545 = vsyncadd [#allocation9], 4294966528 }
 0x116   :  { %2546 = dma.done.wait [#allocation12], 32  }
 0x117   :  { %2547 = vsyncadd [#allocation12], 4294967264 }
 0x118   :  { %2548 = dma.done.wait [#allocation15], 384  }
 0x119   :  { %2549 = vsyncadd [#allocation15], 4294966912 }
 0x11a   :  { %2550 = dma.done.wait [#allocation18], 32  }
 0x11b   :  { %2551 = vsyncadd [#allocation18], 4294967264 }
 0x11c   :  { %2552 = dma.done.wait [#allocation21], 32  }
 0x11d   :  { %2553 = vsyncadd [#allocation21], 4294967264 }
 0x11e   :  { %2554 = dma.done.wait [#allocation24], 528  }
 0x11f   :  { %2555 = vsyncadd [#allocation24], 4294966768 }
 0x120   :  { %2556 = dma.done.wait [#allocation27], 16  }
 0x121   :  { %2557 = vsyncadd [#allocation27], 4294967280  ;;  %v392_v3 = vld [vmem:[#allocation8] sm:$0xff]  ;;  %v393_v4 = vld [vmem:[#allocation8 + $0x8] sm:$0xff]  ;;  %vm410_vm0 = vcmask 130048   ;;  %vm548_vm1 = vcmask 23552  }
 0x122   :  { %v1910_v5 = vld [vmem:[#allocation10] sm:$0xff]   ;;  %v2008_v6 = vpack.c.bf16 %v393_v4, %v392_v3  ;;  %v1925_v8 = vld [vmem:[#allocation10 + $0x8] sm:$0xff]   ;;  %v1926_v11 = vld [vmem:[#allocation10 + $0x10] sm:$0xff]   ;;  %vm259_vm2 = vcmask 261120   ;;  %s2587_s16 = smov 127   ;;  %s2588_s0 = smov 126  }
 0x123   :  { %v1911_v7 = vunpack.c.l.bf16 %v1910_v5  ;;  %v1912_v9 = vunpack.c.h.bf16 %v1910_v5  ;;  %v1915_v10 = vunpack.c.l.bf16 %v1925_v8  ;;  %v1916_v12 = vunpack.c.h.bf16 %v1925_v8  ;;  %v1927_v14 = vld [vmem:[#allocation10 + $0x18] sm:$0xff]   ;;  %v2963_v58 = vld [vmem:[#allocation5] sm:$0xff]  ;;  %v258_v63 = vld [vmem:[#allocation5 + $0x8] sm:$0xff]  ;;  %s2590_s2 = smov [#allocation29]   ;;  %s2591_s20 = smov [#allocation28]  }
 0x124   :  { %2009 = vmatprep.subr.bf16.mxu1 %v2008_v6  ;;  %v1919_v13 = vunpack.c.l.bf16 %v1926_v11  ;;  %v1920_v15 = vunpack.c.h.bf16 %v1926_v11  ;;  %v1923_v16 = vunpack.c.l.bf16 %v1927_v14  ;;  %v1924_v17 = vunpack.c.h.bf16 %v1927_v14  ;;  %s1818_s10 = sshll.u32 %s2590_s2, 4  ;;  %s1806_s9 = sshll.u32 %s2591_s20, 4  ;;  %s1819_s10 = int_to_ptr.vmem [resolvable:$true] %s1818_s10  ;;  %s3623_s9 = int_to_ptr.vmem [resolvable:$true] %s1806_s9 }
 0x125   :  { %1970 = vmatprep.mubr.msk.f32.mxu1 %vm410_vm0, %v1911_v7  ;;  %2011 = vmatpush3.bf16.msra.mxu1 %v2008_v6  ;;  %v260_v62 = vsel %vm259_vm2, %v2963_v58, 0.0  ;;  %v263_v1 = vsel %vm259_vm2, %v258_v63, 0.0  ;;  %v2973_v7 = vld [vmem:[#allocation26] ss:$0 sm:$0xff]  ;;  %v3725_v63 = vmov 920167782   ;;  %p2481_p1 = scmp.lt.s32.totalorder %s1819_s10, %s1819_s10 }
 0x126   :  { %s2476_s23 = scalar_lea.vmem %s1819_s10, 512 }
 0x127   :  { %p2477_p0 = scmp.ne.s32.totalorder %s1819_s10, %s2476_s23  ;;  %p2482_p2 = scmp.lt.s32.totalorder %s2476_s23, %s2476_s23 }
 0x128   :  { %1971 = vmatmul.mubr.msk.f32.vlgmr.msra.gmra.mrb[0].mxu1 %vm410_vm0, %v1912_v9 }
 0x129   :  { %1973 = vmatprep.mubr.msk.f32.mxu1 %vm410_vm0, %v1915_v10  ;;  %p2483_p3 = por %p2482_p2, %p2481_p1 }
 0x12b   :  { %p2484_p4 = pnand %p2483_p3, %p2477_p0 }
 0x12c   :  { %1974 = vmatmul.mubr.msk.f32.gmra.mrb[2].mxu1 %vm410_vm0, %v1916_v12 }
 0x12d   :  { %1976 = vmatprep.mubr.msk.f32.mxu1 %vm410_vm0, %v1919_v13 }
 0x130   :  { %1977 = vmatmul.mubr.msk.f32.gmra.mrb[4].mxu1 %vm410_vm0, %v1920_v15 }
 0x131   :  { %1979 = vmatprep.mubr.msk.f32.mxu1 %vm410_vm0, %v1923_v16 }
 0x134   :  { %1980 = vmatmul.mubr.msk.f32.gmra.mrb[6].mxu1 %vm410_vm0, %v1924_v17 }
 0x1fb   :  { %v1972_v18 = vpop.f32.mrb[0].mxu1 }
 0x1fc   :  { %v501_v19 = vpop.f32.mrb[1].mxu1  ;;  %v626_v20 = vmul.f32 %v1972_v18, %v1972_v18 }
 0x1fd   :  { %v625_v21 = vmul.f32 %v501_v19, %v501_v19 }
 0x1fe   :  { %v2913_v22 = vsel %vm548_vm1, %v626_v20, 0.0 }
 0x1ff   :  { %v1975_v23 = vpop.f32.mrb[2].mxu1  ;;  %v2916_v24 = vsel %vm548_vm1, %v625_v21, 0.0 }
 0x200   :  { %v511_v25 = vpop.f32.mrb[3].mxu1  ;;  %v628_v26 = vmul.f32 %v1975_v23, %v1975_v23 }
 0x201   :  { %v627_v27 = vmul.f32 %v511_v25, %v511_v25 }
 0x202   :  { %v2919_v28 = vsel %vm548_vm1, %v628_v26, 0.0 }
 0x203   :  { %v1978_v29 = vpop.f32.mrb[4].mxu1  ;;  %v2922_v30 = vsel %vm548_vm1, %v627_v27, 0.0 }
 0x204   :  { %v2924_v31 = vsub.f32 %v1972_v18, %v1978_v29  ;;  %v521_v32 = vpop.f32.mrb[5].mxu1  ;;  %v670_v33 = vmul.f32 %v1978_v29, %v1978_v29  ;;  %v610_v34 = vmul.f32 %v1978_v29, %v1972_v18 }
 0x205   :  { %v2926_v35 = vsub.f32 %v501_v19, %v521_v32  ;;  %v669_v36 = vmul.f32 %v521_v32, %v521_v32  ;;  %v609_v37 = vmul.f32 %v521_v32, %v501_v19 }
 0x206   :  { %v2929_v38 = vsel %vm548_vm1, %v670_v33, 0.0  ;;  %v2932_v39 = vsel %vm548_vm1, %v610_v34, 0.0  ;;  %v545_v46 = vmul.f32 %v2924_v31, %v2924_v31 }
 0x207   :  { %3744 = vst [vmem:[#allocation42_spill] sm:$0xff] %v2929_v38  ;;  %3745 = vst [vmem:[#allocation43_spill] sm:$0xff] %v2932_v39  ;;  %v1981_v40 = vpop.f32.mrb[6].mxu1  ;;  %v544_v41 = vmul.f32 %v2926_v35, %v2926_v35  ;;  %v2937_v42 = vsel %vm548_vm1, %v669_v36, 0.0  ;;  %v2940_v43 = vsel %vm548_vm1, %v609_v37, 0.0 }
 0x208   :  { %3746 = vst [vmem:[#allocation44_spill] sm:$0xff] %v2940_v43  ;;  %v2942_v44 = vsub.f32 %v1975_v23, %v1981_v40  ;;  %v531_v45 = vpop.f32.mrb[7].mxu1  ;;  %v672_v47 = vmul.f32 %v1981_v40, %v1981_v40  ;;  %v612_v48 = vmul.f32 %v1981_v40, %v1975_v23  ;;  %v552_v59 = vsel %vm548_vm1, %v545_v46, 0.0 }
 0x209   :  { %v2946_v49 = vsub.f32 %v511_v25, %v531_v45  ;;  %v549_v50 = vsel %vm548_vm1, %v544_v41, 0.0  ;;  %v671_v51 = vmul.f32 %v531_v45, %v531_v45  ;;  %v611_v52 = vmul.f32 %v531_v45, %v511_v25 }
 0x20a   :  { %550 = vadd.xlane.f32.xlu0 %v549_v50  ;;  %v2950_v53 = vsel %vm548_vm1, %v672_v47, 0.0  ;;  %v2953_v54 = vsel %vm548_vm1, %v612_v48, 0.0  ;;  %v547_v61 = vmul.f32 %v2942_v44, %v2942_v44  ;;  %v3730_v46 = vmov 683565275  }
 0x20b   :  { %3747 = vst [vmem:[#allocation45_spill] sm:$0xff] %v2950_v53  ;;  %3748 = vst [vmem:[#allocation46_spill] sm:$0xff] %v2953_v54  ;;  %v546_v55 = vmul.f32 %v2946_v49, %v2946_v49  ;;  %v2958_v56 = vsel %vm548_vm1, %v671_v51, 0.0  ;;  %v2961_v57 = vsel %vm548_vm1, %v611_v52, 0.0  ;;  %v3734_v48 = vmov 2475754826  }
 0x20c   :  { %3749 = vst [vmem:[#allocation47_spill] sm:$0xff] %v2961_v57  ;;  %v558_v0 = vsel %vm548_vm1, %v547_v61, 0.0  ;;  %v3732_v51 = vmov 2131351028  }
 0x20d   :  { %v555_v60 = vsel %vm548_vm1, %v546_v55, 0.0  ;;  %v3727_v55 = vmov 2102212464  }
 0x20e   :  { %553 = vadd.xlane.f32.xlu0 %v552_v59  ;;  %556 = vadd.xlane.f32.xlu1 %v555_v60 }
 0x212   :  { %559 = vadd.xlane.f32.xlu1 %v558_v0  ;;  %261 = vadd.xlane.f32.xlu0 %v260_v62 }
 0x216   :  { %264 = vadd.xlane.f32.xlu1 %v263_v1 }
 0x297   :  { %v551_v2 = vpop.xlane.xlu0 %550 }
 0x298   :  { %2067 = vrsqrt.f32 %v551_v2  ;;  %vm563_vm3 = vcmp.eq.f32.partialorder %v551_v2, inf  ;;  %v566_v6 = vand.u32 2147483648, %v551_v2  ;;  %vm565_vm4 = vcmp.eq.f32.partialorder %v551_v2, 0.0 }
 0x29b   :  { %v554_v3 = vpop.xlane.xlu0 %553  ;;  %v2975_v10 = vpop.xlane.xlu1 %556 }
 0x29c   :  { %2069 = vrsqrt.f32 %v554_v3  ;;  %vm570_vm5 = vcmp.eq.f32.partialorder %v554_v3, inf  ;;  %v573_v15 = vand.u32 2147483648, %v554_v3  ;;  %vm572_vm6 = vcmp.eq.f32.partialorder %v554_v3, 0.0 }
 0x29d   :  { %2071 = vrsqrt.f32 %v2975_v10  ;;  %vm577_vm13 = vcmp.eq.f32.partialorder %v2975_v10, inf }
 0x2a2   :  { %v2068_v4 = vpop.eup %2067 }
 0x2a3   :  { %v562_v5 = vmul.f32 %v2068_v4, %v551_v2 }
 0x2a5   :  { %v564_v8 = vsel %vm563_vm3, %v551_v2, %v562_v5 }
 0x2a6   :  { %v2070_v9 = vpop.eup %2069  ;;  %v2977_v11 = vsel %vm565_vm4, %v566_v6, %v564_v8 }
 0x2a7   :  { %v569_v12 = vmul.f32 %v2070_v9, %v554_v3  ;;  %v2981_v13 = vmul.f32 %v2973_v7, %v2977_v11  ;;  %v2072_v29 = vpop.eup %2071 }
 0x2a8   :  { %v576_v37 = vmul.f32 %v2072_v29, %v2975_v10 }
 0x2a9   :  { %v571_v14 = vsel %vm570_vm5, %v554_v3, %v569_v12  ;;  %v739_v16 = vand.u32 2147483647, %v2981_v13  ;;  %v742_v17 = vand.u32 2139095040, %v2981_v13  ;;  %v3723_v3 = vmov 1326507024  }
 0x2aa   :  { %v2986_v19 = vsel %vm572_vm6, %v573_v15, %v571_v14  ;;  %vm579_vm5 = vcmp.eq.f32.partialorder %v2975_v10, 0.0 }
 0x2ab   :  { %v743_v18 = vshrl.u32 %v742_v17, 23  ;;  %v746_v21 = vand.u32 8388607, %v739_v16  ;;  %v2992_v23 = vmul.f32 %v2973_v7, %v2986_v19 }
 0x2ad   :  { %v1870_v20 = vadd.s32 4294967169, %v743_v18  ;;  %v846_v26 = vand.u32 2139095040, %v2992_v23  ;;  %v747_v27 = vor.u32 8388608, %v746_v21 }
 0x2af   :  { %v749_v25 = vadd.s32 1, %v1870_v20  ;;  %v847_v33 = vshrl.u32 %v846_v26, 23  ;;  %v2996_v41 = vshll.u32 %v747_v27, 8  ;;  %v3722_v27 = vand.u32 2147483647, %v2992_v23 }
 0x2b1   :  { %vm750_vm7 = vcmp.gt.s32.totalorder %v749_v25, 0  ;;  %v1874_v45 = vadd.s32 4294967169, %v847_v33  ;;  %v3010_v33 = vpop.xlane.xlu1 %559 }
 0x2b2   :  { %v751_v32 = vsel %vm750_vm7, %v749_v25, 0  ;;  %2073 = vrsqrt.f32 %v3010_v33  ;;  %vm584_vm7 = vcmp.eq.f32.partialorder %v3010_v33, inf }
 0x2b3   :  { %v753_v34 = vand.u32 31, %v751_v32  ;;  %v752_v36 = vshrl.u32 %v751_v32, 5  ;;  %v853_v14 = vadd.s32 1, %v1874_v45 }
 0x2b5   :  { %v754_v40 = vsub.s32 32, %v753_v34  ;;  %v756_v47 = vshll.u32 %v3730_v46, %v753_v34  ;;  %v759_v50 = vshll.u32 %v3734_v48, %v753_v34  ;;  %v762_v52 = vshll.u32 %v3732_v51, %v753_v34 }
 0x2b6   :  { %v765_v59 = vshll.u32 %v3727_v55, %v753_v34  ;;  %v768_v0 = vshll.u32 %v3725_v63, %v753_v34  ;;  %vm771_vm8 = vcmp.lt.s32.totalorder %v752_v36, 1  ;;  %vm773_vm9 = vcmp.lt.s32.totalorder %v752_v36, 3 }
 0x2b7   :  { %v757_v60 = vshrl.u32 %v3734_v48, %v754_v40  ;;  %v760_v61 = vshrl.u32 %v3732_v51, %v754_v40  ;;  %v763_v62 = vshrl.u32 %v3727_v55, %v754_v40  ;;  %v755_v1 = vshrl.u32 %v3730_v46, %v754_v40 }
 0x2b8   :  { %v766_v2 = vshrl.u32 %v3725_v63, %v754_v40  ;;  %v769_v4 = vshrl.u32 %v3723_v3, %v754_v40  ;;  %vm774_vm10 = vcmp.lt.s32.totalorder %v752_v36, 4  ;;  %vm772_vm11 = vcmp.lt.s32.totalorder %v752_v36, 2 }
 0x2b9   :  { %v758_v5 = vor.u32 %v757_v60, %v756_v47  ;;  %v761_v6 = vor.u32 %v760_v61, %v759_v50  ;;  %v764_v8 = vor.u32 %v763_v62, %v762_v52  ;;  %vm854_vm12 = vcmp.gt.s32.totalorder %v853_v14, 0 }
 0x2ba   :  { %v767_v9 = vor.u32 %v766_v2, %v765_v59  ;;  %v770_v12 = vor.u32 %v769_v4, %v768_v0  ;;  %v855_v50 = vsel %vm854_vm12, %v853_v14, 0  ;;  %v580_v36 = vand.u32 2147483648, %v2975_v10 }
 0x2bb   :  { %v775_v15 = vsel %vm771_vm8, %v755_v1, %v758_v5  ;;  %v776_v17 = vsel %vm774_vm10, %v764_v8, 2102212464  ;;  %v779_v18 = vsel %vm771_vm8, %v758_v5, %v761_v6  ;;  %v783_v20 = vsel %vm771_vm8, %v761_v6, %v764_v8 }
 0x2bc   :  { %v777_v21 = vsel %vm773_vm9, %v761_v6, %v776_v17  ;;  %v780_v25 = vsel %vm774_vm10, %v767_v9, 920167782  ;;  %v784_v26 = vsel %vm774_vm10, %v770_v12, 1326507024  ;;  %v857_v61 = vand.u32 31, %v855_v50 }
 0x2bd   :  { %v781_v29 = vsel %vm773_vm9, %v764_v8, %v780_v25  ;;  %v785_v32 = vsel %vm773_vm9, %v767_v9, %v784_v26  ;;  %v778_v34 = vsel %vm772_vm11, %v775_v15, %v777_v21  ;;  %v578_v62 = vsel %vm577_vm13, %v2975_v10, %v576_v37 }
 0x2be   :  { %v782_v40 = vsel %vm772_vm11, %v779_v18, %v781_v29  ;;  %v786_v47 = vsel %vm772_vm11, %v783_v20, %v785_v32  ;;  %v3026_v0 = vmul.f32 0.1, %v2977_v11  ;;  %v850_v1 = vand.u32 8388607, %v3722_v27 }
 0x2bf   :  { %v3013_v45 = vmul.u32.u64.low %v2996_v41, %v786_v47  ;;  %v3014_v52 = vmul.u32.u64.high %v2996_v41, %v786_v47, %v3013_v45  ;;  %v3017_v59 = vmul.u32.u64.low %v2996_v41, %v782_v40  ;;  %v3018_v60 = vmul.u32.u64.high %v2996_v41, %v782_v40, %v3017_v59 }
 0x2c0   :  { %v794_v2 = vmul.u32 %v2996_v41, %v778_v34  ;;  %v856_v4 = vshrl.u32 %v855_v50, 5  ;;  %v858_v5 = vsub.s32 32, %v857_v61  ;;  %v860_v6 = vshll.u32 %v3730_v46, %v857_v61 }
 0x2c1   :  { %vm796_vm14 = vc.u32 %v3014_v52, %v3017_v59  ;;  %v797_v8 = vadd.s32 1, %v3018_v60  ;;  %v863_v37 = vshll.u32 %v3734_v48, %v857_v61  ;;  %v866_v9 = vshll.u32 %v3732_v51, %v857_v61 }
 0x2c2   :  { %v861_v12 = vshrl.u32 %v3734_v48, %v858_v5  ;;  %v864_v14 = vshrl.u32 %v3732_v51, %v858_v5  ;;  %v867_v15 = vshrl.u32 %v3727_v55, %v858_v5  ;;  %v869_v41 = vshll.u32 %v3727_v55, %v857_v61 }
 0x2c3   :  { %v798_v17 = vsel %vm796_vm14, %v797_v8, %v3018_v60  ;;  %v870_v18 = vshrl.u32 %v3725_v63, %v858_v5  ;;  %v872_v20 = vshll.u32 %v3725_v63, %v857_v61  ;;  %v873_v21 = vshrl.u32 %v3723_v3, %v858_v5 }
 0x2c4   :  { %v799_v25 = vadd.s32 %v798_v17, %v794_v2  ;;  %v862_v26 = vor.u32 %v861_v12, %v860_v6  ;;  %v865_v29 = vor.u32 %v864_v14, %v863_v37  ;;  %v868_v32 = vor.u32 %v867_v15, %v866_v9  ;;  %v2074_v6 = vpop.eup %2073 }
 0x2c5   :  { %v851_v34 = vor.u32 8388608, %v850_v1  ;;  %v859_v40 = vshrl.u32 %v3730_v46, %v858_v5  ;;  %v871_v47 = vor.u32 %v870_v18, %v869_v41  ;;  %v874_v50 = vor.u32 %v873_v21, %v872_v20 }
 0x2c6   :  { %v800_v45 = vadd.s32 536870912, %v799_v25  ;;  %vm875_vm15 = vcmp.lt.s32.totalorder %v856_v4, 1  ;;  %vm877_vm1 = vcmp.lt.s32.totalorder %v856_v4, 3  ;;  %vm878_vm3 = vcmp.lt.s32.totalorder %v856_v4, 4 }
 0x2c7   :  { %v880_v60 = vsel %vm878_vm3, %v868_v32, 2102212464  ;;  %v883_v8 = vsel %vm875_vm15, %v862_v26, %v865_v29  ;;  %v884_v27 = vsel %vm878_vm3, %v871_v47, 920167782  ;;  %v887_v61 = vsel %vm875_vm15, %v865_v29, %v868_v32 }
 0x2c8   :  { %v3048_v3 = vshrl.u32 %v800_v45, 30  ;;  %vm876_vm4 = vcmp.lt.s32.totalorder %v856_v4, 2  ;;  %v885_v2 = vsel %vm877_vm1, %v868_v32, %v884_v27  ;;  %v888_v1 = vsel %vm878_vm3, %v874_v50, 1326507024 }
 0x2c9   :  { %v1168_v5 = vmul.f32 %v3026_v0, %v3026_v0  ;;  %v886_v37 = vsel %vm876_vm4, %v883_v8, %v885_v2  ;;  %v889_v9 = vsel %vm877_vm1, %v871_v47, %v888_v1  ;;  %v891_v12 = vshll.u32 %v851_v34, 8 }
 0x2ca   :  { %v802_v14 = vshll.u32 %v3048_v3, 30  ;;  %v879_v15 = vsel %vm875_vm15, %v859_v40, %v862_v26  ;;  %v881_v41 = vsel %vm877_vm1, %v865_v29, %v880_v60  ;;  %v890_v17 = vsel %vm876_vm4, %v887_v61, %v889_v9 }
 0x2cb   :  { %v3059_v18 = vmul.u32.u64.low %v891_v12, %v890_v17  ;;  %v3060_v27 = vmul.u32.u64.high %v891_v12, %v890_v17, %v3059_v18  ;;  %v3062_v20 = vmul.u32.u64.low %v891_v12, %v886_v37  ;;  %v3063_v21 = vmul.u32.u64.high %v891_v12, %v886_v37, %v3062_v20 }
 0x2cc   :  { %v803_v32 = vsub.s32 %v799_v25, %v802_v14  ;;  %v1172_v47 = vmul.f32 %v1168_v5, %v1168_v5  ;;  %v3067_v34 = vsel %vm579_vm5, %v580_v36, %v578_v62  ;;  %v882_v26 = vsel %vm876_vm4, %v879_v15, %v881_v41 }
 0x2cd   :  { %vm900_vm6 = vc.u32 %v3060_v27, %v3062_v20  ;;  %v901_v29 = vadd.s32 1, %v3063_v21  ;;  %v1165_v40 = vmul.f32 0.1, %v2986_v19  ;;  %v593_v45 = vmax.f32 %v2977_v11, 1e-30 }
 0x2ce   :  { %v805_v50 = vsub.s32 0, %v803_v32  ;;  %v3077_v10 = vmul.f32 %v2973_v7, %v3067_v34  ;;  %v583_v36 = vmul.f32 %v2074_v6, %v3010_v33  ;;  %v1176_v62 = vmul.f32 %v1172_v47, %v3026_v0 }
 0x2cf   :  { %v898_v4 = vmul.u32 %v891_v12, %v882_v26  ;;  %v902_v25 = vsel %vm900_vm6, %v901_v29, %v3063_v21  ;;  %v587_v61 = vand.u32 2147483648, %v3010_v33  ;;  %v1169_v1 = vmul.f32 %v1165_v40, %v1165_v40 }
 0x2d0   :  { %v1871_v60 = vmin.u32 %v805_v50, %v803_v32  ;;  %2075 = vrcp.f32 %v593_v45  ;;  %vm741_vm8 = vcmp.lt.s32.totalorder %v2981_v13, 0  ;;  %v950_v9 = vand.u32 2139095040, %v3077_v10 }
 0x2d1   :  { %v903_v2 = vadd.s32 %v902_v25, %v898_v4  ;;  %v585_v6 = vsel %vm584_vm7, %v3010_v33, %v583_v36  ;;  %vm3089_vm9 = vcmp.le.f32.partialorder %v739_v16, 0.7853982  ;;  %v1180_v14 = vmul.f32 21.0, %v1176_v62 }
 0x2d2   :  { %v807_v8 = vclz %v1871_v60  ;;  %v1200_v15 = vmul.f32 %v1168_v5, %v3026_v0  ;;  %v1188_v17 = vmul.f32 %v1172_v47, %v1168_v5  ;;  %v594_v18 = vmax.f32 %v2986_v19, 1e-30 }
 0x2d3   :  { %v904_v41 = vadd.s32 536870912, %v903_v2  ;;  %v951_v21 = vshrl.u32 %v950_v9, 23  ;;  %vm586_vm11 = vcmp.eq.f32.partialorder %v3010_v33, 0.0  ;;  %v825_v26 = vsub.s32 4, %v3048_v3 }
 0x2d4   :  { %v1872_v37 = vadd.s32 4294967294, %v807_v8  ;;  %v3099_v16 = vmul.f32 %v1169_v1, %v1169_v1  ;;  %v795_v45 = vadd.s32 %v3017_v59, %v3014_v52  ;;  %v1184_v62 = vsub.f32 1.0, %v1180_v14 }
 0x2d5   :  { %v3097_v29 = vshrl.u32 %v904_v41, 30  ;;  %v1878_v36 = vadd.s32 4294967169, %v951_v21  ;;  %v1204_v5 = vmul.f32 %v1200_v15, %v1172_v47  ;;  %v3729_v25 = vand.u32 2147483647, %v3077_v10 }
 0x2d6   :  { %vm1873_vm10 = vcmp.lt.s32.totalorder %v1872_v37, 0  ;;  %v826_v41 = vsel %vm741_vm8, %v825_v26, %v3048_v3  ;;  %v1192_v55 = vmul.f32 35.0, %v1188_v17  ;;  %2077 = vrcp.f32 %v594_v18 }
 0x2d7   :  { %v810_v50 = vsel %vm1873_vm10, 0, %v1872_v37  ;;  %v906_v4 = vshll.u32 %v3097_v29, 30  ;;  %v957_v63 = vadd.s32 1, %v1878_v36  ;;  %v1177_v47 = vmul.f32 %v3099_v16, %v1165_v40 }
 0x2d8   :  { %v811_v60 = vsub.s32 32, %v810_v50  ;;  %v815_v0 = vsub.s32 4294967266, %v810_v50  ;;  %v812_v8 = vshll.u32 %v803_v32, %v810_v50  ;;  %v3111_v14 = vmul.f32 15.0, %v1204_v5 }
 0x2d9   :  { %v3108_v52 = vsub.s32 %v903_v2, %v906_v4  ;;  %vm958_vm12 = vcmp.gt.s32.totalorder %v957_v63, 0  ;;  %v3116_v15 = vand.u32 8388607, %v3729_v25  ;;  %v828_v2 = vsel %vm3089_vm9, 0, %v826_v41 }
 0x2da   :  { %v813_v37 = vshrl.u32 %v795_v45, %v811_v60  ;;  %v816_v9 = vadd.s32 127, %v815_v0  ;;  %v959_v50 = vsel %vm958_vm12, %v957_v63, 0  ;;  %v3118_v45 = vpop.eup %2075  ;;  %v3122_v17 = vadd.f32 %v1192_v55, %v1184_v62 }
 0x2db   :  { %v909_v32 = vsub.s32 0, %v3108_v52  ;;  %v3124_v18 = vshrl.u32 %v959_v50, 5  ;;  %v3128_v60 = vmul.f32 %v3099_v16, %v1169_v1  ;;  %v3130_v0 = vmul.f32 %v1169_v1, %v1165_v40 }
 0x2dc   :  { %v814_v59 = vor.u32 %v813_v37, %v812_v8  ;;  %v817_v21 = vshll.u32 %v816_v9, 23  ;;  %v961_v36 = vand.u32 31, %v959_v50  ;;  %v3132_v4 = vmul.f32 21.0, %v1177_v47 }
 0x2dd   :  { %v1875_v26 = vmin.u32 %v909_v32, %v3108_v52  ;;  %v3136_v8 = vsel %vm586_vm11, %v587_v61, %v585_v6  ;;  %v832_v55 = vadd.s32 3, %v828_v2  ;;  %v899_v62 = vadd.s32 %v3062_v20, %v3060_v27 }
 0x2de   :  { %v818_v3 = vor.u32 4788187, %v817_v21  ;;  %v821_v63 = vcvt.s32.f32 %v814_v59  ;;  %v955_v9 = vor.u32 8388608, %v3116_v15  ;;  %v962_v21 = vsub.s32 32, %v961_v36 }
 0x2df   :  { %v911_v37 = vclz %v1875_v26  ;;  %v964_v40 = vshll.u32 %v3730_v46, %v961_v36  ;;  %vm979_vm13 = vcmp.lt.s32.totalorder %v3124_v18, 1  ;;  %v967_v59 = vshll.u32 %v3734_v48, %v961_v36 }
 0x2e0   :  { %v819_v5 = vand.u32 2147483647, %v818_v3  ;;  %v970_v33 = vshll.u32 %v3732_v51, %v961_v36  ;;  %v3752_v61 = vmov 2102212464   ;;  %vm980_vm14 = vcmp.lt.s32.totalorder %v3124_v18, 2  ;;  %v3150_v50 = vpop.eup %2077 }
 0x2e1   :  { %v1876_v1 = vadd.s32 4294967294, %v911_v37  ;;  %v973_v6 = vshll.u32 %v3752_v61, %v961_v36  ;;  %v965_v27 = vshrl.u32 %v3734_v48, %v962_v21  ;;  %v968_v20 = vshrl.u32 %v3732_v51, %v962_v21 }
 0x2e2   :  { %v822_v41 = vmul.f32 %v821_v63, %v819_v5  ;;  %v3753_v32 = vmov 920167782   ;;  %v971_v3 = vshrl.u32 %v3752_v61, %v962_v21  ;;  %v3754_v26 = vmov 1326507024  }
 0x2e3   :  { %v976_v15 = vshll.u32 %v3753_v32, %v961_v36  ;;  %vm1877_vm15 = vcmp.lt.s32.totalorder %v1876_v1, 0  ;;  %v974_v2 = vshrl.u32 %v3753_v32, %v962_v21  ;;  %v977_v5 = vshrl.u32 %v3754_v26, %v962_v21 }
 0x2e4   :  { %v823_v47 = vxor.u32 2147483648, %v822_v41  ;;  %v914_v37 = vsel %vm1877_vm15, 0, %v1876_v1  ;;  %v966_v25 = vor.u32 %v965_v27, %v964_v40  ;;  %v969_v46 = vor.u32 %v968_v20, %v967_v59 }
 0x2e5   :  { %v915_v36 = vsub.s32 32, %v914_v37  ;;  %v916_v48 = vshll.u32 %v3108_v52, %v914_v37  ;;  %v919_v54 = vsub.s32 4294967266, %v914_v37  ;;  %v972_v39 = vor.u32 %v971_v3, %v970_v33 }
 0x2e6   :  { %v824_v63 = vsel %vm741_vm8, %v823_v47, %v822_v41  ;;  %v975_v57 = vor.u32 %v974_v2, %v973_v6  ;;  %v978_v53 = vor.u32 %v977_v5, %v976_v15  ;;  %vm982_vm1 = vcmp.lt.s32.totalorder %v3124_v18, 4 }
 0x2e7   :  { %v827_v51 = vsel %vm3089_vm9, %v2981_v13, %v824_v63  ;;  %v917_v43 = vshrl.u32 %v899_v62, %v915_v36  ;;  %v920_v38 = vadd.s32 127, %v919_v54  ;;  %vm981_vm3 = vcmp.lt.s32.totalorder %v3124_v18, 3 }
 0x2e8   :  { %2079 = vcosq.f32 %v827_v51  ;;  %v984_v41 = vsel %vm982_vm1, %v972_v39, 2102212464  ;;  %v987_v12 = vsel %vm979_vm13, %v966_v25, %v969_v46  ;;  %v988_v40 = vsel %vm982_vm1, %v975_v57, 920167782 }
 0x2e9   :  { %2081 = vsinq.f32 %v827_v51  ;;  %v918_v1 = vor.u32 %v917_v43, %v916_v48  ;;  %v921_v59 = vshll.u32 %v920_v38, 23  ;;  %v3755_v52 = vmov 683565275  }
 0x2ea   :  { %v963_v47 = vshrl.u32 %v3755_v52, %v962_v21  ;;  %v989_v33 = vsel %vm981_vm3, %v972_v39, %v988_v40  ;;  %v991_v54 = vsel %vm979_vm13, %v969_v46, %v972_v39  ;;  %v992_v62 = vsel %vm982_vm1, %v978_v53, 1326507024 }
 0x2eb   :  { %v990_v51 = vsel %vm980_vm14, %v987_v12, %v989_v33  ;;  %v995_v6 = vshll.u32 %v955_v9, 8  ;;  %vm1216_vm4 = vcmp.lt.f32.partialorder %v2977_v11, 10.0  ;;  %v922_v27 = vor.u32 4788187, %v921_v59 }
 0x2ec   :  { %v983_v43 = vsel %vm979_vm13, %v963_v47, %v966_v25  ;;  %v985_v38 = vsel %vm981_vm3, %v969_v46, %v984_v41  ;;  %v993_v48 = vsel %vm981_vm3, %v975_v57, %v992_v62  ;;  %v929_v21 = vsub.s32 4, %v3097_v29 }
 0x2ed   :  { %v994_v20 = vsel %vm980_vm14, %v991_v54, %v993_v48  ;;  %v3182_v39 = vmul.u32.u64.low %v995_v6, %v990_v51  ;;  %v3183_v53 = vmul.u32.u64.high %v995_v6, %v990_v51, %v3182_v39  ;;  %vm831_vm5 = vweird.f32 %v2981_v13 }
 0x2ee   :  { %v923_v9 = vand.u32 2147483647, %v922_v27  ;;  %v925_v15 = vcvt.s32.f32 %v918_v1  ;;  %v3187_v25 = vmul.u32.u64.low %v995_v6, %v994_v20  ;;  %v3188_v3 = vmul.u32.u64.high %v995_v6, %v994_v20, %v3187_v25 }
 0x2ef   :  { %v833_v46 = vand.u32 3, %v832_v55  ;;  %v3756_v2 = vand.u32 2147483647, %v2992_v23  ;;  %vm845_vm7 = vcmp.lt.s32.totalorder %v2992_v23, 0  ;;  %v986_v5 = vsel %vm980_vm14, %v983_v43, %v985_v38 }
 0x2f0   :  { %vm589_vm8 = vcmp.gt.f32.partialorder %v2977_v11, 0.0  ;;  %v1212_v63 = vsub.f32 %v3122_v17, %v3111_v14  ;;  %v926_v37 = vmul.f32 %v925_v15, %v923_v9  ;;  %v1185_v36 = vsub.f32 1.0, %v3132_v4 }
 0x2f1   :  { %vm3192_vm6 = vcmp.le.f32.partialorder %v3756_v2, 0.7853982  ;;  %v3205_v55 = vmul.f32 %v2973_v7, %v3136_v8  ;;  %v930_v12 = vsel %vm845_vm7, %v929_v21, %v3097_v29  ;;  %v1193_v18 = vmul.f32 35.0, %v3128_v60 }
 0x2f2   :  { %v2080_v41 = vpop.eup %2079  ;;  %v1205_v40 = vmul.f32 %v3130_v0, %v3099_v16  ;;  %v1005_v1 = vadd.s32 1, %v3183_v53  ;;  %v927_v59 = vxor.u32 2147483648, %v926_v37  ;;  %v1002_v4 = vmul.u32 %v995_v6, %v986_v5 }
 0x2f3   :  { %v2082_v14 = vpop.eup %2081  ;;  %v839_v17 = vxor.u32 2147483648, %v2080_v41  ;;  %vm1004_vm9 = vc.u32 %v3188_v3, %v3182_v39  ;;  %vm835_vm10 = vcmp.eq.s32.totalorder %v833_v46, 0  ;;  %vm838_vm11 = vcmp.eq.s32.totalorder %v833_v46, 2 }
 0x2f4   :  { %v836_v7 = vxor.u32 2147483648, %v2082_v14  ;;  %v1006_v47 = vsel %vm1004_vm9, %v1005_v1, %v3183_v53  ;;  %v928_v60 = vsel %vm845_vm7, %v927_v59, %v926_v37  ;;  %v1054_v16 = vand.u32 2139095040, %v3205_v55 }
 0x2f5   :  { %v840_v29 = vsel %vm838_vm11, %v839_v17, %v2082_v14  ;;  %v1007_v33 = vadd.s32 %v1006_v47, %v1002_v4  ;;  %vm834_vm12 = vcmp.lt.s32.totalorder %v833_v46, 2  ;;  %v931_v51 = vsel %vm3192_vm6, %v2992_v23, %v928_v60 }
 0x2f6   :  { %v837_v0 = vsel %vm835_vm10, %v2080_v41, %v836_v7  ;;  %v932_v54 = vsel %vm3192_vm6, 0, %v930_v12  ;;  %2083 = vcosq.f32 %v931_v51  ;;  %v1055_v27 = vshrl.u32 %v1054_v16, 23 }
 0x2f7   :  { %v841_v62 = vsel %vm834_vm12, %v837_v0, %v840_v29  ;;  %v1008_v6 = vadd.s32 536870912, %v1007_v33  ;;  %v2586_v38 = vmov 0.0   ;;  %2085 = vsinq.f32 %v931_v51 }
 0x2f8   :  { %v842_v43 = vsel %vm831_vm5, nan, %v841_v62  ;;  %v1886_v48 = vsel %vm1216_vm4, 1.0, %v2586_v38  ;;  %v1051_v21 = vand.u32 2147483647, %v3205_v55  ;;  %v1197_v53 = vadd.f32 %v1193_v18, %v1185_v36 }
 0x2f9   :  { %v1155_v20 = vmul.f32 0.4472136, %v842_v43  ;;  %v3231_v9 = vshrl.u32 %v1008_v6, 30  ;;  %v1882_v15 = vadd.s32 4294967169, %v1055_v27  ;;  %v3236_v25 = vsel %vm589_vm8, %v3118_v45, 0.0 }
 0x2fa   :  { %v1228_v13 = vmul.f32 %v1886_v48, %v1212_v63  ;;  %v936_v46 = vadd.s32 3, %v932_v54  ;;  %v1209_v57 = vmul.f32 15.0, %v1205_v40  ;;  %vm1268_vm13 = vcmask 64512  }
 0x2fb   :  { %v1159_v2 = vmul.f32 %v1155_v20, %v3236_v25  ;;  %v1010_v5 = vshll.u32 %v3231_v9, 30  ;;  %v1061_v37 = vadd.s32 1, %v1882_v15  ;;  %vm1217_vm14 = vcmp.lt.f32.partialorder %v2986_v19, 10.0 }
 0x2fc   :  { %v1058_v36 = vand.u32 8388607, %v1051_v21  ;;  %v1213_v12 = vsub.f32 %v1197_v53, %v1209_v57  ;;  %v3248_v45 = vmul.f32 0.1, %v3067_v34  ;;  %v937_v63 = vand.u32 3, %v936_v46 }
 0x2fd   :  { %v3243_v41 = vmul.f32 %v1228_v13, %v1159_v2  ;;  %v3245_v11 = vsub.s32 %v1007_v33, %v1010_v5  ;;  %vm1062_vm15 = vcmp.gt.s32.totalorder %v1061_v37, 0  ;;  %vm590_vm1 = vcmp.gt.f32.partialorder %v2986_v19, 0.0 }
 0x2fe   :  { %v1063_v1 = vsel %vm1062_vm15, %v1061_v37, 0  ;;  %vm935_vm3 = vweird.f32 %v2992_v23  ;;  %v1887_v14 = vsel %vm1217_vm14, 1.0, %v2586_v38  ;;  %v1059_v17 = vor.u32 8388608, %v1058_v36 }
 0x2ff   :  { %v1269_v18 = vsel %vm1268_vm13, %v3243_v41, 0.0  ;;  %v1013_v40 = vsub.s32 0, %v3245_v11  ;;  %v1065_v59 = vand.u32 31, %v1063_v1  ;;  %v3257_v7 = vsel %vm590_vm1, %v3150_v50, 0.0 }
 0x300   :  { %1270 = vadd.xlane.f32.xlu0 %v1269_v18  ;;  %v2084_v4 = vpop.eup %2083  ;;  %v1229_v47 = vmul.f32 %v1887_v14, %v1213_v12  ;;  %v3262_v19 = vmul.f32 %v3248_v45, %v3248_v45  ;;  %vm938_vm4 = vcmp.lt.s32.totalorder %v937_v63, 2  ;;  %vm939_vm5 = vcmp.eq.s32.totalorder %v937_v63, 0 }
 0x301   :  { %v1879_v29 = vmin.u32 %v1013_v40, %v3245_v11  ;;  %v2086_v60 = vpop.eup %2085  ;;  %v943_v33 = vxor.u32 2147483648, %v2084_v4  ;;  %v1066_v16 = vsub.s32 32, %v1065_v59  ;;  %vm942_vm6 = vcmp.eq.s32.totalorder %v937_v63, 2 }
 0x302   :  { %v940_v0 = vxor.u32 2147483648, %v2086_v60  ;;  %v1003_v51 = vadd.s32 %v3182_v39, %v3188_v3  ;;  %v1064_v62 = vshrl.u32 %v1063_v1, 5  ;;  %v3759_v6 = vmov 2475754826  }
 0x303   :  { %v1015_v54 = vclz %v1879_v29  ;;  %v944_v50 = vsel %vm942_vm6, %v943_v33, %v2086_v60  ;;  %v1069_v27 = vshrl.u32 %v3759_v6, %v1066_v16  ;;  %v3267_v43 = vshll.u32 %v1059_v17, 8 }
 0x304   :  { %v941_v48 = vsel %vm939_vm5, %v2084_v4, %v940_v0  ;;  %v1068_v53 = vshll.u32 %v3755_v52, %v1065_v59  ;;  %v3760_v15 = vmov 2131351028   ;;  %v1067_v2 = vshrl.u32 %v3755_v52, %v1066_v16 }
 0x305   :  { %v1880_v20 = vadd.s32 4294967294, %v1015_v54  ;;  %v1072_v13 = vshrl.u32 %v3760_v15, %v1066_v16  ;;  %v945_v46 = vsel %vm938_vm4, %v941_v48, %v944_v50  ;;  %v1071_v57 = vshll.u32 %v3759_v6, %v1065_v59 }
 0x306   :  { %v1075_v39 = vshrl.u32 %v3752_v61, %v1066_v16  ;;  %v946_v3 = vsel %vm935_vm3, nan, %v945_v46  ;;  %v1074_v5 = vshll.u32 %v3760_v15, %v1065_v59  ;;  %v1078_v37 = vshrl.u32 %v3753_v32, %v1066_v16 }
 0x307   :  { %vm1881_vm7 = vcmp.lt.s32.totalorder %v1880_v20, 0  ;;  %v1156_v36 = vmul.f32 0.4472136, %v946_v3  ;;  %v1070_v18 = vor.u32 %v1069_v27, %v1068_v53  ;;  %v1077_v63 = vshll.u32 %v3752_v61, %v1065_v59 }
 0x308   :  { %v1018_v12 = vsel %vm1881_vm7, 0, %v1880_v20  ;;  %v1073_v52 = vor.u32 %v1072_v13, %v1071_v57  ;;  %v1076_v14 = vor.u32 %v1075_v39, %v1074_v5  ;;  %v1080_v23 = vshll.u32 %v3753_v32, %v1065_v59 }
 0x309   :  { %v1019_v40 = vsub.s32 32, %v1018_v12  ;;  %v1023_v1 = vsub.s32 4294967266, %v1018_v12  ;;  %v1160_v17 = vmul.f32 %v1156_v36, %v3257_v7  ;;  %v1079_v4 = vor.u32 %v1078_v37, %v1077_v63 }
 0x30a   :  { %v1081_v29 = vshrl.u32 %v3754_v26, %v1066_v16  ;;  %v1020_v60 = vshll.u32 %v3245_v11, %v1018_v12  ;;  %vm1083_vm8 = vcmp.lt.s32.totalorder %v1064_v62, 1  ;;  %vm1084_vm9 = vcmp.lt.s32.totalorder %v1064_v62, 2 }
 0x30b   :  { %v1021_v33 = vshrl.u32 %v1003_v51, %v1019_v40  ;;  %v1024_v0 = vadd.s32 127, %v1023_v1  ;;  %v3284_v54 = vmul.f32 %v1229_v47, %v1160_v17  ;;  %vm1086_vm10 = vcmp.lt.s32.totalorder %v1064_v62, 4 }
 0x30c   :  { %v1082_v50 = vor.u32 %v1081_v29, %v1080_v23  ;;  %v1088_v27 = vsel %vm1086_vm10, %v1076_v14, 2102212464  ;;  %v1091_v48 = vsel %vm1083_vm8, %v1070_v18, %v1073_v52  ;;  %vm1085_vm11 = vcmp.lt.s32.totalorder %v1064_v62, 3 }
 0x30d   :  { %v1022_v61 = vor.u32 %v1021_v33, %v1020_v60  ;;  %v1025_v6 = vshll.u32 %v1024_v0, 23  ;;  %v1272_v20 = vsel %vm1268_vm13, %v3284_v54, 0.0  ;;  %v1092_v32 = vsel %vm1086_vm10, %v1079_v4, 920167782 }
 0x30e   :  { %v1095_v26 = vsel %vm1083_vm8, %v1073_v52, %v1076_v14  ;;  %1273 = vadd.xlane.f32.xlu1 %v1272_v20  ;;  %v1087_v59 = vsel %vm1083_vm8, %v1067_v2, %v1070_v18  ;;  %v1093_v16 = vsel %vm1085_vm11, %v1076_v14, %v1092_v32  ;;  %v1096_v51 = vsel %vm1086_vm10, %v1082_v50, 1326507024 }
 0x30f   :  { %v1026_v11 = vor.u32 4788187, %v1025_v6  ;;  %v1029_v47 = vcvt.s32.f32 %v1022_v61  ;;  %v1089_v53 = vsel %vm1085_vm11, %v1073_v52, %v1088_v27  ;;  %v1094_v15 = vsel %vm1084_vm9, %v1091_v48, %v1093_v16  ;;  %v262_v16 = vpop.xlane.xlu0 %261 }
 0x310   :  { %v1097_v13 = vsel %vm1085_vm11, %v1079_v4, %v1096_v51  ;;  %v3291_v39 = vmul.u32.u64.low %v3267_v43, %v1094_v15  ;;  %v3292_v3 = vmul.u32.u64.high %v3267_v43, %v1094_v15, %v3291_v39  ;;  %v1033_v36 = vsub.s32 4, %v3231_v9 }
 0x311   :  { %v1027_v46 = vand.u32 2147483647, %v1026_v11  ;;  %v1098_v57 = vsel %vm1084_vm9, %v1095_v26, %v1097_v13  ;;  %v1174_v12 = vmul.f32 %v3262_v19, %v3262_v19  ;;  %v1090_v18 = vsel %vm1084_vm9, %v1087_v59, %v1089_v53 }
 0x312   :  { %v3296_v5 = vmul.u32.u64.low %v3267_v43, %v1098_v57  ;;  %v3297_v37 = vmul.u32.u64.high %v3267_v43, %v1098_v57, %v3296_v5  ;;  %v1109_v40 = vadd.s32 1, %v3292_v3  ;;  %v3761_v1 = vand.u32 2147483647, %v3077_v10 }
 0x313   :  { %v1030_v2 = vmul.f32 %v1029_v47, %v1027_v46  ;;  %vm949_vm14 = vcmp.lt.s32.totalorder %v3077_v10, 0  ;;  %v1106_v14 = vmul.u32 %v3267_v43, %v1090_v18  ;;  %v1178_v4 = vmul.f32 %v1174_v12, %v3248_v45 }
 0x314   :  { %vm3306_vm12 = vcmp.le.f32.partialorder %v3761_v1, 0.7853982  ;;  %vm1108_vm15 = vc.u32 %v3297_v37, %v3291_v39  ;;  %v1034_v62 = vsel %vm949_vm14, %v1033_v36, %v3231_v9  ;;  %v595_v33 = vmax.f32 %v3067_v34, 1e-30 }
 0x315   :  { %v1031_v63 = vxor.u32 2147483648, %v1030_v2  ;;  %v1110_v23 = vsel %vm1108_vm15, %v1109_v40, %v3292_v3  ;;  %v1036_v43 = vsel %vm3306_vm12, 0, %v1034_v62  ;;  %v1182_v50 = vmul.f32 21.0, %v1178_v4 }
 0x316   :  { %v1111_v60 = vadd.s32 %v1110_v23, %v1106_v14  ;;  %v1040_v9 = vadd.s32 3, %v1036_v43  ;;  %v1190_v6 = vmul.f32 %v1174_v12, %v3262_v19  ;;  %v1202_v27 = vmul.f32 %v3262_v19, %v3248_v45 }
 0x317   :  { %v1032_v17 = vsel %vm949_vm14, %v1031_v63, %v1030_v2  ;;  %v1186_v20 = vsub.f32 1.0, %v1182_v50  ;;  %v267_v57 = vmul.f32 0.03125, %v262_v16  ;;  %vm1218_vm5 = vcmp.lt.f32.partialorder %v3067_v34, 10.0 }
 0x318   :  { %v1035_v29 = vsel %vm3306_vm12, %v3077_v10, %v1032_v17  ;;  %v1112_v0 = vadd.s32 536870912, %v1111_v60  ;;  %v1041_v26 = vand.u32 3, %v1040_v9  ;;  %v1194_v11 = vmul.f32 35.0, %v1190_v6 }
 0x319   :  { %2087 = vcosq.f32 %v1035_v29  ;;  %v1206_v59 = vmul.f32 %v1202_v27, %v1174_v12  ;;  %vm1039_vm6 = vweird.f32 %v3077_v10  ;;  %v3332_v40 = vsub.f32 %v2963_v58, %v267_v57 }
 0x31a   :  { %2089 = vsinq.f32 %v1035_v29  ;;  %v3323_v61 = vshrl.u32 %v1112_v0, 30  ;;  %v1198_v53 = vadd.f32 %v1194_v11, %v1186_v20  ;;  %vm1046_vm1 = vcmp.eq.s32.totalorder %v1041_v26, 2 }
 0x31b   :  { %2091 = vrcp.f32 %v595_v33  ;;  %v1210_v5 = vmul.f32 15.0, %v1206_v59  ;;  %vm1043_vm3 = vcmp.eq.s32.totalorder %v1041_v26, 0  ;;  %vm1042_vm4 = vcmp.lt.s32.totalorder %v1041_v26, 2 }
 0x31c   :  { %v1114_v48 = vshll.u32 %v3323_v61, 30  ;;  %vm591_vm7 = vcmp.gt.f32.partialorder %v3067_v34, 0.0  ;;  %v1888_v14 = vsel %vm1218_vm5, 1.0, %v2586_v38  ;;  %v1107_v10 = vadd.s32 %v3291_v39, %v3297_v37 }
 0x31d   :  { %v1214_v36 = vsub.f32 %v1198_v53, %v1210_v5  ;;  %v271_v58 = vmul.f32 %v3332_v40, %v3332_v40  ;;  %v1167_v50 = vmul.f32 0.1, %v3136_v8  ;;  %vm1053_vm9 = vcmp.lt.s32.totalorder %v3205_v55, 0 }
 0x31e   :  { %v1115_v32 = vsub.s32 %v1111_v60, %v1114_v48  ;;  %vm1052_vm10 = vcmp.le.f32.partialorder %v1051_v21, 0.7853982  ;;  %vm1143_vm15 = vweird.f32 %v3205_v55 }
 0x31f   :  { %v1230_v62 = vmul.f32 %v1888_v14, %v1214_v36  ;;  %v273_v39 = vsel %vm259_vm2, %v271_v58, 0.0  ;;  %v1171_v37 = vmul.f32 %v1167_v50, %v1167_v50 }
 0x320   :  { %v1117_v51 = vsub.s32 0, %v1115_v32 }
 0x321   :  { %v1175_v59 = vmul.f32 %v1171_v37, %v1171_v37 }
 0x322   :  { %v1883_v46 = vmin.u32 %v1117_v51, %v1115_v32 }
 0x323   :  { %v2088_v47 = vpop.eup %2087  ;;  %v1191_v5 = vmul.f32 %v1175_v59, %v1171_v37 }
 0x324   :  { %v2090_v15 = vpop.eup %2089  ;;  %v1047_v13 = vxor.u32 2147483648, %v2088_v47  ;;  %v1119_v19 = vclz %v1883_v46 }
 0x325   :  { %v1044_v3 = vxor.u32 2147483648, %v2090_v15  ;;  %v2092_v12 = vpop.eup %2091  ;;  %v1195_v36 = vmul.f32 35.0, %v1191_v5 }
 0x326   :  { %v1048_v45 = vsel %vm1046_vm1, %v1047_v13, %v2090_v15  ;;  %v1884_v63 = vadd.s32 4294967294, %v1119_v19  ;;  %v3336_v17 = vsel %vm591_vm7, %v2092_v12, 0.0  ;;  %v1179_v15 = vmul.f32 %v1175_v59, %v1167_v50 }
 0x327   :  { %v1045_v2 = vsel %vm1043_vm3, %v2088_v47, %v1044_v3  ;;  %v596_v13 = vmax.f32 %v3136_v8, 1e-30  ;;  %vm1219_vm1 = vcmp.lt.f32.partialorder %v3136_v8, 10.0  ;;  %vm592_vm3 = vcmp.gt.f32.partialorder %v3136_v8, 0.0  ;;  %v253_v8 = vld [vmem:[#allocation25 + $0x8] sm:$0xff] }
 0x328   :  { %v1049_v18 = vsel %vm1042_vm4, %v1045_v2, %v1048_v45  ;;  %vm1885_vm8 = vcmp.lt.s32.totalorder %v1884_v63, 0  ;;  %v1183_v57 = vmul.f32 21.0, %v1179_v15  ;;  %v1203_v45 = vmul.f32 %v1171_v37, %v1167_v50 }
 0x329   :  { %v1050_v1 = vsel %vm1039_vm6, nan, %v1049_v18  ;;  %v1122_v4 = vsel %vm1885_vm8, 0, %v1884_v63  ;;  %v265_v18 = vpop.xlane.xlu1 %264  ;;  %vm1354_vm4 = vcmask 7168  }
 0x32a   :  { %v1157_v52 = vmul.f32 0.4472136, %v1050_v1  ;;  %v1123_v29 = vsub.s32 32, %v1122_v4  ;;  %v1127_v60 = vsub.s32 4294967266, %v1122_v4  ;;  %v1124_v34 = vshll.u32 %v1115_v32, %v1122_v4 }
 0x32b   :  { %v1137_v32 = vsub.s32 4, %v3323_v61  ;;  %v1187_v19 = vsub.f32 1.0, %v1183_v57  ;;  %v1207_v21 = vmul.f32 %v1203_v45, %v1175_v59  ;;  %v268_v14 = vmul.f32 0.03125, %v265_v18  ;;  %v1856_v18 = vld [vmem:[#allocation23] ss:$0 sm:$0xff] }
 0x32c   :  { %v1161_v23 = vmul.f32 %v1157_v52, %v3336_v17  ;;  %v1125_v43 = vshrl.u32 %v1107_v10, %v1123_v29  ;;  %v1128_v0 = vadd.s32 127, %v1127_v60 }
 0x32d   :  { %v1138_v47 = vsel %vm1053_vm9, %v1137_v32, %v3323_v61  ;;  %v1199_v1 = vadd.f32 %v1195_v36, %v1187_v19  ;;  %v1211_v4 = vmul.f32 15.0, %v1207_v21  ;;  %v255_v32 = vld [vmem:[#allocation25 + $0x18] sm:$0xff] }
 0x32e   :  { %v3343_v33 = vmul.f32 %v1230_v62, %v1161_v23  ;;  %v1126_v6 = vor.u32 %v1125_v43, %v1124_v34  ;;  %v1129_v27 = vshll.u32 %v1128_v0, 23  ;;  %v1140_v46 = vsel %vm1052_vm10, 0, %v1138_v47  ;;  %v2167_v34 = vld [vmem:[#allocation5 + $0x8] sm:$0xff] }
 0x32f   :  { %v1144_v3 = vadd.s32 3, %v1140_v46  ;;  %v1215_v60 = vsub.f32 %v1199_v1, %v1211_v4  ;;  %v3358_v43 = vsub.f32 %v2167_v34, %v268_v14  ;;  %v3396_v14 = vmul.f32 %v3336_v17, %v2946_v49 }
 0x330   :  { %v1275_v9 = vsel %vm1268_vm13, %v3343_v33, 0.0  ;;  %v1130_v48 = vor.u32 4788187, %v1129_v27  ;;  %v1133_v26 = vcvt.s32.f32 %v1126_v6 }
 0x331   :  { %1276 = vadd.xlane.f32.xlu0 %v1275_v9  ;;  %v1145_v2 = vand.u32 3, %v1144_v3  ;;  %v1889_v9 = vsel %vm1219_vm1, 1.0, %v2586_v38 }
 0x332   :  { %v1131_v20 = vand.u32 2147483647, %v1130_v48  ;;  %v1231_v27 = vmul.f32 %v1889_v9, %v1215_v60 }
 0x333   :  { %vm1150_vm11 = vcmp.eq.s32.totalorder %v1145_v2, 2  ;;  %vm1147_vm12 = vcmp.eq.s32.totalorder %v1145_v2, 0  ;;  %vm1146_vm14 = vcmp.lt.s32.totalorder %v1145_v2, 2 }
 0x334   :  { %v1134_v11 = vmul.f32 %v1133_v26, %v1131_v20  ;;  %v252_v20 = vld [vmem:[#allocation25] sm:$0xff]  ;;  %v254_v26 = vld [vmem:[#allocation25 + $0x10] sm:$0xff] }
 0x335   :  { %274 = vadd.xlane.f32.xlu0 %v273_v39  ;;  %v2004_v59 = vpack.c.bf16 %v255_v32, %v254_v26 }
 0x336   :  { %v1135_v16 = vxor.u32 2147483648, %v1134_v11 }
 0x338   :  { %v1136_v51 = vsel %vm1053_vm9, %v1135_v16, %v1134_v11  ;;  %v2000_v11 = vpack.c.bf16 %v253_v8, %v252_v20 }
 0x339   :  { %v1139_v53 = vsel %vm1052_vm10, %v3205_v55, %v1136_v51  ;;  %v272_v55 = vmul.f32 %v3358_v43, %v3358_v43 }
 0x33a   :  { %2093 = vcosq.f32 %v1139_v53  ;;  %2001 = vmatprep.subr.bf16.mxu0 %v2000_v11 }
 0x33b   :  { %2095 = vsinq.f32 %v1139_v53  ;;  %v276_v37 = vsel %vm259_vm2, %v272_v55, 0.0  ;;  %2003 = vmatpush3.bf16.msra.mxu0 %v2000_v11 }
 0x33c   :  { %2097 = vrcp.f32 %v596_v13  ;;  %2005 = vmatprep.subr.bf16.mxu0 %v2004_v59 }
 0x33f   :  { %2007 = vmatpush3.bf16.msra.mxu0 %v2004_v59 }
 0x344   :  { %v2094_v12 = vpop.eup %2093 }
 0x345   :  { %v2096_v61 = vpop.eup %2095  ;;  %v1151_v63 = vxor.u32 2147483648, %v2094_v12 }
 0x346   :  { %v1148_v52 = vxor.u32 2147483648, %v2096_v61  ;;  %v2098_v10 = vpop.eup %2097 }
 0x347   :  { %v1152_v62 = vsel %vm1150_vm11, %v1151_v63, %v2096_v61  ;;  %v3361_v50 = vsel %vm592_vm3, %v2098_v10, 0.0  ;;  %v1857_v63 = vld [vmem:[#allocation22] ss:$0 sm:$0xff] }
 0x348   :  { %v1149_v23 = vsel %vm1147_vm12, %v2094_v12, %v1148_v52 }
 0x349   :  { %v1153_v29 = vsel %vm1146_vm14, %v1149_v23, %v1152_v62 }
 0x34a   :  { %v1154_v58 = vsel %vm1143_vm15, nan, %v1153_v29 }
 0x34b   :  { %v1158_v0 = vmul.f32 0.4472136, %v1154_v58  ;;  %v3408_v58 = vmul.f32 %v3257_v7, %v2924_v31 }
 0x34d   :  { %v1162_v6 = vmul.f32 %v1158_v0, %v3361_v50  ;;  %v3416_v0 = vmul.f32 %v3361_v50, %v2942_v44  ;;  %v3420_v44 = vld [vmem:[#allocation19] ss:$0 sm:$0xff] }
 0x34f   :  { %v1235_v48 = vmul.f32 %v1231_v27, %v1162_v6  ;;  %v2589_v6 = vmov 0  }
 0x350   :  { %2065 = vset.pattern.permute.xlu0 %v2589_v6  ;;  %2066 = vset.pattern.permute.xlu1 %v2589_v6 }
 0x351   :  { %v1278_v39 = vsel %vm1268_vm13, %v1235_v48, 0.0 }
 0x352   :  { %1279 = vadd.xlane.f32.xlu1 %v1278_v39  ;;  %v3423_v39 = vld [vmem:[#allocation17] ss:$0 sm:$0xff] }
 0x356   :  { %277 = vadd.xlane.f32.xlu1 %v276_v37 }
 0x38d   :  { %v1271_v38 = vpop.xlane.xlu0 %1270 }
 0x38e   :  { %v1282_v16 = vmul.f32 0.125, %v1271_v38 }
 0x390   :  { %v3370_v51 = vsub.f32 %v3243_v41, %v1282_v16 }
 0x392   :  { %v1290_v47 = vmul.f32 %v3370_v51, %v3370_v51 }
 0x394   :  { %v1294_v53 = vsel %vm1268_vm13, %v1290_v47, 0.0 }
 0x395   :  { %1295 = vadd.xlane.f32.xlu0 %v1294_v53 }
 0x39b   :  { %v1274_v15 = vpop.xlane.xlu1 %1273 }
 0x39c   :  { %v1283_v13 = vmul.f32 0.125, %v1274_v15 }
 0x39e   :  { %v3376_v46 = vsub.f32 %v3284_v54, %v1283_v13 }
 0x3a0   :  { %v1291_v57 = vmul.f32 %v3376_v46, %v3376_v46 }
 0x3a2   :  { %v1297_v3 = vsel %vm1268_vm13, %v1291_v57, 0.0 }
 0x3a3   :  { %1298 = vadd.xlane.f32.xlu1 %v1297_v3 }
 0x3be   :  { %v1277_v5 = vpop.xlane.xlu0 %1276 }
 0x3bf   :  { %v1284_v41 = vmul.f32 0.125, %v1277_v5 }
 0x3c1   :  { %v3382_v45 = vsub.f32 %v3343_v33, %v1284_v41  ;;  %v3391_v33 = vmul.f32 %v3236_v25, %v2926_v35  ;;  %v1344_v41 = vmul.f32 %v3396_v14, %v3396_v14 }
 0x3c2   :  { %v275_v19 = vpop.xlane.xlu0 %274 }
 0x3c3   :  { %v279_v2 = vmul.f32 0.03125, %v275_v19  ;;  %v1292_v36 = vmul.f32 %v3382_v45, %v3382_v45 }
 0x3c5   :  { %v281_v21 = vadd.f32 1e-05, %v279_v2  ;;  %v1300_v54 = vsel %vm1268_vm13, %v1292_v36, 0.0  ;;  %v1365_v36 = vsel %vm1354_vm4, %v1344_v41, 0.0 }
 0x3c6   :  { %1301 = vadd.xlane.f32.xlu0 %v1300_v54 }
 0x3c7   :  { %2099 = vrsqrt.f32 %v281_v21 }
 0x3d1   :  { %v2100_v12 = vpop.eup %2099 }
 0x3d2   :  { %v285_v61 = vmul.f32 %v2100_v12, %v3332_v40 }
 0x3d4   :  { %v293_v1 = vmul.f32 %v1856_v18, %v285_v61 }
 0x3d6   :  { %v301_v52 = vadd.f32 %v1857_v63, %v293_v1 }
 0x3d8   :  { %1963 = vmatprep.mubr.msk.f32.mxu0 %vm259_vm2, %v301_v52 }
 0x3dc   :  { %1244 = vrot.lane.b32.xlu0 %v3391_v33, %s2587_s16 }
 0x3df   :  { %v1280_v62 = vpop.xlane.xlu1 %1279 }
 0x3e0   :  { %1248 = vrot.lane.b32.xlu0 %v3396_v14, %s2587_s16  ;;  %v1285_v40 = vmul.f32 0.125, %v1280_v62  ;;  %v1342_v62 = vmul.f32 %v3391_v33, %v3391_v33 }
 0x3e2   :  { %v3399_v4 = vsub.f32 %v1235_v48, %v1285_v40 }
 0x3e3   :  { %v278_v23 = vpop.xlane.xlu1 %277 }
 0x3e4   :  { %1260 = vrot.lane.b32.xlu0 %v3396_v14, %s2588_s0  ;;  %v280_v10 = vmul.f32 0.03125, %v278_v23  ;;  %v1293_v35 = vmul.f32 %v3399_v4, %v3399_v4 }
 0x3e6   :  { %v282_v25 = vadd.f32 1e-05, %v280_v10  ;;  %v1303_v29 = vsel %vm1268_vm13, %v1293_v35, 0.0  ;;  %v1355_v35 = vsel %vm1354_vm4, %v1342_v62, 0.0 }
 0x3e7   :  { %1304 = vadd.xlane.f32.xlu1 %v1303_v29 }
 0x3e8   :  { %2101 = vrsqrt.f32 %v282_v25  ;;  %v1343_v25 = vmul.f32 %v3408_v58, %v3408_v58 }
 0x3f2   :  { %v2102_v49 = vpop.eup %2101 }
 0x3f3   :  { %v286_v17 = vmul.f32 %v2102_v49, %v3358_v43  ;;  %v243_v43 = vld [vmem:[#allocation14] sm:$0xff] }
 0x3f4   :  { %2016 = vmatprep.subr.mxu1 %v243_v43  ;;  %1982 = vmatprep.subr.mxu0 %v243_v43 }
 0x3f5   :  { %v294_v60 = vmul.f32 %v1856_v18, %v286_v17  ;;  %2017 = vmatpush3.msra.mxu1 %v243_v43 }
 0x3f7   :  { %v302_v34 = vadd.f32 %v1857_v63, %v294_v60 }
 0x3f8   :  { %1246 = vrot.lane.b32.xlu1 %v3408_v58, %s2587_s16 }
 0x3f9   :  { %1964 = vmatmul.mubr.msk.f32.vlgmr.msra.gmra.mrb[0].mxu0 %vm259_vm2, %v302_v34 }
 0x3fa   :  { %1983 = vmatpush3.msra.mxu0 %v243_v43 }
 0x3fc   :  { %1256 = vrot.lane.b32.xlu1 %v3391_v33, %s2588_s0 }
 0x400   :  { %1258 = vrot.lane.b32.xlu1 %v3408_v58, %s2588_s0 }
 0x404   :  { %1250 = vrot.lane.b32.xlu1 %v3416_v0, %s2587_s16 }
 0x408   :  { %1262 = vrot.lane.b32.xlu1 %v3416_v0, %s2588_s0 }
 0x422   :  { %v1296_v31 = vpop.xlane.xlu0 %1295 }
 0x423   :  { %v1306_v7 = vmul.f32 0.125, %v1296_v31 }
 0x425   :  { %v1310_v9 = vadd.f32 1e-05, %v1306_v7  ;;  %v1360_v7 = vsel %vm1354_vm4, %v1343_v25, 0.0 }
 0x427   :  { %2103 = vrsqrt.f32 %v1310_v9 }
 0x430   :  { %v1299_v48 = vpop.xlane.xlu1 %1298 }
 0x431   :  { %v2104_v27 = vpop.eup %2103  ;;  %v1307_v50 = vmul.f32 0.125, %v1299_v48 }
 0x432   :  { %v1318_v55 = vmul.f32 %v2104_v27, %v3370_v51 }
 0x433   :  { %v1311_v37 = vadd.f32 1e-05, %v1307_v50 }
 0x434   :  { %v1328_v20 = vmul.f32 %v3420_v44, %v1318_v55 }
 0x435   :  { %2105 = vrsqrt.f32 %v1311_v37 }
 0x436   :  { %v1338_v8 = vadd.f32 %v3423_v39, %v1328_v20 }
 0x438   :  { %1984 = vmatprep.mubr.msk.f32.mxu0 %vm1268_vm13, %v1338_v8 }
 0x43f   :  { %v2106_v26 = vpop.eup %2105 }
 0x440   :  { %v1319_v11 = vmul.f32 %v2106_v26, %v3376_v46 }
 0x442   :  { %v1329_v32 = vmul.f32 %v3420_v44, %v1319_v11  ;;  %v3461_v11 = vld [vmem:[#allocation3] ss:$0 sm:$0xff] }
 0x444   :  { %v1339_v59 = vadd.f32 %v3423_v39, %v1329_v32  ;;  %v1345_v32 = vmul.f32 %v3416_v0, %v3416_v0 }
 0x446   :  { %1985 = vmatmul.mubr.msk.f32.vlgmr.msra.gmra.mrb[2].mxu0 %vm1268_vm13, %v1339_v59 }
 0x453   :  { %v1302_v38 = vpop.xlane.xlu0 %1301 }
 0x454   :  { %v1308_v16 = vmul.f32 0.125, %v1302_v38 }
 0x456   :  { %v1312_v51 = vadd.f32 1e-05, %v1308_v16 }
 0x457   :  { %v3432_v47 = vpop.permute.xlu0 %1244 }
 0x458   :  { %2107 = vrsqrt.f32 %v1312_v51  ;;  %v1346_v1 = vmul.f32 %v3432_v47, %v3432_v47 }
 0x45a   :  { %v1356_v40 = vsel %vm1354_vm4, %v1346_v1, 0.0 }
 0x45b   :  { %v1249_v53 = vpop.permute.xlu0 %1248  ;;  %v1357_v49 = vadd.f32 %v1356_v40, %v1355_v35 }
 0x45c   :  { %v1348_v46 = vmul.f32 %v1249_v53, %v1249_v53 }
 0x45e   :  { %v1366_v2 = vsel %vm1354_vm4, %v1348_v46, 0.0 }
 0x45f   :  { %v1261_v3 = vpop.permute.xlu0 %1260 }
 0x460   :  { %v1352_v19 = vmul.f32 %v1261_v3, %v1261_v3 }
 0x462   :  { %v2108_v15 = vpop.eup %2107  ;;  %v1368_v21 = vsel %vm1354_vm4, %v1352_v19, 0.0 }
 0x463   :  { %v1320_v13 = vmul.f32 %v2108_v15, %v3382_v45  ;;  %v1367_v45 = vadd.f32 %v1366_v2, %v1365_v36 }
 0x465   :  { %v1330_v57 = vmul.f32 %v3420_v44, %v1320_v13  ;;  %v1369_v54 = vadd.f32 %v1368_v21, %v1367_v45  ;;  %v1370_v13 = vsel %vm1354_vm4, %v1345_v32, 0.0 }
 0x467   :  { %v1340_v5 = vadd.f32 %v3423_v39, %v1330_v57  ;;  %v1377_v12 = vmax.f32 %v1369_v54, 1e-08 }
 0x469   :  { %1987 = vmatprep.mubr.msk.f32.mxu1 %vm1268_vm13, %v1340_v5  ;;  %2109 = vrsqrt.f32 %v1377_v12 }
 0x473   :  { %v2110_v34 = vpop.eup %2109 }
 0x474   :  { %v1305_v18 = vpop.xlane.xlu1 %1304  ;;  %v1389_v50 = vmul.f32 %v2110_v34, %v3396_v14  ;;  %v1393_v20 = vmul.f32 %v2110_v34, %v1249_v53  ;;  %v1397_v46 = vmul.f32 %v2110_v34, %v1261_v3 }
 0x475   :  { %v1309_v61 = vmul.f32 0.125, %v1305_v18 }
 0x476   :  { %v3468_v14 = vmul.f32 %v3461_v11, %v1389_v50 }
 0x477   :  { %v1313_v63 = vadd.f32 1e-05, %v1309_v61 }
 0x478   :  { %v3445_v52 = vpop.permute.xlu1 %1246  ;;  %v1419_v41 = vmul.f32 %v3468_v14, %v3468_v14 }
 0x479   :  { %2111 = vrsqrt.f32 %v1313_v63  ;;  %v1347_v23 = vmul.f32 %v3445_v52, %v3445_v52 }
 0x47a   :  { %v1439_v12 = vsel %vm1354_vm4, %v1419_v41, 0.0 }
 0x47b   :  { %v1361_v17 = vsel %vm1354_vm4, %v1347_v23, 0.0 }
 0x47c   :  { %v1257_v10 = vpop.permute.xlu1 %1256  ;;  %v1362_v6 = vadd.f32 %v1361_v17, %v1360_v7 }
 0x47d   :  { %v1350_v29 = vmul.f32 %v1257_v10, %v1257_v10 }
 0x47f   :  { %v1358_v60 = vsel %vm1354_vm4, %v1350_v29, 0.0 }
 0x480   :  { %v1359_v43 = vadd.f32 %v1358_v60, %v1357_v49  ;;  %v1259_v31 = vpop.permute.xlu1 %1258 }
 0x481   :  { %v1351_v9 = vmul.f32 %v1259_v31, %v1259_v31 }
 0x482   :  { %v1375_v27 = vmax.f32 %v1359_v43, 1e-08 }
 0x483   :  { %v2112_v48 = vpop.eup %2111  ;;  %v1363_v55 = vsel %vm1354_vm4, %v1351_v9, 0.0 }
 0x484   :  { %v1321_v37 = vmul.f32 %v2112_v48, %v3399_v4  ;;  %2113 = vrsqrt.f32 %v1375_v27  ;;  %v1364_v8 = vadd.f32 %v1363_v55, %v1362_v6  ;;  %v1251_v26 = vpop.permute.xlu1 %1250  ;;  %v3471_v4 = vmul.f32 %v3461_v11, %v1393_v20 }
 0x485   :  { %v1349_v59 = vmul.f32 %v1251_v26, %v1251_v26 }
 0x486   :  { %v1376_v38 = vmax.f32 %v1364_v8, 1e-08  ;;  %v1331_v16 = vmul.f32 %v3420_v44, %v1321_v37  ;;  %v1423_v19 = vmul.f32 %v3471_v4, %v3471_v4 }
 0x487   :  { %v1371_v51 = vsel %vm1354_vm4, %v1349_v59, 0.0 }
 0x488   :  { %2115 = vrsqrt.f32 %v1376_v38  ;;  %v1341_v53 = vadd.f32 %v3423_v39, %v1331_v16  ;;  %v1263_v15 = vpop.permute.xlu1 %1262  ;;  %v1372_v5 = vadd.f32 %v1371_v51, %v1370_v13  ;;  %v3482_v39 = vmul.f32 %v3461_v11, %v1397_v46 }
 0x489   :  { %v1353_v57 = vmul.f32 %v1263_v15, %v1263_v15  ;;  %v1440_v18 = vsel %vm1354_vm4, %v1423_v19, 0.0 }
 0x48a   :  { %1988 = vmatmul.mubr.msk.f32.vlgmr.msra.gmra.mrb[8].mxu1 %vm1268_vm13, %v1341_v53 }
 0x48b   :  { %v1373_v44 = vsel %vm1354_vm4, %v1353_v57, 0.0 }
 0x48c   :  { %v1374_v2 = vadd.f32 %v1373_v44, %v1372_v5 }
 0x48e   :  { %v2114_v36 = vpop.eup %2113  ;;  %v1378_v21 = vmax.f32 %v1374_v2, 1e-08 }
 0x48f   :  { %v1387_v45 = vmul.f32 %v2114_v36, %v3391_v33  ;;  %v1391_v3 = vmul.f32 %v2114_v36, %v3432_v47  ;;  %v1395_v54 = vmul.f32 %v2114_v36, %v1257_v10  ;;  %v1427_v33 = vmul.f32 %v3482_v39, %v3482_v39 }
 0x490   :  { %2117 = vrsqrt.f32 %v1378_v21  ;;  %v1441_v10 = vadd.f32 %v1440_v18, %v1439_v12 }
 0x491   :  { %v3489_v61 = vmul.f32 %v3461_v11, %v1387_v45  ;;  %v3492_v63 = vmul.f32 %v3461_v11, %v1391_v3  ;;  %v3495_v1 = vmul.f32 %v3461_v11, %v1395_v54  ;;  %v1442_v34 = vsel %vm1354_vm4, %v1427_v33, 0.0 }
 0x492   :  { %v2116_v62 = vpop.eup %2115  ;;  %v1443_v6 = vadd.f32 %v1442_v34, %v1441_v10 }
 0x493   :  { %v1417_v47 = vmul.f32 %v3489_v61, %v3489_v61  ;;  %v1421_v40 = vmul.f32 %v3492_v63, %v3492_v63  ;;  %v1425_v23 = vmul.f32 %v3495_v1, %v3495_v1  ;;  %v1388_v35 = vmul.f32 %v2116_v62, %v3408_v58 }
 0x494   :  { %v1392_v25 = vmul.f32 %v2116_v62, %v3445_v52  ;;  %v1396_v17 = vmul.f32 %v2116_v62, %v1259_v31  ;;  %v1451_v8 = vmax.f32 %v1443_v6, 1e-08  ;;  %v244_v6 = vld [vmem:[#allocation16] sm:$0xff] }
 0x495   :  { %v1429_v29 = vsel %vm1354_vm4, %v1417_v47, 0.0  ;;  %v1430_v49 = vsel %vm1354_vm4, %v1421_v40, 0.0  ;;  %v3511_v43 = vmul.f32 %v3461_v11, %v1388_v35  ;;  %v1432_v9 = vsel %vm1354_vm4, %v1425_v23, 0.0 }
 0x496   :  { %v1431_v60 = vadd.f32 %v1430_v49, %v1429_v29  ;;  %v3514_v7 = vmul.f32 %v3461_v11, %v1392_v25  ;;  %v3518_v58 = vmul.f32 %v3461_v11, %v1396_v17  ;;  %vm1469_vm8 = vcmp.eq.f32.partialorder %v1451_v8, inf }
 0x497   :  { %v1418_v27 = vmul.f32 %v3511_v43, %v3511_v43  ;;  %v1472_v25 = vand.u32 2147483648, %v1451_v8  ;;  %vm1471_vm9 = vcmp.eq.f32.partialorder %v1451_v8, 0.0 }
 0x498   :  { %v1433_v52 = vadd.f32 %v1432_v9, %v1431_v60  ;;  %v1422_v31 = vmul.f32 %v3514_v7, %v3514_v7  ;;  %v1426_v48 = vmul.f32 %v3518_v58, %v3518_v58 }
 0x499   :  { %v1434_v37 = vsel %vm1354_vm4, %v1418_v27, 0.0 }
 0x49a   :  { %v2118_v50 = vpop.eup %2117  ;;  %v1449_v55 = vmax.f32 %v1433_v52, 1e-08  ;;  %v1435_v20 = vsel %vm1354_vm4, %v1422_v31, 0.0  ;;  %v1437_v16 = vsel %vm1354_vm4, %v1426_v48, 0.0  ;;  %v245_v52 = vld [vmem:[#allocation16 + $0x8] sm:$0xff] }
 0x49b   :  { %v1436_v32 = vadd.f32 %v1435_v20, %v1434_v37  ;;  %v1390_v59 = vmul.f32 %v2118_v50, %v3416_v0  ;;  %v1394_v38 = vmul.f32 %v2118_v50, %v1251_v26  ;;  %v1398_v51 = vmul.f32 %v2118_v50, %v1263_v15  ;;  %v1858_v31 = vld [vmem:[#allocation20] ss:$0 sm:$0xff]  ;;  %v3764_v20 = vld [vmem:[#allocation42_spill] sm:$0xff] }
 0x49c   :  { %2119 = vrsqrt.f32 %v1449_v55  ;;  %vm1455_vm13 = vcmp.eq.f32.partialorder %v1449_v55, inf  ;;  %v1458_v3 = vand.u32 2147483648, %v1449_v55  ;;  %vm1457_vm5 = vcmp.eq.f32.partialorder %v1449_v55, 0.0 }
 0x49d   :  { %v1438_v53 = vadd.f32 %v1437_v16, %v1436_v32  ;;  %v3531_v13 = vmul.f32 %v3461_v11, %v1390_v59  ;;  %v3534_v57 = vmul.f32 %v3461_v11, %v1394_v38  ;;  %v3537_v46 = vmul.f32 %v3461_v11, %v1398_v51  ;;  %v3766_v32 = vld [vmem:[#allocation45_spill] sm:$0xff]  ;;  %v3767_v59 = vld [vmem:[#allocation47_spill] sm:$0xff] }
 0x49e   :  { %2121 = vrsqrt.f32 %v1451_v8  ;;  %v2012_v27 = vpack.c.bf16 %v245_v52, %v244_v6  ;;  %v3768_v38 = vld [vmem:[#allocation43_spill] sm:$0xff] }
 0x49f   :  { %v1450_v5 = vmax.f32 %v1438_v53, 1e-08  ;;  %v1420_v44 = vmul.f32 %v3531_v13, %v3531_v13  ;;  %v1424_v0 = vmul.f32 %v3534_v57, %v3534_v57  ;;  %v1428_v26 = vmul.f32 %v3537_v46, %v3537_v46  ;;  %v1893_v16 = vld [vmem:[#allocation13] ss:$0 sm:$0xff] }
 0x4a0   :  { %2013 = vmatprep.subr.bf16.mxu0 %v2012_v27 }
 0x4a1   :  { %v1444_v15 = vsel %vm1354_vm4, %v1420_v44, 0.0  ;;  %v1445_v41 = vsel %vm1354_vm4, %v1424_v0, 0.0  ;;  %2123 = vrsqrt.f32 %v1450_v5  ;;  %v1447_v11 = vsel %vm1354_vm4, %v1428_v26, 0.0  ;;  %2015 = vmatpush3.bf16.msra.mxu0 %v2012_v27 }
 0x4a2   :  { %v1446_v19 = vadd.f32 %v1445_v41, %v1444_v15  ;;  %vm1462_vm6 = vcmp.eq.f32.partialorder %v1450_v5, inf  ;;  %v1465_v40 = vand.u32 2147483648, %v1450_v5  ;;  %vm1464_vm7 = vcmp.eq.f32.partialorder %v1450_v5, 0.0 }
 0x4a4   :  { %v1448_v2 = vadd.f32 %v1447_v11, %v1446_v19 }
 0x4a6   :  { %v2120_v36 = vpop.eup %2119  ;;  %v1452_v21 = vmax.f32 %v1448_v2, 1e-08 }
 0x4a7   :  { %v1454_v45 = vmul.f32 %v2120_v36, %v1449_v55 }
 0x4a8   :  { %2125 = vrsqrt.f32 %v1452_v21  ;;  %v2122_v54 = vpop.eup %2121  ;;  %vm1476_vm10 = vcmp.eq.f32.partialorder %v1452_v21, inf  ;;  %v1479_v60 = vand.u32 2147483648, %v1452_v21  ;;  %vm1478_vm11 = vcmp.eq.f32.partialorder %v1452_v21, 0.0 }
 0x4a9   :  { %v1456_v12 = vsel %vm1455_vm13, %v1449_v55, %v1454_v45  ;;  %v1468_v47 = vmul.f32 %v2122_v54, %v1451_v8 }
 0x4aa   :  { %v1459_v18 = vsel %vm1457_vm5, %v1458_v3, %v1456_v12 }
 0x4ab   :  { %v2124_v62 = vpop.eup %2123  ;;  %1483 = vperm.xlu0 %2065, %v1459_v18   ;;  %v1470_v35 = vsel %vm1469_vm8, %v1451_v8, %v1468_v47  ;;  %v3765_v8 = vld [vmem:[#allocation44_spill] sm:$0xff] }
 0x4ac   :  { %v1461_v33 = vmul.f32 %v2124_v62, %v1450_v5  ;;  %v1473_v49 = vsel %vm1471_vm9, %v1472_v25, %v1470_v35 }
 0x4ae   :  { %v1463_v23 = vsel %vm1462_vm6, %v1450_v5, %v1461_v33 }
 0x4af   :  { %v1466_v10 = vsel %vm1464_vm7, %v1465_v40, %v1463_v23 }
 0x4b0   :  { %1488 = vperm.xlu1 %2066, %v1466_v10  }
 0x4b2   :  { %v2126_v29 = vpop.eup %2125 }
 0x4b3   :  { %v1475_v17 = vmul.f32 %v2126_v29, %v1452_v21 }
 0x4b4   :  { %1493 = vperm.xlu1 %2066, %v1473_v49  }
 0x4b5   :  { %v1477_v34 = vsel %vm1476_vm10, %v1452_v21, %v1475_v17 }
 0x4b6   :  { %v1480_v9 = vsel %vm1478_vm11, %v1479_v60, %v1477_v34 }
 0x4b7   :  { %1498 = vperm.xlu0 %2065, %v1480_v9  }
 0x4cc   :  { %v1965_v48 = vpop.f32.mrb[0].mxu0 }
 0x4cd   :  { %v387_v50 = vadd.f32 %v1965_v48, %v1858_v31  ;;  %v381_v55 = vpop.f32.mrb[1].mxu0 }
 0x4ce   :  { %v382_v37 = vadd.f32 %v1858_v31, %v381_v55 }
 0x4cf   :  { %391 = vst.msk [vmem:[#allocation28 + $0x8] sm:$0xff] %vm259_vm2, %v387_v50 }
 0x4d0   :  { %390 = vst.msk [vmem:[#allocation28] sm:$0xff] %vm259_vm2, %v382_v37 }
 0x4d6   :  { %633 = vadd.xlane.f32.xlu0 %v2913_v22  ;;  %v3769_v22 = vld [vmem:[#allocation46_spill] sm:$0xff] }
 0x4d8   :  { %630 = vadd.xlane.f32.xlu1 %v2916_v24 }
 0x4da   :  { %636 = vadd.xlane.f32.xlu0 %v2922_v30 }
 0x4dc   :  { %674 = vadd.xlane.f32.xlu1 %v2937_v42 }
 0x4de   :  { %639 = vadd.xlane.f32.xlu0 %v2919_v28  ;;  %v1898_v28 = vld [vmem:[#allocation11] ss:$0 sm:$0xff] }
 0x4e0   :  { %680 = vadd.xlane.f32.xlu1 %v2958_v56 }
 0x4e2   :  { %677 = vadd.xlane.f32.xlu0 %v3764_v20 }
 0x4e4   :  { %614 = vadd.xlane.f32.xlu1 %v3765_v8 }
 0x4e6   :  { %683 = vadd.xlane.f32.xlu0 %v3766_v32 }
 0x4e8   :  { %620 = vadd.xlane.f32.xlu1 %v3767_v59 }
 0x4ea   :  { %617 = vadd.xlane.f32.xlu0 %v3768_v38 }
 0x4ee   :  { %623 = vadd.xlane.f32.xlu0 %v3769_v22 }
 0x519   :  { %v1986_v24 = vpop.f32.mrb[2].mxu0 }
 0x51a   :  { %v1589_v30 = vpop.f32.mrb[3].mxu0 }
 0x52a   :  { %v1484_v42 = vpop.permute.xlu0 %1483 }
 0x52b   :  { %v1507_v51 = vmul.f32 %v1893_v16, %v1484_v42 }
 0x52d   :  { %v1590_v53 = vadd.f32 %v1589_v30, %v1507_v51 }
 0x52f   :  { %v1489_v56 = vpop.permute.xlu1 %1488  ;;  %v3562_v5 = vadd.f32 %v1898_v28, %v1590_v53 }
 0x530   :  { %v1508_v44 = vmul.f32 %v1893_v16, %v1489_v56 }
 0x531   :  { %1994 = vmatprep.mubr.msk.f32.mxu0 %vm410_vm0, %v3562_v5 }
 0x532   :  { %v1595_v0 = vadd.f32 %v1986_v24, %v1508_v44 }
 0x533   :  { %v1494_v41 = vpop.permute.xlu1 %1493 }
 0x534   :  { %v3566_v26 = vadd.f32 %v1898_v28, %v1595_v0  ;;  %v1509_v11 = vmul.f32 %v1893_v16, %v1494_v41 }
 0x536   :  { %1995 = vmatmul.mubr.msk.f32.vlgmr.msra.gmra.mrb[4].mxu0 %vm410_vm0, %v3566_v26  ;;  %v1499_v15 = vpop.permute.xlu0 %1498 }
 0x537   :  { %v1510_v19 = vmul.f32 %v1893_v16, %v1499_v15 }
 0x55d   :  { %v1989_v2 = vpop.f32.mrb[8].mxu1 }
 0x55e   :  { %v1605_v36 = vadd.f32 %v1989_v2, %v1510_v19  ;;  %v1599_v21 = vpop.f32.mrb[9].mxu1 }
 0x55f   :  { %v1600_v45 = vadd.f32 %v1599_v21, %v1509_v11 }
 0x560   :  { %v3572_v54 = vadd.f32 %v1898_v28, %v1605_v36 }
 0x561   :  { %v3570_v3 = vadd.f32 %v1898_v28, %v1600_v45 }
 0x563   :  { %v3574_v12 = vpop.xlane.xlu0 %633  ;;  %1997 = vmatprep.mubr.msk.f32.mxu0 %vm410_vm0, %v3570_v3 }
 0x564   :  { %1998 = vmatmul.mubr.msk.f32.gmra.mrb[6].mxu0 %vm410_vm0, %v3572_v54  ;;  %vm650_vm2 = vcmp.eq.f32.partialorder %v3574_v12, inf  ;;  %vm652_vm14 = vcmp.eq.f32.partialorder %v3574_v12, 0.0  ;;  %v653_v48 = vand.u32 2147483648, %v3574_v12 }
 0x565   :  { %v631_v18 = vpop.xlane.xlu1 %630 }
 0x566   :  { %2127 = vrsqrt.f32 %v631_v18  ;;  %vm643_vm12 = vcmp.eq.f32.partialorder %v631_v18, inf  ;;  %v646_v52 = vand.u32 2147483648, %v631_v18  ;;  %vm645_vm1 = vcmp.eq.f32.partialorder %v631_v18, 0.0 }
 0x567   :  { %v637_v62 = vpop.xlane.xlu0 %636 }
 0x568   :  { %2129 = vrsqrt.f32 %v637_v62  ;;  %vm657_vm13 = vcmp.eq.f32.partialorder %v637_v62, inf  ;;  %vm659_vm5 = vcmp.eq.f32.partialorder %v637_v62, 0.0  ;;  %v660_v32 = vand.u32 2147483648, %v637_v62 }
 0x569   :  { %2131 = vrsqrt.f32 %v3574_v12  ;;  %v675_v33 = vpop.xlane.xlu1 %674 }
 0x56a   :  { %2133 = vrsqrt.f32 %v675_v33  ;;  %vm687_vm15 = vcmp.eq.f32.partialorder %v675_v33, inf  ;;  %v690_v27 = vand.u32 2147483648, %v675_v33  ;;  %vm689_vm3 = vcmp.eq.f32.partialorder %v675_v33, 0.0 }
 0x56b   :  { %v3581_v47 = vpop.xlane.xlu0 %639 }
 0x56c   :  { %2135 = vrsqrt.f32 %v3581_v47  ;;  %vm664_vm10 = vcmp.eq.f32.partialorder %v3581_v47, inf  ;;  %vm666_vm11 = vcmp.eq.f32.partialorder %v3581_v47, 0.0 }
 0x56d   :  { %v681_v40 = vpop.xlane.xlu1 %680 }
 0x56e   :  { %2137 = vrsqrt.f32 %v681_v40  ;;  %vm701_vm6 = vcmp.eq.f32.partialorder %v681_v40, inf  ;;  %vm703_vm7 = vcmp.eq.f32.partialorder %v681_v40, 0.0  ;;  %v704_v30 = vand.u32 2147483648, %v681_v40 }
 0x56f   :  { %v678_v23 = vpop.xlane.xlu0 %677 }
 0x570   :  { %v2128_v10 = vpop.eup %2127  ;;  %2139 = vrsqrt.f32 %v678_v23  ;;  %vm694_vm8 = vcmp.eq.f32.partialorder %v678_v23, inf  ;;  %v697_v53 = vand.u32 2147483648, %v678_v23  ;;  %vm696_vm9 = vcmp.eq.f32.partialorder %v678_v23, 0.0 }
 0x571   :  { %v642_v35 = vmul.f32 %v2128_v10, %v631_v18 }
 0x572   :  { %v2130_v25 = vpop.eup %2129 }
 0x573   :  { %v2132_v29 = vpop.eup %2131  ;;  %v3584_v49 = vpop.xlane.xlu0 %683  ;;  %v644_v60 = vsel %vm643_vm12, %v631_v18, %v642_v35  ;;  %v656_v34 = vmul.f32 %v2130_v25, %v637_v62  ;;  %v667_v18 = vand.u32 2147483648, %v3581_v47 }
 0x574   :  { %v2134_v17 = vpop.eup %2133  ;;  %2141 = vrsqrt.f32 %v3584_v49  ;;  %v649_v6 = vmul.f32 %v2132_v29, %v3574_v12  ;;  %v647_v37 = vsel %vm645_vm1, %v646_v52, %v644_v60  ;;  %vm710_vm12 = vcmp.eq.f32.partialorder %v3584_v49, 0.0  ;;  %v615_v35 = vpop.xlane.xlu1 %614 }
 0x575   :  { %v686_v9 = vmul.f32 %v2134_v17, %v675_v33  ;;  %v658_v8 = vsel %vm657_vm13, %v637_v62, %v656_v34  ;;  %v711_v62 = vand.u32 2147483648, %v3584_v49 }
 0x576   :  { %v2136_v31 = vpop.eup %2135  ;;  %v651_v24 = vsel %vm650_vm2, %v3574_v12, %v649_v6  ;;  %v661_v44 = vsel %vm659_vm5, %v660_v32, %v658_v8  ;;  %vm708_vm2 = vcmp.eq.f32.partialorder %v3584_v49, inf }
 0x577   :  { %v688_v50 = vsel %vm687_vm15, %v675_v33, %v686_v9  ;;  %v663_v16 = vmul.f32 %v2136_v31, %v3581_v47  ;;  %v654_v19 = vsel %vm652_vm14, %v653_v48, %v651_v24  ;;  %vm1779_vm14 = vcmask 138240   ;;  %v618_v9 = vpop.xlane.xlu0 %617 }
 0x578   :  { %v2138_v55 = vpop.eup %2137  ;;  %v691_v20 = vsel %vm689_vm3, %v690_v27, %v688_v50  ;;  %vm1784_vm15 = vcmask 195584  }
 0x579   :  { %v700_v59 = vmul.f32 %v2138_v55, %v681_v40  ;;  %v713_v38 = vmul.f32 %v691_v20, %v647_v37  ;;  %v665_v2 = vsel %vm664_vm10, %v3581_v47, %v663_v16 }
 0x57a   :  { %v2140_v22 = vpop.eup %2139 }
 0x57b   :  { %v702_v42 = vsel %vm701_vm6, %v681_v40, %v700_v59  ;;  %v693_v51 = vmul.f32 %v2140_v22, %v678_v23  ;;  %v717_v28 = vmax.f32 %v713_v38, 1e-08  ;;  %v668_v40 = vsel %vm666_vm11, %v667_v18, %v665_v2  ;;  %v624_v37 = vpop.xlane.xlu0 %623 }
 0x57c   :  { %v705_v56 = vsel %vm703_vm7, %v704_v30, %v702_v42 }
 0x57d   :  { %v695_v0 = vsel %vm694_vm8, %v678_v23, %v693_v51  ;;  %2143 = vrcp.f32 %v717_v28  ;;  %v715_v15 = vmul.f32 %v705_v56, %v661_v44 }
 0x57e   :  { %v2142_v41 = vpop.eup %2141  ;;  %v698_v11 = vsel %vm696_vm9, %v697_v53, %v695_v0 }
 0x57f   :  { %v707_v36 = vmul.f32 %v2142_v41, %v3584_v49  ;;  %v719_v21 = vmax.f32 %v715_v15, 1e-08  ;;  %v714_v45 = vmul.f32 %v698_v11, %v654_v19 }
 0x581   :  { %v709_v33 = vsel %vm708_vm2, %v3584_v49, %v707_v36  ;;  %2145 = vrcp.f32 %v719_v21  ;;  %v718_v12 = vmax.f32 %v714_v45, 1e-08  ;;  %v621_v49 = vpop.xlane.xlu1 %620 }
 0x582   :  { %v712_v23 = vsel %vm710_vm12, %v711_v62, %v709_v33 }
 0x583   :  { %2147 = vrcp.f32 %v718_v12  ;;  %v716_v10 = vmul.f32 %v712_v23, %v668_v40 }
 0x585   :  { %v720_v25 = vmax.f32 %v716_v10, 1e-08 }
 0x587   :  { %v2144_v29 = vpop.eup %2143  ;;  %2149 = vrcp.f32 %v720_v25 }
 0x588   :  { %v722_v47 = vmul.f32 %v2144_v29, %v615_v35 }
 0x58a   :  { %v1775_v17 = vsel %vm410_vm0, %v3562_v5, %v722_v47 }
 0x58b   :  { %v2146_v60 = vpop.eup %2145  ;;  %v1780_v34 = vsel %vm1779_vm14, %v1775_v17, 0.0 }
 0x58c   :  { %1785 = vst.msk [vmem:[#allocation29] sm:$0xff] %vm1784_vm15, %v1780_v34  ;;  %v726_v6 = vmul.f32 %v2146_v60, %v621_v49 }
 0x58d   :  { %v2148_v52 = vpop.eup %2147 }
 0x58e   :  { %v1777_v27 = vsel %vm410_vm0, %v3570_v3, %v726_v6  ;;  %v724_v31 = vmul.f32 %v2148_v52, %v618_v9 }
 0x58f   :  { %v1782_v48 = vsel %vm1779_vm14, %v1777_v27, 0.0 }
 0x590   :  { %1787 = vst.msk [vmem:[#allocation29 + $0x10] sm:$0xff] %vm1784_vm15, %v1782_v48  ;;  %v1776_v5 = vsel %vm410_vm0, %v3566_v26, %v724_v31 }
 0x591   :  { %v2150_v50 = vpop.eup %2149  ;;  %v1781_v55 = vsel %vm1779_vm14, %v1776_v5, 0.0 }
 0x592   :  { %1786 = vst.msk [vmem:[#allocation29 + $0x8] sm:$0xff] %vm1784_vm15, %v1781_v55  ;;  %v728_v20 = vmul.f32 %v2150_v50, %v624_v37 }
 0x594   :  { %v1778_v8 = vsel %vm410_vm0, %v3572_v54, %v728_v20 }
 0x595   :  { %v1783_v3 = vsel %vm1779_vm14, %v1778_v8, 0.0 }
 0x596   :  { %1788 = vst.msk [vmem:[#allocation29 + $0x18] sm:$0xff] %vm1784_vm15, %v1783_v3 }
 0x597   :  { %2487 = shalt.err (!%p2484_p4)
}
 0x598   :  { %s2488_s14 = scalar_lea.hbm %s3715_s18, 512 }
 0x599   :  { %p2489_p5 = scmp.ne.s32.totalorder %s3715_s18, %s2488_s14  ;;  %p2492_p6 = scmp.lt.u32.totalorder %s2488_s14, %s3715_s18 }
 0x59b   :  { %p2494_p7 = pnand %p2492_p6, %p2489_p5 }
 0x59d   :  { %2497 = shalt.err (!%p2494_p7)
}
 0x59e   :  { %1824 = dma.vmem_to_hbm [thread:$0]  %s1819_s10, 512, %s3715_s18, [#allocation30], %s2564_s21, %s2564_s21, %s2565_s1  }
 0x59f   :  { %s2498_s22 = scalar_lea.vmem %s3623_s9, 256  ;;  %p2503_p9 = scmp.lt.s32.totalorder %s3623_s9, %s3623_s9 }
 0x5a0   :  { %p2499_p8 = scmp.ne.s32.totalorder %s3623_s9, %s2498_s22  ;;  %p2504_p10 = scmp.lt.s32.totalorder %s2498_s22, %s2498_s22 }
 0x5a2   :  { %p2505_p11 = por %p2504_p10, %p2503_p9 }
 0x5a4   :  { %p2506_p12 = pnand %p2505_p11, %p2499_p8 }
 0x5a6   :  { %2509 = shalt.err (!%p2506_p12)
}
 0x5a7   :  { %s2510_s6 = scalar_lea.hbm %s3714_s17, 256 }
 0x5a8   :  { %p2511_p13 = scmp.ne.s32.totalorder %s3714_s17, %s2510_s6  ;;  %p2514_p0 = scmp.lt.u32.totalorder %s2510_s6, %s3714_s17 }
 0x5aa   :  { %p2516_p1 = pnand %p2514_p0, %p2511_p13 }
 0x5ac   :  { %2519 = shalt.err (!%p2516_p1)
}
 0x5ad   :  { %1812 = dma.vmem_to_hbm [thread:$0]  %s3623_s9, 256, %s3714_s17, [#allocation7], %s2564_s21, %s2564_s21, %s2565_s1   ;;  %v1899_v26 = vld [vmem:[#allocation2] ss:$0 sm:$0xff]  ;;  %v1908_v28 = vld [vmem:[#allocation4] ss:$0 sm:$0xff] }
 0x5ae   :  { %v1752_v53 = vmul.f32 %v1908_v28, %v3511_v43  ;;  %v1756_v56 = vmul.f32 %v1908_v28, %v3514_v7  ;;  %v1760_v44 = vmul.f32 %v1908_v28, %v3518_v58  ;;  %v1751_v15 = vmul.f32 %v1908_v28, %v3489_v61  ;;  %s2592_s17 = smov [#allocation31]  }
 0x5af   :  { %v1755_v41 = vmul.f32 %v1908_v28, %v3492_v63  ;;  %v1759_v19 = vmul.f32 %v1908_v28, %v3495_v1  ;;  %v1754_v10 = vmul.f32 %v1908_v28, %v3531_v13  ;;  %v1758_v35 = vmul.f32 %v1908_v28, %v3534_v57  ;;  %s1830_s26 = sshll.u32 %s2592_s17, 4  ;;  %s1831_s26 = int_to_ptr.vmem [resolvable:$true] %s1830_s26 }
 0x5b0   :  { %v1762_v25 = vmul.f32 %v1908_v28, %v3537_v46  ;;  %v1753_v47 = vmul.f32 %v1908_v28, %v3468_v14  ;;  %v1757_v17 = vmul.f32 %v1908_v28, %v3471_v4  ;;  %v1761_v60 = vmul.f32 %v1908_v28, %v3482_v39  ;;  %s2520_s16 = scalar_lea.vmem %s1831_s26, 1536  ;;  %p2525_p3 = scmp.lt.s32.totalorder %s1831_s26, %s1831_s26 }
 0x5b1   :  { %p2521_p2 = scmp.ne.s32.totalorder %s1831_s26, %s2520_s16  ;;  %p2526_p4 = scmp.lt.s32.totalorder %s2520_s16, %s2520_s16 }
 0x5b3   :  { %p2527_p5 = por %p2526_p4, %p2525_p3 }
 0x5b5   :  { %p2528_p6 = pnand %p2527_p5, %p2521_p2 }
 0x609   :  { %v1996_v54 = vpop.f32.mrb[4].mxu0 }
 0x60a   :  { %v1708_v32 = vadd.f32 %v1996_v54, %v1899_v26  ;;  %v1702_v59 = vpop.f32.mrb[5].mxu0 }
 0x60b   :  { %v1703_v38 = vadd.f32 %v1899_v26, %v1702_v59 }
 0x60c   :  { %v1905_v22 = vmul.f32 -1.442695, %v1708_v32 }
 0x60d   :  { %v1904_v24 = vmul.f32 -1.442695, %v1703_v38 }
 0x60e   :  { %2151 = vpow2.f32 %v1905_v22 }
 0x60f   :  { %2153 = vpow2.f32 %v1904_v24 }
 0x618   :  { %v2152_v30 = vpop.eup %2151 }
 0x619   :  { %v2154_v16 = vpop.eup %2153  ;;  %v1734_v42 = vadd.f32 1.0, %v2152_v30 }
 0x61a   :  { %v1733_v51 = vadd.f32 1.0, %v2154_v16 }
 0x61b   :  { %2155 = vrcp.f32 %v1734_v42 }
 0x61c   :  { %2157 = vrcp.f32 %v1733_v51 }
 0x625   :  { %v2156_v0 = vpop.eup %2155 }
 0x626   :  { %v2158_v11 = vpop.eup %2157  ;;  %v1764_v2 = vmul.f32 %v2156_v0, %v1752_v53  ;;  %v1768_v36 = vmul.f32 %v2156_v0, %v1756_v56  ;;  %v1772_v21 = vmul.f32 %v2156_v0, %v1760_v44 }
 0x627   :  { %v1763_v45 = vmul.f32 %v2158_v11, %v1751_v15  ;;  %v1767_v18 = vmul.f32 %v2158_v11, %v1755_v41  ;;  %v1771_v62 = vmul.f32 %v2158_v11, %v1759_v19 }
 0x628   :  { %1790 = vst.msk [vmem:[#allocation31 + $0x8] sm:$0xff] %vm1354_vm4, %v1764_v2  ;;  %1794 = vst.msk [vmem:[#allocation31 + $0x28] sm:$0xff] %vm1354_vm4, %v1768_v36 }
 0x629   :  { %1798 = vst.msk [vmem:[#allocation31 + $0x48] sm:$0xff] %vm1354_vm4, %v1772_v21  ;;  %1789 = vst.msk [vmem:[#allocation31] sm:$0xff] %vm1354_vm4, %v1763_v45 }
 0x62a   :  { %1793 = vst.msk [vmem:[#allocation31 + $0x20] sm:$0xff] %vm1354_vm4, %v1767_v18  ;;  %1797 = vst.msk [vmem:[#allocation31 + $0x40] sm:$0xff] %vm1354_vm4, %v1771_v62 }
 0x637   :  { %v1999_v61 = vpop.f32.mrb[6].mxu0 }
 0x638   :  { %v1718_v63 = vadd.f32 %v1999_v61, %v1899_v26  ;;  %v1712_v1 = vpop.f32.mrb[7].mxu0 }
 0x639   :  { %v1713_v43 = vadd.f32 %v1899_v26, %v1712_v1 }
 0x63a   :  { %v1907_v7 = vmul.f32 -1.442695, %v1718_v63 }
 0x63b   :  { %v1906_v58 = vmul.f32 -1.442695, %v1713_v43 }
 0x63c   :  { %2159 = vpow2.f32 %v1907_v7 }
 0x63d   :  { %2161 = vpow2.f32 %v1906_v58 }
 0x646   :  { %v2160_v33 = vpop.eup %2159 }
 0x647   :  { %v2162_v12 = vpop.eup %2161  ;;  %v1736_v40 = vadd.f32 1.0, %v2160_v33 }
 0x648   :  { %v1735_v23 = vadd.f32 1.0, %v2162_v12 }
 0x649   :  { %2163 = vrcp.f32 %v1736_v40 }
 0x64a   :  { %2165 = vrcp.f32 %v1735_v23 }
 0x653   :  { %v2164_v29 = vpop.eup %2163 }
 0x654   :  { %v2166_v34 = vpop.eup %2165  ;;  %v1766_v49 = vmul.f32 %v2164_v29, %v1754_v10  ;;  %v1770_v9 = vmul.f32 %v2164_v29, %v1758_v35  ;;  %v1774_v6 = vmul.f32 %v2164_v29, %v1762_v25 }
 0x655   :  { %v1765_v52 = vmul.f32 %v2166_v34, %v1753_v47  ;;  %v1769_v27 = vmul.f32 %v2166_v34, %v1757_v17  ;;  %v1773_v13 = vmul.f32 %v2166_v34, %v1761_v60 }
 0x656   :  { %1792 = vst.msk [vmem:[#allocation31 + $0x18] sm:$0xff] %vm1354_vm4, %v1766_v49  ;;  %1796 = vst.msk [vmem:[#allocation31 + $0x38] sm:$0xff] %vm1354_vm4, %v1770_v9 }
 0x657   :  { %1800 = vst.msk [vmem:[#allocation31 + $0x58] sm:$0xff] %vm1354_vm4, %v1774_v6  ;;  %1791 = vst.msk [vmem:[#allocation31 + $0x10] sm:$0xff] %vm1354_vm4, %v1765_v52 }
 0x658   :  { %1795 = vst.msk [vmem:[#allocation31 + $0x30] sm:$0xff] %vm1354_vm4, %v1769_v27  ;;  %1799 = vst.msk [vmem:[#allocation31 + $0x50] sm:$0xff] %vm1354_vm4, %v1773_v13 }
 0x659   :  { %2531 = shalt.err (!%p2528_p6)
}
 0x65a   :  { %s2532_s10 = scalar_lea.hbm %s3716_s19, 1536 }
 0x65b   :  { %p2533_p7 = scmp.ne.s32.totalorder %s3716_s19, %s2532_s10  ;;  %p2536_p8 = scmp.lt.u32.totalorder %s2532_s10, %s3716_s19 }
 0x65d   :  { %p2538_p9 = pnand %p2536_p8, %p2533_p7 }
 0x65f   :  { %2541 = shalt.err (!%p2538_p9)
}
 0x660   :  { %1836 = dma.vmem_to_hbm [thread:$0]  %s1831_s26, 1536, %s3716_s19, [#allocation30], %s2564_s21, %s2564_s21, %s2565_s1  }
 0x661   :  { %2558 = dma.done.wait [#allocation7], 256  }
 0x662   :  { %2559 = vsyncadd [#allocation7], 4294967040 }
 0x663   :  { %2560 = dma.done.wait [#allocation30], 2048  }
 0x664   :  { %2561 = vsyncadd [#allocation30], 4294965248 }
 0x665   :  { %1846 = vsyncpa [#allocation6], 1 }
 0x666   :  { %1847 = vsyncpa [#allocation9], 1 }
 0x667   :  { %1848 = vsyncpa [#allocation12], 1 }
 0x668   :  { %1849 = vsyncpa [#allocation15], 1 }
 0x669   :  { %1850 = vsyncpa [#allocation18], 1 }
 0x66a   :  { %1851 = vsyncpa [#allocation21], 1 }
 0x66b   :  { %1852 = vsyncpa [#allocation24], 1 }
 0x66c   :  { %1853 = vsyncpa [#allocation27], 1 }
 0x66d   :  { %1854 = vsyncpa [#allocation7], 1 }
 0x66e   :  { %1855 = vsyncpa [#allocation30], 1 }

// kernel: _lambda_.5
= control target key start
LH: loop header
LB: loop body
LE: loop exit
PB: predicated region body
PF: predicated region fallthrough
CT: control target
= control target key end

     0   :  { %s7241_s6 = smov 1   ;;  %s7242_s10 = smov 2   ;;  %s8660_s0 = inlined_call_operand.smem [shape: u32[46], index: -1, kind: input, shape index: {}] }
   0x1   :  { %s7359_s5 = sld [smem:[%s8660_s0]]   ;;  %s7243_s14 = smov 3  }
   0x2   :  { %s7364_s9 = sld [smem:[%s8660_s0 + %s7241_s6]]   ;;  %s7244_s18 = smov 4  }
   0x3   :  { %s7369_s13 = sld [smem:[%s8660_s0 + %s7242_s10]]   ;;  %s7245_s22 = smov 5  }
   0x4   :  { %s7374_s17 = sld [smem:[%s8660_s0 + %s7243_s14]]   ;;  %s7246_s26 = smov 6  }
   0x5   :  { %s7379_s21 = sld [smem:[%s8660_s0 + %s7244_s18]]   ;;  %s7247_s30 = smov 7  }
   0x6   :  { %s7384_s25 = sld [smem:[%s8660_s0 + %s7245_s22]]   ;;  %s7248_s4 = smov 8  }
   0x7   :  { %8689 = sst [smem:[#allocation98_spill]] %s7359_s5  ;;  %s7249_s10 = smov 9  }
   0x8   :  { %s7389_s29 = sld [smem:[%s8660_s0 + %s7246_s26]]   ;;  %s7250_s15 = smov 10  }
   0x9   :  { %8690 = sst [smem:[#allocation99_spill]] %s7369_s13  ;;  %s7251_s20 = smov 11  }
   0xa   :  { %s7394_s3 = sld [smem:[%s8660_s0 + %s7247_s30]]   ;;  %s7252_s26 = smov 12  }
   0xb   :  { %8691 = sst [smem:[#allocation100_spill]] %s7379_s21  ;;  %s7253_s1 = smov 13  }
   0xc   :  { %s7399_s8 = sld [smem:[%s8660_s0 + %s7248_s4]]   ;;  %s7254_s7 = smov 14  }
   0xd   :  { %s7404_s14 = sld [smem:[%s8660_s0 + %s7249_s10]]   ;;  %s7256_s22 = smov 16  }
   0xe   :  { %8692 = sst [smem:[#allocation101_spill]] %s7389_s29  ;;  %s7257_s28 = smov 17  }
   0xf   :  { %s7409_s19 = sld [smem:[%s8660_s0 + %s7250_s15]]   ;;  %s7255_s15 = smov 15  }
  0x10   :  { %s7414_s24 = sld [smem:[%s8660_s0 + %s7251_s20]]  }
  0x11   :  { %s7419_s30 = sld [smem:[%s8660_s0 + %s7252_s26]]  }
  0x12   :  { %8693 = sst [smem:[#allocation102_spill]] %s7399_s8 }
  0x13   :  { %s7424_s6 = sld [smem:[%s8660_s0 + %s7253_s1]]  }
  0x14   :  { %s7429_s12 = sld [smem:[%s8660_s0 + %s7254_s7]]   ;;  %s7258_s7 = smov 18  }
  0x15   :  { %8694 = sst [smem:[#allocation103_spill]] %s7409_s19 }
  0x16   :  { %s7434_s20 = sld [smem:[%s8660_s0 + %s7255_s15]]   ;;  %s7259_s15 = smov 19  }
  0x17   :  { %8695 = sst [smem:[#allocation104_spill]] %s7419_s30 }
  0x18   :  { %s7439_s27 = sld [smem:[%s8660_s0 + %s7256_s22]]   ;;  %s7260_s22 = smov 20  }
  0x19   :  { %s7444_s4 = sld [smem:[%s8660_s0 + %s7257_s28]]   ;;  %s7261_s28 = smov 21  }
  0x1a   :  { %8696 = sst [smem:[#allocation105_spill]] %s7429_s12 }
  0x1b   :  { %s7449_s12 = sld [smem:[%s8660_s0 + %s7258_s7]]   ;;  %s7262_s7 = smov 22  }
  0x1c   :  { %s7454_s30 = sld [smem:[%s8660_s0 + %s7259_s15]]   ;;  %s7263_s15 = smov 23  }
  0x1d   :  { %s7464_s19 = sld [smem:[%s8660_s0 + %s7261_s28]]   ;;  %s7265_s28 = smov 25  }
  0x1e   :  { %8697 = sst [smem:[#allocation106_spill]] %s7439_s27 }
  0x1f   :  { %s7459_s27 = sld [smem:[%s8660_s0 + %s7260_s22]]   ;;  %s7264_s22 = smov 24  }
  0x20   :  { %s7474_s8 = sld [smem:[%s8660_s0 + %s7263_s15]]   ;;  %s7267_s15 = smov 27  }
  0x21   :  { %8698 = sst [smem:[#allocation107_spill]] %s7449_s12 }
  0x22   :  { %s7469_s12 = sld [smem:[%s8660_s0 + %s7262_s7]]   ;;  %s7266_s7 = smov 26  }
  0x23   :  { %s7484_s29 = sld [smem:[%s8660_s0 + %s7265_s28]]   ;;  %s7269_s28 = smov 29  }
  0x24   :  { %s7494_s21 = sld [smem:[%s8660_s0 + %s7267_s15]]   ;;  %s7271_s15 = smov 31  }
  0x25   :  { %8699 = sst [smem:[#allocation108_spill]] %s7459_s27 }
  0x26   :  { %s7479_s27 = sld [smem:[%s8660_s0 + %s7264_s22]]   ;;  %s7268_s22 = smov 28  }
  0x27   :  { %s7504_s13 = sld [smem:[%s8660_s0 + %s7269_s28]]   ;;  %s7273_s28 = smov 33  }
  0x28   :  { %8700 = sst [smem:[#allocation109_spill]] %s7469_s12 }
  0x29   :  { %s7489_s12 = sld [smem:[%s8660_s0 + %s7266_s7]]   ;;  %s7270_s7 = smov 30  }
  0x2a   :  { %s7514_s5 = sld [smem:[%s8660_s0 + %s7271_s15]]   ;;  %s7275_s15 = smov 35  }
  0x2c   :  { %8701 = sst [smem:[#allocation110_spill]] %s7479_s27 }
  0x2d   :  { %s7499_s27 = sld [smem:[%s8660_s0 + %s7268_s22]]   ;;  %s7272_s22 = smov 32  }
  0x2e   :  { %8704 = sst [smem:[#allocation113_spill]] %s7504_s13 }
  0x2f   :  { %8702 = sst [smem:[#allocation111_spill]] %s7489_s12 }
  0x30   :  { %s7509_s12 = sld [smem:[%s8660_s0 + %s7270_s7]]   ;;  %s7274_s7 = smov 34  }
  0x31   :  { %8706 = sst [smem:[#allocation115_spill]] %s7514_s5 }
  0x32   :  { %s7524_s13 = sld [smem:[%s8660_s0 + %s7273_s28]]   ;;  %s7277_s28 = smov 37  }
  0x33   :  { %8703 = sst [smem:[#allocation112_spill]] %s7499_s27 }
  0x34   :  { %s7519_s27 = sld [smem:[%s8660_s0 + %s7272_s22]]   ;;  %s7276_s22 = smov 36  }
  0x35   :  { %s7534_s5 = sld [smem:[%s8660_s0 + %s7275_s15]]   ;;  %s7279_s15 = smov 39  }
  0x36   :  { %8705 = sst [smem:[#allocation114_spill]] %s7509_s12 }
  0x37   :  { %s7529_s12 = sld [smem:[%s8660_s0 + %s7274_s7]]   ;;  %s7278_s7 = smov 38  }
  0x38   :  { %8708 = sst [smem:[#allocation117_spill]] %s7524_s13 }
  0x39   :  { %s7544_s13 = sld [smem:[%s8660_s0 + %s7277_s28]]   ;;  %s7281_s28 = smov 41  }
  0x3a   :  { %8707 = sst [smem:[#allocation116_spill]] %s7519_s27 }
  0x3b   :  { %8710 = sst [smem:[#allocation119_spill]] %s7534_s5 }
  0x3c   :  { %s7539_s27 = sld [smem:[%s8660_s0 + %s7276_s22]]   ;;  %s7280_s22 = smov 40  }
  0x3d   :  { %8709 = sst [smem:[#allocation118_spill]] %s7529_s12 }
  0x3e   :  { %s7549_s12 = sld [smem:[%s8660_s0 + %s7278_s7]]   ;;  %s7282_s7 = smov 42  }
  0x3f   :  { %8712 = sst [smem:[#allocation121_spill]] %s7544_s13 }
  0x40   :  { %s7554_s5 = sld [smem:[%s8660_s0 + %s7279_s15]]   ;;  %s7283_s15 = smov 43  }
  0x41   :  { %s7564_s13 = sld [smem:[%s8660_s0 + %s7281_s28]]   ;;  %s7285_s28 = smov 45  }
  0x42   :  { %8711 = sst [smem:[#allocation120_spill]] %s7539_s27 }
  0x43   :  { %s7559_s27 = sld [smem:[%s8660_s0 + %s7280_s22]]   ;;  %s7284_s22 = smov 44  }
  0x44   :  { %8713 = sst [smem:[#allocation122_spill]] %s7549_s12 }
  0x45   :  { %s7569_s12 = sld [smem:[%s8660_s0 + %s7282_s7]]  }
  0x46   :  { %8714 = sst [smem:[#allocation123_spill]] %s7554_s5 }
  0x47   :  { %8716 = sst [smem:[#allocation125_spill]] %s7564_s13 }
  0x48   :  { %s7574_s5 = sld [smem:[%s8660_s0 + %s7283_s15]]  }
  0x49   :  { %8715 = sst [smem:[#allocation124_spill]] %s7559_s27 }
  0x4a   :  { %s7579_s27 = sld [smem:[%s8660_s0 + %s7284_s22]]  }
  0x4b   :  { %s7584_s13 = sld [smem:[%s8660_s0 + %s7285_s28]]  }
  0x4c   :  { %97 = vsyncpa [#allocation3], 0 }
  0x4d   :  { %98 = vsyncpa [#allocation6], 0 }
  0x4e   :  { %99 = vsyncpa [#allocation9], 0 }
  0x4f   :  { %100 = vsyncpa [#allocation12], 0 }
  0x50   :  { %101 = vsyncpa [#allocation15], 0 }
  0x51   :  { %102 = vsyncpa [#allocation18], 0 }
  0x52   :  { %103 = vsyncpa [#allocation21], 0 }
  0x53   :  { %104 = vsyncpa [#allocation24], 0 }
  0x54   :  { %105 = vsyncpa [#allocation27], 0 }
  0x55   :  { %106 = vsyncpa [#allocation30], 0 }
  0x56   :  { %107 = vsyncpa [#allocation33], 0 }
  0x57   :  { %108 = vsyncpa [#allocation36], 0 }
  0x58   :  { %109 = vsyncpa [#allocation39], 0 }
  0x59   :  { %110 = vsyncpa [#allocation42], 0 }
  0x5a   :  { %111 = vsyncpa [#allocation45], 0 }
  0x5b   :  { %112 = vsyncpa [#allocation48], 0 }
  0x5c   :  { %113 = vsyncpa [#allocation51], 0 }
  0x5d   :  { %114 = vsyncpa [#allocation54], 0 }
  0x5e   :  { %115 = vsyncpa [#allocation57], 0 }
  0x5f   :  { %116 = vsyncpa [#allocation60], 0 }
  0x60   :  { %117 = vsyncpa [#allocation63], 0 }
  0x61   :  { %118 = vsyncpa [#allocation66], 0 }
  0x62   :  { %119 = vsyncpa [#allocation69], 0 }
  0x63   :  { %120 = vsyncpa [#allocation4], 0 }
  0x64   :  { %121 = vsyncpa [#allocation72], 0  ;;  %s7286_s0 = smov [#allocation5]   ;;  %s7287_s10 = smov [#allocation8]  }
  0x65   :  { %s139_s7 = sshll.u32 %s7286_s0, 4  ;;  %s163_s11 = sshll.u32 %s7287_s10, 4  ;;  %s140_s7 = int_to_ptr.vmem [resolvable:$true] %s139_s7  ;;  %s7586_s11 = int_to_ptr.vmem [resolvable:$true] %s163_s11 }
  0x66   :  { %s6179_s15 = scalar_lea.hbm %s7364_s9, 768 }
  0x67   :  { %p6180_p0 = scmp.ne.s32.totalorder %s7364_s9, %s6179_s15  ;;  %p6183_p1 = scmp.lt.u32.totalorder %s6179_s15, %s7364_s9 }
  0x69   :  { %p6185_p2 = pnand %p6183_p1, %p6180_p0 }
  0x6b   :  { %6188 = shalt.err (!%p6185_p2)
}
  0x6c   :  { %s6189_s16 = scalar_lea.vmem %s140_s7, 768  ;;  %p6194_p4 = scmp.lt.s32.totalorder %s140_s7, %s140_s7 }
  0x6d   :  { %p6190_p3 = scmp.ne.s32.totalorder %s140_s7, %s6189_s16  ;;  %p6195_p5 = scmp.lt.s32.totalorder %s6189_s16, %s6189_s16 }
  0x6f   :  { %p6196_p6 = por %p6195_p5, %p6194_p4 }
  0x71   :  { %p6197_p7 = pnand %p6196_p6, %p6190_p3 }
  0x73   :  { %6200 = shalt.err (!%p6197_p7)
}
  0x74   :  { %s7288_s18 = smov 128   ;;  %s7289_s22 = smov 8  }
  0x75   :  { %145 = dma.hbm_to_vmem [thread:$0]  %s7364_s9, 768, %s140_s7, [#allocation6], %s7288_s18, %s7288_s18, %s7289_s22  }
  0x76   :  { %s6201_s23 = scalar_lea.hbm %s7374_s17, 1536 }
  0x77   :  { %p6202_p8 = scmp.ne.s32.totalorder %s7374_s17, %s6201_s23  ;;  %p6205_p9 = scmp.lt.u32.totalorder %s6201_s23, %s7374_s17 }
  0x79   :  { %p6207_p10 = pnand %p6205_p9, %p6202_p8 }
  0x7b   :  { %6210 = shalt.err (!%p6207_p10)
}
  0x7c   :  { %s6211_s26 = scalar_lea.vmem %s7586_s11, 1536  ;;  %p6216_p12 = scmp.lt.s32.totalorder %s7586_s11, %s7586_s11 }
  0x7d   :  { %p6212_p11 = scmp.ne.s32.totalorder %s7586_s11, %s6211_s26  ;;  %p6217_p13 = scmp.lt.s32.totalorder %s6211_s26, %s6211_s26 }
  0x7f   :  { %p6218_p0 = por %p6217_p13, %p6216_p12 }
  0x81   :  { %p6219_p1 = pnand %p6218_p0, %p6212_p11 }
  0x83   :  { %6222 = shalt.err (!%p6219_p1)
}
  0x84   :  { %169 = dma.hbm_to_vmem [thread:$0]  %s7374_s17, 1536, %s7586_s11, [#allocation9], %s7288_s18, %s7288_s18, %s7289_s22  }
  0x85   :  { %s7290_s9 = smov [#allocation11]   ;;  %s7291_s1 = smov [#allocation14]  }
  0x86   :  { %s188_s28 = sshll.u32 %s7290_s9, 4  ;;  %s208_s2 = sshll.u32 %s7291_s1, 4  ;;  %s189_s28 = int_to_ptr.vmem [resolvable:$true] %s188_s28  ;;  %s209_s2 = int_to_ptr.vmem [resolvable:$true] %s208_s2 }
  0x87   :  { %s6223_s0 = scalar_lea.hbm %s7384_s25, 16 }
  0x88   :  { %p6224_p2 = scmp.ne.s32.totalorder %s7384_s25, %s6223_s0  ;;  %p6227_p3 = scmp.lt.u32.totalorder %s6223_s0, %s7384_s25 }
  0x8a   :  { %p6229_p4 = pnand %p6227_p3, %p6224_p2 }
  0x8c   :  { %6232 = shalt.err (!%p6229_p4)
}
  0x8d   :  { %s6233_s7 = scalar_lea.vmem %s189_s28, 16  ;;  %s6237_s10 = scalar_lea.vmem %s189_s28, 32 }
  0x8e   :  { %p6234_p5 = scmp.ne.s32.totalorder %s189_s28, %s6233_s7  ;;  %p6238_p6 = scmp.lt.s32.totalorder %s189_s28, %s189_s28 }
  0x8f   :  { %p6239_p7 = scmp.lt.s32.totalorder %s6237_s10, %s6233_s7 }
  0x91   :  { %p6240_p8 = por %p6239_p7, %p6238_p6 }
  0x93   :  { %p6241_p9 = pnand %p6240_p8, %p6234_p5 }
  0x95   :  { %6244 = shalt.err (!%p6241_p9)
}
  0x96   :  { %191 = dma.hbm_to_vmem [thread:$0]  %s7384_s25, 16, %s189_s28, [#allocation12]  }
  0x97   :  { %s6245_s17 = scalar_lea.hbm %s7394_s3, 64 }
  0x98   :  { %p6246_p10 = scmp.ne.s32.totalorder %s7394_s3, %s6245_s17  ;;  %p6249_p11 = scmp.lt.u32.totalorder %s6245_s17, %s7394_s3 }
  0x9a   :  { %p6251_p12 = pnand %p6249_p11, %p6246_p10 }
  0x9c   :  { %6254 = shalt.err (!%p6251_p12)
}
  0x9d   :  { %s6255_s11 = scalar_lea.vmem %s209_s2, 64  ;;  %p6260_p0 = scmp.lt.s32.totalorder %s209_s2, %s209_s2 }
  0x9e   :  { %p6256_p13 = scmp.ne.s32.totalorder %s209_s2, %s6255_s11  ;;  %p6261_p1 = scmp.lt.s32.totalorder %s6255_s11, %s6255_s11 }
  0xa0   :  { %p6262_p2 = por %p6261_p1, %p6260_p0 }
  0xa2   :  { %p6263_p3 = pnand %p6262_p2, %p6256_p13 }
  0xa4   :  { %6266 = shalt.err (!%p6263_p3)
}
  0xa5   :  { %211 = dma.hbm_to_vmem [thread:$0]  %s7394_s3, 64, %s209_s2, [#allocation15]  }
  0xa6   :  { %s7292_s15 = smov [#allocation17]   ;;  %s7293_s25 = smov [#allocation20]  }
  0xa7   :  { %s227_s16 = sshll.u32 %s7292_s15, 4  ;;  %s252_s23 = sshll.u32 %s7293_s25, 4  ;;  %s228_s16 = int_to_ptr.vmem [resolvable:$true] %s227_s16  ;;  %s253_s23 = int_to_ptr.vmem [resolvable:$true] %s252_s23 }
  0xa8   :  { %s6267_s26 = scalar_lea.hbm %s7404_s14, 512 }
  0xa9   :  { %p6268_p4 = scmp.ne.s32.totalorder %s7404_s14, %s6267_s26  ;;  %p6271_p5 = scmp.lt.u32.totalorder %s6267_s26, %s7404_s14 }
  0xab   :  { %p6273_p6 = pnand %p6271_p5, %p6268_p4 }
  0xad   :  { %6276 = shalt.err (!%p6273_p6)
}
  0xae   :  { %s6277_s9 = scalar_lea.vmem %s228_s16, 512  ;;  %p6282_p8 = scmp.lt.s32.totalorder %s228_s16, %s228_s16 }
  0xaf   :  { %p6278_p7 = scmp.ne.s32.totalorder %s228_s16, %s6277_s9  ;;  %p6283_p9 = scmp.lt.s32.totalorder %s6277_s9, %s6277_s9 }
  0xb1   :  { %p6284_p10 = por %p6283_p9, %p6282_p8 }
  0xb3   :  { %p6285_p11 = pnand %p6284_p10, %p6278_p7 }
  0xb5   :  { %6288 = shalt.err (!%p6285_p11)
}
  0xb6   :  { %233 = dma.hbm_to_vmem [thread:$0]  %s7404_s14, 512, %s228_s16, [#allocation18], %s7288_s18, %s7288_s18, %s7289_s22  }
  0xb7   :  { %s6289_s3 = scalar_lea.hbm %s7414_s24, 128 }
  0xb8   :  { %p6290_p12 = scmp.ne.s32.totalorder %s7414_s24, %s6289_s3  ;;  %p6293_p13 = scmp.lt.u32.totalorder %s6289_s3, %s7414_s24 }
  0xba   :  { %p6295_p0 = pnand %p6293_p13, %p6290_p12 }
  0xbc   :  { %6298 = shalt.err (!%p6295_p0)
}
  0xbd   :  { %s6299_s28 = scalar_lea.vmem %s253_s23, 128  ;;  %p6304_p2 = scmp.lt.s32.totalorder %s253_s23, %s253_s23 }
  0xbe   :  { %p6300_p1 = scmp.ne.s32.totalorder %s253_s23, %s6299_s28  ;;  %p6305_p3 = scmp.lt.s32.totalorder %s6299_s28, %s6299_s28 }
  0xc0   :  { %p6306_p4 = por %p6305_p3, %p6304_p2 }
  0xc2   :  { %p6307_p5 = pnand %p6306_p4, %p6300_p1 }
  0xc4   :  { %6310 = shalt.err (!%p6307_p5)
}
  0xc5   :  { %255 = dma.hbm_to_vmem [thread:$0]  %s7414_s24, 128, %s253_s23, [#allocation21]  }
  0xc6   :  { %s7294_s1 = smov [#allocation23]   ;;  %s7295_s14 = smov [#allocation26]  }
  0xc7   :  { %s272_s2 = sshll.u32 %s7294_s1, 4  ;;  %s292_s0 = sshll.u32 %s7295_s14, 4  ;;  %s273_s2 = int_to_ptr.vmem [resolvable:$true] %s272_s2  ;;  %s293_s0 = int_to_ptr.vmem [resolvable:$true] %s292_s0 }
  0xc8   :  { %s6311_s7 = scalar_lea.hbm %s7424_s6, 16 }
  0xc9   :  { %p6312_p6 = scmp.ne.s32.totalorder %s7424_s6, %s6311_s7  ;;  %p6315_p7 = scmp.lt.u32.totalorder %s6311_s7, %s7424_s6 }
  0xcb   :  { %p6317_p8 = pnand %p6315_p7, %p6312_p6 }
  0xcd   :  { %6320 = shalt.err (!%p6317_p8)
}
  0xce   :  { %s6321_s10 = scalar_lea.vmem %s273_s2, 16  ;;  %s6325_s17 = scalar_lea.vmem %s273_s2, 32 }
  0xcf   :  { %p6322_p9 = scmp.ne.s32.totalorder %s273_s2, %s6321_s10  ;;  %p6326_p10 = scmp.lt.s32.totalorder %s273_s2, %s273_s2 }
  0xd0   :  { %p6327_p11 = scmp.lt.s32.totalorder %s6325_s17, %s6321_s10 }
  0xd2   :  { %p6328_p12 = por %p6327_p11, %p6326_p10 }
  0xd4   :  { %p6329_p13 = pnand %p6328_p12, %p6322_p9 }
  0xd6   :  { %6332 = shalt.err (!%p6329_p13)
}
  0xd7   :  { %275 = dma.hbm_to_vmem [thread:$0]  %s7424_s6, 16, %s273_s2, [#allocation24]  }
  0xd8   :  { %s6333_s24 = scalar_lea.hbm %s7434_s20, 128 }
  0xd9   :  { %p6334_p0 = scmp.ne.s32.totalorder %s7434_s20, %s6333_s24  ;;  %p6337_p1 = scmp.lt.u32.totalorder %s6333_s24, %s7434_s20 }
  0xdb   :  { %p6339_p2 = pnand %p6337_p1, %p6334_p0 }
  0xdd   :  { %6342 = shalt.err (!%p6339_p2)
}
  0xde   :  { %s6343_s11 = scalar_lea.vmem %s293_s0, 128  ;;  %p6348_p4 = scmp.lt.s32.totalorder %s293_s0, %s293_s0 }
  0xdf   :  { %p6344_p3 = scmp.ne.s32.totalorder %s293_s0, %s6343_s11  ;;  %p6349_p5 = scmp.lt.s32.totalorder %s6343_s11, %s6343_s11 }
  0xe1   :  { %p6350_p6 = por %p6349_p5, %p6348_p4 }
  0xe3   :  { %p6351_p7 = pnand %p6350_p6, %p6344_p3 }
  0xe5   :  { %6354 = shalt.err (!%p6351_p7)
}
  0xe6   :  { %295 = dma.hbm_to_vmem [thread:$0]  %s7434_s20, 128, %s293_s0, [#allocation27]  }
  0xe7   :  { %s7296_s15 = smov [#allocation29]   ;;  %s7297_s6 = smov [#allocation32]  }
  0xe8   :  { %s313_s16 = sshll.u32 %s7296_s15, 4  ;;  %s336_s25 = sshll.u32 %s7297_s6, 4  ;;  %s314_s16 = int_to_ptr.vmem [resolvable:$true] %s313_s16  ;;  %s337_s25 = int_to_ptr.vmem [resolvable:$true] %s336_s25 }
  0xe9   :  { %s6355_s23 = scalar_lea.hbm %s7444_s4, 512 }
  0xea   :  { %p6356_p8 = scmp.ne.s32.totalorder %s7444_s4, %s6355_s23  ;;  %p6359_p9 = scmp.lt.u32.totalorder %s6355_s23, %s7444_s4 }
  0xec   :  { %p6361_p10 = pnand %p6359_p9, %p6356_p8 }
  0xee   :  { %6364 = shalt.err (!%p6361_p10)
}
  0xef   :  { %s6365_s26 = scalar_lea.vmem %s314_s16, 512  ;;  %p6370_p12 = scmp.lt.s32.totalorder %s314_s16, %s314_s16 }
  0xf0   :  { %p6366_p11 = scmp.ne.s32.totalorder %s314_s16, %s6365_s26  ;;  %p6371_p13 = scmp.lt.s32.totalorder %s6365_s26, %s6365_s26 }
  0xf2   :  { %p6372_p0 = por %p6371_p13, %p6370_p12 }
  0xf4   :  { %p6373_p1 = pnand %p6372_p0, %p6366_p11 }
  0xf6   :  { %6376 = shalt.err (!%p6373_p1)
}
  0xf7   :  { %319 = dma.hbm_to_vmem [thread:$0]  %s7444_s4, 512, %s314_s16, [#allocation30], %s7288_s18, %s7288_s18, %s7289_s22  }
  0xf8   :  { %s6377_s20 = scalar_lea.hbm %s7454_s30, 16 }
  0xf9   :  { %p6378_p2 = scmp.ne.s32.totalorder %s7454_s30, %s6377_s20  ;;  %p6381_p3 = scmp.lt.u32.totalorder %s6377_s20, %s7454_s30 }
  0xfb   :  { %p6383_p4 = pnand %p6381_p3, %p6378_p2 }
  0xfd   :  { %6386 = shalt.err (!%p6383_p4)
}
  0xfe   :  { %s6387_s9 = scalar_lea.vmem %s337_s25, 16  ;;  %s6391_s3 = scalar_lea.vmem %s337_s25, 32 }
  0xff   :  { %p6388_p5 = scmp.ne.s32.totalorder %s337_s25, %s6387_s9  ;;  %p6392_p6 = scmp.lt.s32.totalorder %s337_s25, %s337_s25 }
 0x100   :  { %p6393_p7 = scmp.lt.s32.totalorder %s6391_s3, %s6387_s9 }
 0x102   :  { %p6394_p8 = por %p6393_p7, %p6392_p6 }
 0x104   :  { %p6395_p9 = pnand %p6394_p8, %p6388_p5 }
 0x106   :  { %6398 = shalt.err (!%p6395_p9)
}
 0x107   :  { %339 = dma.hbm_to_vmem [thread:$0]  %s7454_s30, 16, %s337_s25, [#allocation33]  }
 0x108   :  { %s7298_s28 = smov [#allocation35]   ;;  %s7299_s1 = smov [#allocation38]  }
 0x109   :  { %s355_s4 = sshll.u32 %s7298_s28, 4  ;;  %s379_s2 = sshll.u32 %s7299_s1, 4  ;;  %s356_s4 = int_to_ptr.vmem [resolvable:$true] %s355_s4  ;;  %s7645_s2 = int_to_ptr.vmem [resolvable:$true] %s379_s2 }
 0x10a   :  { %s6399_s14 = scalar_lea.hbm %s7464_s19, 256 }
 0x10b   :  { %p6400_p10 = scmp.ne.s32.totalorder %s7464_s19, %s6399_s14  ;;  %p6403_p11 = scmp.lt.u32.totalorder %s6399_s14, %s7464_s19 }
 0x10d   :  { %p6405_p12 = pnand %p6403_p11, %p6400_p10 }
 0x10f   :  { %6408 = shalt.err (!%p6405_p12)
}
 0x110   :  { %s6409_s0 = scalar_lea.vmem %s356_s4, 256  ;;  %p6414_p0 = scmp.lt.s32.totalorder %s356_s4, %s356_s4 }
 0x111   :  { %p6410_p13 = scmp.ne.s32.totalorder %s356_s4, %s6409_s0  ;;  %p6415_p1 = scmp.lt.s32.totalorder %s6409_s0, %s6409_s0 }
 0x113   :  { %p6416_p2 = por %p6415_p1, %p6414_p0 }
 0x115   :  { %p6417_p3 = pnand %p6416_p2, %p6410_p13 }
 0x117   :  { %6420 = shalt.err (!%p6417_p3)
}
 0x118   :  { %361 = dma.hbm_to_vmem [thread:$0]  %s7464_s19, 256, %s356_s4, [#allocation36], %s7288_s18, %s7288_s18, %s7289_s22  }
 0x119   :  { %s6421_s30 = scalar_lea.hbm %s7474_s8, 256 }
 0x11a   :  { %p6422_p4 = scmp.ne.s32.totalorder %s7474_s8, %s6421_s30  ;;  %p6425_p5 = scmp.lt.u32.totalorder %s6421_s30, %s7474_s8 }
 0x11c   :  { %p6427_p6 = pnand %p6425_p5, %p6422_p4 }
 0x11e   :  { %6430 = shalt.err (!%p6427_p6)
}
 0x11f   :  { %s6431_s7 = scalar_lea.vmem %s7645_s2, 256  ;;  %p6436_p8 = scmp.lt.s32.totalorder %s7645_s2, %s7645_s2 }
 0x120   :  { %p6432_p7 = scmp.ne.s32.totalorder %s7645_s2, %s6431_s7  ;;  %p6437_p9 = scmp.lt.s32.totalorder %s6431_s7, %s6431_s7 }
 0x122   :  { %p6438_p10 = por %p6437_p9, %p6436_p8 }
 0x124   :  { %p6439_p11 = pnand %p6438_p10, %p6432_p7 }
 0x126   :  { %6442 = shalt.err (!%p6439_p11)
}
 0x127   :  { %385 = dma.hbm_to_vmem [thread:$0]  %s7474_s8, 256, %s7645_s2, [#allocation39], %s7288_s18, %s7288_s18, %s7289_s22  }
 0x128   :  { %s7300_s19 = smov [#allocation41]   ;;  %s7301_s17 = smov [#allocation44]  }
 0x129   :  { %s403_s10 = sshll.u32 %s7300_s19, 4  ;;  %s426_s24 = sshll.u32 %s7301_s17, 4  ;;  %s404_s10 = int_to_ptr.vmem [resolvable:$true] %s403_s10  ;;  %s427_s24 = int_to_ptr.vmem [resolvable:$true] %s426_s24 }
 0x12a   :  { %s6443_s11 = scalar_lea.hbm %s7484_s29, 256 }
 0x12b   :  { %p6444_p12 = scmp.ne.s32.totalorder %s7484_s29, %s6443_s11  ;;  %p6447_p13 = scmp.lt.u32.totalorder %s6443_s11, %s7484_s29 }
 0x12d   :  { %p6449_p0 = pnand %p6447_p13, %p6444_p12 }
 0x12f   :  { %6452 = shalt.err (!%p6449_p0)
}
 0x130   :  { %s6453_s15 = scalar_lea.vmem %s404_s10, 256  ;;  %p6458_p2 = scmp.lt.s32.totalorder %s404_s10, %s404_s10 }
 0x131   :  { %p6454_p1 = scmp.ne.s32.totalorder %s404_s10, %s6453_s15  ;;  %p6459_p3 = scmp.lt.s32.totalorder %s6453_s15, %s6453_s15 }
 0x133   :  { %p6460_p4 = por %p6459_p3, %p6458_p2 }
 0x135   :  { %p6461_p5 = pnand %p6460_p4, %p6454_p1 }
 0x137   :  { %6464 = shalt.err (!%p6461_p5)
}
 0x138   :  { %409 = dma.hbm_to_vmem [thread:$0]  %s7484_s29, 256, %s404_s10, [#allocation42], %s7288_s18, %s7288_s18, %s7289_s22  }
 0x139   :  { %s6465_s8 = scalar_lea.hbm %s7494_s21, 16 }
 0x13a   :  { %p6466_p6 = scmp.ne.s32.totalorder %s7494_s21, %s6465_s8  ;;  %p6469_p7 = scmp.lt.u32.totalorder %s6465_s8, %s7494_s21 }
 0x13c   :  { %p6471_p8 = pnand %p6469_p7, %p6466_p6 }
 0x13e   :  { %6474 = shalt.err (!%p6471_p8)
}
 0x13f   :  { %s6475_s16 = scalar_lea.vmem %s427_s24, 16  ;;  %s6479_s6 = scalar_lea.vmem %s427_s24, 32 }
 0x140   :  { %p6476_p9 = scmp.ne.s32.totalorder %s427_s24, %s6475_s16  ;;  %p6480_p10 = scmp.lt.s32.totalorder %s427_s24, %s427_s24 }
 0x141   :  { %p6481_p11 = scmp.lt.s32.totalorder %s6479_s6, %s6475_s16 }
 0x143   :  { %p6482_p12 = por %p6481_p11, %p6480_p10 }
 0x145   :  { %p6483_p13 = pnand %p6482_p12, %p6476_p9 }
 0x147   :  { %6486 = shalt.err (!%p6483_p13)
}
 0x148   :  { %s8717_s25 = sld [smem:[#allocation113_spill]]  ;;  %s7302_s23 = smov [#allocation47]  }
 0x149   :  { %429 = dma.hbm_to_vmem [thread:$0]  %s7494_s21, 16, %s427_s24, [#allocation45]  }
 0x14a   :  { %s446_s29 = sshll.u32 %s7302_s23, 4  ;;  %s7303_s26 = smov [#allocation50]   ;;  %s447_s29 = int_to_ptr.vmem [resolvable:$true] %s446_s29 }
 0x14b   :  { %s467_s20 = sshll.u32 %s7303_s26, 4  ;;  %s7677_s20 = int_to_ptr.vmem [resolvable:$true] %s467_s20 }
 0x14e   :  { %s6487_s9 = scalar_lea.hbm %s8717_s25, 64 }
 0x14f   :  { %p6488_p0 = scmp.ne.s32.totalorder %s8717_s25, %s6487_s9  ;;  %p6491_p1 = scmp.lt.u32.totalorder %s6487_s9, %s8717_s25 }
 0x151   :  { %p6493_p2 = pnand %p6491_p1, %p6488_p0 }
 0x153   :  { %6496 = shalt.err (!%p6493_p2)
}
 0x154   :  { %s6497_s3 = scalar_lea.vmem %s447_s29, 64  ;;  %p6502_p4 = scmp.lt.s32.totalorder %s447_s29, %s447_s29 }
 0x155   :  { %p6498_p3 = scmp.ne.s32.totalorder %s447_s29, %s6497_s3  ;;  %p6503_p5 = scmp.lt.s32.totalorder %s6497_s3, %s6497_s3 }
 0x157   :  { %p6504_p6 = por %p6503_p5, %p6502_p4 }
 0x159   :  { %p6505_p7 = pnand %p6504_p6, %p6498_p3 }
 0x15b   :  { %6508 = shalt.err (!%p6505_p7)
}
 0x15c   :  { %s8718_s21 = sld [smem:[#allocation115_spill]] }
 0x15d   :  { %449 = dma.hbm_to_vmem [thread:$0]  %s8717_s25, 64, %s447_s29, [#allocation48]  }
 0x162   :  { %s6509_s28 = scalar_lea.hbm %s8718_s21, 512 }
 0x163   :  { %p6510_p8 = scmp.ne.s32.totalorder %s8718_s21, %s6509_s28  ;;  %p6513_p9 = scmp.lt.u32.totalorder %s6509_s28, %s8718_s21 }
 0x165   :  { %p6515_p10 = pnand %p6513_p9, %p6510_p8 }
 0x167   :  { %6518 = shalt.err (!%p6515_p10)
}
 0x168   :  { %s6519_s4 = scalar_lea.vmem %s7677_s20, 512  ;;  %p6524_p12 = scmp.lt.s32.totalorder %s7677_s20, %s7677_s20 }
 0x169   :  { %p6520_p11 = scmp.ne.s32.totalorder %s7677_s20, %s6519_s4  ;;  %p6525_p13 = scmp.lt.s32.totalorder %s6519_s4, %s6519_s4 }
 0x16b   :  { %p6526_p0 = por %p6525_p13, %p6524_p12 }
 0x16d   :  { %p6527_p1 = pnand %p6526_p0, %p6520_p11 }
 0x16f   :  { %6530 = shalt.err (!%p6527_p1)
}
 0x170   :  { %s8719_s1 = sld [smem:[#allocation117_spill]]  ;;  %s7304_s2 = smov [#allocation53]  }
 0x171   :  { %473 = dma.hbm_to_vmem [thread:$0]  %s8718_s21, 512, %s7677_s20, [#allocation51], %s7288_s18, %s7288_s18, %s7289_s22  }
 0x172   :  { %s490_s14 = sshll.u32 %s7304_s2, 4  ;;  %s7305_s0 = smov [#allocation56]   ;;  %s491_s14 = int_to_ptr.vmem [resolvable:$true] %s490_s14 }
 0x173   :  { %s510_s30 = sshll.u32 %s7305_s0, 4  ;;  %s511_s30 = int_to_ptr.vmem [resolvable:$true] %s510_s30 }
 0x176   :  { %s6531_s7 = scalar_lea.hbm %s8719_s1, 16 }
 0x177   :  { %p6532_p2 = scmp.ne.s32.totalorder %s8719_s1, %s6531_s7  ;;  %p6535_p3 = scmp.lt.u32.totalorder %s6531_s7, %s8719_s1 }
 0x179   :  { %p6537_p4 = pnand %p6535_p3, %p6532_p2 }
 0x17b   :  { %6540 = shalt.err (!%p6537_p4)
}
 0x17c   :  { %s6541_s19 = scalar_lea.vmem %s491_s14, 16  ;;  %s6545_s10 = scalar_lea.vmem %s491_s14, 32 }
 0x17d   :  { %p6542_p5 = scmp.ne.s32.totalorder %s491_s14, %s6541_s19  ;;  %p6546_p6 = scmp.lt.s32.totalorder %s491_s14, %s491_s14 }
 0x17e   :  { %p6547_p7 = scmp.lt.s32.totalorder %s6545_s10, %s6541_s19 }
 0x180   :  { %p6548_p8 = por %p6547_p7, %p6546_p6 }
 0x182   :  { %p6549_p9 = pnand %p6548_p8, %p6542_p5 }
 0x184   :  { %6552 = shalt.err (!%p6549_p9)
}
 0x185   :  { %s8720_s17 = sld [smem:[#allocation119_spill]] }
 0x186   :  { %493 = dma.hbm_to_vmem [thread:$0]  %s8719_s1, 16, %s491_s14, [#allocation54]  }
 0x18b   :  { %s6553_s24 = scalar_lea.hbm %s8720_s17, 64 }
 0x18c   :  { %p6554_p10 = scmp.ne.s32.totalorder %s8720_s17, %s6553_s24  ;;  %p6557_p11 = scmp.lt.u32.totalorder %s6553_s24, %s8720_s17 }
 0x18e   :  { %p6559_p12 = pnand %p6557_p11, %p6554_p10 }
 0x190   :  { %6562 = shalt.err (!%p6559_p12)
}
 0x191   :  { %s6563_s11 = scalar_lea.vmem %s511_s30, 64  ;;  %p6568_p0 = scmp.lt.s32.totalorder %s511_s30, %s511_s30 }
 0x192   :  { %p6564_p13 = scmp.ne.s32.totalorder %s511_s30, %s6563_s11  ;;  %p6569_p1 = scmp.lt.s32.totalorder %s6563_s11, %s6563_s11 }
 0x194   :  { %p6570_p2 = por %p6569_p1, %p6568_p0 }
 0x196   :  { %p6571_p3 = pnand %p6570_p2, %p6564_p13 }
 0x198   :  { %6574 = shalt.err (!%p6571_p3)
}
 0x199   :  { %s8721_s15 = sld [smem:[#allocation121_spill]]  ;;  %s7306_s8 = smov [#allocation59]  }
 0x19a   :  { %513 = dma.hbm_to_vmem [thread:$0]  %s8720_s17, 64, %s511_s30, [#allocation57]  }
 0x19b   :  { %s529_s16 = sshll.u32 %s7306_s8, 4  ;;  %s7307_s6 = smov [#allocation62]   ;;  %s530_s16 = int_to_ptr.vmem [resolvable:$true] %s529_s16 }
 0x19c   :  { %s554_s25 = sshll.u32 %s7307_s6, 4  ;;  %s555_s25 = int_to_ptr.vmem [resolvable:$true] %s554_s25 }
 0x19f   :  { %s6575_s23 = scalar_lea.hbm %s8721_s15, 512 }
 0x1a0   :  { %p6576_p4 = scmp.ne.s32.totalorder %s8721_s15, %s6575_s23  ;;  %p6579_p5 = scmp.lt.u32.totalorder %s6575_s23, %s8721_s15 }
 0x1a2   :  { %p6581_p6 = pnand %p6579_p5, %p6576_p4 }
 0x1a4   :  { %6584 = shalt.err (!%p6581_p6)
}
 0x1a5   :  { %s6585_s29 = scalar_lea.vmem %s530_s16, 512  ;;  %p6590_p8 = scmp.lt.s32.totalorder %s530_s16, %s530_s16 }
 0x1a6   :  { %p6586_p7 = scmp.ne.s32.totalorder %s530_s16, %s6585_s29  ;;  %p6591_p9 = scmp.lt.s32.totalorder %s6585_s29, %s6585_s29 }
 0x1a8   :  { %p6592_p10 = por %p6591_p9, %p6590_p8 }
 0x1aa   :  { %p6593_p11 = pnand %p6592_p10, %p6586_p7 }
 0x1ac   :  { %6596 = shalt.err (!%p6593_p11)
}
 0x1ad   :  { %s8722_s26 = sld [smem:[#allocation123_spill]] }
 0x1ae   :  { %535 = dma.hbm_to_vmem [thread:$0]  %s8721_s15, 512, %s530_s16, [#allocation60], %s7288_s18, %s7288_s18, %s7289_s22  }
 0x1b3   :  { %s6597_s20 = scalar_lea.hbm %s8722_s26, 64 }
 0x1b4   :  { %p6598_p12 = scmp.ne.s32.totalorder %s8722_s26, %s6597_s20  ;;  %p6601_p13 = scmp.lt.u32.totalorder %s6597_s20, %s8722_s26 }
 0x1b6   :  { %p6603_p0 = pnand %p6601_p13, %p6598_p12 }
 0x1b8   :  { %6606 = shalt.err (!%p6603_p0)
}
 0x1b9   :  { %s6607_s9 = scalar_lea.vmem %s555_s25, 64  ;;  %p6612_p2 = scmp.lt.s32.totalorder %s555_s25, %s555_s25 }
 0x1ba   :  { %p6608_p1 = scmp.ne.s32.totalorder %s555_s25, %s6607_s9  ;;  %p6613_p3 = scmp.lt.s32.totalorder %s6607_s9, %s6607_s9 }
 0x1bc   :  { %p6614_p4 = por %p6613_p3, %p6612_p2 }
 0x1be   :  { %p6615_p5 = pnand %p6614_p4, %p6608_p1 }
 0x1c0   :  { %6618 = shalt.err (!%p6615_p5)
}
 0x1c1   :  { %s8723_s3 = sld [smem:[#allocation125_spill]]  ;;  %s7308_s21 = smov [#allocation65]  }
 0x1c2   :  { %557 = dma.hbm_to_vmem [thread:$0]  %s8722_s26, 64, %s555_s25, [#allocation63]  }
 0x1c3   :  { %s574_s28 = sshll.u32 %s7308_s21, 4  ;;  %s7309_s4 = smov [#allocation2]   ;;  %s575_s28 = int_to_ptr.vmem [resolvable:$true] %s574_s28 }
 0x1c4   :  { %s127_s1 = sshll.u32 %s7309_s4, 4  ;;  %s7714_s1 = int_to_ptr.vmem [resolvable:$true] %s127_s1 }
 0x1c7   :  { %s6619_s2 = scalar_lea.hbm %s8723_s3, 16 }
 0x1c8   :  { %p6620_p6 = scmp.ne.s32.totalorder %s8723_s3, %s6619_s2  ;;  %p6623_p7 = scmp.lt.u32.totalorder %s6619_s2, %s8723_s3 }
 0x1ca   :  { %p6625_p8 = pnand %p6623_p7, %p6620_p6 }
 0x1cc   :  { %6628 = shalt.err (!%p6625_p8)
}
 0x1cd   :  { %s6629_s14 = scalar_lea.vmem %s575_s28, 16  ;;  %s6633_s0 = scalar_lea.vmem %s575_s28, 32 }
 0x1ce   :  { %p6630_p9 = scmp.ne.s32.totalorder %s575_s28, %s6629_s14  ;;  %p6634_p10 = scmp.lt.s32.totalorder %s575_s28, %s575_s28 }
 0x1cf   :  { %p6635_p11 = scmp.lt.s32.totalorder %s6633_s0, %s6629_s14 }
 0x1d1   :  { %p6636_p12 = por %p6635_p11, %p6634_p10 }
 0x1d3   :  { %p6637_p13 = pnand %p6636_p12, %p6630_p9 }
 0x1d5   :  { %6640 = shalt.err (!%p6637_p13)
}
 0x1d6   :  { %s8724_s30 = sld [smem:[#allocation98_spill]] }
 0x1d7   :  { %577 = dma.hbm_to_vmem [thread:$0]  %s8723_s3, 16, %s575_s28, [#allocation66]  }
 0x1dc   :  { %s6641_s7 = scalar_lea.hbm %s8724_s30, 256 }
 0x1dd   :  { %p6642_p0 = scmp.ne.s32.totalorder %s8724_s30, %s6641_s7  ;;  %p6645_p1 = scmp.lt.u32.totalorder %s6641_s7, %s8724_s30 }
 0x1df   :  { %p6647_p2 = pnand %p6645_p1, %p6642_p0 }
 0x1e1   :  { %6650 = shalt.err (!%p6647_p2)
}
 0x1e2   :  { %s6651_s19 = scalar_lea.vmem %s7714_s1, 256  ;;  %p6656_p4 = scmp.lt.s32.totalorder %s7714_s1, %s7714_s1 }
 0x1e3   :  { %p6652_p3 = scmp.ne.s32.totalorder %s7714_s1, %s6651_s19  ;;  %p6657_p5 = scmp.lt.s32.totalorder %s6651_s19, %s6651_s19 }
 0x1e5   :  { %p6658_p6 = por %p6657_p5, %p6656_p4 }
 0x1e7   :  { %p6659_p7 = pnand %p6658_p6, %p6652_p3 }
 0x1e9   :  { %6662 = shalt.err (!%p6659_p7)
}
 0x1ea   :  { %s8725_s10 = sld [smem:[#allocation99_spill]]  ;;  %s7310_s17 = smov [#allocation7]  }
 0x1eb   :  { %133 = dma.hbm_to_vmem [thread:$0]  %s8724_s30, 256, %s7714_s1, [#allocation3], %s7288_s18, %s7288_s18, %s7289_s22  }
 0x1ec   :  { %s151_s24 = sshll.u32 %s7310_s17, 4  ;;  %s7311_s11 = smov [#allocation10]   ;;  %s152_s24 = int_to_ptr.vmem [resolvable:$true] %s151_s24 }
 0x1ed   :  { %s175_s15 = sshll.u32 %s7311_s11, 4  ;;  %s7732_s15 = int_to_ptr.vmem [resolvable:$true] %s175_s15 }
 0x1f0   :  { %s6663_s8 = scalar_lea.hbm %s8725_s10, 512 }
 0x1f1   :  { %p6664_p8 = scmp.ne.s32.totalorder %s8725_s10, %s6663_s8  ;;  %p6667_p9 = scmp.lt.u32.totalorder %s6663_s8, %s8725_s10 }
 0x1f3   :  { %p6669_p10 = pnand %p6667_p9, %p6664_p8 }
 0x1f5   :  { %6672 = shalt.err (!%p6669_p10)
}
 0x1f6   :  { %s6673_s16 = scalar_lea.vmem %s152_s24, 512  ;;  %p6678_p12 = scmp.lt.s32.totalorder %s152_s24, %s152_s24 }
 0x1f7   :  { %p6674_p11 = scmp.ne.s32.totalorder %s152_s24, %s6673_s16  ;;  %p6679_p13 = scmp.lt.s32.totalorder %s6673_s16, %s6673_s16 }
 0x1f9   :  { %p6680_p0 = por %p6679_p13, %p6678_p12 }
 0x1fb   :  { %p6681_p1 = pnand %p6680_p0, %p6674_p11 }
 0x1fd   :  { %6684 = shalt.err (!%p6681_p1)
}
 0x1fe   :  { %s8726_s6 = sld [smem:[#allocation100_spill]] }
 0x1ff   :  { %157 = dma.hbm_to_vmem [thread:$0]  %s8725_s10, 512, %s152_s24, [#allocation6], %s7288_s18, %s7288_s18, %s7289_s22  }
 0x204   :  { %s6685_s25 = scalar_lea.hbm %s8726_s6, 512 }
 0x205   :  { %p6686_p2 = scmp.ne.s32.totalorder %s8726_s6, %s6685_s25  ;;  %p6689_p3 = scmp.lt.u32.totalorder %s6685_s25, %s8726_s6 }
 0x207   :  { %p6691_p4 = pnand %p6689_p3, %p6686_p2 }
 0x209   :  { %6694 = shalt.err (!%p6691_p4)
}
 0x20a   :  { %s6695_s23 = scalar_lea.vmem %s7732_s15, 512  ;;  %p6700_p6 = scmp.lt.s32.totalorder %s7732_s15, %s7732_s15 }
 0x20b   :  { %p6696_p5 = scmp.ne.s32.totalorder %s7732_s15, %s6695_s23  ;;  %p6701_p7 = scmp.lt.s32.totalorder %s6695_s23, %s6695_s23 }
 0x20d   :  { %p6702_p8 = por %p6701_p7, %p6700_p6 }
 0x20f   :  { %p6703_p9 = pnand %p6702_p8, %p6696_p5 }
 0x211   :  { %6706 = shalt.err (!%p6703_p9)
}
 0x212   :  { %s7312_s29 = smov 64   ;;  %s8727_s26 = sld [smem:[#allocation101_spill]] }
 0x213   :  { %s7313_s20 = smov 4   ;;  %s7314_s9 = smov [#allocation13]  }
 0x214   :  { %181 = dma.hbm_to_vmem [thread:$0]  %s8726_s6, 512, %s7732_s15, [#allocation9], %s7312_s29, %s7312_s29, %s7313_s20  }
 0x215   :  { %s198_s3 = sshll.u32 %s7314_s9, 4  ;;  %s7315_s21 = smov [#allocation16]   ;;  %s199_s3 = int_to_ptr.vmem [resolvable:$true] %s198_s3 }
 0x216   :  { %s218_s28 = sshll.u32 %s7315_s21, 4  ;;  %s219_s28 = int_to_ptr.vmem [resolvable:$true] %s218_s28 }
 0x218   :  { %s6707_s4 = scalar_lea.hbm %s8727_s26, 16 }
 0x219   :  { %p6708_p10 = scmp.ne.s32.totalorder %s8727_s26, %s6707_s4  ;;  %p6711_p11 = scmp.lt.u32.totalorder %s6707_s4, %s8727_s26 }
 0x21b   :  { %p6713_p12 = pnand %p6711_p11, %p6708_p10 }
 0x21d   :  { %6716 = shalt.err (!%p6713_p12)
}
 0x21e   :  { %s6717_s1 = scalar_lea.vmem %s199_s3, 16  ;;  %s6721_s2 = scalar_lea.vmem %s199_s3, 32 }
 0x21f   :  { %p6718_p13 = scmp.ne.s32.totalorder %s199_s3, %s6717_s1  ;;  %p6722_p0 = scmp.lt.s32.totalorder %s199_s3, %s199_s3 }
 0x220   :  { %p6723_p1 = scmp.lt.s32.totalorder %s6721_s2, %s6717_s1 }
 0x222   :  { %p6724_p2 = por %p6723_p1, %p6722_p0 }
 0x224   :  { %p6725_p3 = pnand %p6724_p2, %p6718_p13 }
 0x226   :  { %6728 = shalt.err (!%p6725_p3)
}
 0x227   :  { %s8728_s14 = sld [smem:[#allocation102_spill]] }
 0x228   :  { %201 = dma.hbm_to_vmem [thread:$0]  %s8727_s26, 16, %s199_s3, [#allocation12]  }
 0x22d   :  { %s6729_s0 = scalar_lea.hbm %s8728_s14, 128 }
 0x22e   :  { %p6730_p4 = scmp.ne.s32.totalorder %s8728_s14, %s6729_s0  ;;  %p6733_p5 = scmp.lt.u32.totalorder %s6729_s0, %s8728_s14 }
 0x230   :  { %p6735_p6 = pnand %p6733_p5, %p6730_p4 }
 0x232   :  { %6738 = shalt.err (!%p6735_p6)
}
 0x233   :  { %s6739_s30 = scalar_lea.vmem %s219_s28, 128  ;;  %p6744_p8 = scmp.lt.s32.totalorder %s219_s28, %s219_s28 }
 0x234   :  { %p6740_p7 = scmp.ne.s32.totalorder %s219_s28, %s6739_s30  ;;  %p6745_p9 = scmp.lt.s32.totalorder %s6739_s30, %s6739_s30 }
 0x236   :  { %p6746_p10 = por %p6745_p9, %p6744_p8 }
 0x238   :  { %p6747_p11 = pnand %p6746_p10, %p6740_p7 }
 0x23a   :  { %6750 = shalt.err (!%p6747_p11)
}
 0x23b   :  { %s8729_s7 = sld [smem:[#allocation103_spill]]  ;;  %s7316_s19 = smov [#allocation19]  }
 0x23c   :  { %221 = dma.hbm_to_vmem [thread:$0]  %s8728_s14, 128, %s219_s28, [#allocation15]  }
 0x23d   :  { %s239_s10 = sshll.u32 %s7316_s19, 4  ;;  %s7317_s17 = smov [#allocation22]   ;;  %s240_s10 = int_to_ptr.vmem [resolvable:$true] %s239_s10 }
 0x23e   :  { %s262_s24 = sshll.u32 %s7317_s17, 4  ;;  %s263_s24 = int_to_ptr.vmem [resolvable:$true] %s262_s24 }
 0x241   :  { %s6751_s11 = scalar_lea.hbm %s8729_s7, 2048 }
 0x242   :  { %p6752_p12 = scmp.ne.s32.totalorder %s8729_s7, %s6751_s11  ;;  %p6755_p13 = scmp.lt.u32.totalorder %s6751_s11, %s8729_s7 }
 0x244   :  { %p6757_p0 = pnand %p6755_p13, %p6752_p12 }
 0x246   :  { %6760 = shalt.err (!%p6757_p0)
}
 0x247   :  { %s6761_s15 = scalar_lea.vmem %s240_s10, 2048  ;;  %p6766_p2 = scmp.lt.s32.totalorder %s240_s10, %s240_s10 }
 0x248   :  { %p6762_p1 = scmp.ne.s32.totalorder %s240_s10, %s6761_s15  ;;  %p6767_p3 = scmp.lt.s32.totalorder %s6761_s15, %s6761_s15 }
 0x24a   :  { %p6768_p4 = por %p6767_p3, %p6766_p2 }
 0x24c   :  { %p6769_p5 = pnand %p6768_p4, %p6762_p1 }
 0x24e   :  { %6772 = shalt.err (!%p6769_p5)
}
 0x24f   :  { %s8730_s8 = sld [smem:[#allocation104_spill]] }
 0x250   :  { %245 = dma.hbm_to_vmem [thread:$0]  %s8729_s7, 2048, %s240_s10, [#allocation18], %s7288_s18, %s7288_s18, %s7289_s22  }
 0x255   :  { %s6773_s16 = scalar_lea.hbm %s8730_s8, 16 }
 0x256   :  { %p6774_p6 = scmp.ne.s32.totalorder %s8730_s8, %s6773_s16  ;;  %p6777_p7 = scmp.lt.u32.totalorder %s6773_s16, %s8730_s8 }
 0x258   :  { %p6779_p8 = pnand %p6777_p7, %p6774_p6 }
 0x25a   :  { %6782 = shalt.err (!%p6779_p8)
}
 0x25b   :  { %s6783_s6 = scalar_lea.vmem %s263_s24, 16  ;;  %s6787_s25 = scalar_lea.vmem %s263_s24, 32 }
 0x25c   :  { %p6784_p9 = scmp.ne.s32.totalorder %s263_s24, %s6783_s6  ;;  %p6788_p10 = scmp.lt.s32.totalorder %s263_s24, %s263_s24 }
 0x25d   :  { %p6789_p11 = scmp.lt.s32.totalorder %s6787_s25, %s6783_s6 }
 0x25f   :  { %p6790_p12 = por %p6789_p11, %p6788_p10 }
 0x261   :  { %p6791_p13 = pnand %p6790_p12, %p6784_p9 }
 0x263   :  { %6794 = shalt.err (!%p6791_p13)
}
 0x264   :  { %s8731_s23 = sld [smem:[#allocation105_spill]]  ;;  %s7318_s29 = smov [#allocation25]  }
 0x265   :  { %265 = dma.hbm_to_vmem [thread:$0]  %s8730_s8, 16, %s263_s24, [#allocation21]  }
 0x266   :  { %s282_s26 = sshll.u32 %s7318_s29, 4  ;;  %s7319_s9 = smov [#allocation28]   ;;  %s283_s26 = int_to_ptr.vmem [resolvable:$true] %s282_s26 }
 0x267   :  { %s301_s3 = sshll.u32 %s7319_s9, 4  ;;  %s7770_s3 = int_to_ptr.vmem [resolvable:$true] %s301_s3 }
 0x26a   :  { %s6795_s21 = scalar_lea.hbm %s8731_s23, 128 }
 0x26b   :  { %p6796_p0 = scmp.ne.s32.totalorder %s8731_s23, %s6795_s21  ;;  %p6799_p1 = scmp.lt.u32.totalorder %s6795_s21, %s8731_s23 }
 0x26d   :  { %p6801_p2 = pnand %p6799_p1, %p6796_p0 }
 0x26f   :  { %6804 = shalt.err (!%p6801_p2)
}
 0x270   :  { %s6805_s28 = scalar_lea.vmem %s283_s26, 128  ;;  %p6810_p4 = scmp.lt.s32.totalorder %s283_s26, %s283_s26 }
 0x271   :  { %p6806_p3 = scmp.ne.s32.totalorder %s283_s26, %s6805_s28  ;;  %p6811_p5 = scmp.lt.s32.totalorder %s6805_s28, %s6805_s28 }
 0x273   :  { %p6812_p6 = por %p6811_p5, %p6810_p4 }
 0x275   :  { %p6813_p7 = pnand %p6812_p6, %p6806_p3 }
 0x277   :  { %6816 = shalt.err (!%p6813_p7)
}
 0x278   :  { %s8732_s4 = sld [smem:[#allocation106_spill]] }
 0x279   :  { %285 = dma.hbm_to_vmem [thread:$0]  %s8731_s23, 128, %s283_s26, [#allocation24]  }
 0x27e   :  { %s6817_s1 = scalar_lea.hbm %s8732_s4, 2048 }
 0x27f   :  { %p6818_p8 = scmp.ne.s32.totalorder %s8732_s4, %s6817_s1  ;;  %p6821_p9 = scmp.lt.u32.totalorder %s6817_s1, %s8732_s4 }
 0x281   :  { %p6823_p10 = pnand %p6821_p9, %p6818_p8 }
 0x283   :  { %6826 = shalt.err (!%p6823_p10)
}
 0x284   :  { %s6827_s2 = scalar_lea.vmem %s7770_s3, 2048  ;;  %p6832_p12 = scmp.lt.s32.totalorder %s7770_s3, %s7770_s3 }
 0x285   :  { %p6828_p11 = scmp.ne.s32.totalorder %s7770_s3, %s6827_s2  ;;  %p6833_p13 = scmp.lt.s32.totalorder %s6827_s2, %s6827_s2 }
 0x287   :  { %p6834_p0 = por %p6833_p13, %p6832_p12 }
 0x289   :  { %p6835_p1 = pnand %p6834_p0, %p6828_p11 }
 0x28b   :  { %6838 = shalt.err (!%p6835_p1)
}
 0x28c   :  { %s8733_s14 = sld [smem:[#allocation107_spill]]  ;;  %s7320_s0 = smov [#allocation31]  }
 0x28d   :  { %307 = dma.hbm_to_vmem [thread:$0]  %s8732_s4, 2048, %s7770_s3, [#allocation27], %s7288_s18, %s7288_s18, %s7289_s22  }
 0x28e   :  { %s326_s30 = sshll.u32 %s7320_s0, 4  ;;  %s7321_s7 = smov [#allocation34]   ;;  %s327_s30 = int_to_ptr.vmem [resolvable:$true] %s326_s30 }
 0x28f   :  { %s346_s19 = sshll.u32 %s7321_s7, 4  ;;  %s347_s19 = int_to_ptr.vmem [resolvable:$true] %s346_s19 }
 0x292   :  { %s6839_s10 = scalar_lea.hbm %s8733_s14, 128 }
 0x293   :  { %p6840_p2 = scmp.ne.s32.totalorder %s8733_s14, %s6839_s10  ;;  %p6843_p3 = scmp.lt.u32.totalorder %s6839_s10, %s8733_s14 }
 0x295   :  { %p6845_p4 = pnand %p6843_p3, %p6840_p2 }
 0x297   :  { %6848 = shalt.err (!%p6845_p4)
}
 0x298   :  { %s6849_s17 = scalar_lea.vmem %s327_s30, 128  ;;  %p6854_p6 = scmp.lt.s32.totalorder %s327_s30, %s327_s30 }
 0x299   :  { %p6850_p5 = scmp.ne.s32.totalorder %s327_s30, %s6849_s17  ;;  %p6855_p7 = scmp.lt.s32.totalorder %s6849_s17, %s6849_s17 }
 0x29b   :  { %p6856_p8 = por %p6855_p7, %p6854_p6 }
 0x29d   :  { %p6857_p9 = pnand %p6856_p8, %p6850_p5 }
 0x29f   :  { %6860 = shalt.err (!%p6857_p9)
}
 0x2a0   :  { %s8734_s24 = sld [smem:[#allocation108_spill]] }
 0x2a1   :  { %329 = dma.hbm_to_vmem [thread:$0]  %s8733_s14, 128, %s327_s30, [#allocation30]  }
 0x2a6   :  { %s6861_s11 = scalar_lea.hbm %s8734_s24, 16 }
 0x2a7   :  { %p6862_p10 = scmp.ne.s32.totalorder %s8734_s24, %s6861_s11  ;;  %p6865_p11 = scmp.lt.u32.totalorder %s6861_s11, %s8734_s24 }
 0x2a9   :  { %p6867_p12 = pnand %p6865_p11, %p6862_p10 }
 0x2ab   :  { %6870 = shalt.err (!%p6867_p12)
}
 0x2ac   :  { %s6871_s15 = scalar_lea.vmem %s347_s19, 16  ;;  %s6875_s8 = scalar_lea.vmem %s347_s19, 32 }
 0x2ad   :  { %p6872_p13 = scmp.ne.s32.totalorder %s347_s19, %s6871_s15  ;;  %p6876_p0 = scmp.lt.s32.totalorder %s347_s19, %s347_s19 }
 0x2ae   :  { %p6877_p1 = scmp.lt.s32.totalorder %s6875_s8, %s6871_s15 }
 0x2b0   :  { %p6878_p2 = por %p6877_p1, %p6876_p0 }
 0x2b2   :  { %p6879_p3 = pnand %p6878_p2, %p6872_p13 }
 0x2b4   :  { %6882 = shalt.err (!%p6879_p3)
}
 0x2b5   :  { %s8735_s16 = sld [smem:[#allocation109_spill]]  ;;  %s7322_s6 = smov [#allocation37]  }
 0x2b6   :  { %349 = dma.hbm_to_vmem [thread:$0]  %s8734_s24, 16, %s347_s19, [#allocation33]  }
 0x2b7   :  { %s367_s25 = sshll.u32 %s7322_s6, 4  ;;  %s7323_s23 = smov [#allocation40]   ;;  %s368_s25 = int_to_ptr.vmem [resolvable:$true] %s367_s25 }
 0x2b8   :  { %s391_s29 = sshll.u32 %s7323_s23, 4  ;;  %s7796_s29 = int_to_ptr.vmem [resolvable:$true] %s391_s29 }
 0x2bb   :  { %s6883_s26 = scalar_lea.hbm %s8735_s16, 1408 }
 0x2bc   :  { %p6884_p4 = scmp.ne.s32.totalorder %s8735_s16, %s6883_s26  ;;  %p6887_p5 = scmp.lt.u32.totalorder %s6883_s26, %s8735_s16 }
 0x2be   :  { %p6889_p6 = pnand %p6887_p5, %p6884_p4 }
 0x2c0   :  { %6892 = shalt.err (!%p6889_p6)
}
 0x2c1   :  { %s6893_s9 = scalar_lea.vmem %s368_s25, 1408  ;;  %p6898_p8 = scmp.lt.s32.totalorder %s368_s25, %s368_s25 }
 0x2c2   :  { %p6894_p7 = scmp.ne.s32.totalorder %s368_s25, %s6893_s9  ;;  %p6899_p9 = scmp.lt.s32.totalorder %s6893_s9, %s6893_s9 }
 0x2c4   :  { %p6900_p10 = por %p6899_p9, %p6898_p8 }
 0x2c6   :  { %p6901_p11 = pnand %p6900_p10, %p6894_p7 }
 0x2c8   :  { %6904 = shalt.err (!%p6901_p11)
}
 0x2c9   :  { %s8736_s3 = sld [smem:[#allocation110_spill]] }
 0x2ca   :  { %373 = dma.hbm_to_vmem [thread:$0]  %s8735_s16, 1408, %s368_s25, [#allocation36], %s7288_s18, %s7288_s18, %s7289_s22  }
 0x2cf   :  { %s6905_s21 = scalar_lea.hbm %s8736_s3, 512 }
 0x2d0   :  { %p6906_p12 = scmp.ne.s32.totalorder %s8736_s3, %s6905_s21  ;;  %p6909_p13 = scmp.lt.u32.totalorder %s6905_s21, %s8736_s3 }
 0x2d2   :  { %p6911_p0 = pnand %p6909_p13, %p6906_p12 }
 0x2d4   :  { %6914 = shalt.err (!%p6911_p0)
}
 0x2d5   :  { %s6915_s28 = scalar_lea.vmem %s7796_s29, 512  ;;  %p6920_p2 = scmp.lt.s32.totalorder %s7796_s29, %s7796_s29 }
 0x2d6   :  { %p6916_p1 = scmp.ne.s32.totalorder %s7796_s29, %s6915_s28  ;;  %p6921_p3 = scmp.lt.s32.totalorder %s6915_s28, %s6915_s28 }
 0x2d8   :  { %p6922_p4 = por %p6921_p3, %p6920_p2 }
 0x2da   :  { %p6923_p5 = pnand %p6922_p4, %p6916_p1 }
 0x2dc   :  { %6926 = shalt.err (!%p6923_p5)
}
 0x2dd   :  { %s8737_s4 = sld [smem:[#allocation111_spill]]  ;;  %s7324_s1 = smov [#allocation43]  }
 0x2de   :  { %397 = dma.hbm_to_vmem [thread:$0]  %s8736_s3, 512, %s7796_s29, [#allocation39], %s7288_s18, %s7288_s18, %s7289_s22  }
 0x2df   :  { %s416_s2 = sshll.u32 %s7324_s1, 4  ;;  %s7325_s14 = smov [#allocation46]   ;;  %s417_s2 = int_to_ptr.vmem [resolvable:$true] %s416_s2 }
 0x2e0   :  { %s436_s0 = sshll.u32 %s7325_s14, 4  ;;  %s437_s0 = int_to_ptr.vmem [resolvable:$true] %s436_s0 }
 0x2e3   :  { %s6927_s30 = scalar_lea.hbm %s8737_s4, 16 }
 0x2e4   :  { %p6928_p6 = scmp.ne.s32.totalorder %s8737_s4, %s6927_s30  ;;  %p6931_p7 = scmp.lt.u32.totalorder %s6927_s30, %s8737_s4 }
 0x2e6   :  { %p6933_p8 = pnand %p6931_p7, %p6928_p6 }
 0x2e8   :  { %6936 = shalt.err (!%p6933_p8)
}
 0x2e9   :  { %s6937_s7 = scalar_lea.vmem %s417_s2, 16  ;;  %s6941_s19 = scalar_lea.vmem %s417_s2, 32 }
 0x2ea   :  { %p6938_p9 = scmp.ne.s32.totalorder %s417_s2, %s6937_s7  ;;  %p6942_p10 = scmp.lt.s32.totalorder %s417_s2, %s417_s2 }
 0x2eb   :  { %p6943_p11 = scmp.lt.s32.totalorder %s6941_s19, %s6937_s7 }
 0x2ed   :  { %p6944_p12 = por %p6943_p11, %p6942_p10 }
 0x2ef   :  { %p6945_p13 = pnand %p6944_p12, %p6938_p9 }
 0x2f1   :  { %6948 = shalt.err (!%p6945_p13)
}
 0x2f2   :  { %s8738_s10 = sld [smem:[#allocation112_spill]] }
 0x2f3   :  { %419 = dma.hbm_to_vmem [thread:$0]  %s8737_s4, 16, %s417_s2, [#allocation42]  }
 0x2f8   :  { %s6949_s17 = scalar_lea.hbm %s8738_s10, 64 }
 0x2f9   :  { %p6950_p0 = scmp.ne.s32.totalorder %s8738_s10, %s6949_s17  ;;  %p6953_p1 = scmp.lt.u32.totalorder %s6949_s17, %s8738_s10 }
 0x2fb   :  { %p6955_p2 = pnand %p6953_p1, %p6950_p0 }
 0x2fd   :  { %6958 = shalt.err (!%p6955_p2)
}
 0x2fe   :  { %s6959_s24 = scalar_lea.vmem %s437_s0, 64  ;;  %p6964_p4 = scmp.lt.s32.totalorder %s437_s0, %s437_s0 }
 0x2ff   :  { %p6960_p3 = scmp.ne.s32.totalorder %s437_s0, %s6959_s24  ;;  %p6965_p5 = scmp.lt.s32.totalorder %s6959_s24, %s6959_s24 }
 0x301   :  { %p6966_p6 = por %p6965_p5, %p6964_p4 }
 0x303   :  { %p6967_p7 = pnand %p6966_p6, %p6960_p3 }
 0x305   :  { %6970 = shalt.err (!%p6967_p7)
}
 0x306   :  { %s8739_s11 = sld [smem:[#allocation114_spill]]  ;;  %s7326_s15 = smov [#allocation49]  }
 0x307   :  { %439 = dma.hbm_to_vmem [thread:$0]  %s8738_s10, 64, %s437_s0, [#allocation45]  }
 0x308   :  { %s455_s8 = sshll.u32 %s7326_s15, 4  ;;  %s7327_s16 = smov [#allocation52]   ;;  %s456_s8 = int_to_ptr.vmem [resolvable:$true] %s455_s8 }
 0x309   :  { %s480_s6 = sshll.u32 %s7327_s16, 4  ;;  %s481_s6 = int_to_ptr.vmem [resolvable:$true] %s480_s6 }
 0x30c   :  { %s6971_s25 = scalar_lea.hbm %s8739_s11, 512 }
 0x30d   :  { %p6972_p8 = scmp.ne.s32.totalorder %s8739_s11, %s6971_s25  ;;  %p6975_p9 = scmp.lt.u32.totalorder %s6971_s25, %s8739_s11 }
 0x30f   :  { %p6977_p10 = pnand %p6975_p9, %p6972_p8 }
 0x311   :  { %6980 = shalt.err (!%p6977_p10)
}
 0x312   :  { %s6981_s23 = scalar_lea.vmem %s456_s8, 512  ;;  %p6986_p12 = scmp.lt.s32.totalorder %s456_s8, %s456_s8 }
 0x313   :  { %p6982_p11 = scmp.ne.s32.totalorder %s456_s8, %s6981_s23  ;;  %p6987_p13 = scmp.lt.s32.totalorder %s6981_s23, %s6981_s23 }
 0x315   :  { %p6988_p0 = por %p6987_p13, %p6986_p12 }
 0x317   :  { %p6989_p1 = pnand %p6988_p0, %p6982_p11 }
 0x319   :  { %6992 = shalt.err (!%p6989_p1)
}
 0x31a   :  { %s8740_s29 = sld [smem:[#allocation116_spill]] }
 0x31b   :  { %461 = dma.hbm_to_vmem [thread:$0]  %s8739_s11, 512, %s456_s8, [#allocation48], %s7288_s18, %s7288_s18, %s7289_s22  }
 0x320   :  { %s6993_s26 = scalar_lea.hbm %s8740_s29, 64 }
 0x321   :  { %p6994_p2 = scmp.ne.s32.totalorder %s8740_s29, %s6993_s26  ;;  %p6997_p3 = scmp.lt.u32.totalorder %s6993_s26, %s8740_s29 }
 0x323   :  { %p6999_p4 = pnand %p6997_p3, %p6994_p2 }
 0x325   :  { %7002 = shalt.err (!%p6999_p4)
}
 0x326   :  { %s7003_s9 = scalar_lea.vmem %s481_s6, 64  ;;  %p7008_p6 = scmp.lt.s32.totalorder %s481_s6, %s481_s6 }
 0x327   :  { %p7004_p5 = scmp.ne.s32.totalorder %s481_s6, %s7003_s9  ;;  %p7009_p7 = scmp.lt.s32.totalorder %s7003_s9, %s7003_s9 }
 0x329   :  { %p7010_p8 = por %p7009_p7, %p7008_p6 }
 0x32b   :  { %p7011_p9 = pnand %p7010_p8, %p7004_p5 }
 0x32d   :  { %7014 = shalt.err (!%p7011_p9)
}
 0x32e   :  { %s8741_s3 = sld [smem:[#allocation118_spill]]  ;;  %s7328_s21 = smov [#allocation55]  }
 0x32f   :  { %483 = dma.hbm_to_vmem [thread:$0]  %s8740_s29, 64, %s481_s6, [#allocation51]  }
 0x330   :  { %s500_s28 = sshll.u32 %s7328_s21, 4  ;;  %s7329_s4 = smov [#allocation58]   ;;  %s501_s28 = int_to_ptr.vmem [resolvable:$true] %s500_s28 }
 0x331   :  { %s520_s1 = sshll.u32 %s7329_s4, 4  ;;  %s521_s1 = int_to_ptr.vmem [resolvable:$true] %s520_s1 }
 0x334   :  { %s7015_s2 = scalar_lea.hbm %s8741_s3, 16 }
 0x335   :  { %p7016_p10 = scmp.ne.s32.totalorder %s8741_s3, %s7015_s2  ;;  %p7019_p11 = scmp.lt.u32.totalorder %s7015_s2, %s8741_s3 }
 0x337   :  { %p7021_p12 = pnand %p7019_p11, %p7016_p10 }
 0x339   :  { %7024 = shalt.err (!%p7021_p12)
}
 0x33a   :  { %s7025_s14 = scalar_lea.vmem %s501_s28, 16  ;;  %s7029_s0 = scalar_lea.vmem %s501_s28, 32 }
 0x33b   :  { %p7026_p13 = scmp.ne.s32.totalorder %s501_s28, %s7025_s14  ;;  %p7030_p0 = scmp.lt.s32.totalorder %s501_s28, %s501_s28 }
 0x33c   :  { %p7031_p1 = scmp.lt.s32.totalorder %s7029_s0, %s7025_s14 }
 0x33e   :  { %p7032_p2 = por %p7031_p1, %p7030_p0 }
 0x340   :  { %p7033_p3 = pnand %p7032_p2, %p7026_p13 }
 0x342   :  { %7036 = shalt.err (!%p7033_p3)
}
 0x343   :  { %s8742_s30 = sld [smem:[#allocation120_spill]] }
 0x344   :  { %503 = dma.hbm_to_vmem [thread:$0]  %s8741_s3, 16, %s501_s28, [#allocation54]  }
 0x349   :  { %s7037_s7 = scalar_lea.hbm %s8742_s30, 64 }
 0x34a   :  { %p7038_p4 = scmp.ne.s32.totalorder %s8742_s30, %s7037_s7  ;;  %p7041_p5 = scmp.lt.u32.totalorder %s7037_s7, %s8742_s30 }
 0x34c   :  { %p7043_p6 = pnand %p7041_p5, %p7038_p4 }
 0x34e   :  { %7046 = shalt.err (!%p7043_p6)
}
 0x34f   :  { %s7047_s19 = scalar_lea.vmem %s521_s1, 64  ;;  %p7052_p8 = scmp.lt.s32.totalorder %s521_s1, %s521_s1 }
 0x350   :  { %p7048_p7 = scmp.ne.s32.totalorder %s521_s1, %s7047_s19  ;;  %p7053_p9 = scmp.lt.s32.totalorder %s7047_s19, %s7047_s19 }
 0x352   :  { %p7054_p10 = por %p7053_p9, %p7052_p8 }
 0x354   :  { %p7055_p11 = pnand %p7054_p10, %p7048_p7 }
 0x356   :  { %7058 = shalt.err (!%p7055_p11)
}
 0x357   :  { %s8743_s10 = sld [smem:[#allocation122_spill]]  ;;  %s7330_s17 = smov [#allocation61]  }
 0x358   :  { %523 = dma.hbm_to_vmem [thread:$0]  %s8742_s30, 64, %s521_s1, [#allocation57]  }
 0x359   :  { %s541_s24 = sshll.u32 %s7330_s17, 4  ;;  %s7331_s11 = smov [#allocation64]   ;;  %s542_s24 = int_to_ptr.vmem [resolvable:$true] %s541_s24 }
 0x35a   :  { %s564_s15 = sshll.u32 %s7331_s11, 4  ;;  %s565_s15 = int_to_ptr.vmem [resolvable:$true] %s564_s15 }
 0x35d   :  { %s7059_s8 = scalar_lea.hbm %s8743_s10, 512 }
 0x35e   :  { %p7060_p12 = scmp.ne.s32.totalorder %s8743_s10, %s7059_s8  ;;  %p7063_p13 = scmp.lt.u32.totalorder %s7059_s8, %s8743_s10 }
 0x360   :  { %p7065_p0 = pnand %p7063_p13, %p7060_p12 }
 0x362   :  { %7068 = shalt.err (!%p7065_p0)
}
 0x363   :  { %s7069_s16 = scalar_lea.vmem %s542_s24, 512  ;;  %p7074_p2 = scmp.lt.s32.totalorder %s542_s24, %s542_s24 }
 0x364   :  { %p7070_p1 = scmp.ne.s32.totalorder %s542_s24, %s7069_s16  ;;  %p7075_p3 = scmp.lt.s32.totalorder %s7069_s16, %s7069_s16 }
 0x366   :  { %p7076_p4 = por %p7075_p3, %p7074_p2 }
 0x368   :  { %p7077_p5 = pnand %p7076_p4, %p7070_p1 }
 0x36a   :  { %7080 = shalt.err (!%p7077_p5)
}
 0x36b   :  { %s8744_s6 = sld [smem:[#allocation124_spill]] }
 0x36c   :  { %547 = dma.hbm_to_vmem [thread:$0]  %s8743_s10, 512, %s542_s24, [#allocation60], %s7288_s18, %s7288_s18, %s7289_s22  }
 0x371   :  { %s7081_s25 = scalar_lea.hbm %s8744_s6, 16 }
 0x372   :  { %p7082_p6 = scmp.ne.s32.totalorder %s8744_s6, %s7081_s25  ;;  %p7085_p7 = scmp.lt.u32.totalorder %s7081_s25, %s8744_s6 }
 0x374   :  { %p7087_p8 = pnand %p7085_p7, %p7082_p6 }
 0x376   :  { %7090 = shalt.err (!%p7087_p8)
}
 0x377   :  { %s7091_s23 = scalar_lea.vmem %s565_s15, 16  ;;  %s7095_s29 = scalar_lea.vmem %s565_s15, 32 }
 0x378   :  { %p7092_p9 = scmp.ne.s32.totalorder %s565_s15, %s7091_s23  ;;  %p7096_p10 = scmp.lt.s32.totalorder %s565_s15, %s565_s15 }
 0x379   :  { %p7097_p11 = scmp.lt.s32.totalorder %s7095_s29, %s7091_s23 }
 0x37b   :  { %p7098_p12 = por %p7097_p11, %p7096_p10 }
 0x37d   :  { %p7099_p13 = pnand %p7098_p12, %p7092_p9 }
 0x37f   :  { %7102 = shalt.err (!%p7099_p13)
}
 0x380   :  { %567 = dma.hbm_to_vmem [thread:$0]  %s8744_s6, 16, %s565_s15, [#allocation63]  }
 0x381   :  { %s7332_s26 = smov [#allocation67]   ;;  %s7333_s3 = smov [#allocation68]  }
 0x382   :  { %s584_s9 = sshll.u32 %s7332_s26, 4  ;;  %s594_s21 = sshll.u32 %s7333_s3, 4  ;;  %s585_s9 = int_to_ptr.vmem [resolvable:$true] %s584_s9  ;;  %s595_s21 = int_to_ptr.vmem [resolvable:$true] %s594_s21 }
 0x383   :  { %s7103_s28 = scalar_lea.hbm %s7569_s12, 16 }
 0x384   :  { %p7104_p0 = scmp.ne.s32.totalorder %s7569_s12, %s7103_s28  ;;  %p7107_p1 = scmp.lt.u32.totalorder %s7103_s28, %s7569_s12 }
 0x386   :  { %p7109_p2 = pnand %p7107_p1, %p7104_p0 }
 0x388   :  { %7112 = shalt.err (!%p7109_p2)
}
 0x389   :  { %s7113_s4 = scalar_lea.vmem %s585_s9, 16  ;;  %s7117_s1 = scalar_lea.vmem %s585_s9, 32 }
 0x38a   :  { %p7114_p3 = scmp.ne.s32.totalorder %s585_s9, %s7113_s4  ;;  %p7118_p4 = scmp.lt.s32.totalorder %s585_s9, %s585_s9 }
 0x38b   :  { %p7119_p5 = scmp.lt.s32.totalorder %s7117_s1, %s7113_s4 }
 0x38d   :  { %p7120_p6 = por %p7119_p5, %p7118_p4 }
 0x38f   :  { %p7121_p7 = pnand %p7120_p6, %p7114_p3 }
 0x391   :  { %7124 = shalt.err (!%p7121_p7)
}
 0x392   :  { %587 = dma.hbm_to_vmem [thread:$0]  %s7569_s12, 16, %s585_s9, [#allocation66]  }
 0x393   :  { %s7125_s2 = scalar_lea.hbm %s7574_s5, 16 }
 0x394   :  { %p7126_p8 = scmp.ne.s32.totalorder %s7574_s5, %s7125_s2  ;;  %p7129_p9 = scmp.lt.u32.totalorder %s7125_s2, %s7574_s5 }
 0x396   :  { %p7131_p10 = pnand %p7129_p9, %p7126_p8 }
 0x398   :  { %7134 = shalt.err (!%p7131_p10)
}
 0x399   :  { %s7135_s14 = scalar_lea.vmem %s595_s21, 16  ;;  %s7139_s0 = scalar_lea.vmem %s595_s21, 32 }
 0x39a   :  { %p7136_p11 = scmp.ne.s32.totalorder %s595_s21, %s7135_s14  ;;  %p7140_p12 = scmp.lt.s32.totalorder %s595_s21, %s595_s21 }
 0x39b   :  { %p7141_p13 = scmp.lt.s32.totalorder %s7139_s0, %s7135_s14 }
 0x39d   :  { %p7142_p0 = por %p7141_p13, %p7140_p12 }
 0x39f   :  { %p7143_p1 = pnand %p7142_p0, %p7136_p11 }
 0x3a1   :  { %7146 = shalt.err (!%p7143_p1)
}
 0x3a2   :  { %597 = dma.hbm_to_vmem [thread:$0]  %s7574_s5, 16, %s595_s21, [#allocation69]  }
 0x3a3   :  { %7191 = dma.done.wait [#allocation3], 256  }
 0x3a4   :  { %7192 = vsyncadd [#allocation3], 4294967040 }
 0x3a5   :  { %7193 = dma.done.wait [#allocation6], 1280  }
 0x3a6   :  { %7194 = vsyncadd [#allocation6], 4294966016 }
 0x3a7   :  { %7195 = dma.done.wait [#allocation9], 2048  }
 0x3a8   :  { %7196 = vsyncadd [#allocation9], 4294965248 }
 0x3a9   :  { %7197 = dma.done.wait [#allocation12], 32  }
 0x3aa   :  { %7198 = vsyncadd [#allocation12], 4294967264 }
 0x3ab   :  { %7199 = dma.done.wait [#allocation15], 192  }
 0x3ac   :  { %7200 = vsyncadd [#allocation15], 4294967104 }
 0x3ad   :  { %7201 = dma.done.wait [#allocation18], 2560  }
 0x3ae   :  { %7202 = vsyncadd [#allocation18], 4294964736 }
 0x3af   :  { %7203 = dma.done.wait [#allocation21], 144  }
 0x3b0   :  { %7204 = vsyncadd [#allocation21], 4294967152 }
 0x3b1   :  { %7205 = dma.done.wait [#allocation24], 144  }
 0x3b2   :  { %7206 = vsyncadd [#allocation24], 4294967152 }
 0x3b3   :  { %7207 = dma.done.wait [#allocation27], 2176  }
 0x3b4   :  { %7208 = vsyncadd [#allocation27], 4294965120 }
 0x3b5   :  { %7209 = dma.done.wait [#allocation30], 640  }
 0x3b6   :  { %7210 = vsyncadd [#allocation30], 4294966656 }
 0x3b7   :  { %7211 = dma.done.wait [#allocation33], 32  }
 0x3b8   :  { %7212 = vsyncadd [#allocation33], 4294967264 }
 0x3b9   :  { %7213 = dma.done.wait [#allocation36], 1664  }
 0x3ba   :  { %7214 = vsyncadd [#allocation36], 4294965632 }
 0x3bb   :  { %7215 = dma.done.wait [#allocation39], 768  }
 0x3bc   :  { %7216 = vsyncadd [#allocation39], 4294966528 }
 0x3bd   :  { %7217 = dma.done.wait [#allocation42], 272  }
 0x3be   :  { %7218 = vsyncadd [#allocation42], 4294967024 }
 0x3bf   :  { %7219 = dma.done.wait [#allocation45], 80  }
 0x3c0   :  { %7220 = vsyncadd [#allocation45], 4294967216 }
 0x3c1   :  { %7221 = dma.done.wait [#allocation48], 576  }
 0x3c2   :  { %7222 = vsyncadd [#allocation48], 4294966720 }
 0x3c3   :  { %7223 = dma.done.wait [#allocation51], 576  }
 0x3c4   :  { %7224 = vsyncadd [#allocation51], 4294966720 }
 0x3c5   :  { %7225 = dma.done.wait [#allocation54], 32  }
 0x3c6   :  { %7226 = vsyncadd [#allocation54], 4294967264 }
 0x3c7   :  { %7227 = dma.done.wait [#allocation57], 128  }
 0x3c8   :  { %7228 = vsyncadd [#allocation57], 4294967168 }
 0x3c9   :  { %7229 = dma.done.wait [#allocation60], 1024  }
 0x3ca   :  { %7230 = vsyncadd [#allocation60], 4294966272 }
 0x3cb   :  { %7231 = dma.done.wait [#allocation63], 80  }
 0x3cc   :  { %7232 = vsyncadd [#allocation63], 4294967216 }
 0x3cd   :  { %7233 = dma.done.wait [#allocation66], 32  }
 0x3ce   :  { %7234 = vsyncadd [#allocation66], 4294967264 }
 0x3cf   :  { %7235 = dma.done.wait [#allocation69], 16  }
 0x3d0   :  { %7236 = vsyncadd [#allocation69], 4294967280  ;;  %v836_v0 = vld [vmem:[#allocation5] sm:$0xff]  ;;  %v837_v1 = vld [vmem:[#allocation5 + $0x8] sm:$0xff]  ;;  %vm920_vm0 = vcmask 130048   ;;  %s7334_s5 = smov 32  }
 0x3d1   :  { %v838_v2 = vld [vmem:[#allocation5 + $0x10] sm:$0xff]  ;;  %v6008_v3 = vpack.i.bf16 %v837_v1, %v836_v0  ;;  %v839_v4 = vld [vmem:[#allocation5 + $0x18] sm:$0xff]  ;;  %v840_v5 = vld [vmem:[#allocation5 + $0x20] sm:$0xff]  ;;  %s7335_s12 = smov 40   ;;  %s7336_s30 = smov 36   ;;  %vm890_vm1 = vcmask 261120  }
 0x3d2   :  { %v841_v6 = vld [vmem:[#allocation5 + $0x28] sm:$0xff]  ;;  %v6013_v8 = vpack.i.bf16 %v839_v4, %v838_v2  ;;  %v6053_v9 = vld [vmem:[#allocation10] sm:$0xff]   ;;  %v847_v11 = vld [vmem:[#allocation8 + $0x8] sm:$0xff]  ;;  %vm893_vm2 = vcmask 293888   ;;  %vm896_vm3 = vcmask 326656   ;;  %s7337_s7 = smov 96  }
 0x3d3   :  { %v6018_v7 = vpack.i.bf16 %v841_v6, %v840_v5  ;;  %6009 = vrot.lane.b32.xlu0 %v6008_v3, %s7334_s5  ;;  %5313 = vmatprep.mubr.msk.bf16.mxu0 %vm920_vm0, %v6053_v9  ;;  %v846_v10 = vld [vmem:[#allocation8] sm:$0xff]  ;;  %v848_v12 = vld [vmem:[#allocation8 + $0x10] sm:$0xff]  ;;  %v849_v13 = vld [vmem:[#allocation8 + $0x18] sm:$0xff]  ;;  %s7338_s19 = smov 92   ;;  %s7339_s10 = smov 101   ;;  %vm1226_vm4 = vcmask 1040384  }
 0x3d4   :  { %v850_v14 = vld [vmem:[#allocation8 + $0x20] sm:$0xff]  ;;  %v851_v15 = vld [vmem:[#allocation8 + $0x28] sm:$0xff]  ;;  %v6055_v35 = vld [vmem:[#allocation10 + $0x10] sm:$0xff]   ;;  %s7340_s17 = smov 97   ;;  %vm7341_vm5 = vmmov 1   ;;  %s7342_s24 = smov 93  }
 0x3d5   :  { %6019 = vrot.lane.b32.xlu1 %v6018_v7, %s7335_s12  ;;  %v834_v20 = vld [vmem:[#allocation2] sm:$0xff]  ;;  %v835_v21 = vld [vmem:[#allocation2 + $0x8] sm:$0xff]  ;;  %v6056_v36 = vld [vmem:[#allocation10 + $0x18] sm:$0xff]   ;;  %s7343_s11 = smov 88   ;;  %s7344_s15 = smov 56   ;;  %vm1083_vm7 = vcmask 31744  }
 0x3d6   :  { %v6054_v34 = vld [vmem:[#allocation10 + $0x8] sm:$0xff]   ;;  %v852_v37 = vld [vmem:[#allocation8 + $0x30] sm:$0xff]  ;;  %v853_v38 = vld [vmem:[#allocation8 + $0x38] sm:$0xff]  ;;  %vm1189_vm8 = vcmask 72704   ;;  %vm1088_vm9 = vcmask 39936   ;;  %s7348_s8 = smov 120  }
 0x3d7   :  { %6014 = vrot.lane.b32.xlu0 %v6013_v8, %s7336_s30  ;;  %v854_v47 = vld [vmem:[#allocation8 + $0x40] sm:$0xff]  ;;  %v783_v48 = vld [vmem:[#allocation35] sm:$0xff]  ;;  %vm7907_vm6 = vmpackc.low %vm1226_vm4, %vm7341_vm5  ;;  %vm1519_vm5 = vcmask 719872   ;;  %s7349_s16 = smov [#allocation70]  }
 0x3d8   :  { %v784_v49 = vld [vmem:[#allocation35 + $0x8] sm:$0x1]  ;;  %v855_v52 = vld [vmem:[#allocation8 + $0x48] sm:$0xff]  ;;  %v856_v53 = vld [vmem:[#allocation8 + $0x50] sm:$0xff]  ;;  %s4786_s6 = sshll.u32 %s7349_s16, 4  ;;  %s4787_s6 = int_to_ptr.vmem [resolvable:$true] %s4786_s6 }
 0x3d9   :  { %v5723_v50 = vpack.c.bf16 %v784_v49, %v783_v48  ;;  %v857_v54 = vld [vmem:[#allocation8 + $0x58] sm:$0xff]  ;;  %v843_v55 = vld [vmem:[#allocation7 + $0x8] sm:$0xff]  ;;  %v842_v57 = vld [vmem:[#allocation7] sm:$0xff]  ;;  %s7147_s25 = scalar_lea.vmem %s4787_s6, 256  ;;  %p7152_p3 = scmp.lt.s32.totalorder %s4787_s6, %s4787_s6 }
 0x3da   :  { %v845_v56 = vld [vmem:[#allocation7 + $0x18] sm:$0xff]  ;;  %v844_v58 = vld [vmem:[#allocation7 + $0x10] sm:$0xff]  ;;  %v806_v51 = vld [vmem:[#allocation46] sm:$0xf]  ;;  %p7148_p2 = scmp.ne.s32.totalorder %s4787_s6, %s7147_s25  ;;  %p7153_p4 = scmp.lt.s32.totalorder %s7147_s25, %s7147_s25 }
 0x3db   :  { %1059 = vrot.lane.b32.xlu0 %v846_v10, %s7313_s20  ;;  %5725 = vmatprep.subr.msk.bf16.mxu1 %vm7907_vm6, %v5723_v50 }
 0x3dc   :  { %5728 = vmatpush3.bf16.msk.msra.mxu1 %vm7907_vm6, %v5723_v50  ;;  %p7154_p5 = por %p7153_p4, %p7152_p3 }
 0x3de   :  { %p7155_p6 = pnand %p7154_p5, %p7148_p2 }
 0x3df   :  { %1061 = vrot.lane.b32.xlu0 %v847_v11, %s7313_s20 }
 0x3e3   :  { %1063 = vrot.lane.b32.xlu0 %v848_v12, %s7313_s20 }
 0x3e7   :  { %1065 = vrot.lane.b32.xlu0 %v849_v13, %s7313_s20 }
 0x3eb   :  { %1109 = vrot.lane.b32.xlu0 %v850_v14, %s7313_s20 }
 0x3ef   :  { %1111 = vrot.lane.b32.xlu0 %v851_v15, %s7313_s20 }
 0x3f3   :  { %1113 = vrot.lane.b32.xlu0 %v852_v37, %s7313_s20 }
 0x3f7   :  { %1115 = vrot.lane.b32.xlu0 %v853_v38, %s7313_s20 }
 0x445   :  { %v6010_v16 = vpop.permute.xlu0 %6009 }
 0x446   :  { %v6012_v18 = vunpack.i.h.bf16 %v6010_v16  ;;  %v6011_v19 = vunpack.i.l.bf16 %v6010_v16 }
 0x447   :  { %v6020_v17 = vpop.permute.xlu1 %6019 }
 0x448   :  { %v6022_v23 = vunpack.i.h.bf16 %v6020_v17  ;;  %v6021_v24 = vunpack.i.l.bf16 %v6020_v17  ;;  %v891_v27 = vsel %vm890_vm1, %v834_v20, %v6011_v19  ;;  %v892_v28 = vsel %vm890_vm1, %v835_v21, %v6012_v18 }
 0x449   :  { %v6015_v22 = vpop.permute.xlu0 %6014 }
 0x44a   :  { %v6017_v25 = vunpack.i.h.bf16 %v6015_v22  ;;  %v6016_v26 = vunpack.i.l.bf16 %v6015_v22 }
 0x44c   :  { %v894_v29 = vsel %vm893_vm2, %v891_v27, %v6016_v26  ;;  %v895_v30 = vsel %vm893_vm2, %v892_v28, %v6017_v25 }
 0x44d   :  { %v897_v31 = vsel %vm896_vm3, %v894_v29, %v6021_v24  ;;  %v898_v32 = vsel %vm896_vm3, %v895_v30, %v6022_v23  ;;  %v1060_v59 = vpop.permute.xlu0 %1059 }
 0x44e   :  { %v899_v33 = vpack.c.bf16 %v898_v32, %v897_v31 }
 0x450   :  { %5311 = vmatprep.subr.bf16.mxu0 %v899_v33 }
 0x451   :  { %5312 = vmatpush3.bf16.msra.mxu0 %v899_v33  ;;  %v1062_v60 = vpop.permute.xlu0 %1061 }
 0x454   :  { %5314 = vmatmul.mubr.msk.bf16.vlgmr.msra.gmra.mrb[0].mxu0 %vm920_vm0, %v6054_v34 }
 0x455   :  { %5317 = vmatprep.mubr.msk.bf16.mxu0 %vm920_vm0, %v6055_v35  ;;  %v1064_v61 = vpop.permute.xlu0 %1063 }
 0x459   :  { %v1066_v62 = vpop.permute.xlu0 %1065 }
 0x45c   :  { %5318 = vmatmul.mubr.msk.bf16.gmra.mrb[4].mxu0 %vm920_vm0, %v6056_v36 }
 0x45d   :  { %v1110_v63 = vpop.permute.xlu0 %1109 }
 0x461   :  { %v1112_v0 = vpop.permute.xlu0 %1111 }
 0x465   :  { %v1114_v2 = vpop.permute.xlu0 %1113 }
 0x469   :  { %v1116_v5 = vpop.permute.xlu0 %1115 }
 0x527   :  { %v7884_v39 = vpop.f32.mrb[0].mxu0 }
 0x528   :  { %1047 = vrot.lane.b32.xlu1 %v7884_v39, %s7337_s7  ;;  %v7888_v40 = vpop.f32.mrb[1].mxu0 }
 0x529   :  { %v7890_v41 = vpop.f32.mrb[2].mxu0 }
 0x52a   :  { %v7892_v42 = vpop.f32.mrb[3].mxu0 }
 0x52c   :  { %1097 = vrot.lane.b32.xlu1 %v7884_v39, %s7338_s19 }
 0x52f   :  { %v5319_v43 = vpop.f32.mrb[4].mxu0 }
 0x530   :  { %1043 = vrot.lane.b32.xlu1 %v7888_v40, %s7337_s7  ;;  %v983_v44 = vpop.f32.mrb[5].mxu0 }
 0x531   :  { %v5320_v45 = vpop.f32.mrb[6].mxu0 }
 0x532   :  { %1077 = vrot.lane.b32.xlu0 %v5320_v45, %s7339_s10  ;;  %v986_v46 = vpop.f32.mrb[7].mxu0 }
 0x534   :  { %1093 = vrot.lane.b32.xlu1 %v7888_v40, %s7338_s19 }
 0x536   :  { %1127 = vrot.lane.b32.xlu0 %v5320_v45, %s7340_s17 }
 0x538   :  { %1049 = vrot.lane.b32.xlu1 %v7890_v41, %s7337_s7 }
 0x53a   :  { %1073 = vrot.lane.b32.xlu0 %v986_v46, %s7339_s10 }
 0x53c   :  { %1099 = vrot.lane.b32.xlu1 %v7890_v41, %s7338_s19 }
 0x53e   :  { %1157 = vrot.lane.b32.xlu0 %v854_v47, %s7313_s20 }
 0x540   :  { %1045 = vrot.lane.b32.xlu1 %v7892_v42, %s7337_s7 }
 0x542   :  { %1123 = vrot.lane.b32.xlu0 %v986_v46, %s7340_s17 }
 0x544   :  { %1095 = vrot.lane.b32.xlu1 %v7892_v42, %s7338_s19 }
 0x546   :  { %1159 = vrot.lane.b32.xlu0 %v855_v52, %s7313_s20 }
 0x548   :  { %1075 = vrot.lane.b32.xlu1 %v5319_v43, %s7339_s10 }
 0x54a   :  { %1171 = vrot.lane.b32.xlu0 %v986_v46, %s7342_s24 }
 0x54c   :  { %1125 = vrot.lane.b32.xlu1 %v5319_v43, %s7340_s17 }
 0x54e   :  { %1161 = vrot.lane.b32.xlu0 %v856_v53, %s7313_s20 }
 0x550   :  { %1071 = vrot.lane.b32.xlu1 %v983_v44, %s7339_s10 }
 0x552   :  { %1163 = vrot.lane.b32.xlu0 %v857_v54, %s7313_s20  ;;  %s7347_s20 = smov 124  }
 0x554   :  { %1141 = vrot.lane.b32.xlu1 %v7888_v40, %s7343_s11 }
 0x556   :  { %1175 = vrot.lane.b32.xlu0 %v5320_v45, %s7342_s24 }
 0x558   :  { %1121 = vrot.lane.b32.xlu1 %v983_v44, %s7340_s17 }
 0x55a   :  { %1004 = vrot.lane.b32.xlu0 %v843_v55, %s7334_s5 }
 0x55c   :  { %1143 = vrot.lane.b32.xlu1 %v7892_v42, %s7343_s11 }
 0x55e   :  { %1008 = vrot.lane.b32.xlu0 %v845_v56, %s7334_s5 }
 0x560   :  { %1169 = vrot.lane.b32.xlu1 %v983_v44, %s7342_s24 }
 0x562   :  { %1020 = vrot.lane.b32.xlu0 %v986_v46, %s7344_s15 }
 0x564   :  { %1145 = vrot.lane.b32.xlu1 %v7884_v39, %s7343_s11 }
 0x566   :  { %1024 = vrot.lane.b32.xlu0 %v5320_v45, %s7344_s15 }
 0x568   :  { %1147 = vrot.lane.b32.xlu1 %v7890_v41, %s7343_s11 }
 0x56c   :  { %1173 = vrot.lane.b32.xlu1 %v5319_v43, %s7342_s24 }
 0x570   :  { %1002 = vrot.lane.b32.xlu1 %v842_v57, %s7334_s5 }
 0x574   :  { %1018 = vrot.lane.b32.xlu1 %v983_v44, %s7344_s15 }
 0x578   :  { %1006 = vrot.lane.b32.xlu1 %v844_v58, %s7334_s5 }
 0x57c   :  { %1022 = vrot.lane.b32.xlu1 %v5319_v43, %s7344_s15 }
 0x59a   :  { %v1048_v1 = vpop.permute.xlu1 %1047 }
 0x59b   :  { %v1086_v22 = vsel %vm1083_vm7, %v1048_v1, %v1064_v61  ;;  %v797_v61 = vld [vmem:[#allocation38 + $0x8] sm:$0x1] }
 0x59e   :  { %v1098_v3 = vpop.permute.xlu1 %1097 }
 0x59f   :  { %v1135_v33 = vsel %vm1083_vm7, %v1098_v3, %v1114_v2  ;;  %v798_v2 = vld [vmem:[#allocation40] sm:$0xff]  ;;  %v799_v3 = vld [vmem:[#allocation40 + $0x8] sm:$0xff] }
 0x5a2   :  { %v1044_v4 = vpop.permute.xlu1 %1043 }
 0x5a3   :  { %v1084_v19 = vsel %vm1083_vm7, %v1044_v4, %v1060_v59  ;;  %v800_v4 = vld [vmem:[#allocation40 + $0x10] sm:$0xff] }
 0x5a4   :  { %v1078_v7 = vpop.permute.xlu0 %1077 }
 0x5a6   :  { %v1094_v6 = vpop.permute.xlu1 %1093 }
 0x5a7   :  { %v1133_v30 = vsel %vm1083_vm7, %v1094_v6, %v1110_v63  ;;  %v785_v63 = vld [vmem:[#allocation37] sm:$0xff] }
 0x5a8   :  { %v1128_v10 = vpop.permute.xlu0 %1127  ;;  %v801_v6 = vld [vmem:[#allocation40 + $0x18] sm:$0xff] }
 0x5aa   :  { %v1050_v8 = vpop.permute.xlu1 %1049 }
 0x5ab   :  { %v1087_v24 = vsel %vm1083_vm7, %v1050_v8, %v1066_v62 }
 0x5ac   :  { %v1074_v12 = vpop.permute.xlu0 %1073  ;;  %v1092_v28 = vsel %vm1088_vm9, %v1087_v24, %v1078_v7  ;;  %v5759_v7 = vpack.c.bf16 %v801_v6, %v800_v4 }
 0x5ae   :  { %v1100_v9 = vpop.permute.xlu1 %1099 }
 0x5af   :  { %v1136_v35 = vsel %vm1083_vm7, %v1100_v9, %v1116_v5  ;;  %v5755_v5 = vpack.c.bf16 %v799_v3, %v798_v2  ;;  %v787_v2 = vld [vmem:[#allocation37 + $0x10] sm:$0xff]  ;;  %v788_v3 = vld [vmem:[#allocation37 + $0x18] sm:$0xff] }
 0x5b0   :  { %v1158_v15 = vpop.permute.xlu0 %1157  ;;  %v1140_v43 = vsel %vm1088_vm9, %v1136_v35, %v1128_v10 }
 0x5b1   :  { %5756 = vmatprep.subr.bf16.mxu1 %v5755_v5 }
 0x5b2   :  { %v1046_v11 = vpop.permute.xlu1 %1045 }
 0x5b3   :  { %v1085_v17 = vsel %vm1083_vm7, %v1046_v11, %v1062_v60  ;;  %v796_v60 = vld [vmem:[#allocation38] sm:$0xff] }
 0x5b4   :  { %v1124_v18 = vpop.permute.xlu0 %1123  ;;  %v1090_v23 = vsel %vm1088_vm9, %v1085_v17, %v1074_v12  ;;  %v5729_v62 = vpack.c.bf16 %v797_v61, %v796_v60 }
 0x5b6   :  { %v1096_v13 = vpop.permute.xlu1 %1095  ;;  %5731 = vmatprep.subr.msk.bf16.mxu0 %vm7907_vm6, %v5729_v62 }
 0x5b7   :  { %v1134_v29 = vsel %vm1083_vm7, %v1096_v13, %v1112_v0  ;;  %5734 = vmatpush3.bf16.msk.msra.mxu0 %vm7907_vm6, %v5729_v62  ;;  %v786_v0 = vld [vmem:[#allocation37 + $0x8] sm:$0xff] }
 0x5b8   :  { %v1160_v27 = vpop.permute.xlu0 %1159  ;;  %v1138_v34 = vsel %vm1088_vm9, %v1134_v29, %v1124_v18  ;;  %v7972_v1 = vpack.c.bf16 %v786_v0, %v785_v63 }
 0x5ba   :  { %v1076_v14 = vpop.permute.xlu1 %1075  ;;  %5736 = vmatprep.subr.bf16.mxu0 %v7972_v1 }
 0x5bb   :  { %v1091_v25 = vsel %vm1088_vm9, %v1086_v22, %v1076_v14 }
 0x5bc   :  { %v1172_v36 = vpop.permute.xlu0 %1171 }
 0x5be   :  { %v1126_v16 = vpop.permute.xlu1 %1125 }
 0x5bf   :  { %v1139_v37 = vsel %vm1088_vm9, %v1135_v33, %v1126_v16 }
 0x5c0   :  { %v1162_v47 = vpop.permute.xlu0 %1161 }
 0x5c2   :  { %v1072_v20 = vpop.permute.xlu1 %1071 }
 0x5c3   :  { %v1089_v21 = vsel %vm1088_vm9, %v1084_v19, %v1072_v20 }
 0x5c4   :  { %5325 = vmatprep.mubr.msk.f32.mxu1 %vm1189_vm8, %v1089_v21  ;;  %v1164_v52 = vpop.permute.xlu0 %1163 }
 0x5c5   :  { %5326 = vmatmul.mubr.msk.f32.vlgmr.msra.gmra.mrb[0].mxu1 %vm1189_vm8, %v1090_v23 }
 0x5c6   :  { %v1142_v26 = vpop.permute.xlu1 %1141  ;;  %5328 = vmatprep.mubr.msk.f32.mxu1 %vm1189_vm8, %v1091_v25  ;;  %5758 = vmatpush3.bf16.msra.mxu1 %v5755_v5 }
 0x5c7   :  { %v1181_v45 = vsel %vm1083_vm7, %v1142_v26, %v1158_v15  ;;  %5760 = vmatprep.subr.bf16.mxu1 %v5759_v7 }
 0x5c8   :  { %v1176_v57 = vpop.permute.xlu0 %1175 }
 0x5c9   :  { %5329 = vmatmul.mubr.msk.f32.gmra.mrb[2].mxu1 %vm1189_vm8, %v1092_v28 }
 0x5ca   :  { %v1122_v31 = vpop.permute.xlu1 %1121  ;;  %5762 = vmatpush3.bf16.msra.mxu1 %v5759_v7 }
 0x5cb   :  { %v1137_v32 = vsel %vm1088_vm9, %v1133_v30, %v1122_v31 }
 0x5cc   :  { %5331 = vmatprep.mubr.msk.f32.mxu1 %vm1189_vm8, %v1137_v32 }
 0x5cd   :  { %5332 = vmatmul.mubr.msk.f32.gmra.mrb[4].mxu1 %vm1189_vm8, %v1138_v34 }
 0x5ce   :  { %v1144_v38 = vpop.permute.xlu1 %1143  ;;  %5334 = vmatprep.mubr.msk.f32.mxu1 %vm1189_vm8, %v1139_v37 }
 0x5cf   :  { %v1182_v44 = vsel %vm1083_vm7, %v1144_v38, %v1160_v27 }
 0x5d0   :  { %v1186_v49 = vsel %vm1088_vm9, %v1182_v44, %v1172_v36 }
 0x5d1   :  { %5335 = vmatmul.mubr.msk.f32.gmra.mrb[6].mxu1 %vm1189_vm8, %v1140_v43 }
 0x5d2   :  { %v1170_v46 = vpop.permute.xlu1 %1169 }
 0x5d3   :  { %v1185_v48 = vsel %vm1088_vm9, %v1181_v45, %v1170_v46 }
 0x5d4   :  { %5337 = vmatprep.mubr.msk.f32.mxu1 %vm1189_vm8, %v1185_v48 }
 0x5d5   :  { %5338 = vmatmul.mubr.msk.f32.gmra.mrb[8].mxu1 %vm1189_vm8, %v1186_v49 }
 0x5d6   :  { %v1146_v50 = vpop.permute.xlu1 %1145 }
 0x5d7   :  { %v1183_v55 = vsel %vm1083_vm7, %v1146_v50, %v1162_v47 }
 0x5da   :  { %v1148_v53 = vpop.permute.xlu1 %1147 }
 0x5db   :  { %v1184_v54 = vsel %vm1083_vm7, %v1148_v53, %v1164_v52 }
 0x5dc   :  { %v1188_v59 = vsel %vm1088_vm9, %v1184_v54, %v1176_v57 }
 0x5de   :  { %v1174_v56 = vpop.permute.xlu1 %1173 }
 0x5df   :  { %v1187_v58 = vsel %vm1088_vm9, %v1183_v55, %v1174_v56  ;;  %vm1034_vm9 = vcmask 457728  }
 0x5e0   :  { %5340 = vmatprep.mubr.msk.f32.mxu1 %vm1189_vm8, %v1187_v58 }
 0x5e1   :  { %5341 = vmatmul.mubr.msk.f32.gmra.mrb[10].mxu1 %vm1189_vm8, %v1188_v59 }
 0x698   :  { %v7975_v8 = vpop.f32.mrb[0].mxu1 }
 0x699   :  { %v7977_v9 = vpop.f32.mrb[1].mxu1  ;;  %v1356_v12 = vmul.f32 %v7975_v8, %v7975_v8 }
 0x69a   :  { %v1355_v13 = vmul.f32 %v7977_v9, %v7977_v9 }
 0x69b   :  { %v1372_v18 = vsel %vm1189_vm8, %v1356_v12, 0.0 }
 0x69c   :  { %v7979_v10 = vpop.f32.mrb[2].mxu1  ;;  %v1367_v21 = vsel %vm1189_vm8, %v1355_v13, 0.0  ;;  %v5739_v13 = vpack.c.bf16 %v788_v3, %v787_v2 }
 0x69d   :  { %v7981_v11 = vpop.f32.mrb[3].mxu1  ;;  %v1358_v19 = vmul.f32 %v7979_v10, %v7979_v10 }
 0x69e   :  { %v1357_v22 = vmul.f32 %v7981_v11, %v7981_v11 }
 0x69f   :  { %v1382_v30 = vsel %vm1189_vm8, %v1358_v19, 0.0  ;;  %v1003_v19 = vpop.permute.xlu1 %1002 }
 0x6a0   :  { %v7987_v14 = vpop.f32.mrb[4].mxu1  ;;  %v1377_v32 = vsel %vm1189_vm8, %v1357_v22, 0.0  ;;  %v792_v22 = vld [vmem:[#allocation37 + $0x38] sm:$0xff] }
 0x6a1   :  { %v1360_v15 = vmul.f32 %v7987_v14, %v7987_v14  ;;  %v7991_v16 = vpop.f32.mrb[5].mxu1 }
 0x6a2   :  { %v1359_v17 = vmul.f32 %v7991_v16, %v7991_v16 }
 0x6a3   :  { %v1373_v20 = vsel %vm1189_vm8, %v1360_v15, 0.0 }
 0x6a4   :  { %v1374_v23 = vadd.f32 %v1373_v20, %v1372_v18  ;;  %v1368_v24 = vsel %vm1189_vm8, %v1359_v17, 0.0  ;;  %v8003_v25 = vpop.f32.mrb[6].mxu1  ;;  %v789_v17 = vld [vmem:[#allocation37 + $0x20] sm:$0xff]  ;;  %v790_v18 = vld [vmem:[#allocation37 + $0x28] sm:$0xff] }
 0x6a5   :  { %v1369_v26 = vadd.f32 %v1368_v24, %v1367_v21  ;;  %v1362_v27 = vmul.f32 %v8003_v25, %v8003_v25  ;;  %v8007_v28 = vpop.f32.mrb[7].mxu1  ;;  %v5743_v20 = vpack.c.bf16 %v790_v18, %v789_v17  ;;  %v791_v21 = vld [vmem:[#allocation37 + $0x30] sm:$0xff] }
 0x6a6   :  { %v1361_v29 = vmul.f32 %v8007_v28, %v8007_v28 }
 0x6a7   :  { %v1383_v31 = vsel %vm1189_vm8, %v1362_v27, 0.0  ;;  %v5747_v27 = vpack.c.bf16 %v792_v22, %v791_v21 }
 0x6a8   :  { %v1384_v33 = vadd.f32 %v1383_v31, %v1382_v30  ;;  %v1378_v34 = vsel %vm1189_vm8, %v1361_v29, 0.0  ;;  %v8015_v35 = vpop.f32.mrb[8].mxu1  ;;  %v1019_v30 = vpop.permute.xlu1 %1018 }
 0x6a9   :  { %v1379_v36 = vadd.f32 %v1378_v34, %v1377_v32  ;;  %v1364_v37 = vmul.f32 %v8015_v35, %v8015_v35  ;;  %v8019_v38 = vpop.f32.mrb[9].mxu1  ;;  %v793_v32 = vld [vmem:[#allocation37 + $0x40] sm:$0xff] }
 0x6aa   :  { %v1363_v43 = vmul.f32 %v8019_v38, %v8019_v38 }
 0x6ab   :  { %v1375_v44 = vsel %vm1189_vm8, %v1364_v37, 0.0 }
 0x6ac   :  { %v1376_v45 = vadd.f32 %v1375_v44, %v1374_v23  ;;  %v1370_v46 = vsel %vm1189_vm8, %v1363_v43, 0.0  ;;  %v1005_v23 = vpop.permute.xlu0 %1004 }
 0x6ad   :  { %v1371_v47 = vadd.f32 %v1370_v46, %v1369_v26  ;;  %v1030_v46 = vsel %vm890_vm1, %v7888_v40, %v1003_v19  ;;  %v1031_v40 = vsel %vm890_vm1, %v7892_v42, %v1005_v23  ;;  %v802_v42 = vld [vmem:[#allocation41] sm:$0xff] }
 0x6ae   :  { %v1388_v48 = vmax.f32 %v1376_v45, 1e-08 }
 0x6af   :  { %v1387_v49 = vmax.f32 %v1371_v47, 1e-08 }
 0x6b0   :  { %6057 = vrsqrt.f32 %v1388_v48  ;;  %vm1400_vm10 = vcmp.eq.f32.partialorder %v1388_v48, inf  ;;  %v1403_v7 = vand.u32 2147483648, %v1388_v48  ;;  %vm1402_vm13 = vcmp.eq.f32.partialorder %v1388_v48, 0.0  ;;  %v1009_v43 = vpop.permute.xlu0 %1008 }
 0x6b1   :  { %6059 = vrsqrt.f32 %v1387_v49  ;;  %vm1393_vm11 = vcmp.eq.f32.partialorder %v1387_v49, inf  ;;  %v1396_v4 = vand.u32 2147483648, %v1387_v49  ;;  %vm1395_vm12 = vcmp.eq.f32.partialorder %v1387_v49, 0.0 }
 0x6b4   :  { %v8025_v50 = vpop.f32.mrb[10].mxu1 }
 0x6b5   :  { %v1366_v52 = vmul.f32 %v8025_v50, %v8025_v50  ;;  %v8029_v53 = vpop.f32.mrb[11].mxu1 }
 0x6b6   :  { %v1365_v54 = vmul.f32 %v8029_v53, %v8029_v53 }
 0x6b7   :  { %v1385_v55 = vsel %vm1189_vm8, %v1366_v52, 0.0  ;;  %v795_v52 = vld [vmem:[#allocation37 + $0x50] sm:$0xff] }
 0x6b8   :  { %v1386_v56 = vadd.f32 %v1385_v55, %v1384_v33  ;;  %v1380_v57 = vsel %vm1189_vm8, %v1365_v54, 0.0  ;;  %v794_v33 = vld [vmem:[#allocation37 + $0x48] sm:$0xff]  ;;  %v1021_v54 = vpop.permute.xlu0 %1020 }
 0x6b9   :  { %v1381_v58 = vadd.f32 %v1380_v57, %v1379_v36  ;;  %v5751_v45 = vpack.c.bf16 %v794_v33, %v793_v32 }
 0x6ba   :  { %v6058_v59 = vpop.eup %6057  ;;  %v1390_v60 = vmax.f32 %v1386_v56, 1e-08  ;;  %v1036_v56 = vsel %vm1034_vm9, %v1031_v40, %v1021_v54 }
 0x6bb   :  { %v6060_v61 = vpop.eup %6059  ;;  %v1389_v62 = vmax.f32 %v1381_v58, 1e-08  ;;  %v1399_v63 = vmul.f32 %v6058_v59, %v1388_v48 }
 0x6bc   :  { %v1392_v0 = vmul.f32 %v6060_v61, %v1387_v49  ;;  %6061 = vrsqrt.f32 %v1390_v60  ;;  %vm1414_vm14 = vcmp.eq.f32.partialorder %v1390_v60, inf  ;;  %v1417_v37 = vand.u32 2147483648, %v1390_v60  ;;  %v1025_v58 = vpop.permute.xlu0 %1024 }
 0x6bd   :  { %v1401_v5 = vsel %vm1400_vm10, %v1388_v48, %v1399_v63  ;;  %6063 = vrsqrt.f32 %v1389_v62  ;;  %vm1407_vm15 = vcmp.eq.f32.partialorder %v1389_v62, inf  ;;  %v1410_v34 = vand.u32 2147483648, %v1389_v62 }
 0x6be   :  { %v1394_v6 = vsel %vm1393_vm11, %v1387_v49, %v1392_v0  ;;  %v1404_v15 = vsel %vm1402_vm13, %v1403_v7, %v1401_v5  ;;  %vm1409_vm0 = vcmp.eq.f32.partialorder %v1389_v62, 0.0  ;;  %vm1416_vm4 = vcmp.eq.f32.partialorder %v1390_v60, 0.0  ;;  %v1007_v49 = vpop.permute.xlu1 %1006 }
 0x6bf   :  { %v1397_v12 = vsel %vm1395_vm12, %v1396_v4, %v1394_v6  ;;  %v1035_v48 = vsel %vm1034_vm9, %v1030_v46, %v1019_v30  ;;  %v1032_v57 = vsel %vm890_vm1, %v7884_v39, %v1007_v49  ;;  %v4911_v39 = vld [vmem:[#allocation34] ss:$0 sm:$0xff] }
 0x6c0   :  { %5347 = vmatprep.mubr.msk.f32.mxu0 %vm1189_vm8, %v1397_v12 }
 0x6c1   :  { %5348 = vmatmul.mubr.msk.f32.vlgmr.msra.gmra.mrb[8].mxu0 %vm1189_vm8, %v1404_v15 }
 0x6c2   :  { %5738 = vmatpush3.bf16.msra.mxu0 %v7972_v1  ;;  %v1023_v55 = vpop.permute.xlu1 %1022 }
 0x6c3   :  { %5740 = vmatprep.subr.bf16.mxu0 %v5739_v13  ;;  %v1037_v59 = vsel %vm1034_vm9, %v1032_v57, %v1023_v55 }
 0x6c6   :  { %v6062_v24 = vpop.eup %6061  ;;  %5742 = vmatpush3.bf16.msra.mxu0 %v5739_v13 }
 0x6c7   :  { %v6064_v26 = vpop.eup %6063  ;;  %5744 = vmatprep.subr.bf16.mxu0 %v5743_v20  ;;  %v1413_v29 = vmul.f32 %v6062_v24, %v1390_v60 }
 0x6c8   :  { %v1406_v31 = vmul.f32 %v6064_v26, %v1389_v62 }
 0x6c9   :  { %v1415_v36 = vsel %vm1414_vm14, %v1390_v60, %v1413_v29  ;;  %v1033_v60 = vsel %vm890_vm1, %v7890_v41, %v1009_v43 }
 0x6ca   :  { %5746 = vmatpush3.bf16.msra.mxu0 %v5743_v20  ;;  %v1408_v1 = vsel %vm1407_vm15, %v1389_v62, %v1406_v31  ;;  %v1418_v47 = vsel %vm1416_vm4, %v1417_v37, %v1415_v36  ;;  %v1038_v61 = vsel %vm1034_vm9, %v1033_v60, %v1025_v58  ;;  %v803_v62 = vld [vmem:[#allocation41 + $0x8] sm:$0x1] }
 0x6cb   :  { %v1411_v44 = vsel %vm1409_vm0, %v1410_v34, %v1408_v1  ;;  %5748 = vmatprep.subr.bf16.mxu0 %v5747_v27  ;;  %v5763_v63 = vpack.c.bf16 %v803_v62, %v802_v42 }
 0x6cc   :  { %5350 = vmatprep.mubr.msk.f32.mxu0 %vm1189_vm8, %v1411_v44 }
 0x6cd   :  { %5351 = vmatmul.mubr.msk.f32.gmra.mrb[10].mxu0 %vm1189_vm8, %v1418_v47  ;;  %5765 = vmatprep.subr.msk.bf16.mxu1 %vm7907_vm6, %v5763_v63 }
 0x6ce   :  { %5750 = vmatpush3.bf16.msra.mxu0 %v5747_v27  ;;  %5375 = vmatprep.mubr.msk.f32.mxu0 %vm1519_vm5, %v1035_v48 }
 0x6cf   :  { %5752 = vmatprep.subr.bf16.mxu0 %v5751_v45 }
 0x6d2   :  { %5754 = vmatpush3.bf16.msra.mxu0 %v5751_v45 }
 0x6d3   :  { %5373 = vmatprep.subr.mxu0 %v795_v52 }
 0x6d6   :  { %5374 = vmatpush3.msra.mxu0 %v795_v52 }
 0x6d7   :  { %5376 = vmatmul.mubr.msk.f32.vlgmr.msra.gmra.mrb[8].mxu0 %vm1519_vm5, %v1036_v56 }
 0x6d8   :  { %5378 = vmatprep.mubr.msk.f32.mxu0 %vm1519_vm5, %v1037_v59 }
 0x6db   :  { %5379 = vmatmul.mubr.msk.f32.gmra.mrb[10].mxu0 %vm1519_vm5, %v1038_v61 }
 0x7aa   :  { %v5377_v0 = vpop.f32.mrb[8].mxu0 }
 0x7ab   :  { %v8058_v2 = vadd.f32 %v5377_v0, %v4911_v39  ;;  %v1598_v3 = vpop.f32.mrb[9].mxu0  ;;  %v809_v0 = vld [vmem:[#allocation49 + $0x8] sm:$0xff] }
 0x7ac   :  { %v8060_v4 = vadd.f32 %v4911_v39, %v1598_v3 }
 0x7ad   :  { %v1628_v6 = vmax.f32 %v8058_v2, 0.0  ;;  %v4956_v2 = vld [vmem:[#allocation44] ss:$0 sm:$0xff] }
 0x7ae   :  { %v1627_v5 = vmax.f32 %v8060_v4, 0.0  ;;  %v5380_v41 = vpop.f32.mrb[10].mxu0 }
 0x7af   :  { %v8064_v7 = vadd.f32 %v5380_v41, %v4911_v39  ;;  %v1608_v12 = vpop.f32.mrb[11].mxu0  ;;  %v812_v41 = vld [vmem:[#allocation50] sm:$0xff] }
 0x7b0   :  { %v8066_v13 = vadd.f32 %v4911_v39, %v1608_v12  ;;  %5389 = vmatprep.mubr.msk.f32.mxu1 %vm890_vm1, %v1627_v5  ;;  %v808_v39 = vld [vmem:[#allocation49] sm:$0xff]  ;;  %v813_v12 = vld [vmem:[#allocation50 + $0x8] sm:$0xff] }
 0x7b1   :  { %5390 = vmatmul.mubr.msk.f32.vlgmr.msra.gmra.mrb[12].mxu1 %vm890_vm1, %v1628_v6  ;;  %v1630_v17 = vmax.f32 %v8064_v7, 0.0  ;;  %v8124_v3 = vpack.c.bf16 %v809_v0, %v808_v39 }
 0x7b2   :  { %v1629_v15 = vmax.f32 %v8066_v13, 0.0  ;;  %5768 = vmatpush3.bf16.msk.msra.mxu1 %vm7907_vm6, %v5763_v63  ;;  %vm1970_vm6 = vcmask 1043456   ;;  %v807_v63 = vld [vmem:[#allocation47] sm:$0xf] }
 0x7b3   :  { %5417 = vmatprep.subr.msk.mxu0 %vm1970_vm6, %v806_v51  ;;  %5437 = vmatprep.subr.msk.mxu1 %vm1970_vm6, %v807_v63 }
 0x7b4   :  { %5392 = vmatprep.mubr.msk.f32.mxu1 %vm890_vm1, %v1629_v15  ;;  %5418 = vmatpush3.msk.msra.mxu0 %vm1970_vm6, %v806_v51  ;;  %v814_v51 = vld [vmem:[#allocation50 + $0x10] sm:$0xff] }
 0x7b5   :  { %5393 = vmatmul.mubr.msk.f32.gmra.mrb[14].mxu1 %vm890_vm1, %v1630_v17 }
 0x7b6   :  { %5399 = vmatprep.mubr.msk.f32.mxu1 %vm1189_vm8, %v7977_v9 }
 0x7b9   :  { %5400 = vmatmul.mubr.msk.f32.vlgmr.msra.gmra.mrb[16].mxu1 %vm1189_vm8, %v7975_v8  ;;  %v4912_v8 = vld [vmem:[#allocation32] ss:$0 sm:$0xff] }
 0x7ba   :  { %5402 = vmatprep.mubr.msk.f32.mxu1 %vm1189_vm8, %v7981_v11  ;;  %5438 = vmatpush3.msk.msra.mxu1 %vm1970_vm6, %v807_v63 }
 0x7bb   :  { %5770 = vmatprep.subr.bf16.mxu1 %v8124_v3 }
 0x7bd   :  { %5403 = vmatmul.mubr.msk.f32.gmra.mrb[18].mxu1 %vm1189_vm8, %v7979_v10 }
 0x7be   :  { %5405 = vmatprep.mubr.msk.f32.mxu1 %vm1189_vm8, %v7991_v16 }
 0x7c1   :  { %5406 = vmatmul.mubr.msk.f32.gmra.mrb[20].mxu1 %vm1189_vm8, %v7987_v14 }
 0x7c2   :  { %5408 = vmatprep.mubr.msk.f32.mxu1 %vm1189_vm8, %v8007_v28 }
 0x7c5   :  { %5409 = vmatmul.mubr.msk.f32.gmra.mrb[22].mxu1 %vm1189_vm8, %v8003_v25 }
 0x7c6   :  { %5411 = vmatprep.mubr.msk.f32.mxu1 %vm1189_vm8, %v8019_v38 }
 0x7c9   :  { %5412 = vmatmul.mubr.msk.f32.gmra.mrb[24].mxu1 %vm1189_vm8, %v8015_v35 }
 0x7ca   :  { %5414 = vmatprep.mubr.msk.f32.mxu1 %vm1189_vm8, %v8029_v53 }
 0x7cd   :  { %5415 = vmatmul.mubr.msk.f32.gmra.mrb[26].mxu1 %vm1189_vm8, %v8025_v50 }
 0x884   :  { %v5391_v9 = vpop.f32.mrb[12].mxu1 }
 0x885   :  { %v1721_v10 = vadd.f32 %v5391_v9, %v4912_v8  ;;  %v1715_v11 = vpop.f32.mrb[13].mxu1  ;;  %v815_v9 = vld [vmem:[#allocation50 + $0x18] sm:$0xff] }
 0x886   :  { %v1716_v14 = vadd.f32 %v4912_v8, %v1715_v11 }
 0x887   :  { %v4918_v16 = vmul.f32 -1.442695, %v1721_v10  ;;  %v5781_v10 = vpack.c.bf16 %v815_v9, %v814_v51  ;;  %v811_v9 = vld [vmem:[#allocation49 + $0x18] sm:$0xff] }
 0x888   :  { %v4917_v25 = vmul.f32 -1.442695, %v1716_v14  ;;  %v5394_v28 = vpop.f32.mrb[14].mxu1 }
 0x889   :  { %6065 = vpow2.f32 %v4918_v16  ;;  %v1731_v35 = vadd.f32 %v5394_v28, %v4912_v8  ;;  %v1725_v38 = vpop.f32.mrb[15].mxu1 }
 0x88a   :  { %6067 = vpow2.f32 %v4917_v25  ;;  %v1726_v53 = vadd.f32 %v4912_v8, %v1725_v38  ;;  %v5777_v8 = vpack.c.bf16 %v813_v12, %v812_v41 }
 0x88b   :  { %v4920_v50 = vmul.f32 -1.442695, %v1731_v35 }
 0x88c   :  { %v4919_v18 = vmul.f32 -1.442695, %v1726_v53  ;;  %v5401_v19 = vpop.f32.mrb[16].mxu1  ;;  %5778 = vmatprep.subr.bf16.mxu0 %v5777_v8 }
 0x88d   :  { %6069 = vpow2.f32 %v4920_v50  ;;  %v1863_v20 = vpop.f32.mrb[17].mxu1 }
 0x88e   :  { %6071 = vpow2.f32 %v4919_v18 }
 0x890   :  { %v5404_v21 = vpop.f32.mrb[18].mxu1 }
 0x891   :  { %v1873_v22 = vpop.f32.mrb[19].mxu1 }
 0x893   :  { %v6066_v23 = vpop.eup %6065 }
 0x894   :  { %v6068_v24 = vpop.eup %6067  ;;  %v1747_v26 = vadd.f32 1.0, %v6066_v23  ;;  %v5407_v27 = vpop.f32.mrb[20].mxu1 }
 0x895   :  { %v1746_v29 = vadd.f32 1.0, %v6068_v24  ;;  %v1883_v30 = vpop.f32.mrb[21].mxu1 }
 0x896   :  { %6073 = vrcp.f32 %v1747_v26 }
 0x897   :  { %v6070_v31 = vpop.eup %6069  ;;  %6075 = vrcp.f32 %v1746_v29 }
 0x898   :  { %v6072_v32 = vpop.eup %6071  ;;  %v1749_v33 = vadd.f32 1.0, %v6070_v31  ;;  %v5410_v34 = vpop.f32.mrb[22].mxu1 }
 0x899   :  { %v1748_v36 = vadd.f32 1.0, %v6072_v32  ;;  %v1893_v1 = vpop.f32.mrb[23].mxu1 }
 0x89a   :  { %6077 = vrcp.f32 %v1749_v33 }
 0x89b   :  { %6079 = vrcp.f32 %v1748_v36 }
 0x89c   :  { %v5413_v37 = vpop.f32.mrb[24].mxu1 }
 0x89d   :  { %v1903_v43 = vpop.f32.mrb[25].mxu1 }
 0x8a0   :  { %v6074_v44 = vpop.eup %6073  ;;  %v5416_v45 = vpop.f32.mrb[26].mxu1 }
 0x8a1   :  { %v6076_v46 = vpop.eup %6075  ;;  %v1923_v47 = vmul.f32 %v6074_v44, %v5401_v19  ;;  %v1927_v48 = vmul.f32 %v6074_v44, %v5407_v27  ;;  %v1931_v49 = vmul.f32 %v6074_v44, %v5413_v37  ;;  %v1913_v52 = vpop.f32.mrb[27].mxu1 }
 0x8a2   :  { %v1922_v54 = vmul.f32 %v6076_v46, %v1863_v20  ;;  %v1926_v55 = vmul.f32 %v6076_v46, %v1883_v30  ;;  %v1930_v40 = vmul.f32 %v6076_v46, %v1903_v43 }
 0x8a4   :  { %v6078_v56 = vpop.eup %6077  ;;  %5419 = vmatprep.mubr.msk.f32.mxu0 %vm1083_vm7, %v1922_v54 }
 0x8a5   :  { %v6080_v57 = vpop.eup %6079  ;;  %v1925_v58 = vmul.f32 %v6078_v56, %v5404_v21  ;;  %v1929_v59 = vmul.f32 %v6078_v56, %v5410_v34  ;;  %v1933_v60 = vmul.f32 %v6078_v56, %v5416_v45  ;;  %5420 = vmatmul.mubr.msk.f32.vlgmr.msra.gmra.mrb[12].mxu0 %vm1083_vm7, %v1923_v47 }
 0x8a6   :  { %v1924_v61 = vmul.f32 %v6080_v57, %v1873_v22  ;;  %v1928_v42 = vmul.f32 %v6080_v57, %v1893_v1  ;;  %v1932_v62 = vmul.f32 %v6080_v57, %v1913_v52  ;;  %5780 = vmatpush3.bf16.msra.mxu0 %v5777_v8  ;;  %v810_v8 = vld [vmem:[#allocation49 + $0x10] sm:$0xff] }
 0x8a7   :  { %5782 = vmatprep.subr.bf16.mxu0 %v5781_v10 }
 0x8a8   :  { %5422 = vmatprep.mubr.msk.f32.mxu0 %vm1083_vm7, %v1924_v61 }
 0x8a9   :  { %5423 = vmatmul.mubr.msk.f32.gmra.mrb[14].mxu0 %vm1083_vm7, %v1925_v58 }
 0x8aa   :  { %5425 = vmatprep.mubr.msk.f32.mxu0 %vm1083_vm7, %v1926_v55  ;;  %5784 = vmatpush3.bf16.msra.mxu0 %v5781_v10 }
 0x8ad   :  { %5426 = vmatmul.mubr.msk.f32.gmra.mrb[16].mxu0 %vm1083_vm7, %v1927_v48 }
 0x8ae   :  { %5428 = vmatprep.mubr.msk.f32.mxu0 %vm1083_vm7, %v1928_v42 }
 0x8b1   :  { %5429 = vmatmul.mubr.msk.f32.gmra.mrb[18].mxu0 %vm1083_vm7, %v1929_v59 }
 0x8b2   :  { %5431 = vmatprep.mubr.msk.f32.mxu0 %vm1083_vm7, %v1930_v40 }
 0x8b5   :  { %5432 = vmatmul.mubr.msk.f32.gmra.mrb[20].mxu0 %vm1083_vm7, %v1931_v49 }
 0x8b6   :  { %5434 = vmatprep.mubr.msk.f32.mxu0 %vm1083_vm7, %v1932_v62 }
 0x8b9   :  { %5435 = vmatmul.mubr.msk.f32.gmra.mrb[22].mxu0 %vm1083_vm7, %v1933_v60 }
 0x978   :  { %v8127_v11 = vpop.f32.mrb[12].mxu0 }
 0x979   :  { %v8129_v14 = vpop.f32.mrb[13].mxu0  ;;  %v2100_v28 = vmul.f32 %v8127_v11, %v8127_v11 }
 0x97a   :  { %v2099_v35 = vmul.f32 %v8129_v14, %v8129_v14 }
 0x97b   :  { %v2116_v19 = vsel %vm1083_vm7, %v2100_v28, 0.0 }
 0x97c   :  { %v8131_v16 = vpop.f32.mrb[14].mxu0  ;;  %v2111_v22 = vsel %vm1083_vm7, %v2099_v35, 0.0 }
 0x97d   :  { %v8133_v25 = vpop.f32.mrb[15].mxu0  ;;  %v2102_v20 = vmul.f32 %v8131_v16, %v8131_v16 }
 0x97e   :  { %v2101_v23 = vmul.f32 %v8133_v25, %v8133_v25 }
 0x97f   :  { %v2126_v33 = vsel %vm1083_vm7, %v2102_v20, 0.0 }
 0x980   :  { %v8139_v38 = vpop.f32.mrb[16].mxu0  ;;  %v2121_v36 = vsel %vm1083_vm7, %v2101_v23, 0.0 }
 0x981   :  { %v2104_v53 = vmul.f32 %v8139_v38, %v8139_v38  ;;  %v8143_v50 = vpop.f32.mrb[17].mxu0 }
 0x982   :  { %v2103_v18 = vmul.f32 %v8143_v50, %v8143_v50 }
 0x983   :  { %v2117_v21 = vsel %vm1083_vm7, %v2104_v53, 0.0 }
 0x984   :  { %v2118_v24 = vadd.f32 %v2117_v21, %v2116_v19  ;;  %v2112_v26 = vsel %vm1083_vm7, %v2103_v18, 0.0  ;;  %v8155_v27 = vpop.f32.mrb[18].mxu0  ;;  %v5773_v21 = vpack.c.bf16 %v811_v9, %v810_v8 }
 0x985   :  { %v2113_v29 = vadd.f32 %v2112_v26, %v2111_v22  ;;  %v2106_v30 = vmul.f32 %v8155_v27, %v8155_v27  ;;  %v8159_v31 = vpop.f32.mrb[19].mxu0 }
 0x986   :  { %v2105_v32 = vmul.f32 %v8159_v31, %v8159_v31 }
 0x987   :  { %v2127_v34 = vsel %vm1083_vm7, %v2106_v30, 0.0 }
 0x988   :  { %v2128_v1 = vadd.f32 %v2127_v34, %v2126_v33  ;;  %v2122_v37 = vsel %vm1083_vm7, %v2105_v32, 0.0  ;;  %v8167_v43 = vpop.f32.mrb[20].mxu0 }
 0x989   :  { %v2123_v44 = vadd.f32 %v2122_v37, %v2121_v36  ;;  %v2108_v45 = vmul.f32 %v8167_v43, %v8167_v43  ;;  %v8171_v46 = vpop.f32.mrb[21].mxu0  ;;  %v816_v36 = vld [vmem:[#allocation52] sm:$0xf] }
 0x98a   :  { %v2107_v47 = vmul.f32 %v8171_v46, %v8171_v46 }
 0x98b   :  { %v2119_v48 = vsel %vm1083_vm7, %v2108_v45, 0.0 }
 0x98c   :  { %v2120_v49 = vadd.f32 %v2119_v48, %v2118_v24  ;;  %v2114_v52 = vsel %vm1083_vm7, %v2107_v47, 0.0  ;;  %v8177_v54 = vpop.f32.mrb[22].mxu0 }
 0x98d   :  { %v2115_v55 = vadd.f32 %v2114_v52, %v2113_v29  ;;  %v2110_v40 = vmul.f32 %v8177_v54, %v8177_v54  ;;  %v8181_v56 = vpop.f32.mrb[23].mxu0  ;;  %v4957_v52 = vld [vmem:[#allocation43] ss:$0 sm:$0xff] }
 0x98e   :  { %v2132_v57 = vmax.f32 %v2120_v49, 1e-08  ;;  %v2109_v58 = vmul.f32 %v8181_v56, %v8181_v56  ;;  %v819_v49 = vld [vmem:[#allocation56] sm:$0xf] }
 0x98f   :  { %v2131_v59 = vmax.f32 %v2115_v55, 1e-08  ;;  %v2129_v60 = vsel %vm1083_vm7, %v2110_v40, 0.0  ;;  %5493 = vmatprep.subr.msk.mxu0 %vm1970_vm6, %v819_v49 }
 0x990   :  { %6081 = vrsqrt.f32 %v2132_v57  ;;  %v2130_v61 = vadd.f32 %v2129_v60, %v2128_v1  ;;  %v2124_v42 = vsel %vm1083_vm7, %v2109_v58, 0.0  ;;  %vm2144_vm8 = vcmp.eq.f32.partialorder %v2132_v57, inf }
 0x991   :  { %v2125_v62 = vadd.f32 %v2124_v42, %v2123_v44  ;;  %6083 = vrsqrt.f32 %v2131_v59  ;;  %vm2137_vm10 = vcmp.eq.f32.partialorder %v2131_v59, inf  ;;  %v2140_v10 = vand.u32 2147483648, %v2131_v59 }
 0x992   :  { %v2134_v63 = vmax.f32 %v2130_v61, 1e-08  ;;  %vm2139_vm11 = vcmp.eq.f32.partialorder %v2131_v59, 0.0  ;;  %v2147_v18 = vand.u32 2147483648, %v2132_v57  ;;  %vm2146_vm12 = vcmp.eq.f32.partialorder %v2132_v57, 0.0 }
 0x993   :  { %v2133_v39 = vmax.f32 %v2125_v62, 1e-08 }
 0x994   :  { %6085 = vrsqrt.f32 %v2134_v63  ;;  %vm2158_vm13 = vcmp.eq.f32.partialorder %v2134_v63, inf  ;;  %v2161_v32 = vand.u32 2147483648, %v2134_v63  ;;  %vm2160_vm0 = vcmp.eq.f32.partialorder %v2134_v63, 0.0 }
 0x995   :  { %6087 = vrsqrt.f32 %v2133_v39  ;;  %vm2151_vm14 = vcmp.eq.f32.partialorder %v2133_v39, inf  ;;  %v2154_v26 = vand.u32 2147483648, %v2133_v39  ;;  %vm2153_vm15 = vcmp.eq.f32.partialorder %v2133_v39, 0.0 }
 0x99a   :  { %v6082_v0 = vpop.eup %6081 }
 0x99b   :  { %v6084_v41 = vpop.eup %6083  ;;  %v2143_v12 = vmul.f32 %v6082_v0, %v2132_v57 }
 0x99c   :  { %v2136_v51 = vmul.f32 %v6084_v41, %v2131_v59 }
 0x99d   :  { %v2145_v28 = vsel %vm2144_vm8, %v2132_v57, %v2143_v12 }
 0x99e   :  { %v6086_v35 = vpop.eup %6085  ;;  %v2138_v53 = vsel %vm2137_vm10, %v2131_v59, %v2136_v51  ;;  %v2148_v23 = vsel %vm2146_vm12, %v2147_v18, %v2145_v28 }
 0x99f   :  { %v6088_v19 = vpop.eup %6087  ;;  %v2141_v20 = vsel %vm2139_vm11, %v2140_v10, %v2138_v53  ;;  %v2157_v22 = vmul.f32 %v6086_v35, %v2134_v63 }
 0x9a0   :  { %5439 = vmatprep.mubr.msk.f32.mxu1 %vm1083_vm7, %v2141_v20  ;;  %v2150_v24 = vmul.f32 %v6088_v19, %v2133_v39 }
 0x9a1   :  { %5440 = vmatmul.mubr.msk.f32.vlgmr.msra.gmra.mrb[28].mxu1 %vm1083_vm7, %v2148_v23  ;;  %v2159_v29 = vsel %vm2158_vm13, %v2134_v63, %v2157_v22 }
 0x9a2   :  { %5772 = vmatpush3.bf16.msra.mxu1 %v8124_v3  ;;  %v2152_v30 = vsel %vm2151_vm14, %v2133_v39, %v2150_v24  ;;  %v2162_v34 = vsel %vm2160_vm0, %v2161_v32, %v2159_v29  ;;  %vm7346_vm14 = vmmov 0  }
 0x9a3   :  { %v2155_v33 = vsel %vm2153_vm15, %v2154_v26, %v2152_v30  ;;  %5774 = vmatprep.subr.bf16.mxu1 %v5773_v21 }
 0x9a4   :  { %5442 = vmatprep.mubr.msk.f32.mxu1 %vm1083_vm7, %v2155_v33 }
 0x9a5   :  { %5443 = vmatmul.mubr.msk.f32.gmra.mrb[30].mxu1 %vm1083_vm7, %v2162_v34 }
 0x9a6   :  { %5776 = vmatpush3.bf16.msra.mxu1 %v5773_v21  ;;  %5453 = vmatprep.mubr.msk.f32.mxu1 %vm890_vm1, %v1627_v5 }
 0x9a7   :  { %5473 = vmatprep.subr.msk.mxu1 %vm1970_vm6, %v816_v36 }
 0x9a9   :  { %5454 = vmatmul.mubr.msk.f32.vlgmr.msra.gmra.mrb[28].mxu1 %vm890_vm1, %v1628_v6 }
 0x9aa   :  { %5456 = vmatprep.mubr.msk.f32.mxu1 %vm890_vm1, %v1629_v15  ;;  %5474 = vmatpush3.msk.msra.mxu1 %vm1970_vm6, %v816_v36  ;;  %v820_v36 = vld [vmem:[#allocation58] sm:$0xf] }
 0x9ab   :  { %5513 = vmatprep.subr.msk.mxu1 %vm1970_vm6, %v820_v36 }
 0x9ad   :  { %5457 = vmatmul.mubr.msk.f32.gmra.mrb[30].mxu1 %vm890_vm1, %v1630_v17 }
 0x9ae   :  { %5475 = vmatprep.mubr.msk.f32.mxu1 %vm1083_vm7, %v8129_v14 }
 0x9b1   :  { %5476 = vmatmul.mubr.msk.f32.vlgmr.msra.gmra.mrb[32].mxu1 %vm1083_vm7, %v8127_v11 }
 0x9b2   :  { %5478 = vmatprep.mubr.msk.f32.mxu1 %vm1083_vm7, %v8133_v25  ;;  %5514 = vmatpush3.msk.msra.mxu1 %vm1970_vm6, %v820_v36 }
 0x9b5   :  { %5479 = vmatmul.mubr.msk.f32.gmra.mrb[34].mxu1 %vm1083_vm7, %v8131_v16 }
 0x9b6   :  { %5481 = vmatprep.mubr.msk.f32.mxu1 %vm1083_vm7, %v8143_v50 }
 0x9b9   :  { %5482 = vmatmul.mubr.msk.f32.gmra.mrb[36].mxu1 %vm1083_vm7, %v8139_v38 }
 0x9ba   :  { %5484 = vmatprep.mubr.msk.f32.mxu1 %vm1083_vm7, %v8159_v31 }
 0x9bd   :  { %5485 = vmatmul.mubr.msk.f32.gmra.mrb[38].mxu1 %vm1083_vm7, %v8155_v27 }
 0x9be   :  { %5487 = vmatprep.mubr.msk.f32.mxu1 %vm1083_vm7, %v8171_v46 }
 0x9c1   :  { %5488 = vmatmul.mubr.msk.f32.gmra.mrb[40].mxu1 %vm1083_vm7, %v8167_v43 }
 0x9c2   :  { %5490 = vmatprep.mubr.msk.f32.mxu1 %vm1083_vm7, %v8181_v56 }
 0x9c5   :  { %5491 = vmatmul.mubr.msk.f32.gmra.mrb[42].mxu1 %vm1083_vm7, %v8177_v54 }
 0xa7c   :  { %v5455_v4 = vpop.f32.mrb[28].mxu1 }
 0xa7d   :  { %v8230_v5 = vadd.f32 %v5455_v4, %v4956_v2  ;;  %v2329_v6 = vpop.f32.mrb[29].mxu1  ;;  %v822_v4 = vld [vmem:[#allocation59 + $0x8] sm:$0xff] }
 0xa7e   :  { %v8232_v7 = vadd.f32 %v4956_v2, %v2329_v6 }
 0xa7f   :  { %v2359_v17 = vmax.f32 %v8230_v5, 0.0 }
 0xa80   :  { %v2358_v13 = vmax.f32 %v8232_v7, 0.0  ;;  %v5458_v15 = vpop.f32.mrb[30].mxu1 }
 0xa81   :  { %v8236_v3 = vadd.f32 %v5458_v15, %v4956_v2  ;;  %v2339_v11 = vpop.f32.mrb[31].mxu1  ;;  %v825_v15 = vld [vmem:[#allocation61] sm:$0xff] }
 0xa82   :  { %v8238_v14 = vadd.f32 %v4956_v2, %v2339_v11  ;;  %5467 = vmatprep.mubr.msk.f32.mxu0 %vm890_vm1, %v2358_v13  ;;  %v821_v2 = vld [vmem:[#allocation59] sm:$0xff]  ;;  %v826_v11 = vld [vmem:[#allocation61 + $0x8] sm:$0xff] }
 0xa83   :  { %5468 = vmatmul.mubr.msk.f32.vlgmr.msra.gmra.mrb[24].mxu0 %vm890_vm1, %v2359_v17  ;;  %v2361_v38 = vmax.f32 %v8236_v3, 0.0  ;;  %v8270_v6 = vpack.c.bf16 %v822_v4, %v821_v2 }
 0xa84   :  { %v2360_v16 = vmax.f32 %v8238_v14, 0.0  ;;  %v5477_v25 = vpop.f32.mrb[32].mxu1  ;;  %5494 = vmatpush3.msk.msra.mxu0 %vm1970_vm6, %v819_v49 }
 0xa85   :  { %v2594_v50 = vpop.f32.mrb[33].mxu1  ;;  %5786 = vmatprep.subr.bf16.mxu1 %v8270_v6 }
 0xa86   :  { %5470 = vmatprep.mubr.msk.f32.mxu0 %vm890_vm1, %v2360_v16 }
 0xa87   :  { %5471 = vmatmul.mubr.msk.f32.gmra.mrb[26].mxu0 %vm890_vm1, %v2361_v38 }
 0xa88   :  { %v5480_v27 = vpop.f32.mrb[34].mxu1 }
 0xa89   :  { %v2604_v31 = vpop.f32.mrb[35].mxu1 }
 0xa8c   :  { %v5483_v1 = vpop.f32.mrb[36].mxu1 }
 0xa8d   :  { %v2614_v37 = vpop.f32.mrb[37].mxu1 }
 0xa90   :  { %v5486_v43 = vpop.f32.mrb[38].mxu1 }
 0xa91   :  { %v2624_v44 = vpop.f32.mrb[39].mxu1 }
 0xa94   :  { %v5489_v45 = vpop.f32.mrb[40].mxu1 }
 0xa95   :  { %v2634_v46 = vpop.f32.mrb[41].mxu1 }
 0xa98   :  { %v5492_v47 = vpop.f32.mrb[42].mxu1 }
 0xa99   :  { %v2644_v48 = vpop.f32.mrb[43].mxu1 }
 0xb56   :  { %v5469_v54 = vpop.f32.mrb[24].mxu0 }
 0xb57   :  { %v2452_v55 = vadd.f32 %v5469_v54, %v4957_v52  ;;  %v2446_v40 = vpop.f32.mrb[25].mxu0 }
 0xb58   :  { %v2447_v56 = vadd.f32 %v4957_v52, %v2446_v40 }
 0xb59   :  { %v4963_v57 = vmul.f32 -1.442695, %v2452_v55 }
 0xb5a   :  { %v4962_v58 = vmul.f32 -1.442695, %v2447_v56  ;;  %v5472_v59 = vpop.f32.mrb[26].mxu0 }
 0xb5b   :  { %6089 = vpow2.f32 %v4963_v57  ;;  %v2462_v60 = vadd.f32 %v5472_v59, %v4957_v52  ;;  %v2456_v61 = vpop.f32.mrb[27].mxu0 }
 0xb5c   :  { %6091 = vpow2.f32 %v4962_v58  ;;  %v2457_v42 = vadd.f32 %v4957_v52, %v2456_v61 }
 0xb5d   :  { %v4965_v62 = vmul.f32 -1.442695, %v2462_v60 }
 0xb5e   :  { %v4964_v63 = vmul.f32 -1.442695, %v2457_v42 }
 0xb5f   :  { %6093 = vpow2.f32 %v4965_v62 }
 0xb60   :  { %6095 = vpow2.f32 %v4964_v63 }
 0xb65   :  { %v6090_v39 = vpop.eup %6089 }
 0xb66   :  { %v6092_v0 = vpop.eup %6091  ;;  %v2478_v41 = vadd.f32 1.0, %v6090_v39 }
 0xb67   :  { %v2477_v12 = vadd.f32 1.0, %v6092_v0 }
 0xb68   :  { %6097 = vrcp.f32 %v2478_v41 }
 0xb69   :  { %v6094_v51 = vpop.eup %6093  ;;  %6099 = vrcp.f32 %v2477_v12 }
 0xb6a   :  { %v6096_v8 = vpop.eup %6095  ;;  %v2480_v9 = vadd.f32 1.0, %v6094_v51 }
 0xb6b   :  { %v2479_v10 = vadd.f32 1.0, %v6096_v8 }
 0xb6c   :  { %6101 = vrcp.f32 %v2480_v9 }
 0xb6d   :  { %6103 = vrcp.f32 %v2479_v10 }
 0xb72   :  { %v6098_v28 = vpop.eup %6097 }
 0xb73   :  { %v6100_v35 = vpop.eup %6099  ;;  %v2654_v53 = vmul.f32 %v6098_v28, %v5477_v25  ;;  %v2658_v18 = vmul.f32 %v6098_v28, %v5483_v1  ;;  %v2662_v19 = vmul.f32 %v6098_v28, %v5489_v45  ;;  %v827_v25 = vld [vmem:[#allocation61 + $0x10] sm:$0xff] }
 0xb74   :  { %v2653_v20 = vmul.f32 %v6100_v35, %v2594_v50  ;;  %v2657_v21 = vmul.f32 %v6100_v35, %v2614_v37  ;;  %v2661_v22 = vmul.f32 %v6100_v35, %v2634_v46  ;;  %v5793_v50 = vpack.c.bf16 %v826_v11, %v825_v15 }
 0xb76   :  { %v6102_v23 = vpop.eup %6101  ;;  %5495 = vmatprep.mubr.msk.f32.mxu0 %vm1083_vm7, %v2653_v20  ;;  %5794 = vmatprep.subr.bf16.mxu0 %v5793_v50 }
 0xb77   :  { %v6104_v24 = vpop.eup %6103  ;;  %5496 = vmatmul.mubr.msk.f32.vlgmr.msra.gmra.mrb[28].mxu0 %vm1083_vm7, %v2654_v53  ;;  %v2656_v26 = vmul.f32 %v6102_v23, %v5480_v27  ;;  %v2660_v29 = vmul.f32 %v6102_v23, %v5486_v43  ;;  %v2664_v30 = vmul.f32 %v6102_v23, %v5492_v47  ;;  %v828_v27 = vld [vmem:[#allocation61 + $0x18] sm:$0xff] }
 0xb78   :  { %v2655_v32 = vmul.f32 %v6104_v24, %v2604_v31  ;;  %v2659_v33 = vmul.f32 %v6104_v24, %v2624_v44  ;;  %v2663_v34 = vmul.f32 %v6104_v24, %v2644_v48  ;;  %v5797_v31 = vpack.c.bf16 %v828_v27, %v827_v25  ;;  %5796 = vmatpush3.bf16.msra.mxu0 %v5793_v50  ;;  %v823_v50 = vld [vmem:[#allocation59 + $0x10] sm:$0xff]  ;;  %v824_v27 = vld [vmem:[#allocation59 + $0x18] sm:$0xff] }
 0xb7a   :  { %5498 = vmatprep.mubr.msk.f32.mxu0 %vm1083_vm7, %v2655_v32  ;;  %5798 = vmatprep.subr.bf16.mxu0 %v5797_v31 }
 0xb7b   :  { %5499 = vmatmul.mubr.msk.f32.gmra.mrb[30].mxu0 %vm1083_vm7, %v2656_v26 }
 0xb7c   :  { %5501 = vmatprep.mubr.msk.f32.mxu0 %vm1083_vm7, %v2657_v21  ;;  %5800 = vmatpush3.bf16.msra.mxu0 %v5797_v31 }
 0xb7f   :  { %5502 = vmatmul.mubr.msk.f32.gmra.mrb[32].mxu0 %vm1083_vm7, %v2658_v18 }
 0xb80   :  { %5504 = vmatprep.mubr.msk.f32.mxu0 %vm1083_vm7, %v2659_v33 }
 0xb83   :  { %5505 = vmatmul.mubr.msk.f32.gmra.mrb[34].mxu0 %vm1083_vm7, %v2660_v29 }
 0xb84   :  { %5507 = vmatprep.mubr.msk.f32.mxu0 %vm1083_vm7, %v2661_v22 }
 0xb87   :  { %5508 = vmatmul.mubr.msk.f32.gmra.mrb[36].mxu0 %vm1083_vm7, %v2662_v19 }
 0xb88   :  { %5510 = vmatprep.mubr.msk.f32.mxu0 %vm1083_vm7, %v2663_v34 }
 0xb8b   :  { %5511 = vmatmul.mubr.msk.f32.gmra.mrb[38].mxu0 %vm1083_vm7, %v2664_v30 }
 0xc4a   :  { %v8273_v1 = vpop.f32.mrb[28].mxu0 }
 0xc4b   :  { %v8275_v37 = vpop.f32.mrb[29].mxu0  ;;  %v2830_v45 = vmul.f32 %v8273_v1, %v8273_v1 }
 0xc4c   :  { %v2829_v46 = vmul.f32 %v8275_v37, %v8275_v37 }
 0xc4d   :  { %v2846_v54 = vsel %vm1083_vm7, %v2830_v45, 0.0 }
 0xc4e   :  { %v8277_v43 = vpop.f32.mrb[30].mxu0  ;;  %v2841_v56 = vsel %vm1083_vm7, %v2829_v46, 0.0 }
 0xc4f   :  { %v8279_v44 = vpop.f32.mrb[31].mxu0  ;;  %v2832_v55 = vmul.f32 %v8277_v43, %v8277_v43 }
 0xc50   :  { %v2831_v57 = vmul.f32 %v8279_v44, %v8279_v44 }
 0xc51   :  { %v2856_v39 = vsel %vm1083_vm7, %v2832_v55, 0.0 }
 0xc52   :  { %v8285_v47 = vpop.f32.mrb[32].mxu0  ;;  %v2851_v41 = vsel %vm1083_vm7, %v2831_v57, 0.0 }
 0xc53   :  { %v2834_v48 = vmul.f32 %v8285_v47, %v8285_v47  ;;  %v8289_v49 = vpop.f32.mrb[33].mxu0 }
 0xc54   :  { %v2833_v52 = vmul.f32 %v8289_v49, %v8289_v49 }
 0xc55   :  { %v2847_v40 = vsel %vm1083_vm7, %v2834_v48, 0.0 }
 0xc56   :  { %v2848_v58 = vadd.f32 %v2847_v40, %v2846_v54  ;;  %v2842_v59 = vsel %vm1083_vm7, %v2833_v52, 0.0  ;;  %v8301_v60 = vpop.f32.mrb[34].mxu0  ;;  %v5789_v40 = vpack.c.bf16 %v824_v27, %v823_v50 }
 0xc57   :  { %v2843_v61 = vadd.f32 %v2842_v59, %v2841_v56  ;;  %v2836_v42 = vmul.f32 %v8301_v60, %v8301_v60  ;;  %v8305_v62 = vpop.f32.mrb[35].mxu0 }
 0xc58   :  { %v2835_v63 = vmul.f32 %v8305_v62, %v8305_v62 }
 0xc59   :  { %v2857_v0 = vsel %vm1083_vm7, %v2836_v42, 0.0 }
 0xc5a   :  { %v2858_v12 = vadd.f32 %v2857_v0, %v2856_v39  ;;  %v2852_v51 = vsel %vm1083_vm7, %v2835_v63, 0.0  ;;  %v8313_v8 = vpop.f32.mrb[36].mxu0 }
 0xc5b   :  { %v2853_v9 = vadd.f32 %v2852_v51, %v2851_v41  ;;  %v2838_v10 = vmul.f32 %v8313_v8, %v8313_v8  ;;  %v8317_v28 = vpop.f32.mrb[37].mxu0  ;;  %v5001_v41 = vld [vmem:[#allocation55] ss:$0 sm:$0xff] }
 0xc5c   :  { %v2837_v35 = vmul.f32 %v8317_v28, %v8317_v28 }
 0xc5d   :  { %v2849_v53 = vsel %vm1083_vm7, %v2838_v10, 0.0 }
 0xc5e   :  { %v2850_v18 = vadd.f32 %v2849_v53, %v2848_v58  ;;  %v2844_v19 = vsel %vm1083_vm7, %v2837_v35, 0.0  ;;  %v8323_v20 = vpop.f32.mrb[38].mxu0 }
 0xc5f   :  { %v2845_v21 = vadd.f32 %v2844_v19, %v2843_v61  ;;  %v2840_v22 = vmul.f32 %v8323_v20, %v8323_v20  ;;  %v8327_v23 = vpop.f32.mrb[39].mxu0 }
 0xc60   :  { %v2862_v24 = vmax.f32 %v2850_v18, 1e-08  ;;  %v2839_v26 = vmul.f32 %v8327_v23, %v8327_v23 }
 0xc61   :  { %v2861_v29 = vmax.f32 %v2845_v21, 1e-08  ;;  %v2859_v30 = vsel %vm1083_vm7, %v2840_v22, 0.0 }
 0xc62   :  { %6105 = vrsqrt.f32 %v2862_v24  ;;  %v2860_v32 = vadd.f32 %v2859_v30, %v2858_v12  ;;  %v2854_v33 = vsel %vm1083_vm7, %v2839_v26, 0.0  ;;  %vm2874_vm4 = vcmp.eq.f32.partialorder %v2862_v24, inf }
 0xc63   :  { %v2855_v34 = vadd.f32 %v2854_v33, %v2853_v9  ;;  %6107 = vrsqrt.f32 %v2861_v29  ;;  %vm2867_vm5 = vcmp.eq.f32.partialorder %v2861_v29, inf  ;;  %v2870_v31 = vand.u32 2147483648, %v2861_v29 }
 0xc64   :  { %v2864_v36 = vmax.f32 %v2860_v32, 1e-08  ;;  %vm2869_vm9 = vcmp.eq.f32.partialorder %v2861_v29, 0.0  ;;  %v2877_v52 = vand.u32 2147483648, %v2862_v24  ;;  %vm2876_vm8 = vcmp.eq.f32.partialorder %v2862_v24, 0.0 }
 0xc65   :  { %v2863_v2 = vmax.f32 %v2855_v34, 1e-08 }
 0xc66   :  { %6109 = vrsqrt.f32 %v2864_v36  ;;  %vm2888_vm10 = vcmp.eq.f32.partialorder %v2864_v36, inf  ;;  %v2891_v63 = vand.u32 2147483648, %v2864_v36  ;;  %vm2890_vm13 = vcmp.eq.f32.partialorder %v2864_v36, 0.0 }
 0xc67   :  { %6111 = vrsqrt.f32 %v2863_v2  ;;  %vm2881_vm11 = vcmp.eq.f32.partialorder %v2863_v2, inf  ;;  %v2884_v59 = vand.u32 2147483648, %v2863_v2  ;;  %vm2883_vm12 = vcmp.eq.f32.partialorder %v2863_v2, 0.0 }
 0xc6c   :  { %v6106_v4 = vpop.eup %6105 }
 0xc6d   :  { %v6108_v15 = vpop.eup %6107  ;;  %v2873_v11 = vmul.f32 %v6106_v4, %v2862_v24 }
 0xc6e   :  { %v2866_v25 = vmul.f32 %v6108_v15, %v2861_v29 }
 0xc6f   :  { %v2875_v45 = vsel %vm2874_vm4, %v2862_v24, %v2873_v11 }
 0xc70   :  { %v6110_v46 = vpop.eup %6109  ;;  %v2868_v48 = vsel %vm2867_vm5, %v2861_v29, %v2866_v25  ;;  %v2878_v57 = vsel %vm2876_vm8, %v2877_v52, %v2875_v45  ;;  %v7345_v52 = vmov 0.0  }
 0xc71   :  { %v6112_v54 = vpop.eup %6111  ;;  %v2871_v55 = vsel %vm2869_vm9, %v2870_v31, %v2868_v48  ;;  %v2887_v56 = vmul.f32 %v6110_v46, %v2864_v36 }
 0xc72   :  { %5515 = vmatprep.mubr.msk.f32.mxu1 %vm1083_vm7, %v2871_v55  ;;  %v2880_v58 = vmul.f32 %v6112_v54, %v2863_v2 }
 0xc73   :  { %5516 = vmatmul.mubr.msk.f32.vlgmr.msra.gmra.mrb[44].mxu1 %vm1083_vm7, %v2878_v57  ;;  %v2889_v61 = vsel %vm2888_vm10, %v2864_v36, %v2887_v56 }
 0xc74   :  { %5788 = vmatpush3.bf16.msra.mxu1 %v8270_v6  ;;  %v2882_v42 = vsel %vm2881_vm11, %v2863_v2, %v2880_v58  ;;  %v2892_v0 = vsel %vm2890_vm13, %v2891_v63, %v2889_v61  ;;  %v829_v6 = vld [vmem:[#allocation62] sm:$0xf] }
 0xc75   :  { %v2885_v39 = vsel %vm2883_vm12, %v2884_v59, %v2882_v42  ;;  %5790 = vmatprep.subr.bf16.mxu1 %v5789_v40  ;;  %5549 = vmatprep.subr.msk.mxu0 %vm1970_vm6, %v829_v6 }
 0xc76   :  { %5518 = vmatprep.mubr.msk.f32.mxu1 %vm1083_vm7, %v2885_v39 }
 0xc77   :  { %5519 = vmatmul.mubr.msk.f32.gmra.mrb[46].mxu1 %vm1083_vm7, %v2892_v0 }
 0xc78   :  { %5792 = vmatpush3.bf16.msra.mxu1 %v5789_v40  ;;  %5529 = vmatprep.mubr.msk.f32.mxu1 %vm890_vm1, %v2358_v13 }
 0xc79   :  { %5569 = vmatprep.subr.bf16.mxu1 %v7345_v52 }
 0xc7b   :  { %5530 = vmatmul.mubr.msk.f32.vlgmr.msra.gmra.mrb[44].mxu1 %vm890_vm1, %v2359_v17 }
 0xc7c   :  { %5532 = vmatprep.mubr.msk.f32.mxu1 %vm890_vm1, %v2360_v16  ;;  %v5002_v16 = vld [vmem:[#allocation53] ss:$0 sm:$0xff] }
 0xc7f   :  { %5533 = vmatmul.mubr.msk.f32.gmra.mrb[46].mxu1 %vm890_vm1, %v2361_v38 }
 0xc80   :  { %5573 = vmatprep.mubr.msk.bf16.mxu1 %vm7346_vm14, %v7345_v52 }
 0xd4e   :  { %v5531_v12 = vpop.f32.mrb[44].mxu1 }
 0xd4f   :  { %v3059_v7 = vpop.f32.mrb[45].mxu1  ;;  %v8353_v13 = vadd.f32 %v5531_v12, %v5001_v41  ;;  %v6169_v12 = vld [vmem:[#allocation10 + $0x10] sm:$0xff]  }
 0xd50   :  { %v8351_v51 = vadd.f32 %v5001_v41, %v3059_v7  ;;  %v6170_v7 = vld [vmem:[#allocation10 + $0x18] sm:$0xff]  }
 0xd52   :  { %v5534_v5 = vpop.f32.mrb[46].mxu1  ;;  %5543 = vmatprep.mubr.msk.f32.mxu0 %vm890_vm1, %v8351_v51 }
 0xd53   :  { %v3069_v17 = vpop.f32.mrb[47].mxu1  ;;  %5544 = vmatmul.mubr.msk.f32.vlgmr.msra.gmra.mrb[40].mxu0 %vm890_vm1, %v8353_v13  ;;  %v8362_v14 = vadd.f32 %v5534_v5, %v5001_v41 }
 0xd54   :  { %v8359_v3 = vadd.f32 %v5001_v41, %v3069_v17  ;;  %5550 = vmatpush3.msk.msra.mxu0 %vm1970_vm6, %v829_v6 }
 0xd56   :  { %5546 = vmatprep.mubr.msk.f32.mxu0 %vm890_vm1, %v8359_v3 }
 0xd57   :  { %5547 = vmatmul.mubr.msk.f32.gmra.mrb[42].mxu0 %vm890_vm1, %v8362_v14 }
 0xd58   :  { %5551 = vmatprep.mubr.msk.f32.mxu0 %vm1083_vm7, %v8275_v37 }
 0xd5b   :  { %5552 = vmatmul.mubr.msk.f32.vlgmr.msra.gmra.mrb[44].mxu0 %vm1083_vm7, %v8273_v1 }
 0xd5c   :  { %5554 = vmatprep.mubr.msk.f32.mxu0 %vm1083_vm7, %v8279_v44 }
 0xd5f   :  { %5555 = vmatmul.mubr.msk.f32.gmra.mrb[46].mxu0 %vm1083_vm7, %v8277_v43 }
 0xd60   :  { %5557 = vmatprep.mubr.msk.f32.mxu0 %vm1083_vm7, %v8289_v49 }
 0xd63   :  { %5558 = vmatmul.mubr.msk.f32.gmra.mrb[48].mxu0 %vm1083_vm7, %v8285_v47 }
 0xd64   :  { %5560 = vmatprep.mubr.msk.f32.mxu0 %vm1083_vm7, %v8305_v62 }
 0xd67   :  { %5561 = vmatmul.mubr.msk.f32.gmra.mrb[50].mxu0 %vm1083_vm7, %v8301_v60 }
 0xd68   :  { %5563 = vmatprep.mubr.msk.f32.mxu0 %vm1083_vm7, %v8317_v28 }
 0xd6b   :  { %5564 = vmatmul.mubr.msk.f32.gmra.mrb[52].mxu0 %vm1083_vm7, %v8313_v8 }
 0xd6c   :  { %5566 = vmatprep.mubr.msk.f32.mxu0 %vm1083_vm7, %v8327_v23 }
 0xd6f   :  { %5567 = vmatmul.mubr.msk.f32.gmra.mrb[54].mxu0 %vm1083_vm7, %v8323_v20 }
 0xe26   :  { %v5545_v38 = vpop.f32.mrb[40].mxu0 }
 0xe27   :  { %v3178_v1 = vadd.f32 %v5545_v38, %v5002_v16  ;;  %v3172_v37 = vpop.f32.mrb[41].mxu0 }
 0xe28   :  { %v3173_v43 = vadd.f32 %v5002_v16, %v3172_v37 }
 0xe29   :  { %v5008_v44 = vmul.f32 -1.442695, %v3178_v1 }
 0xe2a   :  { %v5007_v47 = vmul.f32 -1.442695, %v3173_v43  ;;  %v5548_v49 = vpop.f32.mrb[42].mxu0 }
 0xe2b   :  { %6113 = vpow2.f32 %v5008_v44  ;;  %v3188_v60 = vadd.f32 %v5548_v49, %v5002_v16  ;;  %v3182_v62 = vpop.f32.mrb[43].mxu0 }
 0xe2c   :  { %6115 = vpow2.f32 %v5007_v47  ;;  %v3183_v9 = vadd.f32 %v5002_v16, %v3182_v62 }
 0xe2d   :  { %v5010_v8 = vmul.f32 -1.442695, %v3188_v60 }
 0xe2e   :  { %v5009_v10 = vmul.f32 -1.442695, %v3183_v9  ;;  %v5553_v28 = vpop.f32.mrb[44].mxu0 }
 0xe2f   :  { %6117 = vpow2.f32 %v5010_v8  ;;  %v3320_v35 = vpop.f32.mrb[45].mxu0 }
 0xe30   :  { %6119 = vpow2.f32 %v5009_v10 }
 0xe32   :  { %v5556_v53 = vpop.f32.mrb[46].mxu0 }
 0xe33   :  { %v3330_v18 = vpop.f32.mrb[47].mxu0 }
 0xe35   :  { %v6114_v19 = vpop.eup %6113 }
 0xe36   :  { %v6116_v20 = vpop.eup %6115  ;;  %v3204_v21 = vadd.f32 1.0, %v6114_v19  ;;  %v5559_v22 = vpop.f32.mrb[48].mxu0 }
 0xe37   :  { %v3203_v23 = vadd.f32 1.0, %v6116_v20  ;;  %v3340_v24 = vpop.f32.mrb[49].mxu0 }
 0xe38   :  { %6121 = vrcp.f32 %v3204_v21 }
 0xe39   :  { %v6118_v26 = vpop.eup %6117  ;;  %6123 = vrcp.f32 %v3203_v23 }
 0xe3a   :  { %v6120_v29 = vpop.eup %6119  ;;  %v3206_v30 = vadd.f32 1.0, %v6118_v26  ;;  %v5562_v32 = vpop.f32.mrb[50].mxu0 }
 0xe3b   :  { %v3205_v33 = vadd.f32 1.0, %v6120_v29  ;;  %v3350_v34 = vpop.f32.mrb[51].mxu0 }
 0xe3c   :  { %6125 = vrcp.f32 %v3206_v30 }
 0xe3d   :  { %6127 = vrcp.f32 %v3205_v33 }
 0xe3e   :  { %v5565_v36 = vpop.f32.mrb[52].mxu0 }
 0xe3f   :  { %v3360_v2 = vpop.f32.mrb[53].mxu0 }
 0xe42   :  { %v6122_v4 = vpop.eup %6121  ;;  %v5568_v15 = vpop.f32.mrb[54].mxu0 }
 0xe43   :  { %v6124_v11 = vpop.eup %6123  ;;  %v3380_v25 = vmul.f32 %v6122_v4, %v5553_v28  ;;  %v3384_v50 = vmul.f32 %v6122_v4, %v5559_v22  ;;  %v3388_v27 = vmul.f32 %v6122_v4, %v5565_v36  ;;  %v3370_v31 = vpop.f32.mrb[55].mxu0 }
 0xe44   :  { %v3379_v45 = vmul.f32 %v6124_v11, %v3320_v35  ;;  %v3383_v46 = vmul.f32 %v6124_v11, %v3340_v24  ;;  %v3387_v48 = vmul.f32 %v6124_v11, %v3360_v2 }
 0xe46   :  { %v6126_v54 = vpop.eup %6125  ;;  %v6023_v55 = vpack.i.bf16 %v3380_v25, %v3379_v45  ;;  %v6028_v40 = vpack.i.bf16 %v3384_v50, %v3383_v46  ;;  %v6033_v56 = vpack.i.bf16 %v3388_v27, %v3387_v48  ;;  %v6171_v45 = vld [vmem:[#allocation5 + $0x10] sm:$0xff]  ;;  %v6172_v48 = vld [vmem:[#allocation5] sm:$0xff] }
 0xe47   :  { %v6128_v57 = vpop.eup %6127  ;;  %v3382_v58 = vmul.f32 %v6126_v54, %v5556_v53  ;;  %v3386_v59 = vmul.f32 %v6126_v54, %v5562_v32  ;;  %v3390_v61 = vmul.f32 %v6126_v54, %v5568_v15  ;;  %v6173_v54 = vld [vmem:[#allocation5 + $0x8] sm:$0xff] }
 0xe48   :  { %v3381_v42 = vmul.f32 %v6128_v57, %v3330_v18  ;;  %v3385_v63 = vmul.f32 %v6128_v57, %v3350_v34  ;;  %v3389_v39 = vmul.f32 %v6128_v57, %v3370_v31  ;;  %6024 = vrot.lane.b32.xlu1 %v6023_v55, %s7334_s5  ;;  %6029 = vrot.lane.b32.xlu0 %v6028_v40, %s7336_s30  ;;  %v6174_v57 = vld [vmem:[#allocation5 + $0x18] sm:$0xff] }
 0xe4a   :  { %v6038_v0 = vpack.i.bf16 %v3382_v58, %v3381_v42  ;;  %v6043_v6 = vpack.i.bf16 %v3386_v59, %v3385_v63  ;;  %v6048_v41 = vpack.i.bf16 %v3390_v61, %v3389_v39 }
 0xe4c   :  { %6034 = vrot.lane.b32.xlu1 %v6033_v56, %s7335_s12  ;;  %6039 = vrot.lane.b32.xlu0 %v6038_v0, %s7334_s5 }
 0xe50   :  { %6044 = vrot.lane.b32.xlu1 %v6043_v6, %s7336_s30  ;;  %6049 = vrot.lane.b32.xlu0 %v6048_v41, %s7335_s12  ;;  %v6175_v41 = vld [vmem:[#allocation5 + $0x28] sm:$0xff] }
 0xe73   :  { %3455 = vxpose.xlu1.c.b16.start [1/2] (short) (narrow) %v6169_v12, 16 }
 0xe77   :  { %3456 = vxpose.xlu1.c.b16.end [2/2] (short) (narrow) %v6170_v7, 16  ;;  %v6176_v7 = vld [vmem:[#allocation5 + $0x20] sm:$0xff] }
 0xeba   :  { %v6025_v5 = vpop.permute.xlu1 %6024  ;;  %v6030_v17 = vpop.permute.xlu0 %6029 }
 0xebb   :  { %v6027_v16 = vunpack.i.h.bf16 %v6025_v5  ;;  %v6026_v38 = vunpack.i.l.bf16 %v6025_v5  ;;  %v6032_v1 = vunpack.i.h.bf16 %v6030_v17  ;;  %v6031_v37 = vunpack.i.l.bf16 %v6030_v17 }
 0xebd   :  { %v3440_v43 = vsel %vm890_vm1, %v8353_v13, %v6027_v16  ;;  %v3439_v44 = vsel %vm890_vm1, %v8351_v51, %v6026_v38 }
 0xebe   :  { %v6035_v47 = vpop.permute.xlu1 %6034  ;;  %v6040_v49 = vpop.permute.xlu0 %6039  ;;  %v3444_v9 = vsel %vm893_vm2, %v3440_v43, %v6032_v1  ;;  %v3443_v8 = vsel %vm893_vm2, %v3439_v44, %v6031_v37 }
 0xebf   :  { %v6037_v60 = vunpack.i.h.bf16 %v6035_v47  ;;  %v6036_v62 = vunpack.i.l.bf16 %v6035_v47  ;;  %v6042_v10 = vunpack.i.h.bf16 %v6040_v49  ;;  %v6041_v28 = vunpack.i.l.bf16 %v6040_v49 }
 0xec1   :  { %v3448_v35 = vsel %vm896_vm3, %v3444_v9, %v6037_v60  ;;  %v3447_v53 = vsel %vm896_vm3, %v3443_v8, %v6036_v62  ;;  %v3442_v23 = vsel %vm890_vm1, %v8362_v14, %v6042_v10  ;;  %v3441_v24 = vsel %vm890_vm1, %v8359_v3, %v6041_v28  ;;  %v6177_v28 = vld [vmem:[#allocation2] sm:$0xff] }
 0xec2   :  { %v3451_v18 = vpack.c.bf16 %v3448_v35, %v3447_v53  ;;  %v6045_v19 = vpop.permute.xlu1 %6044  ;;  %v6050_v13 = vpop.permute.xlu0 %6049 }
 0xec3   :  { %v6047_v20 = vunpack.i.h.bf16 %v6045_v19  ;;  %v6046_v21 = vunpack.i.l.bf16 %v6045_v19  ;;  %v6052_v51 = vunpack.i.h.bf16 %v6050_v13  ;;  %v6051_v22 = vunpack.i.l.bf16 %v6050_v13 }
 0xec4   :  { %5570 = vmatpush3.bf16.msra.mxu1 %v3451_v18  ;;  %v6178_v18 = vld [vmem:[#allocation2 + $0x8] sm:$0xff] }
 0xec5   :  { %v3445_v26 = vsel %vm893_vm2, %v3441_v24, %v6046_v21  ;;  %v3446_v29 = vsel %vm893_vm2, %v3442_v23, %v6047_v20  ;;  %5571 = vmatprep.subr.bf16.mxu1 %v7345_v52  ;;  %v733_v20 = vld [vmem:[#allocation14] sm:$0xf]  ;;  %vm3751_vm2 = vcmask 64512  }
 0xec6   :  { %v3449_v30 = vsel %vm896_vm3, %v3445_v26, %v6051_v22  ;;  %v3450_v32 = vsel %vm896_vm3, %v3446_v29, %v6052_v51 }
 0xec7   :  { %v3452_v33 = vpack.c.bf16 %v3450_v32, %v3449_v30 }
 0xec9   :  { %5572 = vmatpush3.bf16.msra.mxu1 %v3452_v33 }
 0xeca   :  { %5577 = vmatprep.subr.msk.mxu1 %vm1970_vm6, %v733_v20 }
 0xed9   :  { %v3463_v34 = vpop.trf.xlu1 }
 0xeda   :  { %5574 = vmatmul.mubr.msk.bf16.vlgmr.msra.gmra.mrb[48].mxu1 %vm890_vm1, %v3463_v34 }
 0xedb   :  { %5578 = vmatpush3.msk.msra.mxu1 %vm1970_vm6, %v733_v20 }
 0xfad   :  { %v3508_v36 = vpop.f32.mrb[48].mxu1 }
 0xfae   :  { %3517 = vrot.lane.b32.xlu0 %v3508_v36, %s7347_s20  ;;  %v5575_v14 = vpop.f32.mrb[49].mxu1  ;;  %v3525_v35 = vadd.f32 %v6177_v28, %v3508_v36 }
 0xfaf   :  { %v3511_v3 = vpop.f32.mrb[50].mxu1 }
 0xfb0   :  { %v5576_v2 = vpop.f32.mrb[51].mxu1  ;;  %v3527_v53 = vsel %vm890_vm1, %v3525_v35, 0.0  ;;  %v3526_v19 = vadd.f32 %v6178_v18, %v3511_v3 }
 0xfb2   :  { %3521 = vrot.lane.b32.xlu0 %v3508_v36, %s7348_s8  ;;  %v3530_v13 = vsel %vm890_vm1, %v3526_v19, 0.0 }
 0xfb6   :  { %3519 = vrot.lane.b32.xlu0 %v3511_v3, %s7347_s20 }
 0xfba   :  { %3523 = vrot.lane.b32.xlu0 %v3511_v3, %s7348_s8 }
 0xfbe   :  { %3570 = vrot.lane.b32.xlu0 %v3508_v36, %s7337_s7 }
 0xfc2   :  { %3572 = vrot.lane.b32.xlu0 %v3511_v3, %s7337_s7 }
0x1020   :  { %v3518_v4 = vpop.permute.xlu0 %3517 }
0x1021   :  { %3574 = vrot.lane.b32.xlu0 %v3518_v4, %s7337_s7 }
0x1024   :  { %v3522_v15 = vpop.permute.xlu0 %3521 }
0x1028   :  { %v3520_v11 = vpop.permute.xlu0 %3519 }
0x1029   :  { %3576 = vrot.lane.b32.xlu0 %v3520_v11, %s7337_s7 }
0x102c   :  { %v3524_v25 = vpop.permute.xlu0 %3523 }
0x102d   :  { %3578 = vrot.lane.b32.xlu0 %v3522_v15, %s7337_s7  ;;  %3580 = vrot.lane.b32.xlu1 %v3524_v25, %s7337_s7 }
0x1030   :  { %v3571_v50 = vpop.permute.xlu0 %3570 }
0x1031   :  { %v8423_v52 = vadd.f32 %v6172_v48, %v3571_v50  ;;  %v736_v48 = vld [vmem:[#allocation17 + $0x8] sm:$0xff] }
0x1033   :  { %v3594_v59 = vmul.f32 %v8423_v52, %v8423_v52 }
0x1034   :  { %v3573_v27 = vpop.permute.xlu0 %3572 }
0x1035   :  { %v3589_v55 = vadd.f32 %v6173_v54, %v3573_v27  ;;  %v3600_v17 = vsel %vm1083_vm7, %v3594_v59, 0.0  ;;  %v739_v54 = vld [vmem:[#allocation19] sm:$0xff] }
0x1036   :  { %v743_v59 = vld [vmem:[#allocation19 + $0x20] sm:$0xff] }
0x1037   :  { %v3595_v61 = vmul.f32 %v3589_v55, %v3589_v55 }
0x1039   :  { %v3605_v16 = vsel %vm1083_vm7, %v3595_v61, 0.0  ;;  %v744_v61 = vld [vmem:[#allocation19 + $0x28] sm:$0xff] }
0x1093   :  { %v3575_v31 = vpop.permute.xlu0 %3574 }
0x1094   :  { %v8421_v46 = vadd.f32 %v6171_v45, %v3575_v31  ;;  %v734_v45 = vld [vmem:[#allocation16] sm:$0xff] }
0x1095   :  { %5588 = vmatprep.subr.mxu1 %v734_v45 }
0x1096   :  { %v3596_v56 = vmul.f32 %v8421_v46, %v8421_v46 }
0x1098   :  { %v3601_v0 = vsel %vm1083_vm7, %v3596_v56, 0.0  ;;  %v741_v56 = vld [vmem:[#allocation19 + $0x10] sm:$0xff] }
0x1099   :  { %v3602_v43 = vadd.f32 %v3601_v0, %v3600_v17 }
0x109b   :  { %v3577_v40 = vpop.permute.xlu0 %3576 }
0x109c   :  { %v8427_v58 = vadd.f32 %v6174_v57, %v3577_v40  ;;  %v742_v57 = vld [vmem:[#allocation19 + $0x18] sm:$0xff] }
0x109e   :  { %v3597_v42 = vmul.f32 %v8427_v58, %v8427_v58 }
0x109f   :  { %v3581_v63 = vpop.permute.xlu1 %3580  ;;  %v3579_v39 = vpop.permute.xlu0 %3578 }
0x10a0   :  { %v3606_v6 = vsel %vm1083_vm7, %v3597_v42, 0.0  ;;  %v3593_v12 = vadd.f32 %v6175_v41, %v3581_v63  ;;  %v3592_v5 = vadd.f32 %v6176_v7, %v3579_v39  ;;  %v5817_v42 = vpack.c.bf16 %v744_v61, %v743_v59  ;;  %v745_v63 = vld [vmem:[#allocation19 + $0x30] sm:$0xff]  ;;  %v746_v39 = vld [vmem:[#allocation19 + $0x38] sm:$0xff]  ;;  %v748_v41 = vld [vmem:[#allocation19 + $0x48] sm:$0xff] }
0x10a1   :  { %v3607_v37 = vadd.f32 %v3606_v6, %v3605_v16  ;;  %v5821_v0 = vpack.c.bf16 %v746_v39, %v745_v63  ;;  %v747_v6 = vld [vmem:[#allocation19 + $0x40] sm:$0xff]  ;;  %v749_v7 = vld [vmem:[#allocation19 + $0x50] sm:$0xff]  ;;  %v738_v59 = vld [vmem:[#allocation17 + $0x18] sm:$0xff] }
0x10a2   :  { %v3599_v38 = vmul.f32 %v3593_v12, %v3593_v12  ;;  %v3598_v1 = vmul.f32 %v3592_v5, %v3592_v5  ;;  %v751_v16 = vld [vmem:[#allocation19 + $0x60] sm:$0xff]  ;;  %v5026_v63 = vld [vmem:[#allocation64] ss:$0 sm:$0xff] }
0x10a4   :  { %v3608_v44 = vsel %vm1083_vm7, %v3599_v38, 0.0  ;;  %v3603_v47 = vsel %vm1083_vm7, %v3598_v1, 0.0  ;;  %v752_v38 = vld [vmem:[#allocation19 + $0x68] sm:$0xff] }
0x10a5   :  { %v3609_v49 = vadd.f32 %v3608_v44, %v3607_v37  ;;  %v3604_v60 = vadd.f32 %v3603_v47, %v3602_v43  ;;  %v5833_v1 = vpack.c.bf16 %v752_v38, %v751_v16  ;;  %v760_v16 = vld [vmem:[#allocation28] sm:$0xff] }
0x10a7   :  { %v3611_v62 = vmax.f32 %v3609_v49, 1e-08  ;;  %v3610_v9 = vmax.f32 %v3604_v60, 1e-08 }
0x10a9   :  { %v3615_v8 = vsel %vm1083_vm7, %v3611_v62, 0.0  ;;  %v3612_v10 = vsel %vm1083_vm7, %v3610_v9, 0.0 }
0x10aa   :  { %3616 = vadd.xlane.f32.xlu1 %v3615_v8  ;;  %3613 = vadd.xlane.f32.xlu0 %v3612_v10 }
0x10ae   :  { %3528 = vadd.xlane.f32.xlu0 %v3527_v53 }
0x10b2   :  { %3531 = vadd.xlane.f32.xlu0 %v3530_v13 }
0x1137   :  { %v3617_v21 = vpop.xlane.xlu1 %3616  ;;  %v3614_v51 = vpop.xlane.xlu0 %3613 }
0x1138   :  { %v3620_v22 = vmul.f32 0.25, %v3617_v21  ;;  %v3619_v23 = vmul.f32 0.25, %v3614_v51 }
0x113a   :  { %6129 = vrsqrt.f32 %v3620_v22 }
0x113b   :  { %6131 = vrsqrt.f32 %v3619_v23  ;;  %v3529_v24 = vpop.xlane.xlu0 %3528 }
0x113c   :  { %v3534_v26 = vmul.f32 0.03125, %v3529_v24 }
0x113e   :  { %v8445_v29 = vsub.f32 %v3525_v35, %v3534_v26 }
0x113f   :  { %v3532_v30 = vpop.xlane.xlu0 %3531 }
0x1140   :  { %v3535_v32 = vmul.f32 0.03125, %v3532_v30  ;;  %v3538_v33 = vmul.f32 %v8445_v29, %v8445_v29 }
0x1142   :  { %v8449_v34 = vsub.f32 %v3526_v19, %v3535_v32  ;;  %v3540_v36 = vsel %vm890_vm1, %v3538_v33, 0.0 }
0x1143   :  { %3541 = vadd.xlane.f32.xlu0 %v3540_v36 }
0x1144   :  { %v6130_v14 = vpop.eup %6129  ;;  %v3539_v3 = vmul.f32 %v8449_v34, %v8449_v34 }
0x1145   :  { %v6132_v2 = vpop.eup %6131  ;;  %v8454_v4 = vmul.f32 %v6130_v14, %v3589_v55  ;;  %v8470_v50 = vmul.f32 %v6130_v14, %v8427_v58  ;;  %v8478_v31 = vmul.f32 %v6130_v14, %v3593_v12  ;;  %v740_v55 = vld [vmem:[#allocation19 + $0x8] sm:$0xff]  ;;  %v5813_v58 = vpack.c.bf16 %v742_v57, %v741_v56 }
0x1146   :  { %v8457_v15 = vmul.f32 %v6132_v2, %v8423_v52  ;;  %v3543_v11 = vsel %vm890_vm1, %v3539_v3, 0.0  ;;  %v8463_v25 = vmul.f32 %v6132_v2, %v8421_v46  ;;  %v8472_v27 = vmul.f32 %v6132_v2, %v3592_v5  ;;  %v735_v46 = vld [vmem:[#allocation17] sm:$0xff]  ;;  %v750_v5 = vld [vmem:[#allocation19 + $0x58] sm:$0xff] }
0x1147   :  { %3544 = vadd.xlane.f32.xlu1 %v3543_v11  ;;  %v8482_v52 = vpack.c.bf16 %v736_v48, %v735_v46  ;;  %v5809_v40 = vpack.c.bf16 %v740_v55, %v739_v54  ;;  %v5825_v12 = vpack.c.bf16 %v748_v41, %v747_v6  ;;  %v5829_v17 = vpack.c.bf16 %v750_v5, %v749_v7  ;;  %v5025_v46 = vld [vmem:[#allocation65] ss:$0 sm:$0xff] }
0x1148   :  { %5579 = vmatprep.mubr.msk.f32.mxu1 %vm1083_vm7, %v8457_v15 }
0x1149   :  { %5580 = vmatmul.mubr.msk.f32.vlgmr.msra.gmra.mrb[52].mxu1 %vm1083_vm7, %v8454_v4  ;;  %5810 = vmatprep.subr.bf16.mxu0 %v5809_v40 }
0x114a   :  { %5582 = vmatprep.mubr.msk.f32.mxu1 %vm1083_vm7, %v8463_v25  ;;  %5589 = vmatpush3.msra.mxu1 %v734_v45 }
0x114b   :  { %5802 = vmatprep.subr.bf16.mxu1 %v8482_v52  ;;  %5812 = vmatpush3.bf16.msra.mxu0 %v5809_v40 }
0x114c   :  { %5814 = vmatprep.subr.bf16.mxu0 %v5813_v58 }
0x114d   :  { %5583 = vmatmul.mubr.msk.f32.gmra.mrb[54].mxu1 %vm1083_vm7, %v8470_v50 }
0x114e   :  { %5585 = vmatprep.mubr.msk.f32.mxu1 %vm1083_vm7, %v8472_v27 }
0x114f   :  { %5816 = vmatpush3.bf16.msra.mxu0 %v5813_v58  ;;  %v737_v58 = vld [vmem:[#allocation17 + $0x10] sm:$0xff] }
0x1150   :  { %5818 = vmatprep.subr.bf16.mxu0 %v5817_v42  ;;  %v5805_v41 = vpack.c.bf16 %v738_v59, %v737_v58 }
0x1151   :  { %5586 = vmatmul.mubr.msk.f32.gmra.mrb[56].mxu1 %vm1083_vm7, %v8478_v31 }
0x1153   :  { %5820 = vmatpush3.bf16.msra.mxu0 %v5817_v42 }
0x1154   :  { %5822 = vmatprep.subr.bf16.mxu0 %v5821_v0 }
0x1157   :  { %5824 = vmatpush3.bf16.msra.mxu0 %v5821_v0 }
0x1158   :  { %5826 = vmatprep.subr.bf16.mxu0 %v5825_v12 }
0x115b   :  { %5828 = vmatpush3.bf16.msra.mxu0 %v5825_v12 }
0x115c   :  { %5830 = vmatprep.subr.bf16.mxu0 %v5829_v17 }
0x115f   :  { %5832 = vmatpush3.bf16.msra.mxu0 %v5829_v17  ;;  %v755_v17 = vld [vmem:[#allocation20] sm:$0xff] }
0x1160   :  { %5834 = vmatprep.subr.bf16.mxu0 %v5833_v1 }
0x1163   :  { %5836 = vmatpush3.bf16.msra.mxu0 %v5833_v1 }
0x11d0   :  { %v3542_v37 = vpop.xlane.xlu0 %3541 }
0x11d1   :  { %v3546_v47 = vmul.f32 0.03125, %v3542_v37  ;;  %v762_v37 = vld [vmem:[#allocation28 + $0x10] sm:$0xff] }
0x11d3   :  { %v3548_v28 = vadd.f32 1e-05, %v3546_v47  ;;  %v763_v47 = vld [vmem:[#allocation28 + $0x18] sm:$0xff] }
0x11d4   :  { %v3545_v35 = vpop.xlane.xlu1 %3544 }
0x11d5   :  { %v3547_v24 = vmul.f32 0.03125, %v3545_v35  ;;  %6133 = vrsqrt.f32 %v3548_v28  ;;  %v767_v28 = vld [vmem:[#allocation28 + $0x38] sm:$0xff]  ;;  %v768_v35 = vld [vmem:[#allocation28 + $0x40] sm:$0xff] }
0x11d7   :  { %v3549_v14 = vadd.f32 1e-05, %v3547_v24  ;;  %v775_v24 = vld [vmem:[#allocation28 + $0x78] sm:$0xff] }
0x11df   :  { %v6134_v11 = vpop.eup %6133 }
0x11e0   :  { %v3552_v45 = vmul.f32 %v6134_v11, %v8445_v29 }
0x11e2   :  { %v3560_v57 = vmul.f32 %v5025_v46, %v3552_v45 }
0x11e4   :  { %v8518_v7 = vadd.f32 %v5026_v63, %v3560_v57 }
0x121c   :  { %v8485_v43 = vpop.f32.mrb[52].mxu1 }
0x121d   :  { %v8487_v44 = vpop.f32.mrb[53].mxu1  ;;  %v3746_v49 = vmul.f32 %v8485_v43, %v8485_v43 }
0x121e   :  { %v3745_v60 = vmul.f32 %v8487_v44, %v8487_v44 }
0x121f   :  { %v3757_v53 = vsel %vm3751_vm2, %v3746_v49, 0.0  ;;  %v764_v49 = vld [vmem:[#allocation28 + $0x20] sm:$0xff] }
0x1220   :  { %v8493_v62 = vpop.f32.mrb[54].mxu1  ;;  %v3752_v19 = vsel %vm3751_vm2, %v3745_v60, 0.0  ;;  %v765_v60 = vld [vmem:[#allocation28 + $0x28] sm:$0xff] }
0x1221   :  { %v3748_v9 = vmul.f32 %v8493_v62, %v8493_v62  ;;  %v8497_v8 = vpop.f32.mrb[55].mxu1 }
0x1222   :  { %v3747_v10 = vmul.f32 %v8497_v8, %v8497_v8 }
0x1223   :  { %v3758_v18 = vsel %vm3751_vm2, %v3748_v9, 0.0  ;;  %v5849_v9 = vpack.c.bf16 %v765_v60, %v764_v49  ;;  %v759_v49 = vld [vmem:[#allocation26] sm:$0xff]  ;;  %v776_v60 = vld [vmem:[#allocation29] sm:$0xff] }
0x1224   :  { %v3759_v13 = vadd.f32 %v3758_v18, %v3757_v53  ;;  %v3753_v20 = vsel %vm3751_vm2, %v3747_v10, 0.0  ;;  %v8505_v21 = vpop.f32.mrb[56].mxu1  ;;  %v766_v10 = vld [vmem:[#allocation28 + $0x30] sm:$0xff]  ;;  %v769_v53 = vld [vmem:[#allocation28 + $0x48] sm:$0xff]  ;;  %v771_v18 = vld [vmem:[#allocation28 + $0x58] sm:$0xff] }
0x1225   :  { %v3754_v51 = vadd.f32 %v3753_v20, %v3752_v19  ;;  %v3750_v22 = vmul.f32 %v8505_v21, %v8505_v21  ;;  %v8509_v23 = vpop.f32.mrb[57].mxu1 }
0x1226   :  { %v3749_v26 = vmul.f32 %v8509_v23, %v8509_v23 }
0x1227   :  { %v3760_v30 = vsel %vm3751_vm2, %v3750_v22, 0.0  ;;  %v754_v22 = vld [vmem:[#allocation19 + $0x78] sm:$0xff] }
0x1228   :  { %v3761_v32 = vadd.f32 %v3760_v30, %v3759_v13  ;;  %v3755_v33 = vsel %vm3751_vm2, %v3749_v26, 0.0  ;;  %v773_v13 = vld [vmem:[#allocation28 + $0x68] sm:$0xff]  ;;  %v5038_v30 = vld [vmem:[#allocation13] ss:$0 sm:$0xff] }
0x1229   :  { %v3756_v36 = vadd.f32 %v3755_v33, %v3754_v51  ;;  %v753_v51 = vld [vmem:[#allocation19 + $0x70] sm:$0xff] }
0x122a   :  { %v3763_v3 = vmax.f32 %v3761_v32, 1e-08 }
0x122b   :  { %v3762_v2 = vmax.f32 %v3756_v36, 1e-08 }
0x122c   :  { %6135 = vrsqrt.f32 %v3763_v3  ;;  %vm3773_vm3 = vcmp.eq.f32.partialorder %v3763_v3, inf  ;;  %v3776_v0 = vand.u32 2147483648, %v3763_v3  ;;  %vm3775_vm0 = vcmp.eq.f32.partialorder %v3763_v3, 0.0 }
0x122d   :  { %6137 = vrsqrt.f32 %v3762_v2  ;;  %vm3766_vm6 = vcmp.eq.f32.partialorder %v3762_v2, inf  ;;  %v3769_v61 = vand.u32 2147483648, %v3762_v2  ;;  %vm3768_vm15 = vcmp.eq.f32.partialorder %v3762_v2, 0.0 }
0x122e   :  { %6139 = vrsqrt.f32 %v3549_v14 }
0x1236   :  { %v6136_v48 = vpop.eup %6135 }
0x1237   :  { %v6138_v54 = vpop.eup %6137  ;;  %v3772_v55 = vmul.f32 %v6136_v48, %v3763_v3 }
0x1238   :  { %v6140_v40 = vpop.eup %6139  ;;  %v3765_v56 = vmul.f32 %v6138_v54, %v3762_v2 }
0x1239   :  { %v3774_v42 = vsel %vm3773_vm3, %v3763_v3, %v3772_v55  ;;  %v3553_v6 = vmul.f32 %v6140_v40, %v8449_v34  ;;  %v761_v34 = vld [vmem:[#allocation28 + $0x8] sm:$0xff]  ;;  %v758_v40 = vld [vmem:[#allocation25] sm:$0xff] }
0x123a   :  { %v3767_v39 = vsel %vm3766_vm6, %v3762_v2, %v3765_v56  ;;  %v3777_v12 = vsel %vm3775_vm0, %v3776_v0, %v3774_v42  ;;  %v5841_v1 = vpack.c.bf16 %v761_v34, %v760_v16  ;;  %v5039_v56 = vld [vmem:[#allocation11] ss:$0 sm:$0xff] }
0x123b   :  { %v3770_v29 = vsel %vm3768_vm15, %v3769_v61, %v3767_v39  ;;  %v3561_v5 = vmul.f32 %v5025_v46, %v3553_v6 }
0x123c   :  { %5590 = vmatprep.mubr.msk.f32.mxu1 %vm3751_vm2, %v3770_v29 }
0x123d   :  { %5591 = vmatmul.mubr.msk.f32.vlgmr.msra.gmra.mrb[58].mxu1 %vm3751_vm2, %v3777_v12  ;;  %v8524_v38 = vadd.f32 %v5026_v63, %v3561_v5 }
0x123e   :  { %5804 = vmatpush3.bf16.msra.mxu1 %v8482_v52  ;;  %5601 = vmatprep.mubr.msk.f32.mxu1 %vm890_vm1, %v8518_v7  ;;  %v5845_v52 = vpack.c.bf16 %v763_v47, %v762_v37 }
0x123f   :  { %5806 = vmatprep.subr.bf16.mxu1 %v5805_v41 }
0x1242   :  { %5808 = vmatpush3.bf16.msra.mxu1 %v5805_v41 }
0x1243   :  { %5639 = vmatprep.subr.mxu1 %v755_v17 }
0x1245   :  { %5602 = vmatmul.mubr.msk.f32.vlgmr.msra.gmra.mrb[58].mxu1 %vm890_vm1, %v8524_v38 }
0x1246   :  { %5641 = vmatprep.mubr.msk.f32.mxu1 %vm3751_vm2, %v8487_v44  ;;  %5640 = vmatpush3.msra.mxu1 %v755_v17  ;;  %v5853_v44 = vpack.c.bf16 %v767_v28, %v766_v10 }
0x1247   :  { %5842 = vmatprep.subr.bf16.mxu1 %v5841_v1 }
0x1249   :  { %5642 = vmatmul.mubr.msk.f32.vlgmr.msra.gmra.mrb[60].mxu1 %vm3751_vm2, %v8485_v43  ;;  %v5857_v43 = vpack.c.bf16 %v769_v53, %v768_v35 }
0x124a   :  { %5644 = vmatprep.mubr.msk.f32.mxu1 %vm3751_vm2, %v8497_v8  ;;  %5844 = vmatpush3.bf16.msra.mxu1 %v5841_v1  ;;  %v770_v8 = vld [vmem:[#allocation28 + $0x50] sm:$0xff] }
0x124b   :  { %5846 = vmatprep.subr.bf16.mxu1 %v5845_v52  ;;  %v5861_v19 = vpack.c.bf16 %v771_v18, %v770_v8 }
0x124d   :  { %5645 = vmatmul.mubr.msk.f32.gmra.mrb[62].mxu1 %vm3751_vm2, %v8493_v62  ;;  %v772_v62 = vld [vmem:[#allocation28 + $0x60] sm:$0xff] }
0x124e   :  { %5647 = vmatprep.mubr.msk.f32.mxu1 %vm3751_vm2, %v8509_v23  ;;  %5848 = vmatpush3.bf16.msra.mxu1 %v5845_v52  ;;  %v5865_v20 = vpack.c.bf16 %v773_v13, %v772_v62  ;;  %v774_v23 = vld [vmem:[#allocation28 + $0x70] sm:$0xff] }
0x124f   :  { %5850 = vmatprep.subr.bf16.mxu1 %v5849_v9  ;;  %v5869_v26 = vpack.c.bf16 %v775_v24, %v774_v23 }
0x1251   :  { %5648 = vmatmul.mubr.msk.f32.gmra.mrb[64].mxu1 %vm3751_vm2, %v8505_v21  ;;  %v5837_v21 = vpack.c.bf16 %v754_v22, %v753_v51 }
0x1252   :  { %5852 = vmatpush3.bf16.msra.mxu1 %v5849_v9  ;;  %v777_v9 = vld [vmem:[#allocation29 + $0x8] sm:$0xff] }
0x1253   :  { %5854 = vmatprep.subr.bf16.mxu1 %v5853_v44  ;;  %5838 = vmatprep.subr.bf16.mxu0 %v5837_v21  ;;  %v5873_v10 = vpack.c.bf16 %v777_v9, %v776_v60 }
0x1254   :  { %5840 = vmatpush3.bf16.msra.mxu0 %v5837_v21 }
0x1255   :  { %5650 = vmatprep.subr.mxu0 %v758_v40 }
0x1256   :  { %5856 = vmatpush3.bf16.msra.mxu1 %v5853_v44 }
0x1257   :  { %5858 = vmatprep.subr.bf16.mxu1 %v5857_v43 }
0x125a   :  { %5860 = vmatpush3.bf16.msra.mxu1 %v5857_v43 }
0x125b   :  { %5862 = vmatprep.subr.bf16.mxu1 %v5861_v19 }
0x125e   :  { %5864 = vmatpush3.bf16.msra.mxu1 %v5861_v19 }
0x125f   :  { %5866 = vmatprep.subr.bf16.mxu1 %v5865_v20 }
0x1262   :  { %5868 = vmatpush3.bf16.msra.mxu1 %v5865_v20 }
0x1263   :  { %5870 = vmatprep.subr.bf16.mxu1 %v5869_v26 }
0x1266   :  { %5872 = vmatpush3.bf16.msra.mxu1 %v5869_v26 }
0x1318   :  { %v5603_v32 = vpop.f32.mrb[58].mxu1 }
0x1319   :  { %v3947_v33 = vadd.f32 %v5603_v32, %v5038_v30  ;;  %v3931_v36 = vpop.f32.mrb[59].mxu1 }
0x131a   :  { %v3946_v14 = vadd.f32 %v5038_v30, %v3931_v36 }
0x131b   :  { %v3949_v11 = vmax.f32 %v3947_v33, 0.0 }
0x131c   :  { %v3948_v3 = vmax.f32 %v3946_v14, 0.0  ;;  %v5643_v2 = vpop.f32.mrb[60].mxu1 }
0x131d   :  { %v4127_v45 = vpop.f32.mrb[61].mxu1 }
0x131e   :  { %5636 = vmatprep.mubr.f32.mxu0 %v3948_v3  ;;  %5698 = vmatprep.mubr.f32.mxu1 %v3948_v3 }
0x131f   :  { %5637 = vmatmul.mubr.f32.vlgmr.msra.gmra.mrb[56].mxu0 %v3949_v11  ;;  %5699 = vmatmul.mubr.f32.vlgmr.msra.gmra.mrb[66].mxu1 %v3949_v11 }
0x1320   :  { %v5646_v46 = vpop.f32.mrb[62].mxu1  ;;  %5651 = vmatpush3.msra.mxu0 %v758_v40 }
0x1321   :  { %v4137_v48 = vpop.f32.mrb[63].mxu1  ;;  %5661 = vmatprep.subr.mxu0 %v759_v49 }
0x1324   :  { %v5649_v54 = vpop.f32.mrb[64].mxu1 }
0x1325   :  { %v4147_v55 = vpop.f32.mrb[65].mxu1 }
0x13f2   :  { %v5638_v57 = vpop.f32.mrb[56].mxu0  ;;  %v8540_v58 = vpop.f32.mrb[66].mxu1 }
0x13f3   :  { %v4028_v59 = vadd.f32 %v5638_v57, %v5039_v56  ;;  %v4022_v61 = vpop.f32.mrb[57].mxu0  ;;  %v8542_v42 = vpop.f32.mrb[67].mxu1 }
0x13f4   :  { %v4023_v63 = vadd.f32 %v5039_v56, %v4022_v61  ;;  %v778_v61 = vld [vmem:[#allocation29 + $0x10] sm:$0xff] }
0x13f5   :  { %v5041_v39 = vmul.f32 -1.442695, %v4028_v59 }
0x13f6   :  { %v5040_v0 = vmul.f32 -1.442695, %v4023_v63  ;;  %v779_v63 = vld [vmem:[#allocation29 + $0x18] sm:$0xff] }
0x13f7   :  { %6141 = vpow2.f32 %v5041_v39  ;;  %v5877_v39 = vpack.c.bf16 %v779_v63, %v778_v61 }
0x13f8   :  { %6143 = vpow2.f32 %v5040_v0  ;;  %v780_v0 = vld [vmem:[#allocation31] sm:$0xff] }
0x1401   :  { %v6142_v6 = vpop.eup %6141 }
0x1402   :  { %v6144_v29 = vpop.eup %6143  ;;  %v4038_v41 = vadd.f32 1.0, %v6142_v6  ;;  %v5056_v6 = vld [vmem:[#allocation23] ss:$0 sm:$0xff] }
0x1403   :  { %v4037_v12 = vadd.f32 1.0, %v6144_v29 }
0x1404   :  { %6145 = vrcp.f32 %v4038_v41 }
0x1405   :  { %6147 = vrcp.f32 %v4037_v12 }
0x140e   :  { %v6146_v5 = vpop.eup %6145 }
0x140f   :  { %v6148_v17 = vpop.eup %6147  ;;  %v4157_v16 = vmul.f32 %v6146_v5, %v5643_v2  ;;  %v4159_v34 = vmul.f32 %v6146_v5, %v5646_v46  ;;  %v4161_v1 = vmul.f32 %v6146_v5, %v5649_v54 }
0x1410   :  { %v4156_v37 = vmul.f32 %v6148_v17, %v4127_v45  ;;  %v4158_v47 = vmul.f32 %v6148_v17, %v4137_v48  ;;  %v4160_v52 = vmul.f32 %v6148_v17, %v4147_v55 }
0x1412   :  { %5652 = vmatprep.mubr.msk.f32.mxu0 %vm3751_vm2, %v4156_v37 }
0x1413   :  { %5653 = vmatmul.mubr.msk.f32.vlgmr.msra.gmra.mrb[58].mxu0 %vm3751_vm2, %v4157_v16 }
0x1414   :  { %5655 = vmatprep.mubr.msk.f32.mxu0 %vm3751_vm2, %v4158_v47  ;;  %5662 = vmatpush3.msra.mxu0 %v759_v49 }
0x1415   :  { %5874 = vmatprep.subr.bf16.mxu0 %v5873_v10 }
0x1417   :  { %5656 = vmatmul.mubr.msk.f32.gmra.mrb[60].mxu0 %vm3751_vm2, %v4159_v34 }
0x1418   :  { %5658 = vmatprep.mubr.msk.f32.mxu0 %vm3751_vm2, %v4160_v52 }
0x141b   :  { %5659 = vmatmul.mubr.msk.f32.gmra.mrb[62].mxu0 %vm3751_vm2, %v4161_v1 }
0x14e6   :  { %v8550_v28 = vpop.f32.mrb[58].mxu0 }
0x14e7   :  { %v4246_v44 = vpop.f32.mrb[59].mxu0  ;;  %v4276_v35 = vmul.f32 %v8550_v28, %v8550_v28 }
0x14e8   :  { %v4275_v53 = vmul.f32 %v4246_v44, %v4246_v44 }
0x14e9   :  { %v4286_v62 = vsel %vm3751_vm2, %v4276_v35, 0.0 }
0x14ea   :  { %v8554_v43 = vpop.f32.mrb[60].mxu0  ;;  %v4281_v20 = vsel %vm3751_vm2, %v4275_v53, 0.0 }
0x14eb   :  { %v4278_v8 = vmul.f32 %v8554_v43, %v8554_v43  ;;  %v4256_v18 = vpop.f32.mrb[61].mxu0 }
0x14ec   :  { %v4277_v19 = vmul.f32 %v4256_v18, %v4256_v18 }
0x14ed   :  { %v4287_v13 = vsel %vm3751_vm2, %v4278_v8, 0.0 }
0x14ee   :  { %v4288_v51 = vadd.f32 %v4287_v13, %v4286_v62  ;;  %v4282_v22 = vsel %vm3751_vm2, %v4277_v19, 0.0  ;;  %v5660_v23 = vpop.f32.mrb[62].mxu0 }
0x14ef   :  { %v4283_v21 = vadd.f32 %v4282_v22, %v4281_v20  ;;  %v4280_v24 = vmul.f32 %v5660_v23, %v5660_v23  ;;  %v4266_v26 = vpop.f32.mrb[63].mxu0 }
0x14f0   :  { %v4279_v30 = vmul.f32 %v4266_v26, %v4266_v26 }
0x14f1   :  { %v4289_v32 = vsel %vm3751_vm2, %v4280_v24, 0.0 }
0x14f2   :  { %v4290_v33 = vadd.f32 %v4289_v32, %v4288_v51  ;;  %v4284_v36 = vsel %vm3751_vm2, %v4279_v30, 0.0 }
0x14f3   :  { %v4285_v14 = vadd.f32 %v4284_v36, %v4283_v21 }
0x14f4   :  { %v4292_v3 = vmax.f32 %v4290_v33, 1e-08 }
0x14f5   :  { %v4291_v2 = vmax.f32 %v4285_v14, 1e-08 }
0x14f6   :  { %6149 = vrsqrt.f32 %v4292_v3  ;;  %vm4302_vm4 = vcmp.eq.f32.partialorder %v4292_v3, inf  ;;  %v4305_v56 = vand.u32 2147483648, %v4292_v3  ;;  %vm4304_vm8 = vcmp.eq.f32.partialorder %v4292_v3, 0.0 }
0x14f7   :  { %6151 = vrsqrt.f32 %v4291_v2  ;;  %vm4295_vm5 = vcmp.eq.f32.partialorder %v4291_v2, inf  ;;  %v4298_v54 = vand.u32 2147483648, %v4291_v2  ;;  %vm4297_vm9 = vcmp.eq.f32.partialorder %v4291_v2, 0.0 }
0x1500   :  { %v6150_v11 = vpop.eup %6149 }
0x1501   :  { %v6152_v45 = vpop.eup %6151  ;;  %v4301_v46 = vmul.f32 %v6150_v11, %v4292_v3 }
0x1502   :  { %v4294_v48 = vmul.f32 %v6152_v45, %v4291_v2 }
0x1503   :  { %v4303_v55 = vsel %vm4302_vm4, %v4292_v3, %v4301_v46 }
0x1504   :  { %v4296_v40 = vsel %vm4295_vm5, %v4291_v2, %v4294_v48  ;;  %v4306_v59 = vsel %vm4304_vm8, %v4305_v56, %v4303_v55 }
0x1505   :  { %v4299_v57 = vsel %vm4297_vm9, %v4298_v54, %v4296_v40 }
0x1506   :  { %5663 = vmatprep.mubr.msk.f32.mxu0 %vm3751_vm2, %v4299_v57 }
0x1507   :  { %5664 = vmatmul.mubr.msk.f32.vlgmr.msra.gmra.mrb[64].mxu0 %vm3751_vm2, %v4306_v59 }
0x1508   :  { %5876 = vmatpush3.bf16.msra.mxu0 %v5873_v10 }
0x1509   :  { %5878 = vmatprep.subr.bf16.mxu0 %v5877_v39 }
0x150c   :  { %5880 = vmatpush3.bf16.msra.mxu0 %v5877_v39 }
0x150d   :  { %5712 = vmatprep.subr.mxu0 %v780_v0 }
0x15da   :  { %v5665_v29 = vpop.f32.mrb[64].mxu0 }
0x15db   :  { %v4460_v41 = vadd.f32 %v8540_v58, %v5665_v29  ;;  %v4379_v12 = vpop.f32.mrb[65].mxu0 }
0x15dc   :  { %v4455_v5 = vadd.f32 %v8542_v42, %v4379_v12 }
0x15dd   :  { %v4470_v17 = vadd.f32 %v5056_v6, %v4460_v41 }
0x15de   :  { %v4469_v16 = vadd.f32 %v5056_v6, %v4455_v5 }
0x15df   :  { %v4690_v34 = vadd.f32 %v4470_v17, %v8524_v38 }
0x15e0   :  { %5709 = vmatprep.mubr.msk.f32.mxu0 %vm890_vm1, %v4469_v16  ;;  %v4689_v1 = vadd.f32 %v4469_v16, %v8518_v7 }
0x15e1   :  { %5710 = vmatmul.mubr.msk.f32.vlgmr.msra.gmra.mrb[66].mxu0 %vm890_vm1, %v4470_v17  ;;  %v4694_v37 = vsel %vm890_vm1, %v4690_v34, 0.0 }
0x15e2   :  { %4695 = vadd.xlane.f32.xlu1 %v4694_v37  ;;  %5714 = vmatprep.mubr.msk.f32.mxu0 %vm3751_vm2, %v4246_v44  ;;  %v4691_v58 = vsel %vm890_vm1, %v4689_v1, 0.0  ;;  %v5057_v44 = vld [vmem:[#allocation22] ss:$0 sm:$0xff] }
0x15e3   :  { %4692 = vadd.xlane.f32.xlu0 %v4691_v58  ;;  %5713 = vmatpush3.msra.mxu0 %v780_v0 }
0x15e5   :  { %5715 = vmatmul.mubr.msk.f32.vlgmr.msra.gmra.mrb[68].mxu0 %vm3751_vm2, %v8550_v28 }
0x15e6   :  { %5717 = vmatprep.mubr.msk.f32.mxu0 %vm3751_vm2, %v4256_v18 }
0x15e9   :  { %5718 = vmatmul.mubr.msk.f32.gmra.mrb[70].mxu0 %vm3751_vm2, %v8554_v43 }
0x15ea   :  { %5720 = vmatprep.mubr.msk.f32.mxu0 %vm3751_vm2, %v4266_v26 }
0x15ed   :  { %5721 = vmatmul.mubr.msk.f32.gmra.mrb[72].mxu0 %vm3751_vm2, %v5660_v23 }
0x166f   :  { %v4696_v7 = vpop.xlane.xlu1 %4695 }
0x1670   :  { %v4698_v38 = vmul.f32 0.03125, %v4696_v7  ;;  %v4693_v42 = vpop.xlane.xlu0 %4692 }
0x1671   :  { %v4697_v47 = vmul.f32 0.03125, %v4693_v42 }
0x1672   :  { %v8582_v52 = vsub.f32 %v4690_v34, %v4698_v38 }
0x1673   :  { %v8584_v49 = vsub.f32 %v4689_v1, %v4697_v47 }
0x1674   :  { %v4702_v60 = vmul.f32 %v8582_v52, %v8582_v52 }
0x1675   :  { %v4701_v9 = vmul.f32 %v8584_v49, %v8584_v49 }
0x1676   :  { %v4706_v10 = vsel %vm890_vm1, %v4702_v60, 0.0  ;;  %v5068_v60 = vld [vmem:[#allocation68] ss:$0 sm:$0xff] }
0x1677   :  { %4707 = vadd.xlane.f32.xlu1 %v4706_v10  ;;  %v4703_v28 = vsel %vm890_vm1, %v4701_v9, 0.0 }
0x1678   :  { %4704 = vadd.xlane.f32.xlu0 %v4703_v28  ;;  %v5069_v28 = vld [vmem:[#allocation67] ss:$0 sm:$0xff] }
0x16b4   :  { %v5711_v35 = vpop.f32.mrb[66].mxu0 }
0x16b5   :  { %v4555_v53 = vadd.f32 %v5711_v35, %v5057_v44  ;;  %v4549_v43 = vpop.f32.mrb[67].mxu0 }
0x16b6   :  { %v4550_v8 = vadd.f32 %v5057_v44, %v4549_v43 }
0x16b7   :  { %v5061_v18 = vmul.f32 -1.442695, %v4555_v53 }
0x16b8   :  { %v5060_v19 = vmul.f32 -1.442695, %v4550_v8  ;;  %v5716_v62 = vpop.f32.mrb[68].mxu0 }
0x16b9   :  { %6153 = vpow2.f32 %v5061_v18  ;;  %v4654_v13 = vpop.f32.mrb[69].mxu0 }
0x16ba   :  { %6155 = vpow2.f32 %v5060_v19 }
0x16bc   :  { %v5719_v20 = vpop.f32.mrb[70].mxu0 }
0x16bd   :  { %v4664_v51 = vpop.f32.mrb[71].mxu0 }
0x16c0   :  { %v5722_v22 = vpop.f32.mrb[72].mxu0 }
0x16c1   :  { %v4674_v23 = vpop.f32.mrb[73].mxu0 }
0x16c3   :  { %v6154_v21 = vpop.eup %6153 }
0x16c4   :  { %v6156_v24 = vpop.eup %6155  ;;  %v4565_v26 = vadd.f32 1.0, %v6154_v21 }
0x16c5   :  { %v4564_v30 = vadd.f32 1.0, %v6156_v24 }
0x16c6   :  { %6157 = vrcp.f32 %v4565_v26 }
0x16c7   :  { %6159 = vrcp.f32 %v4564_v30 }
0x16d0   :  { %v6158_v32 = vpop.eup %6157 }
0x16d1   :  { %v6160_v33 = vpop.eup %6159  ;;  %v4684_v36 = vmul.f32 %v6158_v32, %v5716_v62  ;;  %v4686_v14 = vmul.f32 %v6158_v32, %v5719_v20  ;;  %v4688_v3 = vmul.f32 %v6158_v32, %v5722_v22 }
0x16d2   :  { %v4683_v2 = vmul.f32 %v6160_v33, %v4654_v13  ;;  %v4685_v11 = vmul.f32 %v6160_v33, %v4664_v51  ;;  %v4687_v45 = vmul.f32 %v6160_v33, %v4674_v23 }
0x16d3   :  { %v8593_v46 = vadd.f32 %v4684_v36, %v8454_v4  ;;  %v8596_v48 = vadd.f32 %v4686_v14, %v8470_v50  ;;  %v8599_v54 = vadd.f32 %v4688_v3, %v8478_v31 }
0x16d4   :  { %v8602_v55 = vadd.f32 %v4683_v2, %v8457_v15  ;;  %v8605_v40 = vadd.f32 %v4685_v11, %v8463_v25  ;;  %v8608_v56 = vadd.f32 %v4687_v45, %v8472_v27 }
0x16d5   :  { %v4742_v57 = vmul.f32 %v8593_v46, %v8593_v46  ;;  %v4744_v4 = vmul.f32 %v8596_v48, %v8596_v48  ;;  %v4746_v50 = vmul.f32 %v8599_v54, %v8599_v54 }
0x16d6   :  { %v4741_v31 = vmul.f32 %v8602_v55, %v8602_v55  ;;  %v4743_v15 = vmul.f32 %v8605_v40, %v8605_v40  ;;  %v4745_v25 = vmul.f32 %v8608_v56, %v8608_v56 }
0x16d7   :  { %v4752_v27 = vsel %vm1083_vm7, %v4742_v57, 0.0  ;;  %v4753_v59 = vsel %vm1083_vm7, %v4744_v4, 0.0  ;;  %v4755_v0 = vsel %vm1083_vm7, %v4746_v50, 0.0 }
0x16d8   :  { %v4754_v61 = vadd.f32 %v4753_v59, %v4752_v27  ;;  %v4747_v63 = vsel %vm1083_vm7, %v4741_v31, 0.0  ;;  %v4748_v39 = vsel %vm1083_vm7, %v4743_v15, 0.0  ;;  %v4750_v41 = vsel %vm1083_vm7, %v4745_v25, 0.0 }
0x16d9   :  { %v4749_v6 = vadd.f32 %v4748_v39, %v4747_v63 }
0x16da   :  { %v4756_v29 = vadd.f32 %v4755_v0, %v4754_v61 }
0x16db   :  { %v4751_v12 = vadd.f32 %v4750_v41, %v4749_v6 }
0x16dc   :  { %v4758_v5 = vmax.f32 %v4756_v29, 1e-08 }
0x16dd   :  { %v4757_v17 = vmax.f32 %v4751_v12, 1e-08 }
0x16de   :  { %v4762_v16 = vsel %vm1083_vm7, %v4758_v5, 0.0 }
0x16df   :  { %4763 = vadd.xlane.f32.xlu1 %v4762_v16  ;;  %v4759_v34 = vsel %vm1083_vm7, %v4757_v17, 0.0 }
0x16e0   :  { %4760 = vadd.xlane.f32.xlu0 %v4759_v34 }
0x1704   :  { %v4708_v1 = vpop.xlane.xlu1 %4707 }
0x1705   :  { %v4710_v37 = vmul.f32 0.03125, %v4708_v1  ;;  %v4705_v58 = vpop.xlane.xlu0 %4704 }
0x1706   :  { %v4709_v7 = vmul.f32 0.03125, %v4705_v58 }
0x1707   :  { %v4712_v38 = vadd.f32 1e-05, %v4710_v37 }
0x1708   :  { %v4711_v42 = vadd.f32 1e-05, %v4709_v7 }
0x1709   :  { %6161 = vrsqrt.f32 %v4712_v38 }
0x170a   :  { %6163 = vrsqrt.f32 %v4711_v42 }
0x1713   :  { %v6162_v47 = vpop.eup %6161 }
0x1714   :  { %v6164_v9 = vpop.eup %6163  ;;  %v4716_v10 = vmul.f32 %v6162_v47, %v8582_v52 }
0x1715   :  { %v4715_v44 = vmul.f32 %v6164_v9, %v8584_v49 }
0x1716   :  { %v4724_v35 = vmul.f32 %v5068_v60, %v4716_v10 }
0x1717   :  { %v4723_v53 = vmul.f32 %v5068_v60, %v4715_v44 }
0x1718   :  { %v4732_v43 = vadd.f32 %v5069_v28, %v4724_v35 }
0x1719   :  { %v4731_v8 = vadd.f32 %v5069_v28, %v4723_v53 }
0x171a   :  { %4734 = vst.msk [vmem:[#allocation70 + $0x8] sm:$0xff] %vm890_vm1, %v4732_v43 }
0x171b   :  { %4733 = vst.msk [vmem:[#allocation70] sm:$0xff] %vm890_vm1, %v4731_v8 }
0x171c   :  { %7158 = shalt.err (!%p7155_p6)
}
0x171d   :  { %s7159_s23 = scalar_lea.hbm %s7579_s27, 256 }
0x171e   :  { %p7160_p7 = scmp.ne.s32.totalorder %s7579_s27, %s7159_s23  ;;  %p7163_p8 = scmp.lt.u32.totalorder %s7159_s23, %s7579_s27 }
0x1720   :  { %p7165_p9 = pnand %p7163_p8, %p7160_p7 }
0x1722   :  { %7168 = shalt.err (!%p7165_p9)
}
0x1723   :  { %4792 = dma.vmem_to_hbm [thread:$0]  %s4787_s6, 256, %s7579_s27, [#allocation4], %s7288_s18, %s7288_s18, %s7289_s22  }
0x1724   :  { %s7350_s29 = smov [#allocation71]  }
0x1725   :  { %s4798_s26 = sshll.u32 %s7350_s29, 4  ;;  %s4799_s26 = int_to_ptr.vmem [resolvable:$true] %s4798_s26 }
0x1726   :  { %s7169_s27 = scalar_lea.vmem %s4799_s26, 768  ;;  %p7174_p11 = scmp.lt.s32.totalorder %s4799_s26, %s4799_s26 }
0x1727   :  { %p7170_p10 = scmp.ne.s32.totalorder %s4799_s26, %s7169_s27  ;;  %p7175_p12 = scmp.lt.s32.totalorder %s7169_s27, %s7169_s27 }
0x1729   :  { %p7176_p13 = por %p7175_p12, %p7174_p11 }
0x172b   :  { %p7177_p0 = pnand %p7176_p13, %p7170_p10 }
0x176c   :  { %v4764_v52 = vpop.xlane.xlu1 %4763 }
0x176d   :  { %v4766_v49 = vmul.f32 0.25, %v4764_v52  ;;  %v4761_v18 = vpop.xlane.xlu0 %4760 }
0x176e   :  { %v4765_v19 = vmul.f32 0.25, %v4761_v18 }
0x176f   :  { %6165 = vrsqrt.f32 %v4766_v49 }
0x1770   :  { %6167 = vrsqrt.f32 %v4765_v19 }
0x1779   :  { %v6166_v62 = vpop.eup %6165 }
0x177a   :  { %v6168_v13 = vpop.eup %6167  ;;  %v4770_v20 = vmul.f32 %v6166_v62, %v8593_v46  ;;  %v4772_v51 = vmul.f32 %v6166_v62, %v8596_v48  ;;  %v4774_v22 = vmul.f32 %v6166_v62, %v8599_v54 }
0x177b   :  { %v4769_v23 = vmul.f32 %v6168_v13, %v8602_v55  ;;  %v4771_v21 = vmul.f32 %v6168_v13, %v8605_v40  ;;  %v4773_v24 = vmul.f32 %v6168_v13, %v8608_v56 }
0x177c   :  { %4776 = vst.msk [vmem:[#allocation71 + $0x8] sm:$0xff] %vm1083_vm7, %v4770_v20  ;;  %4778 = vst.msk [vmem:[#allocation71 + $0x18] sm:$0xff] %vm1083_vm7, %v4772_v51 }
0x177d   :  { %4780 = vst.msk [vmem:[#allocation71 + $0x28] sm:$0xff] %vm1083_vm7, %v4774_v22  ;;  %4775 = vst.msk [vmem:[#allocation71] sm:$0xff] %vm1083_vm7, %v4769_v23 }
0x177e   :  { %4777 = vst.msk [vmem:[#allocation71 + $0x10] sm:$0xff] %vm1083_vm7, %v4771_v21  ;;  %4779 = vst.msk [vmem:[#allocation71 + $0x20] sm:$0xff] %vm1083_vm7, %v4773_v24 }
0x177f   :  { %7180 = shalt.err (!%p7177_p0)
}
0x1780   :  { %s7181_s9 = scalar_lea.hbm %s7584_s13, 768 }
0x1781   :  { %p7182_p1 = scmp.ne.s32.totalorder %s7584_s13, %s7181_s9  ;;  %p7185_p2 = scmp.lt.u32.totalorder %s7181_s9, %s7584_s13 }
0x1783   :  { %p7187_p3 = pnand %p7185_p2, %p7182_p1 }
0x1785   :  { %7190 = shalt.err (!%p7187_p3)
}
0x1786   :  { %4804 = dma.vmem_to_hbm [thread:$0]  %s4799_s26, 768, %s7584_s13, [#allocation72], %s7288_s18, %s7288_s18, %s7289_s22  }
0x1787   :  { %7237 = dma.done.wait [#allocation4], 256  }
0x1788   :  { %7238 = vsyncadd [#allocation4], 4294967040 }
0x1789   :  { %7239 = dma.done.wait [#allocation72], 768  }
0x178a   :  { %7240 = vsyncadd [#allocation72], 4294966528 }
0x178b   :  { %4811 = vsyncpa [#allocation3], 1 }
0x178c   :  { %4812 = vsyncpa [#allocation6], 1 }
0x178d   :  { %4813 = vsyncpa [#allocation9], 1 }
0x178e   :  { %4814 = vsyncpa [#allocation12], 1 }
0x178f   :  { %4815 = vsyncpa [#allocation15], 1 }
0x1790   :  { %4816 = vsyncpa [#allocation18], 1 }
0x1791   :  { %4817 = vsyncpa [#allocation21], 1 }
0x1792   :  { %4818 = vsyncpa [#allocation24], 1 }
0x1793   :  { %4819 = vsyncpa [#allocation27], 1 }
0x1794   :  { %4820 = vsyncpa [#allocation30], 1 }
0x1795   :  { %4821 = vsyncpa [#allocation33], 1 }
0x1796   :  { %4822 = vsyncpa [#allocation36], 1 }
0x1797   :  { %4823 = vsyncpa [#allocation39], 1 }
0x1798   :  { %4824 = vsyncpa [#allocation42], 1 }
0x1799   :  { %4825 = vsyncpa [#allocation45], 1 }
0x179a   :  { %4826 = vsyncpa [#allocation48], 1 }
0x179b   :  { %4827 = vsyncpa [#allocation51], 1 }
0x179c   :  { %4828 = vsyncpa [#allocation54], 1 }
0x179d   :  { %4829 = vsyncpa [#allocation57], 1 }
0x179e   :  { %4830 = vsyncpa [#allocation60], 1 }
0x179f   :  { %4831 = vsyncpa [#allocation63], 1 }
0x17a0   :  { %4832 = vsyncpa [#allocation66], 1 }
0x17a1   :  { %4833 = vsyncpa [#allocation69], 1 }
0x17a2   :  { %4834 = vsyncpa [#allocation4], 1 }
0x17a3   :  { %4835 = vsyncpa [#allocation72], 1 }

</bundles_post_ra>
